<compile_context>
chip_gen: v7x
topology: tpu7x:2x2x1
jax: 0.10.0
libtpu: 0.0.40
codegen_flags: <defaults>
</compile_context>

<pallas_src>
import functools
import math

import jax
import jax.numpy as jnp
from jax.experimental import pallas as pl
from jax.experimental.pallas import tpu as pltpu


def _block_attn_kernel(x_ref, wqkv_ref, bqkv_ref, wo_ref, bo_ref, o_ref,
                       *, num_heads, head_dim, mxu_dtype):
    BB, S, C = x_ref.shape
    scale = 1.0 / math.sqrt(head_dim)

    def mx(a):
        # Optional bf16 cast for MXU operands only (softmax stays f32).
        return a if mxu_dtype is None else a.astype(mxu_dtype)

    # Flatten the BB blocks into one (BB*S, C) slab for the projections.
    x2 = x_ref[...].reshape(BB * S, C)

    # Fused QKV projection: a single MXU matmul of width 3C.
    qkv = jnp.dot(mx(x2), mx(wqkv_ref[...]),
                  preferred_element_type=jnp.float32) + bqkv_ref[...]

    q = qkv[:, 0:C] * scale
    k = qkv[:, C:2 * C]
    v = qkv[:, 2 * C:3 * C]

    q3 = q.reshape(BB, S, C)
    k3 = k.reshape(BB, S, C)
    v3 = v.reshape(BB, S, C)

    wo = wo_ref[...]                                   # (C, C)

    # Per-head attention, batched over the BB blocks.  The output projection
    # is accumulated per head, which removes the lane concatenate.
    out2 = jnp.zeros((BB * S, C), dtype=jnp.float32)
    for h in range(num_heads):
        lo, hi = h * head_dim, (h + 1) * head_dim
        qh = q3[:, :, lo:hi]                           # (BB, S, hd)
        kh = k3[:, :, lo:hi]                           # (BB, S, hd)
        vh = v3[:, :, lo:hi]                           # (BB, S, hd)

        s = jnp.einsum('bqd,bkd->bqk', mx(qh), mx(kh),
                       preferred_element_type=jnp.float32)     # (BB, S, S)
        s = s - jnp.max(s, axis=-1, keepdims=True)
        p = jnp.exp(s)                                          # f32 softmax
        p = p * pl.reciprocal(jnp.sum(p, axis=-1, keepdims=True), approx=False)

        oh = jnp.einsum('bqk,bkd->bqd', mx(p), mx(vh),
                        preferred_element_type=jnp.float32)     # (BB, S, hd)
        out2 = out2 + jnp.dot(mx(oh.reshape(BB * S, head_dim)),
                              mx(wo[lo:hi, :]),
                              preferred_element_type=jnp.float32)

    out2 = out2 + bo_ref[...]
    # Lane-dense single store of the whole slab.
    o_ref[...] = out2.reshape(BB, S, C).astype(o_ref.dtype)


def _choose_block_batch(nblocks, target=16):
    """Largest divisor of nblocks <= target that (if possible) still leaves
    >= 2 grid steps, so v7x's two TensorCores both get work."""
    best = 1
    for d in range(1, min(nblocks, target) + 1):
        if nblocks % d == 0 and (nblocks // d >= 2 or nblocks == 1):
            best = d
    return best


def block_attention(x, params, *, block_size, num_heads, block_batch=None,
                    mxu_dtype=None):
    """x: (B, C, H, W) float32 (NCHW, same layout as the PyTorch module)."""
    B, C, H, W = x.shape
    bs = block_size
    S = bs * bs
    nbh, nbw = H // bs, W // bs
    nblocks = B * nbh * nbw
    head_dim = C // num_heads

    BB = _choose_block_batch(nblocks) if block_batch is None else block_batch
    assert nblocks % BB == 0

    # NCHW -> (nblocks, S, C)   (matches the PyTorch view/permute/reshape chain)
    xb = x.reshape(B, C, nbh, bs, nbw, bs)
    xb = jnp.transpose(xb, (0, 2, 4, 3, 5, 1)).reshape(nblocks, S, C)

    # PyTorch MHA params: in_proj_weight (3C, C), in_proj_bias (3C,),
    # out_proj.weight (C, C), out_proj.bias (C,).  Fuse QKV: x @ in_w.T.
    in_w, in_b, out_w, out_b = params
    w_qkv = in_w.T                    # (C, 3C)
    b_qkv = in_b.reshape(1, 3 * C)
    wo_t = out_w.T                    # (C, C)
    bo = out_b.reshape(1, C)

    kernel = functools.partial(_block_attn_kernel, num_heads=num_heads,
                               head_dim=head_dim, mxu_dtype=mxu_dtype)

    out = pl.pallas_call(
        kernel,
        out_shape=jax.ShapeDtypeStruct((nblocks, S, C), x.dtype),
        grid_spec=pltpu.PrefetchScalarGridSpec(
            num_scalar_prefetch=0,
            grid=(nblocks // BB,),
            in_specs=[
                pl.BlockSpec((BB, S, C), lambda i: (i, 0, 0)),    # tokens
                pl.BlockSpec((C, 3 * C), lambda i: (0, 0)),       # fused QKV weight
                pl.BlockSpec((1, 3 * C), lambda i: (0, 0)),       # fused QKV bias
                pl.BlockSpec((C, C), lambda i: (0, 0)),           # out-proj weight
                pl.BlockSpec((1, C), lambda i: (0, 0)),           # out-proj bias
            ],
            out_specs=pl.BlockSpec((BB, S, C), lambda i: (i, 0, 0)),
        ),
        compiler_params=pltpu.CompilerParams(
            dimension_semantics=("parallel",)),
    )(xb, w_qkv, b_qkv, wo_t, bo)

    # (nblocks, S, C) -> NCHW  (inverse of the PyTorch permute chain)
    out = out.reshape(B, nbh, nbw, bs, bs, C)
    out = jnp.transpose(out, (0, 5, 1, 3, 2, 4)).reshape(B, C, H, W)
    return out


def _reference(x, params, *, block_size, num_heads):
    """Pure-JAX reference matching torch.nn.MultiheadAttention semantics."""
    B, C, H, W = x.shape
    bs = block_size
    S = bs * bs
    nbh, nbw = H // bs, W // bs
    head_dim = C // num_heads
    in_w, in_b, out_w, out_b = params

    xb = x.reshape(B, C, nbh, bs, nbw, bs)
    xb = jnp.transpose(xb, (0, 2, 4, 3, 5, 1)).reshape(-1, S, C)

    q = xb @ in_w[0 * C:1 * C].T + in_b[0 * C:1 * C]
    k = xb @ in_w[1 * C:2 * C].T + in_b[1 * C:2 * C]
    v = xb @ in_w[2 * C:3 * C].T + in_b[2 * C:3 * C]

    def split(t):
        return jnp.transpose(t.reshape(-1, S, num_heads, head_dim), (0, 2, 1, 3))

    qh, kh, vh = split(q), split(k), split(v)
    s = jnp.einsum('nhqd,nhkd->nhqk', qh, kh) / math.sqrt(head_dim)
    p = jax.nn.softmax(s, axis=-1)
    o = jnp.einsum('nhqk,nhkd->nhqd', p, vh)
    o = jnp.transpose(o, (0, 2, 1, 3)).reshape(-1, S, C)
    o = o @ out_w.T + out_b

    o = o.reshape(B, nbh, nbw, bs, bs, C)
    return jnp.transpose(o, (0, 5, 1, 3, 2, 4)).reshape(B, C, H, W)


if __name__ == "__main__":
    B, C, H, W = 2, 32, 16, 16
    block_size = 4
    num_heads = 4

    key = jax.random.PRNGKey(0)
    kx, k1, k2, k3, k4 = jax.random.split(key, 5)
    x = jax.random.normal(kx, (B, C, H, W), dtype=jnp.float32)

    # Deterministic synthetic parameters (shapes from nn.MultiheadAttention(C, num_heads))
    in_proj_w = 0.1 * jax.random.normal(k1, (3 * C, C), dtype=jnp.float32)
    in_proj_b = 0.1 * jax.random.normal(k2, (3 * C,), dtype=jnp.float32)
    out_proj_w = 0.1 * jax.random.normal(k3, (C, C), dtype=jnp.float32)
    out_proj_b = 0.1 * jax.random.normal(k4, (C,), dtype=jnp.float32)
    params = (in_proj_w, in_proj_b, out_proj_w, out_proj_b)

    out = block_attention(x, params, block_size=block_size, num_heads=num_heads)
    out = jax.block_until_ready(out)

    ref = _reference(x, params, block_size=block_size, num_heads=num_heads)
    assert out.shape == (B, C, H, W)
    assert jnp.allclose(out, ref, atol=1e-4, rtol=1e-4), "mismatch vs reference"

    print("KERNEL_OK")
</pallas_src>

<mosaic_0001>
module attributes {stable_mosaic.version = 11 : i64} {
  func.func @_block_attn_kernel(%arg0: i32, %arg1: memref<16x16x32xf32, #tpu.memory_space<vmem>>, %arg2: memref<32x96xf32, #tpu.memory_space<vmem>>, %arg3: memref<1x96xf32, #tpu.memory_space<vmem>>, %arg4: memref<32x32xf32, #tpu.memory_space<vmem>>, %arg5: memref<1x32xf32, #tpu.memory_space<vmem>>, %arg6: memref<16x16x32xf32, #tpu.memory_space<vmem>>) attributes {dimension_semantics = [#tpu.dimension_semantics<parallel>], iteration_bounds = array<i64: 2>, scalar_prefetch = 0 : i64, scratch_operands = 0 : i64, tpu.core_type = #tpu.core_type<tc>, window_params = [{transform_indices = @transform_0, window_bounds = array<i64: 16, 16, 32>}, {pipeline_mode = #tpu.pipeline_mode<synchronous>, transform_indices = @transform_1, window_bounds = array<i64: 32, 96>}, {pipeline_mode = #tpu.pipeline_mode<synchronous>, transform_indices = @transform_2, window_bounds = array<i64: 1, 96>}, {pipeline_mode = #tpu.pipeline_mode<synchronous>, transform_indices = @transform_3, window_bounds = array<i64: 32, 32>}, {pipeline_mode = #tpu.pipeline_mode<synchronous>, transform_indices = @transform_4, window_bounds = array<i64: 1, 32>}, {transform_indices = @transform_5, window_bounds = array<i64: 16, 16, 32>}]} {
    %c0 = arith.constant 0 : index
    %c0_0 = arith.constant 0 : index
    %c0_1 = arith.constant 0 : index
    %0 = vector.load %arg1[%c0, %c0_0, %c0_1] : memref<16x16x32xf32, #tpu.memory_space<vmem>>, vector<16x16x32xf32>
    %1 = vector.shape_cast %0 : vector<16x16x32xf32> to vector<256x32xf32>
    %c0_2 = arith.constant 0 : index
    %c0_3 = arith.constant 0 : index
    %2 = vector.load %arg2[%c0_2, %c0_3] : memref<32x96xf32, #tpu.memory_space<vmem>>, vector<32x96xf32>
    %cst = arith.constant dense<0.000000e+00> : vector<256x96xf32>
    %3 = tpu.matmul %1, %2, %cst {dimension_numbers = #tpu.dot_dimension_numbers<[1], [0], [0], [1], [0, 0, 1, 1], [], []>} : vector<256x32xf32>, vector<32x96xf32>, vector<256x96xf32> -> vector<256x96xf32>
    %c0_4 = arith.constant 0 : index
    %c0_5 = arith.constant 0 : index
    %4 = vector.load %arg3[%c0_4, %c0_5] : memref<1x96xf32, #tpu.memory_space<vmem>>, vector<1x96xf32>
    %5 = vector.broadcast %4 : vector<1x96xf32> to vector<256x96xf32>
    %6 = arith.addf %3, %5 : vector<256x96xf32>
    %7 = vector.extract_strided_slice %6 {offsets = [0, 0], sizes = [256, 32], strides = [1, 1]} : vector<256x96xf32> to vector<256x32xf32>
    %cst_6 = arith.constant 0.353553385 : f32
    %8 = vector.broadcast %cst_6 : f32 to vector<256x32xf32>
    %9 = arith.mulf %7, %8 : vector<256x32xf32>
    %10 = vector.extract_strided_slice %6 {offsets = [0, 32], sizes = [256, 32], strides = [1, 1]} : vector<256x96xf32> to vector<256x32xf32>
    %11 = vector.extract_strided_slice %6 {offsets = [0, 64], sizes = [256, 32], strides = [1, 1]} : vector<256x96xf32> to vector<256x32xf32>
    %12 = vector.shape_cast %9 : vector<256x32xf32> to vector<16x16x32xf32>
    %13 = vector.shape_cast %10 : vector<256x32xf32> to vector<16x16x32xf32>
    %14 = vector.shape_cast %11 : vector<256x32xf32> to vector<16x16x32xf32>
    %c0_7 = arith.constant 0 : index
    %c0_8 = arith.constant 0 : index
    %15 = vector.load %arg4[%c0_7, %c0_8] : memref<32x32xf32, #tpu.memory_space<vmem>>, vector<32x32xf32>
    %cst_9 = arith.constant 0.000000e+00 : f32
    %16 = vector.broadcast %cst_9 : f32 to vector<256x32xf32>
    %17 = vector.extract_strided_slice %12 {offsets = [0, 0, 0], sizes = [16, 16, 8], strides = [1, 1, 1]} : vector<16x16x32xf32> to vector<16x16x8xf32>
    %18 = vector.extract_strided_slice %13 {offsets = [0, 0, 0], sizes = [16, 16, 8], strides = [1, 1, 1]} : vector<16x16x32xf32> to vector<16x16x8xf32>
    %19 = vector.extract_strided_slice %14 {offsets = [0, 0, 0], sizes = [16, 16, 8], strides = [1, 1, 1]} : vector<16x16x32xf32> to vector<16x16x8xf32>
    "tpu.trace_start"() <{level = 10 : i32, message = "bqd,bkd->bqk"}> : () -> ()
    %cst_10 = arith.constant dense<0.000000e+00> : vector<16x16x16xf32>
    %20 = tpu.matmul %17, %18, %cst_10 {dimension_numbers = #tpu.dot_dimension_numbers<[2], [2], [1], [1], [0, 0, 0, 1, 1, 1], [0], [0]>} : vector<16x16x8xf32>, vector<16x16x8xf32>, vector<16x16x16xf32> -> vector<16x16x16xf32>
    "tpu.trace_stop"() : () -> ()
    %cst_11 = arith.constant dense<0xFF800000> : vector<16x16xf32>
    %21 = vector.multi_reduction <maximumf>, %20, %cst_11 [2] : vector<16x16x16xf32> to vector<16x16xf32>
    %22 = vector.shape_cast %21 : vector<16x16xf32> to vector<16x16x1xf32>
    %23 = vector.broadcast %22 : vector<16x16x1xf32> to vector<16x16x16xf32>
    %24 = arith.subf %20, %23 : vector<16x16x16xf32>
    %25 = math.exp %24 : vector<16x16x16xf32>
    %cst_12 = arith.constant dense<0.000000e+00> : vector<16x16xf32>
    %26 = vector.multi_reduction <add>, %25, %cst_12 [2] : vector<16x16x16xf32> to vector<16x16xf32>
    %27 = vector.shape_cast %26 : vector<16x16xf32> to vector<16x16x1xf32>
    %28 = tpu.reciprocal %27 : vector<16x16x1xf32> -> vector<16x16x1xf32>
    %29 = vector.broadcast %28 : vector<16x16x1xf32> to vector<16x16x16xf32>
    %30 = arith.mulf %25, %29 : vector<16x16x16xf32>
    "tpu.trace_start"() <{level = 10 : i32, message = "bqk,bkd->bqd"}> : () -> ()
    %cst_13 = arith.constant dense<0.000000e+00> : vector<16x16x8xf32>
    %31 = tpu.matmul %30, %19, %cst_13 {dimension_numbers = #tpu.dot_dimension_numbers<[2], [1], [1], [2], [0, 0, 0, 1, 1, 2], [0], [0]>} : vector<16x16x16xf32>, vector<16x16x8xf32>, vector<16x16x8xf32> -> vector<16x16x8xf32>
    "tpu.trace_stop"() : () -> ()
    %32 = vector.shape_cast %31 : vector<16x16x8xf32> to vector<256x8xf32>
    %33 = vector.extract_strided_slice %15 {offsets = [0, 0], sizes = [8, 32], strides = [1, 1]} : vector<32x32xf32> to vector<8x32xf32>
    %cst_14 = arith.constant dense<0.000000e+00> : vector<256x32xf32>
    %34 = tpu.matmul %32, %33, %cst_14 {dimension_numbers = #tpu.dot_dimension_numbers<[1], [0], [0], [1], [0, 0, 1, 1], [], []>} : vector<256x8xf32>, vector<8x32xf32>, vector<256x32xf32> -> vector<256x32xf32>
    %35 = arith.addf %16, %34 : vector<256x32xf32>
    %36 = vector.extract_strided_slice %12 {offsets = [0, 0, 8], sizes = [16, 16, 8], strides = [1, 1, 1]} : vector<16x16x32xf32> to vector<16x16x8xf32>
    %37 = vector.extract_strided_slice %13 {offsets = [0, 0, 8], sizes = [16, 16, 8], strides = [1, 1, 1]} : vector<16x16x32xf32> to vector<16x16x8xf32>
    %38 = vector.extract_strided_slice %14 {offsets = [0, 0, 8], sizes = [16, 16, 8], strides = [1, 1, 1]} : vector<16x16x32xf32> to vector<16x16x8xf32>
    "tpu.trace_start"() <{level = 10 : i32, message = "bqd,bkd->bqk"}> : () -> ()
    %cst_15 = arith.constant dense<0.000000e+00> : vector<16x16x16xf32>
    %39 = tpu.matmul %36, %37, %cst_15 {dimension_numbers = #tpu.dot_dimension_numbers<[2], [2], [1], [1], [0, 0, 0, 1, 1, 1], [0], [0]>} : vector<16x16x8xf32>, vector<16x16x8xf32>, vector<16x16x16xf32> -> vector<16x16x16xf32>
    "tpu.trace_stop"() : () -> ()
    %cst_16 = arith.constant dense<0xFF800000> : vector<16x16xf32>
    %40 = vector.multi_reduction <maximumf>, %39, %cst_16 [2] : vector<16x16x16xf32> to vector<16x16xf32>
    %41 = vector.shape_cast %40 : vector<16x16xf32> to vector<16x16x1xf32>
    %42 = vector.broadcast %41 : vector<16x16x1xf32> to vector<16x16x16xf32>
    %43 = arith.subf %39, %42 : vector<16x16x16xf32>
    %44 = math.exp %43 : vector<16x16x16xf32>
    %cst_17 = arith.constant dense<0.000000e+00> : vector<16x16xf32>
    %45 = vector.multi_reduction <add>, %44, %cst_17 [2] : vector<16x16x16xf32> to vector<16x16xf32>
    %46 = vector.shape_cast %45 : vector<16x16xf32> to vector<16x16x1xf32>
    %47 = tpu.reciprocal %46 : vector<16x16x1xf32> -> vector<16x16x1xf32>
    %48 = vector.broadcast %47 : vector<16x16x1xf32> to vector<16x16x16xf32>
    %49 = arith.mulf %44, %48 : vector<16x16x16xf32>
    "tpu.trace_start"() <{level = 10 : i32, message = "bqk,bkd->bqd"}> : () -> ()
    %cst_18 = arith.constant dense<0.000000e+00> : vector<16x16x8xf32>
    %50 = tpu.matmul %49, %38, %cst_18 {dimension_numbers = #tpu.dot_dimension_numbers<[2], [1], [1], [2], [0, 0, 0, 1, 1, 2], [0], [0]>} : vector<16x16x16xf32>, vector<16x16x8xf32>, vector<16x16x8xf32> -> vector<16x16x8xf32>
    "tpu.trace_stop"() : () -> ()
    %51 = vector.shape_cast %50 : vector<16x16x8xf32> to vector<256x8xf32>
    %52 = vector.extract_strided_slice %15 {offsets = [8, 0], sizes = [8, 32], strides = [1, 1]} : vector<32x32xf32> to vector<8x32xf32>
    %cst_19 = arith.constant dense<0.000000e+00> : vector<256x32xf32>
    %53 = tpu.matmul %51, %52, %cst_19 {dimension_numbers = #tpu.dot_dimension_numbers<[1], [0], [0], [1], [0, 0, 1, 1], [], []>} : vector<256x8xf32>, vector<8x32xf32>, vector<256x32xf32> -> vector<256x32xf32>
    %54 = arith.addf %35, %53 : vector<256x32xf32>
    %55 = vector.extract_strided_slice %12 {offsets = [0, 0, 16], sizes = [16, 16, 8], strides = [1, 1, 1]} : vector<16x16x32xf32> to vector<16x16x8xf32>
    %56 = vector.extract_strided_slice %13 {offsets = [0, 0, 16], sizes = [16, 16, 8], strides = [1, 1, 1]} : vector<16x16x32xf32> to vector<16x16x8xf32>
    %57 = vector.extract_strided_slice %14 {offsets = [0, 0, 16], sizes = [16, 16, 8], strides = [1, 1, 1]} : vector<16x16x32xf32> to vector<16x16x8xf32>
    "tpu.trace_start"() <{level = 10 : i32, message = "bqd,bkd->bqk"}> : () -> ()
    %cst_20 = arith.constant dense<0.000000e+00> : vector<16x16x16xf32>
    %58 = tpu.matmul %55, %56, %cst_20 {dimension_numbers = #tpu.dot_dimension_numbers<[2], [2], [1], [1], [0, 0, 0, 1, 1, 1], [0], [0]>} : vector<16x16x8xf32>, vector<16x16x8xf32>, vector<16x16x16xf32> -> vector<16x16x16xf32>
    "tpu.trace_stop"() : () -> ()
    %cst_21 = arith.constant dense<0xFF800000> : vector<16x16xf32>
    %59 = vector.multi_reduction <maximumf>, %58, %cst_21 [2] : vector<16x16x16xf32> to vector<16x16xf32>
    %60 = vector.shape_cast %59 : vector<16x16xf32> to vector<16x16x1xf32>
    %61 = vector.broadcast %60 : vector<16x16x1xf32> to vector<16x16x16xf32>
    %62 = arith.subf %58, %61 : vector<16x16x16xf32>
    %63 = math.exp %62 : vector<16x16x16xf32>
    %cst_22 = arith.constant dense<0.000000e+00> : vector<16x16xf32>
    %64 = vector.multi_reduction <add>, %63, %cst_22 [2] : vector<16x16x16xf32> to vector<16x16xf32>
    %65 = vector.shape_cast %64 : vector<16x16xf32> to vector<16x16x1xf32>
    %66 = tpu.reciprocal %65 : vector<16x16x1xf32> -> vector<16x16x1xf32>
    %67 = vector.broadcast %66 : vector<16x16x1xf32> to vector<16x16x16xf32>
    %68 = arith.mulf %63, %67 : vector<16x16x16xf32>
    "tpu.trace_start"() <{level = 10 : i32, message = "bqk,bkd->bqd"}> : () -> ()
    %cst_23 = arith.constant dense<0.000000e+00> : vector<16x16x8xf32>
    %69 = tpu.matmul %68, %57, %cst_23 {dimension_numbers = #tpu.dot_dimension_numbers<[2], [1], [1], [2], [0, 0, 0, 1, 1, 2], [0], [0]>} : vector<16x16x16xf32>, vector<16x16x8xf32>, vector<16x16x8xf32> -> vector<16x16x8xf32>
    "tpu.trace_stop"() : () -> ()
    %70 = vector.shape_cast %69 : vector<16x16x8xf32> to vector<256x8xf32>
    %71 = vector.extract_strided_slice %15 {offsets = [16, 0], sizes = [8, 32], strides = [1, 1]} : vector<32x32xf32> to vector<8x32xf32>
    %cst_24 = arith.constant dense<0.000000e+00> : vector<256x32xf32>
    %72 = tpu.matmul %70, %71, %cst_24 {dimension_numbers = #tpu.dot_dimension_numbers<[1], [0], [0], [1], [0, 0, 1, 1], [], []>} : vector<256x8xf32>, vector<8x32xf32>, vector<256x32xf32> -> vector<256x32xf32>
    %73 = arith.addf %54, %72 : vector<256x32xf32>
    %74 = vector.extract_strided_slice %12 {offsets = [0, 0, 24], sizes = [16, 16, 8], strides = [1, 1, 1]} : vector<16x16x32xf32> to vector<16x16x8xf32>
    %75 = vector.extract_strided_slice %13 {offsets = [0, 0, 24], sizes = [16, 16, 8], strides = [1, 1, 1]} : vector<16x16x32xf32> to vector<16x16x8xf32>
    %76 = vector.extract_strided_slice %14 {offsets = [0, 0, 24], sizes = [16, 16, 8], strides = [1, 1, 1]} : vector<16x16x32xf32> to vector<16x16x8xf32>
    "tpu.trace_start"() <{level = 10 : i32, message = "bqd,bkd->bqk"}> : () -> ()
    %cst_25 = arith.constant dense<0.000000e+00> : vector<16x16x16xf32>
    %77 = tpu.matmul %74, %75, %cst_25 {dimension_numbers = #tpu.dot_dimension_numbers<[2], [2], [1], [1], [0, 0, 0, 1, 1, 1], [0], [0]>} : vector<16x16x8xf32>, vector<16x16x8xf32>, vector<16x16x16xf32> -> vector<16x16x16xf32>
    "tpu.trace_stop"() : () -> ()
    %cst_26 = arith.constant dense<0xFF800000> : vector<16x16xf32>
    %78 = vector.multi_reduction <maximumf>, %77, %cst_26 [2] : vector<16x16x16xf32> to vector<16x16xf32>
    %79 = vector.shape_cast %78 : vector<16x16xf32> to vector<16x16x1xf32>
    %80 = vector.broadcast %79 : vector<16x16x1xf32> to vector<16x16x16xf32>
    %81 = arith.subf %77, %80 : vector<16x16x16xf32>
    %82 = math.exp %81 : vector<16x16x16xf32>
    %cst_27 = arith.constant dense<0.000000e+00> : vector<16x16xf32>
    %83 = vector.multi_reduction <add>, %82, %cst_27 [2] : vector<16x16x16xf32> to vector<16x16xf32>
    %84 = vector.shape_cast %83 : vector<16x16xf32> to vector<16x16x1xf32>
    %85 = tpu.reciprocal %84 : vector<16x16x1xf32> -> vector<16x16x1xf32>
    %86 = vector.broadcast %85 : vector<16x16x1xf32> to vector<16x16x16xf32>
    %87 = arith.mulf %82, %86 : vector<16x16x16xf32>
    "tpu.trace_start"() <{level = 10 : i32, message = "bqk,bkd->bqd"}> : () -> ()
    %cst_28 = arith.constant dense<0.000000e+00> : vector<16x16x8xf32>
    %88 = tpu.matmul %87, %76, %cst_28 {dimension_numbers = #tpu.dot_dimension_numbers<[2], [1], [1], [2], [0, 0, 0, 1, 1, 2], [0], [0]>} : vector<16x16x16xf32>, vector<16x16x8xf32>, vector<16x16x8xf32> -> vector<16x16x8xf32>
    "tpu.trace_stop"() : () -> ()
    %89 = vector.shape_cast %88 : vector<16x16x8xf32> to vector<256x8xf32>
    %90 = vector.extract_strided_slice %15 {offsets = [24, 0], sizes = [8, 32], strides = [1, 1]} : vector<32x32xf32> to vector<8x32xf32>
    %cst_29 = arith.constant dense<0.000000e+00> : vector<256x32xf32>
    %91 = tpu.matmul %89, %90, %cst_29 {dimension_numbers = #tpu.dot_dimension_numbers<[1], [0], [0], [1], [0, 0, 1, 1], [], []>} : vector<256x8xf32>, vector<8x32xf32>, vector<256x32xf32> -> vector<256x32xf32>
    %92 = arith.addf %73, %91 : vector<256x32xf32>
    %c0_30 = arith.constant 0 : index
    %c0_31 = arith.constant 0 : index
    %93 = vector.load %arg5[%c0_30, %c0_31] : memref<1x32xf32, #tpu.memory_space<vmem>>, vector<1x32xf32>
    %94 = vector.broadcast %93 : vector<1x32xf32> to vector<256x32xf32>
    %95 = arith.addf %92, %94 : vector<256x32xf32>
    %96 = vector.shape_cast %95 : vector<256x32xf32> to vector<16x16x32xf32>
    %c0_32 = arith.constant 0 : index
    %c0_33 = arith.constant 0 : index
    %c0_34 = arith.constant 0 : index
    %97 = vector.load %arg6[%c0_32, %c0_33, %c0_34] : memref<16x16x32xf32, #tpu.memory_space<vmem>>, vector<16x16x32xf32>
    tpu.vector_store %arg6[%c0_32, %c0_33, %c0_34], %96 {strides = array<i32>} : memref<16x16x32xf32, #tpu.memory_space<vmem>>, vector<16x16x32xf32>,
    return
  }
  func.func @transform_0(%arg0: i32) -> (i32, i32, i32) {
    %c0_i32 = arith.constant 0 : i32
    %c0_i32_0 = arith.constant 0 : i32
    %c0_i32_1 = arith.constant 0 : i32
    return %arg0, %c0_i32, %c0_i32_0 : i32, i32, i32
  }
  func.func @transform_1(%arg0: i32) -> (i32, i32) {
    %c0_i32 = arith.constant 0 : i32
    %c0_i32_0 = arith.constant 0 : i32
    %c0_i32_1 = arith.constant 0 : i32
    return %c0_i32, %c0_i32_0 : i32, i32
  }
  func.func @transform_2(%arg0: i32) -> (i32, i32) {
    %c0_i32 = arith.constant 0 : i32
    %c0_i32_0 = arith.constant 0 : i32
    %c0_i32_1 = arith.constant 0 : i32
    return %c0_i32, %c0_i32_0 : i32, i32
  }
  func.func @transform_3(%arg0: i32) -> (i32, i32) {
    %c0_i32 = arith.constant 0 : i32
    %c0_i32_0 = arith.constant 0 : i32
    %c0_i32_1 = arith.constant 0 : i32
    return %c0_i32, %c0_i32_0 : i32, i32
  }
  func.func @transform_4(%arg0: i32) -> (i32, i32) {
    %c0_i32 = arith.constant 0 : i32
    %c0_i32_0 = arith.constant 0 : i32
    %c0_i32_1 = arith.constant 0 : i32
    return %c0_i32, %c0_i32_0 : i32, i32
  }
  func.func @transform_5(%arg0: i32) -> (i32, i32, i32) {
    %c0_i32 = arith.constant 0 : i32
    %c0_i32_0 = arith.constant 0 : i32
    %c0_i32_1 = arith.constant 0 : i32
    return %arg0, %c0_i32, %c0_i32_0 : i32, i32, i32
  }
}

</mosaic_0001>

<bundles_post_ra>
// kernel: tpu_custom_call.1
= control target key start
LH: loop header
LB: loop body
LE: loop exit
PB: predicated region body
PF: predicated region fallthrough
CT: control target
= control target key end

     0   :  { %10 = vsyncpa [#allocation3], 0  ;;  %s23211_s0 = inlined_call_operand.hbm [shape: f32[32,16,32], index: 0, kind: input, shape index: {}]   ;;  %s23212_s1 = inlined_call_operand.hbm [shape: f32[32,96], index: 1, kind: input, shape index: {}]   ;;  %s23213_s2 = inlined_call_operand.vmem [shape: f32[1,96], index: 2, kind: input, shape index: {}]   ;;  %s23214_s3 = inlined_call_operand.hbm [shape: f32[32,32], index: 3, kind: input, shape index: {}]   ;;  %s23215_s4 = inlined_call_operand.vmem [shape: f32[1,32], index: 4, kind: input, shape index: {}]   ;;  %s23216_s5 = inlined_call_operand.hbm [shape: f32[32,16,32], index: 5, kind: output, shape index: {}]  }
   0x1   :  { %12 = vsyncpa [#allocation3 + $0x1], 0 }
   0x2   :  { %13 = vsyncpa [#allocation6], 0 }
   0x3   :  { %14 = vsyncpa [#allocation4], 0 }
   0x4   :  { %16 = vsyncpa [#allocation4 + $0x1], 0  ;;  %s19593_s18 = smov 0   ;;  %s19595_s19 = smov 0  }
   0x5   :  { %s19597_s20 = smov 0   ;;  %s19599_s21 = smov 0  }
   0x6 LB: > { %s19614_s22 = sadd.s32 4294967295, %s19542_s21   ;;  %s15004_s23 = sadd.s32 4294967294, %s19542_s21   ;;  %s19542_s21 = sphi %s19599_s21, %s23664_s21   ;;  %s19538_s20 = sphi %s19597_s20, %s23663_s20   ;;  %s19534_s19 = sphi %s19595_s19, %s23662_s19   ;;  %s19530_s18 = sphi %s19593_s18, %s23661_s18  }
   0x7   : > { %p42_p0 = scmp.ne.s32.totalorder %s19534_s19, %s19530_s18  ;;  %p23217_p1 = scmp.eq.s32.totalorder %s19614_s22, 0 }
   0x8   : > { %p156_p3 = scmp.eq.s32.totalorder %s15004_s23, 1  ;;  %p15005_p5 = scmp.ge.s32.totalorder %s19542_s21, 1 }
   0x9   : > { %p19623_p4 = por %p23217_p1, %p42_p0  ;;  %p163_p7 = scmp.lt.s32.totalorder %s19542_s21, 3 }
   0xa   : > { %p19628_p6 = por %p156_p3, %p42_p0  ;;  %s19544_s27 = smov [#allocation5]  }
   0xb   : > { %s23344_s24 = scalar_select %p19623_p4, 1, 0 }
   0xc   : > { %s23345_s25 = scalar_select %p19628_p6, 1, 0 }
   0xd   : > { %p19633_p8 = pnand %p15005_p5, %p163_p7  ;;  %s175_s28 = sshll.u32 %s19544_s27, 4  ;;  %s19637_s28 = int_to_ptr.vmem [resolvable:$true] %s175_s28 }
   0xe   : > { %s19545_s30 = smov [#allocation7]   ;;  %s19386_s9 = scalar_lea.hbm %s23212_s1, 512 }
   0xf   : > { %p18164_p9 = pneg %p19633_p8  ;;  %s191_s6 = sshll.u32 %s19545_s30, 4  ;;  %s19648_s6 = int_to_ptr.vmem [resolvable:$true] %s191_s6 }
  0x10   : > { %p19387_p12 = scmp.ne.s32.totalorder %s23212_s1, %s19386_s9  ;;  %p19393_p5 = scmp.lt.u32.totalorder %s19386_s9, %s23212_s1 }
  0x11   : > { %p19644_p11 = pnand %p18164_p9, %p23217_p1 }
  0x13   : > { %p19388_p13 = pneg %p19644_p11 }
  0x15   : > { %p19389_p0 = pnand %p19388_p13, %p19387_p12 }
  0x17   : > { %p19390_p3 = pneg %p19389_p0 }
  0x19   : > { %p19395_p7 = pnand %p19393_p5, %p19390_p3 }
  0x1b   : > { %19398 = shalt.err (!%p19395_p7)
}
  0x1c   : > { %s19399_s14 = scalar_lea.vmem %s19637_s28, 512  ;;  %p19407_p2 = scmp.lt.s32.totalorder %s19637_s28, %s19637_s28 }
  0x1d   : > { %p19400_p9 = scmp.ne.s32.totalorder %s19637_s28, %s19399_s14  ;;  %p19408_p12 = scmp.lt.s32.totalorder %s19399_s14, %s19399_s14 }
  0x1f   : > { %p19402_p10 = pnand %p19400_p9, %p19388_p13  ;;  %p19409_p0 = por %p19408_p12, %p19407_p2 }
  0x21   : > { %p19403_p1 = pneg %p19402_p10 }
  0x23   : > { %p19410_p6 = pnand %p19409_p0, %p19403_p1 }
  0x25   : > { %19413 = shalt.err (!%p19410_p6)
}
  0x26   : > { %s19546_s15 = smov 128   ;;  %s19547_s16 = smov 8  }
  0x27   : > { %18167 = dma.hbm_to_vmem [thread:$0]  (!%p19644_p11), %s23212_s1, 512, %s19637_s28, [#allocation6], %s19546_s15, %s19546_s15, %s19547_s16  }
  0x28   : > { %s19414_s7 = scalar_lea.hbm %s23214_s3, 512 }
  0x29   : > { %p19415_p1 = scmp.ne.s32.totalorder %s23214_s3, %s19414_s7  ;;  %p19421_p10 = scmp.lt.u32.totalorder %s19414_s7, %s23214_s3 }
  0x2b   : > { %p19417_p2 = pnand %p19415_p1, %p19388_p13 }
  0x2d   : > { %p19418_p6 = pneg %p19417_p2 }
  0x2f   : > { %p19423_p3 = pnand %p19421_p10, %p19418_p6 }
  0x31   : > { %19426 = shalt.err (!%p19423_p3)
}
  0x32   : > { %s19427_s28 = scalar_lea.vmem %s19648_s6, 512  ;;  %p19435_p12 = scmp.lt.s32.totalorder %s19648_s6, %s19648_s6 }
  0x33   : > { %p19428_p5 = scmp.ne.s32.totalorder %s19648_s6, %s19427_s28  ;;  %p19436_p0 = scmp.lt.s32.totalorder %s19427_s28, %s19427_s28 }
  0x35   : > { %p19430_p7 = pnand %p19428_p5, %p19388_p13  ;;  %p19437_p1 = por %p19436_p0, %p19435_p12 }
  0x37   : > { %p19431_p9 = pneg %p19430_p7 }
  0x39   : > { %p19438_p2 = pnand %p19437_p1, %p19431_p9 }
  0x3b   : > { %19441 = shalt.err (!%p19438_p2)
}
  0x3c   : > { %18170 = dma.hbm_to_vmem [thread:$0]  (!%p19644_p11), %s23214_s3, 512, %s19648_s6, [#allocation6], %s19546_s15, %s19546_s15, %s19547_s16  }
  0x3d   : > { %s19709_s29 = sadd.s32 1, %s19542_s21   ;;  %s29_s14 = sadd.s32 1, %s19538_s20 }
  0x3e   : > { %s26_s17 = ssub.s32 %s19542_s21, %s19709_s29  ;;  %p36_p13 = scmp.ne.s32.totalorder %s19538_s20, %s19534_s19 }
  0x3f   : > { %p27_p6 = scmp.eq.s32.totalorder %s26_s17, 0  ;;  %p37_p10 = scmp.eq.s32.totalorder %s19542_s21, 0 }
  0x40   : > { %p23348_p3 = scmp.eq.s32.totalorder %s19614_s22, 1  ;;  %p18181_p7 = scmp.lt.s32.totalorder %s19542_s21, 2 }
  0x41   : > { %s19725_s27 = scalar_select %p27_p6, %s19538_s20, %s29_s14  }
  0x42   : > { %p19719_p5 = por %p23348_p3, %p36_p13  ;;  %p38_p9 = por %p37_p10, %p36_p13 }
  0x43   : > { %s208_s30 = sand.u32 1, %s19538_s20   ;;  %s15571_s6 = sshll.u32 %s19542_s21, 12 }
  0x44   : > { %s23349_s23 = scalar_select %p19719_p5, 1, 0 }
  0x45   : > { %s15009_s7 = sshll.u32 %s208_s30, 8  ;;  %s19732_s10 = scalar_lea.hbm %s23211_s0, %s15571_s6 }
  0x46   : > { %s212_s11 = scalar_lea.vmem [#allocation2], %s15009_s7  ;;  %p19736_p11 = pnand %p18181_p7, %p38_p9 }
  0x47   : > { %s220_s28 = sshll.u32 %s212_s11, 4  ;;  %s19740_s13 = scalar_lea.sflag [#allocation3], %s208_s30  ;;  %s19734_s28 = int_to_ptr.vmem [resolvable:$true] %s220_s28 }
  0x48   : > { %s19442_s14 = scalar_lea.hbm %s19732_s10, 4096  ;;  %p19444_p0 = pneg %p19736_p11 }
  0x49   : > { %p19443_p12 = scmp.ne.s32.totalorder %s19732_s10, %s19442_s14  ;;  %s19447_s6 = scalar_lea.hbm %s23211_s0, 8192 }
  0x4a   : > { %p19448_p13 = scmp.lt.u32.totalorder %s19732_s10, %s23211_s0  ;;  %p19449_p6 = scmp.lt.u32.totalorder %s19447_s6, %s19442_s14 }
  0x4b   : > { %p19445_p1 = pnand %p19444_p0, %p19443_p12  ;;  %p19451_p3 = scmp.lt.u32.totalorder %s19442_s14, %s19732_s10 }
  0x4c   : > { %p19450_p10 = por %p19449_p6, %p19448_p13 }
  0x4d   : > { %p19446_p2 = pneg %p19445_p1 }
  0x4e   : > { %p19452_p7 = por %p19451_p3, %p19450_p10 }
  0x50   : > { %p19453_p9 = pnand %p19452_p7, %p19446_p2 }
  0x52   : > { %19456 = shalt.err (!%p19453_p9)
}
  0x53   : > { %s19457_s30 = scalar_lea.vmem %s19734_s28, 4096  ;;  %s19548_s11 = smov [#allocation2]  }
  0x54   : > { %p19458_p12 = scmp.ne.s32.totalorder %s19734_s28, %s19457_s30  ;;  %s19462_s17 = sshll.u32 %s19548_s11, 4  ;;  %s19463_s17 = int_to_ptr.vmem [resolvable:$false] %s19462_s17 }
  0x55   : > { %s19464_s7 = scalar_lea.vmem %s19463_s17, 8192  ;;  %p19465_p4 = scmp.lt.s32.totalorder %s19734_s28, %s19463_s17 }
  0x56   : > { %p19460_p1 = pnand %p19458_p12, %p19444_p0  ;;  %p19466_p13 = scmp.lt.s32.totalorder %s19464_s7, %s19457_s30 }
  0x58   : > { %p19461_p5 = pneg %p19460_p1  ;;  %p19467_p6 = por %p19466_p13, %p19465_p4 }
  0x5a   : > { %p19468_p10 = pnand %p19467_p6, %p19461_p5 }
  0x5c   : > { %19471 = shalt.err (!%p19468_p10)
}
  0x5d   : > { %18174 = dma.hbm_to_vmem [thread:$0]  (!%p19736_p11), %s19732_s10, 4096, %s19734_s28, %s19740_s13, %s19546_s15, %s19546_s15, %s19547_s16  }
  0x5e   : > { %232 = sbr.rel (%p19633_p8) target bundleno = 3957 (0xf75), region = 40 }
  0x65   : > { %s19774_s14 = sand.u32 1, %s19534_s19   ;;  %p23351_p4 = scmp.ne.s32.totalorder %s23344_s24, 0 }
  0x66   : > { %s15014_s6 = sshll.u32 %s19774_s14, 8  ;;  %s235_s8 = scalar_lea.sflag [#allocation3], %s19774_s14 }
  0x67   : > { %s19780_s12 = scalar_lea.vmem [#allocation2], %s15014_s6 }
  0x68   : > { %19517 = dma.done.wait (%p23351_p4), %s235_s8, 4096  }
  0x69   : > { %19519 = vsyncadd (%p23351_p4), %s235_s8, 4294963200  ;;  %p23352_p5 = scmp.eq.s32.totalorder %s19614_s22, 0 }
  0x6b   : > { %19521 = dma.done.wait (%p23352_p5), [#allocation6], 1024   ;;  %p23353_p8 = pmov %p23352_p5 }
  0x6c   : > { %vm318_vm0 = vcmask 261120   ;;  %v307_v0 = vld [vmem:[#allocation5] sm:$0xff]  ;;  %v308_v1 = vld [vmem:[#allocation5 + $0x8] sm:$0xff]  ;;  %v309_v2 = vld [vmem:[#allocation5 + $0x10] sm:$0xff]  ;;  %vm682_vm1 = vcmask 64512   ;;  %s19549_s15 = smov 96  }
  0x6d   : > { %19523 = vsyncadd (%p23353_p8), [#allocation6], 4294966272  ;;  %v17406_v3 = vpack.c.bf16 %v308_v1, %v307_v0  ;;  %v310_v4 = vld [vmem:[#allocation5 + $0x18] sm:$0xff]  ;;  %v275_v5 = vld [vmem:[%s19780_s12] sm:$0xff]  ;;  %s19550_s16 = smov 64   ;;  %s19551_s10 = smov 88  }
  0x6e   : > { %v17410_v6 = vpack.c.bf16 %v310_v4, %v309_v2  ;;  %16262 = vmatprep.mubr.msk.f32.mxu0 %vm318_vm0, %v275_v5  ;;  %v276_v7 = vld [vmem:[%s19780_s12 + $0x8] sm:$0xff]  ;;  %v277_v8 = vld [vmem:[%s19780_s12 + $0x10] sm:$0xff]  ;;  %v278_v9 = vld [vmem:[%s19780_s12 + $0x18] sm:$0xff]  ;;  %s19552_s28 = smov 120   ;;  %vm2133_vm3 = vcmask 130048   ;;  %s19553_s13 = smov 56  }
  0x6f   : > { %17407 = vmatprep.subr.bf16.mxu0 %v17406_v3  ;;  %v279_v10 = vld [vmem:[%s19780_s12 + $0x20] sm:$0xff]  ;;  %v280_v11 = vld [vmem:[%s19780_s12 + $0x28] sm:$0xff]  ;;  %v281_v12 = vld [vmem:[%s19780_s12 + $0x30] sm:$0xff]  ;;  %s19554_s9 = smov 80   ;;  %s19555_s30 = smov 112  }
  0x70   : > { %17409 = vmatpush3.bf16.msra.mxu0 %v17406_v3  ;;  %v282_v13 = vld [vmem:[%s19780_s12 + $0x38] sm:$0xff]  ;;  %v283_v14 = vld [vmem:[%s19780_s12 + $0x40] sm:$0xff]  ;;  %v284_v15 = vld [vmem:[%s19780_s12 + $0x48] sm:$0xff]  ;;  %s19556_s11 = smov 48   ;;  %s19557_s17 = smov 72  }
  0x71   : > { %17411 = vmatprep.subr.bf16.mxu0 %v17410_v6  ;;  %v285_v16 = vld [vmem:[%s19780_s12 + $0x50] sm:$0xff]  ;;  %v286_v17 = vld [vmem:[%s19780_s12 + $0x58] sm:$0xff]  ;;  %v287_v18 = vld [vmem:[%s19780_s12 + $0x60] sm:$0xff]  ;;  %s19558_s7 = smov 104   ;;  %s19559_s8 = smov 40  }
  0x72   : > { %v288_v19 = vld [vmem:[%s19780_s12 + $0x68] sm:$0xff]  ;;  %v289_v20 = vld [vmem:[%s19780_s12 + $0x70] sm:$0xff]  ;;  %v290_v21 = vld [vmem:[%s19780_s12 + $0x78] sm:$0xff]  ;;  %s23046_s26 = scalar_lea.vmem [#allocation8], %s15014_s6  ;;  %s15573_s6 = sshll.u32 %s19614_s22, 12 }
  0x73   : > { %v291_v22 = vld [vmem:[%s19780_s12 + $0x80] sm:$0xff]  ;;  %v292_v23 = vld [vmem:[%s19780_s12 + $0x88] sm:$0xff]  ;;  %v293_v24 = vld [vmem:[%s19780_s12 + $0x90] sm:$0xff]  ;;  %s14898_s22 = scalar_lea.sflag [#allocation4], %s19774_s14  ;;  %p23658_p0 = scmp.ne.s32.totalorder %s23349_s23, 0 }
  0x74   : > { %17413 = vmatpush3.bf16.msra.mxu0 %v17410_v6  ;;  %v294_v25 = vld [vmem:[%s19780_s12 + $0x98] sm:$0xff]  ;;  %v295_v26 = vld [vmem:[%s19780_s12 + $0xa0] sm:$0xff]  ;;  %v296_v27 = vld [vmem:[%s19780_s12 + $0xa8] sm:$0xff] }
  0x75   : > { %v297_v28 = vld [vmem:[%s19780_s12 + $0xb0] sm:$0xff]  ;;  %v298_v29 = vld [vmem:[%s19780_s12 + $0xb8] sm:$0xff]  ;;  %v299_v30 = vld [vmem:[%s19780_s12 + $0xc0] sm:$0xff] }
  0x76   : > { %v300_v31 = vld [vmem:[%s19780_s12 + $0xc8] sm:$0xff]  ;;  %v301_v32 = vld [vmem:[%s19780_s12 + $0xd0] sm:$0xff]  ;;  %v302_v33 = vld [vmem:[%s19780_s12 + $0xd8] sm:$0xff] }
  0x77   : > { %16263 = vmatmul.mubr.msk.f32.vlgmr.msra.gmra.mrb[0].mxu0 %vm318_vm0, %v276_v7  ;;  %v303_v34 = vld [vmem:[%s19780_s12 + $0xe0] sm:$0xff]  ;;  %v304_v35 = vld [vmem:[%s19780_s12 + $0xe8] sm:$0xff]  ;;  %v305_v36 = vld [vmem:[%s19780_s12 + $0xf0] sm:$0xff] }
  0x78   : > { %16265 = vmatprep.mubr.msk.f32.mxu0 %vm318_vm0, %v277_v8  ;;  %v306_v37 = vld [vmem:[%s19780_s12 + $0xf8] sm:$0xff]  ;;  %v19857_v38 = vld [vmem:[%s23213_s2] ss:$0 sm:$0xff]  ;;  %vm20122_vm2 = vmpackc.low %vm682_vm1, %vm682_vm1 }
  0x7b   : > { %16266 = vmatmul.mubr.msk.f32.gmra.mrb[2].mxu0 %vm318_vm0, %v278_v9 }
  0x7c   : > { %16268 = vmatprep.mubr.msk.f32.mxu0 %vm318_vm0, %v279_v10 }
  0x7f   : > { %16269 = vmatmul.mubr.msk.f32.gmra.mrb[4].mxu0 %vm318_vm0, %v280_v11 }
  0x80   : > { %16271 = vmatprep.mubr.msk.f32.mxu0 %vm318_vm0, %v281_v12 }
  0x83   : > { %16272 = vmatmul.mubr.msk.f32.gmra.mrb[6].mxu0 %vm318_vm0, %v282_v13 }
  0x84   : > { %16274 = vmatprep.mubr.msk.f32.mxu0 %vm318_vm0, %v283_v14 }
  0x87   : > { %16275 = vmatmul.mubr.msk.f32.gmra.mrb[8].mxu0 %vm318_vm0, %v284_v15 }
  0x88   : > { %16277 = vmatprep.mubr.msk.f32.mxu0 %vm318_vm0, %v285_v16 }
  0x8b   : > { %16278 = vmatmul.mubr.msk.f32.gmra.mrb[10].mxu0 %vm318_vm0, %v286_v17 }
  0x8c   : > { %16280 = vmatprep.mubr.msk.f32.mxu0 %vm318_vm0, %v287_v18 }
  0x8f   : > { %16281 = vmatmul.mubr.msk.f32.gmra.mrb[12].mxu0 %vm318_vm0, %v288_v19 }
  0x90   : > { %16283 = vmatprep.mubr.msk.f32.mxu0 %vm318_vm0, %v289_v20 }
  0x93   : > { %16284 = vmatmul.mubr.msk.f32.gmra.mrb[14].mxu0 %vm318_vm0, %v290_v21 }
  0x94   : > { %16286 = vmatprep.mubr.msk.f32.mxu0 %vm318_vm0, %v291_v22 }
  0x97   : > { %16287 = vmatmul.mubr.msk.f32.gmra.mrb[16].mxu0 %vm318_vm0, %v292_v23 }
  0x98   : > { %16289 = vmatprep.mubr.msk.f32.mxu0 %vm318_vm0, %v293_v24 }
  0x9b   : > { %16290 = vmatmul.mubr.msk.f32.gmra.mrb[18].mxu0 %vm318_vm0, %v294_v25 }
  0x9c   : > { %16292 = vmatprep.mubr.msk.f32.mxu0 %vm318_vm0, %v295_v26 }
  0x9f   : > { %16293 = vmatmul.mubr.msk.f32.gmra.mrb[20].mxu0 %vm318_vm0, %v296_v27 }
  0xa0   : > { %16295 = vmatprep.mubr.msk.f32.mxu0 %vm318_vm0, %v297_v28 }
  0xa3   : > { %16296 = vmatmul.mubr.msk.f32.gmra.mrb[22].mxu0 %vm318_vm0, %v298_v29 }
  0xa4   : > { %16298 = vmatprep.mubr.msk.f32.mxu0 %vm318_vm0, %v299_v30 }
  0xa7   : > { %16299 = vmatmul.mubr.msk.f32.gmra.mrb[24].mxu0 %vm318_vm0, %v300_v31 }
  0xa8   : > { %16301 = vmatprep.mubr.msk.f32.mxu0 %vm318_vm0, %v301_v32 }
  0xab   : > { %16302 = vmatmul.mubr.msk.f32.gmra.mrb[26].mxu0 %vm318_vm0, %v302_v33 }
  0xac   : > { %16304 = vmatprep.mubr.msk.f32.mxu0 %vm318_vm0, %v303_v34 }
  0xaf   : > { %16305 = vmatmul.mubr.msk.f32.gmra.mrb[28].mxu0 %vm318_vm0, %v304_v35 }
  0xb0   : > { %16307 = vmatprep.mubr.msk.f32.mxu0 %vm318_vm0, %v305_v36 }
  0xb3   : > { %16308 = vmatmul.mubr.msk.f32.gmra.mrb[30].mxu0 %vm318_vm0, %v306_v37 }
 0x14a   : > { %v16264_v39 = vpop.f32.mrb[0].mxu0 }
 0x14b   : > { %v19860_v40 = vadd.f32 %v16264_v39, %v19857_v38  ;;  %v481_v41 = vpop.f32.mrb[1].mxu0 }
 0x14c   : > { %v482_v42 = vadd.f32 %v19857_v38, %v481_v41 }
 0x14e   : > { %v16267_v43 = vpop.f32.mrb[2].mxu0  ;;  %v19864_v44 = vpack.i.bf16 %v19860_v40, %v482_v42  ;;  %v19866_v45 = vmul.f32 0.35355338, %v482_v42 }
 0x14f   : > { %v19869_v46 = vadd.f32 %v16267_v43, %v19857_v38  ;;  %v491_v47 = vpop.f32.mrb[3].mxu0 }
 0x150   : > { %23354 = vst [vmem:[#allocation12_spill] sm:$0xff] %v19864_v44  ;;  %23355 = vst [vmem:[#allocation13_spill] sm:$0xff] %v19866_v45  ;;  %v19872_v48 = vadd.f32 %v19857_v38, %v491_v47  ;;  %18235 = vrot.lane.b32.xlu0 %v19864_v44, %s19549_s15  ;;  %16314 = vmatprep.mubr.msk.f32.mxu1 %vm682_vm1, %v19866_v45 }
 0x152   : > { %v16270_v49 = vpop.f32.mrb[4].mxu0  ;;  %v19880_v50 = vpack.i.bf16 %v19869_v46, %v19872_v48 }
 0x153   : > { %v19883_v51 = vadd.f32 %v16270_v49, %v19857_v38  ;;  %v501_v52 = vpop.f32.mrb[5].mxu0 }
 0x154   : > { %23356 = vst [vmem:[#allocation14_spill] sm:$0xff] %v19880_v50  ;;  %v19886_v53 = vadd.f32 %v19857_v38, %v501_v52  ;;  %18240 = vrot.lane.b32.xlu0 %v19880_v50, %s19549_s15 }
 0x156   : > { %v16273_v54 = vpop.f32.mrb[6].mxu0  ;;  %v19892_v55 = vpack.i.bf16 %v19883_v51, %v19886_v53 }
 0x157   : > { %v19895_v56 = vadd.f32 %v16273_v54, %v19857_v38  ;;  %v511_v57 = vpop.f32.mrb[7].mxu0 }
 0x158   : > { %23357 = vst [vmem:[#allocation15_spill] sm:$0xff] %v19892_v55  ;;  %v19898_v58 = vadd.f32 %v19857_v38, %v511_v57  ;;  %18245 = vrot.lane.b32.xlu1 %v19892_v55, %s19549_s15 }
 0x15a   : > { %v16276_v59 = vpop.f32.mrb[8].mxu0  ;;  %v19904_v60 = vpack.i.bf16 %v19895_v56, %v19898_v58 }
 0x15b   : > { %v19907_v61 = vadd.f32 %v16276_v59, %v19857_v38  ;;  %v521_v62 = vpop.f32.mrb[9].mxu0 }
 0x15c   : > { %23358 = vst [vmem:[#allocation16_spill] sm:$0xff] %v19904_v60  ;;  %v19910_v63 = vadd.f32 %v19857_v38, %v521_v62  ;;  %18250 = vrot.lane.b32.xlu1 %v19904_v60, %s19549_s15 }
 0x15e   : > { %v16279_v0 = vpop.f32.mrb[10].mxu0  ;;  %v19916_v1 = vpack.i.bf16 %v19907_v61, %v19910_v63 }
 0x15f   : > { %v19919_v2 = vadd.f32 %v16279_v0, %v19857_v38  ;;  %v531_v3 = vpop.f32.mrb[11].mxu0 }
 0x160   : > { %23359 = vst [vmem:[#allocation17_spill] sm:$0xff] %v19916_v1  ;;  %v19922_v4 = vadd.f32 %v19857_v38, %v531_v3  ;;  %18255 = vrot.lane.b32.xlu0 %v19916_v1, %s19549_s15 }
 0x162   : > { %v16282_v5 = vpop.f32.mrb[12].mxu0  ;;  %v19928_v6 = vpack.i.bf16 %v19919_v2, %v19922_v4 }
 0x163   : > { %v19931_v7 = vadd.f32 %v16282_v5, %v19857_v38  ;;  %v541_v8 = vpop.f32.mrb[13].mxu0 }
 0x164   : > { %23360 = vst [vmem:[#allocation18_spill] sm:$0xff] %v19928_v6  ;;  %v19934_v9 = vadd.f32 %v19857_v38, %v541_v8  ;;  %18260 = vrot.lane.b32.xlu1 %v19928_v6, %s19549_s15 }
 0x166   : > { %v16285_v10 = vpop.f32.mrb[14].mxu0  ;;  %v19940_v11 = vpack.i.bf16 %v19931_v7, %v19934_v9 }
 0x167   : > { %v19943_v12 = vadd.f32 %v16285_v10, %v19857_v38  ;;  %v551_v13 = vpop.f32.mrb[15].mxu0 }
 0x168   : > { %v19946_v14 = vadd.f32 %v19857_v38, %v551_v13  ;;  %18265 = vrot.lane.b32.xlu0 %v19940_v11, %s19549_s15 }
 0x16a   : > { %v16288_v15 = vpop.f32.mrb[16].mxu0  ;;  %v19952_v16 = vpack.i.bf16 %v19943_v12, %v19946_v14 }
 0x16b   : > { %v19955_v17 = vadd.f32 %v16288_v15, %v19857_v38  ;;  %v561_v18 = vpop.f32.mrb[17].mxu0 }
 0x16c   : > { %23361 = vst [vmem:[#allocation19_spill] sm:$0xff] %v19952_v16  ;;  %v562_v19 = vadd.f32 %v19857_v38, %v561_v18  ;;  %18270 = vrot.lane.b32.xlu1 %v19952_v16, %s19549_s15 }
 0x16e   : > { %v16291_v20 = vpop.f32.mrb[18].mxu0  ;;  %v19960_v21 = vmul.f32 0.35355338, %v562_v19  ;;  %v19963_v22 = vpack.i.bf16 %v19955_v17, %v562_v19  ;;  %v20087_v19 = vmul.f32 0.35355338, %v19872_v48 }
 0x16f   : > { %v19966_v23 = vadd.f32 %v16291_v20, %v19857_v38  ;;  %v571_v24 = vpop.f32.mrb[19].mxu0  ;;  %v20105_v48 = vmul.f32 0.35355338, %v19898_v58  ;;  %v20116_v20 = vmul.f32 0.35355338, %v19869_v46  ;;  %v23376_v58 = vmov 0 }
 0x170   : > { %23362 = vst [vmem:[#allocation20_spill] sm:$0xff] %v19960_v21  ;;  %23363 = vst [vmem:[#allocation21_spill] sm:$0xff] %v19963_v22  ;;  %16370 = vmatprep.mubr.msk.f32.mxu0 %vm682_vm1, %v19960_v21  ;;  %18275 = vrot.lane.b32.xlu0 %v19963_v22, %s19549_s15  ;;  %v19973_v25 = vadd.f32 %v19857_v38, %v571_v24  ;;  %v23377_v58 = vsel %vm20122_vm2, 4294967295, %v23376_v58 }
 0x171   : > { %23372 = vst [vmem:[#allocation30_spill] sm:$0xff] %v20087_v19  ;;  %23374 = vst [vmem:[#allocation32_spill] sm:$0xff] %v20105_v48 }
 0x172   : > { %v16294_v26 = vpop.f32.mrb[20].mxu0  ;;  %v19977_v27 = vpack.i.bf16 %v19966_v23, %v19973_v25  ;;  %23375 = vst [vmem:[#allocation33_spill] sm:$0xff] %v20116_v20  ;;  %23378 = vst [vmem:[#allocation34_spill] sm:$0xff] %v23377_v58 }
 0x173   : > { %v19980_v28 = vadd.f32 %v16294_v26, %v19857_v38  ;;  %v581_v29 = vpop.f32.mrb[21].mxu0 }
 0x174   : > { %23364 = vst [vmem:[#allocation22_spill] sm:$0xff] %v19977_v27  ;;  %v19983_v30 = vadd.f32 %v19857_v38, %v581_v29  ;;  %18280 = vrot.lane.b32.xlu1 %v19977_v27, %s19549_s15 }
 0x176   : > { %v16297_v31 = vpop.f32.mrb[22].mxu0  ;;  %v19989_v32 = vpack.i.bf16 %v19980_v28, %v19983_v30 }
 0x177   : > { %v19992_v33 = vadd.f32 %v16297_v31, %v19857_v38  ;;  %v591_v34 = vpop.f32.mrb[23].mxu0 }
 0x178   : > { %23365 = vst [vmem:[#allocation23_spill] sm:$0xff] %v19989_v32  ;;  %18285 = vrot.lane.b32.xlu0 %v19989_v32, %s19549_s15  ;;  %v19997_v35 = vadd.f32 %v19857_v38, %v591_v34  ;;  %v20127_v34 = vmul.f32 0.35355338, %v19886_v53 }
 0x17a   : > { %v16300_v36 = vpop.f32.mrb[24].mxu0  ;;  %v20001_v37 = vpack.i.bf16 %v19992_v33, %v19997_v35  ;;  %23379 = vst [vmem:[#allocation35_spill] sm:$0xff] %v20127_v34 }
 0x17b   : > { %v20004_v39 = vadd.f32 %v16300_v36, %v19857_v38  ;;  %v601_v41 = vpop.f32.mrb[25].mxu0 }
 0x17c   : > { %23366 = vst [vmem:[#allocation24_spill] sm:$0xff] %v20001_v37  ;;  %v20007_v42 = vadd.f32 %v19857_v38, %v601_v41  ;;  %18290 = vrot.lane.b32.xlu1 %v20001_v37, %s19549_s15 }
 0x17e   : > { %v16303_v43 = vpop.f32.mrb[26].mxu0  ;;  %v20013_v47 = vpack.i.bf16 %v20004_v39, %v20007_v42 }
 0x17f   : > { %v20016_v49 = vadd.f32 %v16303_v43, %v19857_v38  ;;  %v611_v52 = vpop.f32.mrb[27].mxu0 }
 0x180   : > { %23367 = vst [vmem:[#allocation25_spill] sm:$0xff] %v20013_v47  ;;  %18295 = vrot.lane.b32.xlu0 %v20013_v47, %s19549_s15  ;;  %v20021_v54 = vadd.f32 %v19857_v38, %v611_v52 }
 0x182   : > { %v16306_v57 = vpop.f32.mrb[28].mxu0  ;;  %v20025_v59 = vpack.i.bf16 %v20016_v49, %v20021_v54 }
 0x183   : > { %v20028_v62 = vadd.f32 %v16306_v57, %v19857_v38  ;;  %v621_v0 = vpop.f32.mrb[29].mxu0 }
 0x184   : > { %23368 = vst [vmem:[#allocation26_spill] sm:$0xff] %v20025_v59  ;;  %v20031_v3 = vadd.f32 %v19857_v38, %v621_v0  ;;  %18300 = vrot.lane.b32.xlu1 %v20025_v59, %s19549_s15 }
 0x186   : > { %v16309_v5 = vpop.f32.mrb[30].mxu0  ;;  %v20037_v8 = vpack.i.bf16 %v20028_v62, %v20031_v3 }
 0x187   : > { %v20040_v10 = vadd.f32 %v16309_v5, %v19857_v38  ;;  %v631_v13 = vpop.f32.mrb[31].mxu0  ;;  %v20140_v5 = vmul.f32 0.35355338, %v19895_v56 }
 0x188   : > { %23369 = vst [vmem:[#allocation27_spill] sm:$0xff] %v20037_v8  ;;  %v20043_v15 = vadd.f32 %v19857_v38, %v631_v13  ;;  %18305 = vrot.lane.b32.xlu0 %v20037_v8, %s19549_s15  ;;  %v20080_v38 = vmul.f32 0.35355338, %v19860_v40  ;;  %v20098_v40 = vmul.f32 0.35355338, %v19883_v51 }
 0x189   : > { %23380 = vst [vmem:[#allocation36_spill] sm:$0xff] %v20140_v5 }
 0x18a   : > { %v20049_v18 = vpack.i.bf16 %v20040_v10, %v20043_v15  ;;  %23371 = vst [vmem:[#allocation29_spill] sm:$0xff] %v20080_v38  ;;  %23373 = vst [vmem:[#allocation31_spill] sm:$0xff] %v20098_v40 }
 0x18c   : > { %23370 = vst [vmem:[#allocation28_spill] sm:$0xff] %v20049_v18  ;;  %18310 = vrot.lane.b32.xlu1 %v20049_v18, %s19549_s15  ;;  %18325 = vrot.lane.b32.xlu0 %v19892_v55, %s19550_s16  ;;  %s14912_s15 = sshll.u32 %s23046_s26, 4  ;;  %s23162_s15 = int_to_ptr.vmem [resolvable:$true] %s14912_s15 }
 0x190   : > { %18315 = vrot.lane.b32.xlu1 %v19864_v44, %s19550_s16  ;;  %18335 = vrot.lane.b32.xlu0 %v19916_v1, %s19550_s16 }
 0x194   : > { %18320 = vrot.lane.b32.xlu1 %v19880_v50, %s19550_s16  ;;  %18340 = vrot.lane.b32.xlu0 %v19928_v6, %s19550_s16 }
 0x198   : > { %18330 = vrot.lane.b32.xlu1 %v19904_v60, %s19550_s16  ;;  %18345 = vrot.lane.b32.xlu0 %v19940_v11, %s19550_s16 }
 0x19c   : > { %18350 = vrot.lane.b32.xlu1 %v19952_v16, %s19550_s16  ;;  %18365 = vrot.lane.b32.xlu0 %v19989_v32, %s19550_s16 }
 0x1a0   : > { %18355 = vrot.lane.b32.xlu1 %v19963_v22, %s19550_s16  ;;  %18390 = vrot.lane.b32.xlu0 %v19864_v44, %s19551_s10 }
 0x1a4   : > { %18360 = vrot.lane.b32.xlu1 %v19977_v27, %s19550_s16  ;;  %18400 = vrot.lane.b32.xlu0 %v19892_v55, %s19551_s10 }
 0x1a8   : > { %18370 = vrot.lane.b32.xlu1 %v20001_v37, %s19550_s16  ;;  %3880 = vrot.lane.b32.xlu0 %v20080_v38, %s19552_s28 }
 0x1ac   : > { %18375 = vrot.lane.b32.xlu1 %v20013_v47, %s19550_s16  ;;  %3969 = vrot.lane.b32.xlu0 %v20087_v19, %s19552_s28 }
 0x1b0   : > { %18380 = vrot.lane.b32.xlu1 %v20025_v59, %s19550_s16  ;;  %18410 = vrot.lane.b32.xlu0 %v19916_v1, %s19551_s10 }
 0x1b4   : > { %18385 = vrot.lane.b32.xlu1 %v20037_v8, %s19550_s16  ;;  %4062 = vrot.lane.b32.xlu0 %v20098_v40, %s19552_s28 }
 0x1b8   : > { %18395 = vrot.lane.b32.xlu1 %v19880_v50, %s19551_s10  ;;  %4151 = vrot.lane.b32.xlu0 %v20105_v48, %s19552_s28 }
 0x1bc   : > { %3878 = vrot.lane.b32.xlu1 %v19866_v45, %s19552_s28 }
 0x1c0   : > { %18405 = vrot.lane.b32.xlu1 %v19904_v60, %s19551_s10 }
 0x1c2   : > { %v18236_v51 = vpop.permute.xlu0 %18235 }
 0x1c3   : > { %v18238_v24 = vunpack.i.h.bf16 %v18236_v51  ;;  %v18237_v26 = vunpack.i.l.bf16 %v18236_v51 }
 0x1c4   : > { %3971 = vrot.lane.b32.xlu1 %v20116_v20, %s19552_s28 }
 0x1c5   : > { %v17414_v29 = vpack.c.bf16 %v18238_v24, %v18237_v26 }
 0x1c6   : > { %v18241_v31 = vpop.permute.xlu0 %18240 }
 0x1c7   : > { %v18243_v36 = vunpack.i.h.bf16 %v18241_v31  ;;  %v18242_v41 = vunpack.i.l.bf16 %v18241_v31  ;;  %17416 = vmatprep.subr.msk.bf16.mxu1 %vm20122_vm2, %v17414_v29 }
 0x1c8   : > { %17419 = vmatpush3.bf16.xpose.msk.msra.mxu1 %vm20122_vm2, %v17414_v29  ;;  %4060 = vrot.lane.b32.xlu1 %v20127_v34, %s19552_s28 }
 0x1c9   : > { %v17420_v46 = vpack.c.bf16 %v18243_v36, %v18242_v41 }
 0x1ca   : > { %v18246_v43 = vpop.permute.xlu1 %18245 }
 0x1cb   : > { %v18248_v52 = vunpack.i.h.bf16 %v18246_v43  ;;  %v18247_v57 = vunpack.i.l.bf16 %v18246_v43  ;;  %17422 = vmatprep.subr.msk.bf16.mxu1 %vm20122_vm2, %v17420_v46 }
 0x1cc   : > { %18415 = vrot.lane.b32.xlu1 %v19928_v6, %s19551_s10 }
 0x1cd   : > { %v17426_v53 = vpack.c.bf16 %v18248_v52, %v18247_v57 }
 0x1ce   : > { %v18251_v0 = vpop.permute.xlu1 %18250 }
 0x1cf   : > { %16315 = vmatmul.mubr.msk.f32.vlgmr.msra.gmra.mrb[0].mxu1 %vm682_vm1, %v20080_v38  ;;  %v18253_v13 = vunpack.i.h.bf16 %v18251_v0  ;;  %v18252_v51 = vunpack.i.l.bf16 %v18251_v0 }
 0x1d0   : > { %4153 = vrot.lane.b32.xlu1 %v20140_v5, %s19552_s28  ;;  %17425 = vmatpush3.bf16.xpose.msk.msra.mxu1 %vm20122_vm2, %v17420_v46 }
 0x1d1   : > { %16321 = vmatprep.mubr.msk.f32.mxu1 %vm682_vm1, %v20087_v19  ;;  %17428 = vmatprep.subr.msk.bf16.mxu1 %vm20122_vm2, %v17426_v53  ;;  %v17432_v56 = vpack.c.bf16 %v18253_v13, %v18252_v51  ;;  %v20171_v13 = vmul.f32 0.35355338, %v19910_v63 }
 0x1d2   : > { %v18256_v24 = vpop.permute.xlu0 %18255 }
 0x1d3   : > { %v18258_v26 = vunpack.i.h.bf16 %v18256_v24  ;;  %v18257_v29 = vunpack.i.l.bf16 %v18256_v24 }
 0x1d4   : > { %18420 = vrot.lane.b32.xlu1 %v20049_v18, %s19550_s16 }
 0x1d5   : > { %v17438_v36 = vpack.c.bf16 %v18258_v26, %v18257_v29 }
 0x1d6   : > { %v18261_v41 = vpop.permute.xlu1 %18260 }
 0x1d7   : > { %16322 = vmatmul.mubr.msk.f32.vlgmr.msra.gmra.mrb[2].mxu1 %vm682_vm1, %v20116_v20  ;;  %v18263_v43 = vunpack.i.h.bf16 %v18261_v41  ;;  %v18262_v52 = vunpack.i.l.bf16 %v18261_v41 }
 0x1d8   : > { %17431 = vmatpush3.bf16.xpose.msk.msra.mxu1 %vm20122_vm2, %v17426_v53  ;;  %16328 = vmatprep.mubr.msk.f32.mxu1 %vm682_vm1, %v20127_v34 }
 0x1d9   : > { %17434 = vmatprep.subr.msk.bf16.mxu1 %vm20122_vm2, %v17432_v56  ;;  %v17444_v51 = vpack.c.bf16 %v18263_v43, %v18262_v52  ;;  %v20186_v43 = vmul.f32 0.35355338, %v19907_v61  ;;  %v20196_v52 = vmul.f32 0.35355338, %v19922_v4  ;;  %v20203_v61 = vmul.f32 0.35355338, %v19983_v30 }
 0x1da   : > { %v18266_v31 = vpop.permute.xlu0 %18265 }
 0x1db   : > { %v18268_v26 = vunpack.i.h.bf16 %v18266_v31  ;;  %v18267_v29 = vunpack.i.l.bf16 %v18266_v31  ;;  %23381 = vst [vmem:[#allocation37_spill] sm:$0xff] %v20186_v43  ;;  %23383 = vst [vmem:[#allocation39_spill] sm:$0xff] %v20196_v52 }
 0x1dc   : > { %23384 = vst [vmem:[#allocation40_spill] sm:$0xff] %v20203_v61 }
 0x1de   : > { %v18271_v41 = vpop.permute.xlu1 %18270 }
 0x1df   : > { %16329 = vmatmul.mubr.msk.f32.vlgmr.msra.gmra.mrb[4].mxu1 %vm682_vm1, %v20098_v40 }
 0x1e0   : > { %17437 = vmatpush3.bf16.xpose.msk.msra.mxu1 %vm20122_vm2, %v17432_v56  ;;  %16335 = vmatprep.mubr.msk.f32.mxu1 %vm682_vm1, %v20105_v48  ;;  %v20273_v48 = vmul.f32 0.35355338, %v20028_v62 }
 0x1e1   : > { %17440 = vmatprep.subr.msk.bf16.mxu1 %vm20122_vm2, %v17438_v36 }
 0x1e2   : > { %v18276_v46 = vpop.permute.xlu0 %18275  ;;  %23394 = vst [vmem:[#allocation50_spill] sm:$0xff] %v20273_v48 }
 0x1e3   : > { %v18278_v57 = vunpack.i.h.bf16 %v18276_v46  ;;  %v18277_v53 = vunpack.i.l.bf16 %v18276_v46 }
 0x1e5   : > { %v17462_v0 = vpack.c.bf16 %v18278_v57, %v18277_v53  ;;  %v17450_v57 = vpack.c.bf16 %v18268_v26, %v18267_v29  ;;  %v20224_v26 = vmul.f32 0.35355338, %v19934_v9 }
 0x1e7   : > { %16336 = vmatmul.mubr.msk.f32.vlgmr.msra.gmra.mrb[6].mxu1 %vm682_vm1, %v20140_v5  ;;  %17464 = vmatprep.subr.msk.bf16.mxu0 %vm20122_vm2, %v17462_v0  ;;  %23387 = vst [vmem:[#allocation43_spill] sm:$0xff] %v20224_v26 }
 0x1e8   : > { %17443 = vmatpush3.bf16.xpose.msk.msra.mxu1 %vm20122_vm2, %v17438_v36  ;;  %16342 = vmatprep.mubr.msk.f32.mxu1 %vm682_vm1, %v20171_v13  ;;  %v20189_v36 = vmul.f32 0.35355338, %v19955_v17  ;;  %v18281_v17 = vpop.permute.xlu1 %18280 }
 0x1e9   : > { %17467 = vmatpush3.bf16.xpose.msk.msra.mxu0 %vm20122_vm2, %v17462_v0  ;;  %17446 = vmatprep.subr.msk.bf16.mxu1 %vm20122_vm2, %v17444_v51  ;;  %v18273_v0 = vunpack.i.h.bf16 %v18271_v41 }
 0x1ea   : > { %v18286_v63 = vpop.permute.xlu0 %18285  ;;  %23382 = vst [vmem:[#allocation38_spill] sm:$0xff] %v20189_v36 }
 0x1eb   : > { %v18288_v56 = vunpack.i.h.bf16 %v18286_v63  ;;  %v18287_v24 = vunpack.i.l.bf16 %v18286_v63 }
 0x1ed   : > { %v17474_v46 = vpack.c.bf16 %v18288_v56, %v18287_v24  ;;  %v20214_v56 = vmul.f32 0.35355338, %v19919_v2  ;;  %v20217_v24 = vmul.f32 0.35355338, %v19980_v28  ;;  %v20231_v2 = vmul.f32 0.35355338, %v20007_v42 }
 0x1ee   : > { %v18291_v30 = vpop.permute.xlu1 %18290 }
 0x1ef   : > { %16343 = vmatmul.mubr.msk.f32.vlgmr.msra.gmra.mrb[8].mxu1 %vm682_vm1, %v20186_v43  ;;  %17476 = vmatprep.subr.msk.bf16.mxu0 %vm20122_vm2, %v17474_v46  ;;  %23385 = vst [vmem:[#allocation41_spill] sm:$0xff] %v20214_v56  ;;  %23386 = vst [vmem:[#allocation42_spill] sm:$0xff] %v20217_v24 }
 0x1f0   : > { %16371 = vmatmul.mubr.msk.f32.vlgmr.msra.gmra.mrb[32].mxu0 %vm682_vm1, %v20189_v36  ;;  %17449 = vmatpush3.bf16.xpose.msk.msra.mxu1 %vm20122_vm2, %v17444_v51  ;;  %v18272_v51 = vunpack.i.l.bf16 %v18271_v41  ;;  %23388 = vst [vmem:[#allocation44_spill] sm:$0xff] %v20231_v2 }
 0x1f1   : > { %16349 = vmatprep.mubr.msk.f32.mxu1 %vm682_vm1, %v20196_v52  ;;  %17479 = vmatpush3.bf16.xpose.msk.msra.mxu0 %vm20122_vm2, %v17474_v46 }
 0x1f2   : > { %16384 = vmatprep.mubr.msk.f32.mxu0 %vm682_vm1, %v20203_v61  ;;  %17452 = vmatprep.subr.msk.bf16.mxu1 %vm20122_vm2, %v17450_v57  ;;  %v18296_v4 = vpop.permute.xlu0 %18295  ;;  %v17456_v29 = vpack.c.bf16 %v18273_v0, %v18272_v51  ;;  %v20245_v0 = vmul.f32 0.35355338, %v20004_v39  ;;  %v20252_v51 = vmul.f32 0.35355338, %v19946_v14 }
 0x1f3   : > { %v18298_v31 = vunpack.i.h.bf16 %v18296_v4  ;;  %v18297_v53 = vunpack.i.l.bf16 %v18296_v4  ;;  %v18282_v4 = vunpack.i.l.bf16 %v18281_v17 }
 0x1f4   : > { %23390 = vst [vmem:[#allocation46_spill] sm:$0xff] %v20245_v0  ;;  %23391 = vst [vmem:[#allocation47_spill] sm:$0xff] %v20252_v51 }
 0x1f5   : > { %v17486_v63 = vpack.c.bf16 %v18298_v31, %v18297_v53  ;;  %v20242_v31 = vmul.f32 0.35355338, %v19931_v7  ;;  %v20259_v7 = vmul.f32 0.35355338, %v20031_v3 }
 0x1f6   : > { %v18301_v28 = vpop.permute.xlu1 %18300 }
 0x1f7   : > { %16350 = vmatmul.mubr.msk.f32.vlgmr.msra.gmra.mrb[10].mxu1 %vm682_vm1, %v20214_v56  ;;  %17488 = vmatprep.subr.msk.bf16.mxu0 %vm20122_vm2, %v17486_v63  ;;  %23389 = vst [vmem:[#allocation45_spill] sm:$0xff] %v20242_v31  ;;  %23392 = vst [vmem:[#allocation48_spill] sm:$0xff] %v20259_v7  ;;  %v18302_v62 = vunpack.i.l.bf16 %v18301_v28 }
 0x1f8   : > { %16385 = vmatmul.mubr.msk.f32.vlgmr.msra.gmra.mrb[34].mxu0 %vm682_vm1, %v20217_v24  ;;  %17455 = vmatpush3.bf16.xpose.msk.msra.mxu1 %vm20122_vm2, %v17450_v57  ;;  %v18283_v57 = vunpack.i.h.bf16 %v18281_v17 }
 0x1f9   : > { %16356 = vmatprep.mubr.msk.f32.mxu1 %vm682_vm1, %v20224_v26  ;;  %17491 = vmatpush3.bf16.xpose.msk.msra.mxu0 %vm20122_vm2, %v17486_v63 }
 0x1fa   : > { %16398 = vmatprep.mubr.msk.f32.mxu0 %vm682_vm1, %v20231_v2  ;;  %17458 = vmatprep.subr.msk.bf16.mxu1 %vm20122_vm2, %v17456_v29  ;;  %v18306_v9 = vpop.permute.xlu0 %18305  ;;  %v17468_v63 = vpack.c.bf16 %v18283_v57, %v18282_v4  ;;  %v20270_v57 = vmul.f32 0.35355338, %v19943_v12 }
 0x1fb   : > { %v18308_v41 = vunpack.i.h.bf16 %v18306_v9  ;;  %v18307_v46 = vunpack.i.l.bf16 %v18306_v9 }
 0x1fc   : > { %23393 = vst [vmem:[#allocation49_spill] sm:$0xff] %v20270_v57 }
 0x1fd   : > { %v17498_v42 = vpack.c.bf16 %v18308_v41, %v18307_v46  ;;  %v18292_v41 = vunpack.i.l.bf16 %v18291_v30 }
 0x1fe   : > { %v18311_v53 = vpop.permute.xlu1 %18310  ;;  %v18326_v39 = vpop.permute.xlu0 %18325 }
 0x1ff   : > { %16357 = vmatmul.mubr.msk.f32.vlgmr.msra.gmra.mrb[12].mxu1 %vm682_vm1, %v20242_v31  ;;  %17500 = vmatprep.subr.msk.bf16.mxu0 %vm20122_vm2, %v17498_v42  ;;  %v18328_v3 = vunpack.i.h.bf16 %v18326_v39  ;;  %v18327_v46 = vunpack.i.l.bf16 %v18326_v39  ;;  %v20295_v39 = vmul.f32 0.35355338, %v19997_v35  ;;  %v20309_v35 = vmul.f32 0.35355338, %v20021_v54 }
 0x200   : > { %16399 = vmatmul.mubr.msk.f32.vlgmr.msra.gmra.mrb[36].mxu0 %vm682_vm1, %v20245_v0  ;;  %17461 = vmatpush3.bf16.xpose.msk.msra.mxu1 %vm20122_vm2, %v17456_v29  ;;  %v18293_v29 = vunpack.i.h.bf16 %v18291_v30  ;;  %v20292_v30 = vmul.f32 0.35355338, %v19966_v23  ;;  %v20323_v54 = vmul.f32 0.35355338, %v20043_v15 }
 0x201   : > { %16363 = vmatprep.mubr.msk.f32.mxu1 %vm682_vm1, %v20252_v51  ;;  %17503 = vmatpush3.bf16.xpose.msk.msra.mxu0 %vm20122_vm2, %v17498_v42  ;;  %v20278_v42 = vmul.f32 0.35355338, %v19973_v25  ;;  %v20284_v12 = vpack.c.bf16 %v18328_v3, %v18327_v46  ;;  %v18303_v25 = vunpack.i.h.bf16 %v18301_v28  ;;  %23397 = vst [vmem:[#allocation53_spill] sm:$0xff] %v20295_v39  ;;  %v20306_v28 = vmul.f32 0.35355338, %v19992_v33  ;;  %23399 = vst [vmem:[#allocation55_spill] sm:$0xff] %v20309_v35 }
 0x202   : > { %16412 = vmatprep.mubr.msk.f32.mxu0 %vm682_vm1, %v20259_v7  ;;  %v18316_v14 = vpop.permute.xlu1 %18315  ;;  %17470 = vmatprep.subr.msk.bf16.mxu1 %vm20122_vm2, %v17468_v63  ;;  %v17480_v40 = vpack.c.bf16 %v18293_v29, %v18292_v41  ;;  %23396 = vst [vmem:[#allocation52_spill] sm:$0xff] %v20292_v30  ;;  %v20320_v33 = vmul.f32 0.35355338, %v20016_v49  ;;  %23401 = vst [vmem:[#allocation57_spill] sm:$0xff] %v20323_v54  ;;  %v20332_v49 = vmul.f32 0.35355338, %v20040_v10 }
 0x203   : > { %v18318_v17 = vunpack.i.h.bf16 %v18316_v14  ;;  %v18317_v9 = vunpack.i.l.bf16 %v18316_v14  ;;  %23395 = vst [vmem:[#allocation51_spill] sm:$0xff] %v20278_v42  ;;  %v18313_v14 = vunpack.i.h.bf16 %v18311_v53  ;;  %23398 = vst [vmem:[#allocation54_spill] sm:$0xff] %v20306_v28 }
 0x204   : > { %23400 = vst [vmem:[#allocation56_spill] sm:$0xff] %v20320_v33  ;;  %23402 = vst [vmem:[#allocation58_spill] sm:$0xff] %v20332_v49 }
 0x205   : > { %v17510_v4 = vpack.c.bf16 %v18318_v17, %v18317_v9  ;;  %v18312_v17 = vunpack.i.l.bf16 %v18311_v53 }
 0x206   : > { %v18321_v9 = vpop.permute.xlu1 %18320 }
 0x207   : > { %16364 = vmatmul.mubr.msk.f32.vlgmr.msra.gmra.mrb[14].mxu1 %vm682_vm1, %v20270_v57  ;;  %17511 = vmatprep.subr.bf16.mxu0 %v17510_v4  ;;  %v17504_v23 = vpack.c.bf16 %v18313_v14, %v18312_v17  ;;  %v18322_v53 = vunpack.i.l.bf16 %v18321_v9 }
 0x208   : > { %16413 = vmatmul.mubr.msk.f32.vlgmr.msra.gmra.mrb[38].mxu0 %vm682_vm1, %v20273_v48  ;;  %17473 = vmatpush3.bf16.xpose.msk.msra.mxu1 %vm20122_vm2, %v17468_v63  ;;  %v17492_v63 = vpack.c.bf16 %v18303_v25, %v18302_v62 }
 0x209   : > { %16377 = vmatprep.mubr.msk.f32.mxu1 %vm682_vm1, %v20278_v42  ;;  %17513 = vmatpush3.bf16.msra.mxu0 %v17510_v4 }
 0x20a   : > { %17519 = vmatprep.subr.bf16.mxu0 %v20284_v12  ;;  %17482 = vmatprep.subr.msk.bf16.mxu1 %vm20122_vm2, %v17480_v40  ;;  %v18331_v41 = vpop.permute.xlu1 %18330 }
 0x20b   : > { %v18333_v3 = vunpack.i.h.bf16 %v18331_v41  ;;  %v18332_v46 = vunpack.i.l.bf16 %v18331_v41 }
 0x20d   : > { %v20336_v15 = vpack.c.bf16 %v18333_v3, %v18332_v46 }
 0x20f   : > { %16378 = vmatmul.mubr.msk.f32.vlgmr.msra.gmra.mrb[16].mxu1 %vm682_vm1, %v20292_v30 }
 0x210   : > { %17485 = vmatpush3.bf16.xpose.msk.msra.mxu1 %vm20122_vm2, %v17480_v40  ;;  %16391 = vmatprep.mubr.msk.f32.mxu1 %vm682_vm1, %v20295_v39  ;;  %v18323_v40 = vunpack.i.h.bf16 %v18321_v9 }
 0x211   : > { %17494 = vmatprep.subr.msk.bf16.mxu1 %vm20122_vm2, %v17492_v63 }
 0x212   : > { %v17514_v29 = vpack.c.bf16 %v18323_v40, %v18322_v53 }
 0x217   : > { %16392 = vmatmul.mubr.msk.f32.vlgmr.msra.gmra.mrb[18].mxu1 %vm682_vm1, %v20306_v28 }
 0x218   : > { %17497 = vmatpush3.bf16.xpose.msk.msra.mxu1 %vm20122_vm2, %v17492_v63  ;;  %16405 = vmatprep.mubr.msk.f32.mxu1 %vm682_vm1, %v20309_v35 }
 0x219   : > { %17506 = vmatprep.subr.msk.bf16.mxu1 %vm20122_vm2, %v17504_v23 }
 0x21f   : > { %16406 = vmatmul.mubr.msk.f32.vlgmr.msra.gmra.mrb[20].mxu1 %vm682_vm1, %v20320_v33 }
 0x220   : > { %17509 = vmatpush3.bf16.xpose.msk.msra.mxu1 %vm20122_vm2, %v17504_v23  ;;  %16419 = vmatprep.mubr.msk.f32.mxu1 %vm682_vm1, %v20323_v54 }
 0x221   : > { %17515 = vmatprep.subr.bf16.mxu1 %v17514_v29 }
 0x227   : > { %16420 = vmatmul.mubr.msk.f32.vlgmr.msra.gmra.mrb[22].mxu1 %vm682_vm1, %v20332_v49 }
 0x228   : > { %17517 = vmatpush3.bf16.msra.mxu1 %v17514_v29 }
 0x229   : > { %17523 = vmatprep.subr.bf16.mxu1 %v20336_v15 }
 0x2a2   : > { %v20339_v4 = vpop.f32.mrb[0].mxu1 }
 0x2a3   : > { %v20341_v25 = vpop.f32.mrb[1].mxu1  ;;  %v2137_v62 = vsel %vm2133_vm3, %v20339_v4, -inf }
 0x2a4   : > { %2138 = vmax.xlane.f32.xlu1 %v2137_v62  ;;  %v2134_v10 = vsel %vm2133_vm3, %v20341_v25, -inf }
 0x2a5   : > { %2135 = vmax.xlane.f32.xlu0 %v2134_v10 }
 0x2aa   : > { %v20347_v63 = vpop.f32.mrb[2].mxu1 }
 0x2ab   : > { %v20349_v14 = vpop.f32.mrb[3].mxu1  ;;  %v2143_v17 = vsel %vm2133_vm3, %v20347_v63, -inf }
 0x2ac   : > { %2144 = vmax.xlane.f32.xlu1 %v2143_v17  ;;  %v2140_v23 = vsel %vm2133_vm3, %v20349_v14, -inf }
 0x2ad   : > { %2141 = vmax.xlane.f32.xlu0 %v2140_v23 }
 0x2b2   : > { %v20355_v9 = vpop.f32.mrb[4].mxu1 }
 0x2b3   : > { %v20357_v40 = vpop.f32.mrb[5].mxu1  ;;  %v2149_v53 = vsel %vm2133_vm3, %v20355_v9, -inf }
 0x2b4   : > { %2150 = vmax.xlane.f32.xlu0 %v2149_v53  ;;  %v2146_v29 = vsel %vm2133_vm3, %v20357_v40, -inf }
 0x2b8   : > { %2147 = vmax.xlane.f32.xlu0 %v2146_v29 }
 0x2ba   : > { %v20363_v41 = vpop.f32.mrb[6].mxu1 }
 0x2bb   : > { %v20365_v3 = vpop.f32.mrb[7].mxu1  ;;  %v2155_v46 = vsel %vm2133_vm3, %v20363_v41, -inf }
 0x2bc   : > { %2156 = vmax.xlane.f32.xlu1 %v2155_v46  ;;  %v2152_v62 = vsel %vm2133_vm3, %v20365_v3, -inf }
 0x2c0   : > { %2153 = vmax.xlane.f32.xlu1 %v2152_v62 }
 0x2c2   : > { %v20371_v10 = vpop.f32.mrb[8].mxu1 }
 0x2c3   : > { %v20373_v17 = vpop.f32.mrb[32].mxu0  ;;  %v20375_v23 = vpop.f32.mrb[9].mxu1  ;;  %v2161_v53 = vsel %vm2133_vm3, %v20371_v10, -inf }
 0x2c4   : > { %v20379_v29 = vpop.f32.mrb[33].mxu0  ;;  %2162 = vmax.xlane.f32.xlu0 %v2161_v53  ;;  %v2185_v19 = vsel %vm2133_vm3, %v20373_v17, -inf  ;;  %v2158_v5 = vsel %vm2133_vm3, %v20375_v23, -inf }
 0x2c5   : > { %v2182_v53 = vsel %vm2133_vm3, %v20379_v29, -inf }
 0x2c8   : > { %2186 = vmax.xlane.f32.xlu0 %v2185_v19 }
 0x2ca   : > { %v20383_v46 = vpop.f32.mrb[10].mxu1 }
 0x2cb   : > { %v20385_v38 = vpop.f32.mrb[34].mxu0  ;;  %v20387_v62 = vpop.f32.mrb[11].mxu1  ;;  %v2167_v34 = vsel %vm2133_vm3, %v20383_v46, -inf }
 0x2cc   : > { %v20393_v20 = vpop.f32.mrb[35].mxu0  ;;  %2159 = vmax.xlane.f32.xlu0 %v2158_v5  ;;  %2168 = vmax.xlane.f32.xlu1 %v2167_v34  ;;  %v2164_v19 = vsel %vm2133_vm3, %v20387_v62, -inf  ;;  %v2197_v44 = vsel %vm2133_vm3, %v20385_v38, -inf  ;;  %v20411_v5 = vpop.permute.xlu1 %18350 }
 0x2cd   : > { %v2194_v34 = vsel %vm2133_vm3, %v20393_v20, -inf }
 0x2d0   : > { %2183 = vmax.xlane.f32.xlu0 %v2182_v53  ;;  %2165 = vmax.xlane.f32.xlu1 %v2164_v19  ;;  %v20429_v58 = vpop.permute.xlu1 %18355 }
 0x2d2   : > { %v20399_v45 = vpop.f32.mrb[12].mxu1 }
 0x2d3   : > { %v20401_v1 = vpop.f32.mrb[36].mxu0  ;;  %v20403_v55 = vpop.f32.mrb[13].mxu1  ;;  %v2173_v33 = vsel %vm2133_vm3, %v20399_v45, -inf }
 0x2d4   : > { %v20407_v49 = vpop.f32.mrb[37].mxu0  ;;  %2198 = vmax.xlane.f32.xlu0 %v2197_v44  ;;  %v2209_v44 = vsel %vm2133_vm3, %v20401_v1, -inf  ;;  %v2170_v59 = vsel %vm2133_vm3, %v20403_v55, -inf }
 0x2d8   : > { %2195 = vmax.xlane.f32.xlu0 %v2194_v34 }
 0x2da   : > { %v20413_v53 = vpop.f32.mrb[14].mxu1 }
 0x2db   : > { %v20415_v19 = vpop.f32.mrb[38].mxu0  ;;  %v20417_v48 = vpop.f32.mrb[15].mxu1  ;;  %v2179_v18 = vsel %vm2133_vm3, %v20413_v53, -inf }
 0x2dc   : > { %v20423_v2 = vpop.f32.mrb[39].mxu0  ;;  %2174 = vmax.xlane.f32.xlu0 %v2173_v33  ;;  %2180 = vmax.xlane.f32.xlu1 %v2179_v18  ;;  %v2176_v34 = vsel %vm2133_vm3, %v20417_v48, -inf  ;;  %v20439_v33 = vpop.permute.xlu1 %18360  ;;  %v2221_v50 = vsel %vm2133_vm3, %v20415_v19, -inf }
 0x2dd   : > { %v2218_v18 = vsel %vm2133_vm3, %v20423_v2, -inf  ;;  %23403 = vst [vmem:[#allocation59_spill] sm:$0xff] %v20439_v33 }
 0x2e0   : > { %2210 = vmax.xlane.f32.xlu0 %v2209_v44  ;;  %2177 = vmax.xlane.f32.xlu1 %v2176_v34  ;;  %v2206_v44 = vsel %vm2133_vm3, %v20407_v49, -inf }
 0x2e2   : > { %v20431_v28 = vpop.f32.mrb[16].mxu1 }
 0x2e3   : > { %v20433_v6 = vpop.f32.mrb[17].mxu1  ;;  %v2191_v34 = vsel %vm2133_vm3, %v20431_v28, -inf }
 0x2e4   : > { %2171 = vmax.xlane.f32.xlu0 %v2170_v59  ;;  %2219 = vmax.xlane.f32.xlu1 %v2218_v18  ;;  %v2188_v59 = vsel %vm2133_vm3, %v20433_v6, -inf  ;;  %v20453_v18 = vpop.permute.xlu1 %18370 }
 0x2e5   : > { %23404 = vst [vmem:[#allocation60_spill] sm:$0xff] %v20453_v18 }
 0x2e8   : > { %2207 = vmax.xlane.f32.xlu0 %v2206_v44  ;;  %2192 = vmax.xlane.f32.xlu1 %v2191_v34  ;;  %v20457_v44 = vpop.permute.xlu0 %18335  ;;  %v20461_v54 = vpop.permute.xlu1 %18375 }
 0x2e9   : > { %23405 = vst [vmem:[#allocation61_spill] sm:$0xff] %v20461_v54 }
 0x2ea   : > { %v20445_v60 = vpop.f32.mrb[18].mxu1 }
 0x2eb   : > { %v20447_v61 = vpop.f32.mrb[19].mxu1  ;;  %v2203_v30 = vsel %vm2133_vm3, %v20445_v60, -inf }
 0x2ec   : > { %2222 = vmax.xlane.f32.xlu0 %v2221_v50  ;;  %2189 = vmax.xlane.f32.xlu1 %v2188_v59  ;;  %v2200_v7 = vsel %vm2133_vm3, %v20447_v61, -inf  ;;  %v20473_v18 = vpop.permute.xlu1 %18380 }
 0x2ed   : > { %23406 = vst [vmem:[#allocation62_spill] sm:$0xff] %v20473_v18 }
 0x2f0   : > { %2204 = vmax.xlane.f32.xlu1 %v2203_v30  ;;  %v20471_v30 = vpop.permute.xlu0 %18340  ;;  %v20485_v57 = vpop.permute.xlu1 %18385 }
 0x2f1   : > { %23407 = vst [vmem:[#allocation63_spill] sm:$0xff] %v20485_v57 }
 0x2f2   : > { %v20459_v34 = vpop.f32.mrb[20].mxu1 }
 0x2f3   : > { %v20463_v37 = vpop.f32.mrb[21].mxu1  ;;  %v2215_v50 = vsel %vm2133_vm3, %v20459_v34, -inf }
 0x2f4   : > { %2201 = vmax.xlane.f32.xlu1 %v2200_v7  ;;  %2216 = vmax.xlane.f32.xlu0 %v2215_v50  ;;  %v2212_v59 = vsel %vm2133_vm3, %v20463_v37, -inf  ;;  %v20483_v50 = vpop.permute.xlu0 %18345 }
 0x2f8   : > { %2213 = vmax.xlane.f32.xlu1 %v2212_v59  ;;  %v20487_v0 = vpop.permute.xlu0 %18365  ;;  %v20489_v59 = vpop.permute.xlu1 %18395 }
 0x2f9   : > { %23408 = vst [vmem:[#allocation64_spill] sm:$0xff] %v20487_v0  ;;  %23409 = vst [vmem:[#allocation65_spill] sm:$0xff] %v20489_v59 }
 0x2fa   : > { %v20475_v21 = vpop.f32.mrb[22].mxu1 }
 0x2fb   : > { %v20477_v54 = vpop.f32.mrb[23].mxu1  ;;  %v2227_v35 = vsel %vm2133_vm3, %v20475_v21, -inf }
 0x2fc   : > { %2228 = vmax.xlane.f32.xlu0 %v2227_v35  ;;  %v2224_v7 = vsel %vm2133_vm3, %v20477_v54, -inf  ;;  %v20491_v18 = vpop.permute.xlu0 %18390  ;;  %v20493_v27 = vpop.permute.xlu1 %3878 }
 0x2fd   : > { %2225 = vmax.xlane.f32.xlu1 %v2224_v7  ;;  %23410 = vst [vmem:[#allocation66_spill] sm:$0xff] %v20491_v18  ;;  %23411 = vst [vmem:[#allocation67_spill] sm:$0xff] %v20493_v27 }
 0x300   : > { %v20495_v8 = vpop.permute.xlu0 %18400  ;;  %v20497_v26 = vpop.permute.xlu1 %18405 }
 0x301   : > { %23412 = vst [vmem:[#allocation68_spill] sm:$0xff] %v20495_v8  ;;  %23413 = vst [vmem:[#allocation69_spill] sm:$0xff] %v20497_v26 }
 0x304   : > { %v20499_v35 = vpop.permute.xlu0 %3880  ;;  %v20501_v39 = vpop.permute.xlu1 %3971 }
 0x305   : > { %23414 = vst [vmem:[#allocation70_spill] sm:$0xff] %v20499_v35  ;;  %23415 = vst [vmem:[#allocation71_spill] sm:$0xff] %v20501_v39 }
 0x308   : > { %v20503_v7 = vpop.permute.xlu0 %3969  ;;  %v20505_v33 = vpop.permute.xlu1 %4060 }
 0x309   : > { %23416 = vst [vmem:[#allocation72_spill] sm:$0xff] %v20503_v7  ;;  %23417 = vst [vmem:[#allocation73_spill] sm:$0xff] %v20505_v33 }
 0x30c   : > { %v20507_v57 = vpop.permute.xlu0 %18410  ;;  %v20509_v0 = vpop.permute.xlu1 %18415 }
 0x30d   : > { %23418 = vst [vmem:[#allocation74_spill] sm:$0xff] %v20507_v57  ;;  %23419 = vst [vmem:[#allocation75_spill] sm:$0xff] %v20509_v0 }
 0x310   : > { %v20511_v59 = vpop.permute.xlu0 %4062  ;;  %v20513_v18 = vpop.permute.xlu1 %4153 }
 0x311   : > { %23420 = vst [vmem:[#allocation76_spill] sm:$0xff] %v20511_v59  ;;  %23421 = vst [vmem:[#allocation77_spill] sm:$0xff] %v20513_v18 }
 0x314   : > { %v20515_v27 = vpop.permute.xlu1 %18420  ;;  %v20517_v8 = vpop.permute.xlu0 %4151 }
 0x315   : > { %23422 = vst [vmem:[#allocation78_spill] sm:$0xff] %v20515_v27  ;;  %23423 = vst [vmem:[#allocation79_spill] sm:$0xff] %v20517_v8 }
 0x331   : > { %v2139_v26 = vpop.xlane.xlu1 %2138 }
 0x332   : > { %v2231_v35 = vsub.f32 %v20339_v4, %v2139_v26  ;;  %v2136_v39 = vpop.xlane.xlu0 %2135 }
 0x333   : > { %v2230_v7 = vsub.f32 %v20341_v25, %v2136_v39 }
 0x334   : > { %v2264_v56 = vmul.f32 1.442695, %v2231_v35 }
 0x335   : > { %v2262_v33 = vmul.f32 1.442695, %v2230_v7 }
 0x336   : > { %18874 = vpow2.f32 %v2264_v56 }
 0x337   : > { %18876 = vpow2.f32 %v2262_v33 }
 0x339   : > { %v2145_v57 = vpop.xlane.xlu1 %2144 }
 0x33a   : > { %v2233_v0 = vsub.f32 %v20347_v63, %v2145_v57  ;;  %v2142_v59 = vpop.xlane.xlu0 %2141 }
 0x33b   : > { %v2232_v18 = vsub.f32 %v20349_v14, %v2142_v59 }
 0x33c   : > { %v2268_v24 = vmul.f32 1.442695, %v2233_v0 }
 0x33d   : > { %v2266_v27 = vmul.f32 1.442695, %v2232_v18 }
 0x33e   : > { %18878 = vpow2.f32 %v2268_v24 }
 0x33f   : > { %18880 = vpow2.f32 %v2266_v27 }
 0x340   : > { %v20523_v8 = vpop.eup %18874 }
 0x341   : > { %v20525_v26 = vpop.eup %18876  ;;  %v2151_v4 = vpop.xlane.xlu0 %2150  ;;  %v2329_v39 = vsel %vm2133_vm3, %v20523_v8, 0.0 }
 0x342   : > { %v2235_v56 = vsub.f32 %v20355_v9, %v2151_v4  ;;  %2330 = vadd.xlane.f32.xlu0 %v2329_v39  ;;  %v2326_v57 = vsel %vm2133_vm3, %v20525_v26, 0.0 }
 0x343   : > { %2327 = vadd.xlane.f32.xlu1 %v2326_v57 }
 0x344   : > { %v2272_v25 = vmul.f32 1.442695, %v2235_v56 }
 0x345   : > { %v2148_v0 = vpop.xlane.xlu0 %2147 }
 0x346   : > { %18882 = vpow2.f32 %v2272_v25  ;;  %v2234_v24 = vsub.f32 %v20357_v40, %v2148_v0 }
 0x348   : > { %v20533_v63 = vpop.eup %18878  ;;  %v2270_v27 = vmul.f32 1.442695, %v2234_v24 }
 0x349   : > { %v2157_v14 = vpop.xlane.xlu1 %2156  ;;  %v2335_v33 = vsel %vm2133_vm3, %v20533_v63, 0.0  ;;  %v20537_v18 = vpop.eup %18880 }
 0x34a   : > { %18884 = vpow2.f32 %v2270_v27  ;;  %v2237_v9 = vsub.f32 %v20363_v41, %v2157_v14  ;;  %2336 = vadd.xlane.f32.xlu1 %v2335_v33  ;;  %v2332_v7 = vsel %vm2133_vm3, %v20537_v18, 0.0 }
 0x34c   : > { %v2276_v59 = vmul.f32 1.442695, %v2237_v9 }
 0x34d   : > { %v2154_v35 = vpop.xlane.xlu1 %2153 }
 0x34e   : > { %18886 = vpow2.f32 %v2276_v59  ;;  %v2236_v40 = vsub.f32 %v20365_v3, %v2154_v35  ;;  %2333 = vadd.xlane.f32.xlu1 %v2332_v7 }
 0x350   : > { %v20543_v4 = vpop.eup %18882  ;;  %v2274_v39 = vmul.f32 1.442695, %v2236_v40 }
 0x351   : > { %v2163_v56 = vpop.xlane.xlu0 %2162  ;;  %v2341_v57 = vsel %vm2133_vm3, %v20543_v4, 0.0 }
 0x352   : > { %18888 = vpow2.f32 %v2274_v39  ;;  %v2239_v41 = vsub.f32 %v20371_v10, %v2163_v56  ;;  %2342 = vadd.xlane.f32.xlu0 %v2341_v57 }
 0x354   : > { %v20548_v25 = vpop.eup %18884  ;;  %v2280_v0 = vmul.f32 1.442695, %v2239_v41 }
 0x355   : > { %v2187_v24 = vpop.xlane.xlu0 %2186  ;;  %v2338_v27 = vsel %vm2133_vm3, %v20548_v25, 0.0 }
 0x356   : > { %18890 = vpow2.f32 %v2280_v0  ;;  %v2247_v3 = vsub.f32 %v20373_v17, %v2187_v24  ;;  %2339 = vadd.xlane.f32.xlu0 %v2338_v27 }
 0x358   : > { %v20553_v14 = vpop.eup %18886  ;;  %v2296_v33 = vmul.f32 1.442695, %v2247_v3 }
 0x359   : > { %v2160_v9 = vpop.xlane.xlu0 %2159  ;;  %v2169_v59 = vpop.xlane.xlu1 %2168  ;;  %v2347_v10 = vsel %vm2133_vm3, %v20553_v14, 0.0 }
 0x35a   : > { %18892 = vpow2.f32 %v2296_v33  ;;  %v2238_v35 = vsub.f32 %v20375_v23, %v2160_v9  ;;  %v2241_v7 = vsub.f32 %v20383_v46, %v2169_v59  ;;  %2348 = vadd.xlane.f32.xlu1 %v2347_v10 }
 0x35c   : > { %v20559_v40 = vpop.eup %18888  ;;  %v2278_v39 = vmul.f32 1.442695, %v2238_v35  ;;  %v2284_v56 = vmul.f32 1.442695, %v2241_v7 }
 0x35d   : > { %v2184_v17 = vpop.xlane.xlu0 %2183  ;;  %v2166_v57 = vpop.xlane.xlu1 %2165  ;;  %v2344_v41 = vsel %vm2133_vm3, %v20559_v40, 0.0 }
 0x35e   : > { %18894 = vpow2.f32 %v2278_v39  ;;  %v2246_v0 = vsub.f32 %v20379_v29, %v2184_v17  ;;  %v2240_v24 = vsub.f32 %v20387_v62, %v2166_v57  ;;  %2345 = vadd.xlane.f32.xlu1 %v2344_v41 }
 0x35f   : > { %18896 = vpow2.f32 %v2284_v56 }
 0x360   : > { %v20565_v23 = vpop.eup %18890  ;;  %v2294_v46 = vmul.f32 1.442695, %v2246_v0  ;;  %v2282_v27 = vmul.f32 1.442695, %v2240_v24 }
 0x361   : > { %v2199_v3 = vpop.xlane.xlu0 %2198  ;;  %v2353_v33 = vsel %vm2133_vm3, %v20565_v23, 0.0 }
 0x362   : > { %18898 = vpow2.f32 %v2294_v46  ;;  %v2251_v9 = vsub.f32 %v20385_v38, %v2199_v3  ;;  %2354 = vadd.xlane.f32.xlu0 %v2353_v33 }
 0x363   : > { %18900 = vpow2.f32 %v2282_v27 }
 0x364   : > { %v20570_v59 = vpop.eup %18892  ;;  %v2304_v29 = vmul.f32 1.442695, %v2251_v9 }
 0x365   : > { %v2196_v10 = vpop.xlane.xlu0 %2195  ;;  %v2377_v62 = vsel %vm2133_vm3, %v20570_v59, 0.0 }
 0x366   : > { %18902 = vpow2.f32 %v2304_v29  ;;  %v2250_v35 = vsub.f32 %v20393_v20, %v2196_v10  ;;  %2378 = vadd.xlane.f32.xlu0 %v2377_v62 }
 0x368   : > { %v20575_v7 = vpop.eup %18894  ;;  %v2302_v39 = vmul.f32 1.442695, %v2250_v35 }
 0x369   : > { %v20577_v56 = vpop.eup %18896  ;;  %v2175_v17 = vpop.xlane.xlu0 %2174  ;;  %v2350_v57 = vsel %vm2133_vm3, %v20575_v7, 0.0 }
 0x36a   : > { %v2181_v38 = vpop.xlane.xlu1 %2180  ;;  %18904 = vpow2.f32 %v2302_v39  ;;  %v2243_v41 = vsub.f32 %v20399_v45, %v2175_v17  ;;  %2351 = vadd.xlane.f32.xlu0 %v2350_v57  ;;  %v2359_v20 = vsel %vm2133_vm3, %v20577_v56, 0.0 }
 0x36b   : > { %v2245_v0 = vsub.f32 %v20413_v53, %v2181_v38  ;;  %2360 = vadd.xlane.f32.xlu1 %v2359_v20 }
 0x36c   : > { %v20585_v24 = vpop.eup %18898  ;;  %v2288_v46 = vmul.f32 1.442695, %v2243_v41 }
 0x36d   : > { %v2292_v27 = vmul.f32 1.442695, %v2245_v0  ;;  %v20587_v3 = vpop.eup %18900  ;;  %v2211_v33 = vpop.xlane.xlu0 %2210  ;;  %v2374_v29 = vsel %vm2133_vm3, %v20585_v24, 0.0 }
 0x36e   : > { %v2178_v9 = vpop.xlane.xlu1 %2177  ;;  %18906 = vpow2.f32 %v2288_v46  ;;  %v2255_v45 = vsub.f32 %v20401_v1, %v2211_v33  ;;  %2375 = vadd.xlane.f32.xlu0 %v2374_v29  ;;  %v2356_v10 = vsel %vm2133_vm3, %v20587_v3, 0.0 }
 0x36f   : > { %v2244_v53 = vsub.f32 %v20417_v48, %v2178_v9  ;;  %18908 = vpow2.f32 %v2292_v27  ;;  %2357 = vadd.xlane.f32.xlu1 %v2356_v10 }
 0x370   : > { %v20595_v62 = vpop.eup %18902  ;;  %v2312_v35 = vmul.f32 1.442695, %v2255_v45 }
 0x371   : > { %v2290_v39 = vmul.f32 1.442695, %v2244_v53  ;;  %v2172_v17 = vpop.xlane.xlu0 %2171  ;;  %v2389_v57 = vsel %vm2133_vm3, %v20595_v62, 0.0 }
 0x372   : > { %v2220_v38 = vpop.xlane.xlu1 %2219  ;;  %18910 = vpow2.f32 %v2312_v35  ;;  %v2242_v1 = vsub.f32 %v20403_v55, %v2172_v17  ;;  %2390 = vadd.xlane.f32.xlu0 %v2389_v57 }
 0x373   : > { %v2258_v48 = vsub.f32 %v20423_v2, %v2220_v38  ;;  %18912 = vpow2.f32 %v2290_v39 }
 0x374   : > { %v20601_v41 = vpop.eup %18904  ;;  %v2286_v0 = vmul.f32 1.442695, %v2242_v1 }
 0x375   : > { %v2318_v20 = vmul.f32 1.442695, %v2258_v48  ;;  %v2208_v46 = vpop.xlane.xlu0 %2207  ;;  %v2386_v33 = vsel %vm2133_vm3, %v20601_v41, 0.0 }
 0x376   : > { %v2193_v27 = vpop.xlane.xlu1 %2192  ;;  %18914 = vpow2.f32 %v2286_v0  ;;  %v2254_v9 = vsub.f32 %v20407_v49, %v2208_v46  ;;  %2387 = vadd.xlane.f32.xlu0 %v2386_v33 }
 0x377   : > { %v2249_v29 = vsub.f32 %v20431_v28, %v2193_v27  ;;  %18916 = vpow2.f32 %v2318_v20 }
 0x378   : > { %v20607_v55 = vpop.eup %18906  ;;  %v2310_v2 = vmul.f32 1.442695, %v2254_v9 }
 0x379   : > { %v2300_v45 = vmul.f32 1.442695, %v2249_v29  ;;  %v20609_v53 = vpop.eup %18908  ;;  %v2223_v10 = vpop.xlane.xlu0 %2222  ;;  %v2365_v39 = vsel %vm2133_vm3, %v20607_v55, 0.0 }
 0x37a   : > { %v2190_v35 = vpop.xlane.xlu1 %2189  ;;  %18918 = vpow2.f32 %v2310_v2  ;;  %v2259_v17 = vsub.f32 %v20415_v19, %v2223_v10  ;;  %2366 = vadd.xlane.f32.xlu0 %v2365_v39  ;;  %v2371_v28 = vsel %vm2133_vm3, %v20609_v53, 0.0 }
 0x37b   : > { %v2248_v49 = vsub.f32 %v20433_v6, %v2190_v35  ;;  %18920 = vpow2.f32 %v2300_v45  ;;  %2372 = vadd.xlane.f32.xlu1 %v2371_v28 }
 0x37c   : > { %v20617_v38 = vpop.eup %18910  ;;  %v2320_v57 = vmul.f32 1.442695, %v2259_v17 }
 0x37d   : > { %v2298_v1 = vmul.f32 1.442695, %v2248_v49  ;;  %v20619_v48 = vpop.eup %18912  ;;  %v2401_v20 = vsel %vm2133_vm3, %v20617_v38, 0.0 }
 0x37e   : > { %v2205_v0 = vpop.xlane.xlu1 %2204  ;;  %18922 = vpow2.f32 %v2320_v57  ;;  %2402 = vadd.xlane.f32.xlu0 %v2401_v20  ;;  %v2368_v6 = vsel %vm2133_vm3, %v20619_v48, 0.0 }
 0x37f   : > { %v2253_v19 = vsub.f32 %v20445_v60, %v2205_v0  ;;  %18924 = vpow2.f32 %v2298_v1  ;;  %2369 = vadd.xlane.f32.xlu1 %v2368_v6 }
 0x380   : > { %v20626_v46 = vpop.eup %18914 }
 0x381   : > { %v2308_v27 = vmul.f32 1.442695, %v2253_v19  ;;  %v20628_v33 = vpop.eup %18916  ;;  %v2217_v29 = vpop.xlane.xlu0 %2216  ;;  %v2362_v2 = vsel %vm2133_vm3, %v20626_v46, 0.0 }
 0x382   : > { %v2202_v9 = vpop.xlane.xlu1 %2201  ;;  %v2257_v60 = vsub.f32 %v20459_v34, %v2217_v29  ;;  %2363 = vadd.xlane.f32.xlu0 %v2362_v2  ;;  %v2410_v10 = vsel %vm2133_vm3, %v20628_v33, 0.0 }
 0x383   : > { %18926 = vpow2.f32 %v2308_v27  ;;  %v2252_v45 = vsub.f32 %v20447_v61, %v2202_v9  ;;  %2411 = vadd.xlane.f32.xlu1 %v2410_v10 }
 0x384   : > { %v20636_v35 = vpop.eup %18918  ;;  %v2316_v17 = vmul.f32 1.442695, %v2257_v60 }
 0x385   : > { %v2306_v39 = vmul.f32 1.442695, %v2252_v45  ;;  %v20638_v49 = vpop.eup %18920  ;;  %v2398_v28 = vsel %vm2133_vm3, %v20636_v35, 0.0 }
 0x386   : > { %2399 = vadd.xlane.f32.xlu0 %v2398_v28  ;;  %v2383_v61 = vsel %vm2133_vm3, %v20638_v49, 0.0  ;;  %v2214_v2 = vpop.xlane.xlu1 %2213 }
 0x387   : > { %18928 = vpow2.f32 %v2306_v39  ;;  %2384 = vadd.xlane.f32.xlu1 %v2383_v61  ;;  %v2256_v45 = vsub.f32 %v20463_v37, %v2214_v2 }
 0x388   : > { %v20644_v34 = vpop.eup %18922  ;;  %18930 = vpow2.f32 %v2316_v17 }
 0x389   : > { %v20646_v57 = vpop.eup %18924  ;;  %v2413_v1 = vsel %vm2133_vm3, %v20644_v34, 0.0  ;;  %v2314_v60 = vmul.f32 1.442695, %v2256_v45  ;;  %v2229_v10 = vpop.xlane.xlu0 %2228  ;;  %v18338_v45 = vunpack.i.h.bf16 %v20457_v44 }
 0x38a   : > { %2414 = vadd.xlane.f32.xlu0 %v2413_v1  ;;  %v2380_v0 = vsel %vm2133_vm3, %v20646_v57, 0.0  ;;  %v2261_v39 = vsub.f32 %v20475_v21, %v2229_v10 }
 0x38b   : > { %2381 = vadd.xlane.f32.xlu1 %v2380_v0  ;;  %18932 = vpow2.f32 %v2314_v60  ;;  %v2226_v0 = vpop.xlane.xlu1 %2225  ;;  %v18337_v60 = vunpack.i.l.bf16 %v20457_v44 }
 0x38c   : > { %v2324_v17 = vmul.f32 1.442695, %v2261_v39 }
 0x38d   : > { %v20652_v20 = vpop.eup %18926 }
 0x38e   : > { %v2395_v19 = vsel %vm2133_vm3, %v20652_v20, 0.0  ;;  %18934 = vpow2.f32 %v2324_v17 }
 0x38f   : > { %2396 = vadd.xlane.f32.xlu0 %v2395_v19 }
 0x391   : > { %v20656_v6 = vpop.eup %18928 }
 0x392   : > { %v2392_v27 = vsel %vm2133_vm3, %v20656_v6, 0.0  ;;  %v20660_v9 = vpop.eup %18930 }
 0x393   : > { %2393 = vadd.xlane.f32.xlu0 %v2392_v27  ;;  %v2407_v29 = vsel %vm2133_vm3, %v20660_v9, 0.0 }
 0x395   : > { %v20670_v28 = vpop.eup %18932 }
 0x396   : > { %v2404_v61 = vsel %vm2133_vm3, %v20670_v28, 0.0 }
 0x397   : > { %2408 = vadd.xlane.f32.xlu0 %v2407_v29 }
 0x398   : > { %v20674_v1 = vpop.eup %18934 }
 0x399   : > { %v2419_v37 = vsel %vm2133_vm3, %v20674_v1, 0.0 }
 0x39c   : > { %4242 = vrot.lane.b32.xlu1 %v20171_v13, %s19552_s28 }
 0x3ad   : > { %18425 = vrot.lane.b32.xlu0 %v19940_v11, %s19551_s10 }
 0x3c0   : > { %2405 = vadd.xlane.f32.xlu1 %v2404_v61  ;;  %v2260_v61 = vsub.f32 %v20477_v54, %v2226_v0  ;;  %v18343_v54 = vunpack.i.h.bf16 %v20471_v30  ;;  %v18342_v0 = vunpack.i.l.bf16 %v20471_v30 }
 0x3c2   : > { %v2322_v44 = vmul.f32 1.442695, %v2260_v61 }
 0x3cc   : > { %2420 = vadd.xlane.f32.xlu0 %v2419_v37 }
 0x3cf   : > { %v2331_v19 = vpop.xlane.xlu0 %2330 }
 0x3d0   : > { %18936 = vrcp.f32 %v2331_v19  ;;  %v2328_v27 = vpop.xlane.xlu1 %2327  ;;  %v17526_v19 = vpack.c.bf16 %v18338_v45, %v18337_v60  ;;  %v18347_v60 = vunpack.i.l.bf16 %v20483_v50 }
 0x3d1   : > { %18430 = vrot.lane.b32.xlu1 %v19952_v16, %s19551_s10  ;;  %18938 = vrcp.f32 %v2328_v27 }
 0x3d7   : > { %v2337_v21 = vpop.xlane.xlu1 %2336 }
 0x3d8   : > { %18940 = vrcp.f32 %v2337_v21 }
 0x3da   : > { %v18937_v29 = vpop.eup %18936 }
 0x3db   : > { %v18939_v2 = vpop.eup %18938  ;;  %v2334_v10 = vpop.xlane.xlu1 %2333  ;;  %v2455_v17 = vmul.f32 %v18937_v29, %v20523_v8 }
 0x3dc   : > { %18942 = vrcp.f32 %v2334_v10  ;;  %v2454_v39 = vmul.f32 %v18939_v2, %v20525_v26  ;;  %v17530_v2 = vpack.c.bf16 %v18343_v54, %v18342_v0 }
 0x3de   : > { %16426 = vmatprep.mubr.msk.f32.mxu0 %vm2133_vm3, %v2454_v39 }
 0x3df   : > { %v2343_v37 = vpop.xlane.xlu0 %2342  ;;  %16427 = vmatmul.mubr.msk.f32.vlgmr.msra.gmra.mrb[40].mxu0 %vm2133_vm3, %v2455_v17 }
 0x3e0   : > { %17521 = vmatpush3.bf16.msra.mxu0 %v20284_v12  ;;  %18944 = vrcp.f32 %v2343_v37 }
 0x3e1   : > { %17527 = vmatprep.subr.bf16.mxu0 %v17526_v19 }
 0x3e2   : > { %4244 = vrot.lane.b32.xlu0 %v20186_v43, %s19552_s28  ;;  %v18941_v26 = vpop.eup %18940 }
 0x3e3   : > { %v2340_v27 = vpop.xlane.xlu0 %2339  ;;  %v2457_v29 = vmul.f32 %v18941_v26, %v20533_v63  ;;  %v18348_v63 = vunpack.i.h.bf16 %v20483_v50 }
 0x3e4   : > { %18946 = vrcp.f32 %v2340_v27  ;;  %v18352_v27 = vunpack.i.l.bf16 %v20411_v5 }
 0x3e5   : > { %18948 = vpow2.f32 %v2322_v44  ;;  %v18353_v44 = vunpack.i.h.bf16 %v20411_v5 }
 0x3e6   : > { %4333 = vrot.lane.b32.xlu0 %v20196_v52, %s19552_s28  ;;  %v18943_v8 = vpop.eup %18942 }
 0x3e7   : > { %v2349_v21 = vpop.xlane.xlu1 %2348  ;;  %v2456_v12 = vmul.f32 %v18943_v8, %v20537_v18  ;;  %v17538_v0 = vpack.c.bf16 %v18353_v44, %v18352_v27  ;;  %v23427_v44 = vld [vmem:[#allocation53_spill] sm:$0xff] }
 0x3e8   : > { %18950 = vrcp.f32 %v2349_v21 }
 0x3e9   : > { %16433 = vmatprep.mubr.msk.f32.mxu1 %vm2133_vm3, %v2456_v12 }
 0x3ea   : > { %18435 = vrot.lane.b32.xlu0 %v19963_v22, %s19551_s10  ;;  %16434 = vmatmul.mubr.msk.f32.vlgmr.msra.gmra.mrb[24].mxu1 %vm2133_vm3, %v2457_v29  ;;  %v18945_v30 = vpop.eup %18944  ;;  %v18358_v29 = vunpack.i.h.bf16 %v20429_v58 }
 0x3eb   : > { %17525 = vmatpush3.bf16.msra.mxu1 %v20336_v15  ;;  %v2346_v45 = vpop.xlane.xlu1 %2345  ;;  %v2459_v17 = vmul.f32 %v18945_v30, %v20543_v4  ;;  %v17534_v15 = vpack.c.bf16 %v18348_v63, %v18347_v60  ;;  %v23424_v63 = vld [vmem:[#allocation42_spill] sm:$0xff] }
 0x3ec   : > { %17531 = vmatprep.subr.bf16.mxu1 %v17530_v2  ;;  %18952 = vrcp.f32 %v2346_v45  ;;  %v18357_v45 = vunpack.i.l.bf16 %v20429_v58  ;;  %v23426_v58 = vld [vmem:[#allocation59_spill] sm:$0xff] }
 0x3ee   : > { %4426 = vrot.lane.b32.xlu0 %v20242_v31, %s19552_s28  ;;  %v18947_v18 = vpop.eup %18946 }
 0x3ef   : > { %v2355_v10 = vpop.xlane.xlu0 %2354  ;;  %v2458_v39 = vmul.f32 %v18947_v18, %v20548_v25  ;;  %v20707_v61 = vpop.eup %18948 }
 0x3f0   : > { %v2416_v50 = vsel %vm2133_vm3, %v20707_v61, 0.0  ;;  %18954 = vrcp.f32 %v2355_v10  ;;  %v23425_v10 = vld [vmem:[#allocation41_spill] sm:$0xff] }
 0x3f1   : > { %16440 = vmatprep.mubr.msk.f32.mxu0 %vm2133_vm3, %v2458_v39  ;;  %v20741_v39 = vpack.c.bf16 %v18358_v29, %v18357_v45  ;;  %v23433_v45 = vld [vmem:[#allocation55_spill] sm:$0xff] }
 0x3f2   : > { %4515 = vrot.lane.b32.xlu0 %v20252_v51, %s19552_s28  ;;  %16441 = vmatmul.mubr.msk.f32.vlgmr.msra.gmra.mrb[42].mxu0 %vm2133_vm3, %v2459_v17  ;;  %v18951_v25 = vpop.eup %18950 }
 0x3f3   : > { %17529 = vmatpush3.bf16.msra.mxu0 %v17526_v19  ;;  %v20713_v37 = vpop.xlane.xlu0 %2378  ;;  %v2461_v54 = vmul.f32 %v18951_v25, %v20553_v14 }
 0x3f4   : > { %17535 = vmatprep.subr.bf16.mxu0 %v17534_v15 }
 0x3f5   : > { %2417 = vadd.xlane.f32.xlu1 %v2416_v50  ;;  %v18363_v50 = vunpack.i.h.bf16 %v23426_v58 }
 0x3f6   : > { %18445 = vrot.lane.b32.xlu0 %v19989_v32, %s19551_s10  ;;  %v18953_v4 = vpop.eup %18952 }
 0x3f7   : > { %v2352_v26 = vpop.xlane.xlu0 %2351  ;;  %v2460_v19 = vmul.f32 %v18953_v4, %v20559_v40 }
 0x3f8   : > { %18956 = vrcp.f32 %v2352_v26  ;;  %v2361_v8 = vpop.xlane.xlu1 %2360  ;;  %v23428_v26 = vld [vmem:[#allocation43_spill] sm:$0xff] }
 0x3f9   : > { %16447 = vmatprep.mubr.msk.f32.mxu1 %vm2133_vm3, %v2460_v19  ;;  %18958 = vrcp.f32 %v2361_v8 }
 0x3fa   : > { %4608 = vrot.lane.b32.xlu0 %v20189_v36, %s19552_s28  ;;  %16448 = vmatmul.mubr.msk.f32.vlgmr.msra.gmra.mrb[26].mxu1 %vm2133_vm3, %v2461_v54  ;;  %v18955_v12 = vpop.eup %18954  ;;  %v23430_v54 = vld [vmem:[#allocation22_spill] sm:$0xff] }
 0x3fb   : > { %17533 = vmatpush3.bf16.msra.mxu1 %v17530_v2  ;;  %v2376_v21 = vpop.xlane.xlu0 %2375  ;;  %v2463_v18 = vmul.f32 %v18955_v12, %v20565_v23  ;;  %v23431_v12 = vld [vmem:[#allocation46_spill] sm:$0xff] }
 0x3fc   : > { %17539 = vmatprep.subr.bf16.mxu1 %v17538_v0  ;;  %v2358_v5 = vpop.xlane.xlu1 %2357 }
 0x3fd   : > { %18960 = vrcp.f32 %v2358_v5 }
 0x3fe   : > { %4697 = vrot.lane.b32.xlu0 %v20278_v42, %s19552_s28 }
 0x3ff   : > { %v2391_v40 = vpop.xlane.xlu0 %2390 }
 0x402   : > { %18455 = vrot.lane.b32.xlu0 %v20013_v47, %s19551_s10  ;;  %v18957_v14 = vpop.eup %18956 }
 0x403   : > { %v2388_v30 = vpop.xlane.xlu0 %2387  ;;  %v2462_v2 = vmul.f32 %v18957_v14, %v20575_v7  ;;  %v18959_v60 = vpop.eup %18958  ;;  %v18362_v7 = vunpack.i.l.bf16 %v23426_v58  ;;  %v23432_v14 = vld [vmem:[#allocation49_spill] sm:$0xff] }
 0x404   : > { %v2465_v27 = vmul.f32 %v18959_v60, %v20577_v56 }
 0x405   : > { %16454 = vmatprep.mubr.msk.f32.mxu0 %vm2133_vm3, %v2462_v2 }
 0x406   : > { %4790 = vrot.lane.b32.xlu0 %v23424_v63, %s19552_s28  ;;  %4335 = vrot.lane.b32.xlu1 %v23425_v10, %s19552_s28 }
 0x407   : > { %16455 = vmatmul.mubr.msk.f32.vlgmr.msra.gmra.mrb[44].mxu0 %vm2133_vm3, %v2463_v18  ;;  %v18961_v17 = vpop.eup %18960  ;;  %v2367_v23 = vpop.xlane.xlu0 %2366  ;;  %v23434_v18 = vld [vmem:[#allocation20_spill] sm:$0xff] }
 0x408   : > { %17537 = vmatpush3.bf16.msra.mxu0 %v17534_v15  ;;  %v2373_v25 = vpop.xlane.xlu1 %2372  ;;  %v2464_v4 = vmul.f32 %v18961_v17, %v20587_v3  ;;  %v17546_v15 = vpack.c.bf16 %v18363_v50, %v18362_v7  ;;  %v23429_v3 = vld [vmem:[#allocation27_spill] sm:$0xff] }
 0x409   : > { %17543 = vmatprep.subr.bf16.mxu0 %v20741_v39  ;;  %18962 = vrcp.f32 %v2373_v25 }
 0x40a   : > { %4879 = vrot.lane.b32.xlu0 %v23427_v44, %s19552_s28  ;;  %4424 = vrot.lane.b32.xlu1 %v23428_v26, %s19552_s28 }
 0x40b   : > { %16461 = vmatprep.mubr.msk.f32.mxu1 %vm2133_vm3, %v2464_v4  ;;  %v2403_v19 = vpop.xlane.xlu0 %2402 }
 0x40c   : > { %16462 = vmatmul.mubr.msk.f32.vlgmr.msra.gmra.mrb[28].mxu1 %vm2133_vm3, %v2465_v27  ;;  %v2370_v8 = vpop.xlane.xlu1 %2369  ;;  %v23437_v27 = vld [vmem:[#allocation24_spill] sm:$0xff] }
 0x40d   : > { %17541 = vmatpush3.bf16.msra.mxu1 %v17538_v0  ;;  %18964 = vrcp.f32 %v2370_v8  ;;  %v23438_v8 = vld [vmem:[#allocation64_spill] sm:$0xff] }
 0x40e   : > { %17547 = vmatprep.subr.bf16.mxu1 %v17546_v15  ;;  %18465 = vrot.lane.b32.xlu0 %v23429_v3, %s19551_s10  ;;  %18966 = vrcp.f32 %v2367_v23 }
 0x40f   : > { %18440 = vrot.lane.b32.xlu1 %v23430_v54, %s19551_s10  ;;  %v2364_v56 = vpop.xlane.xlu0 %2363 }
 0x410   : > { %18968 = vrcp.f32 %v2364_v56  ;;  %v2412_v5 = vpop.xlane.xlu1 %2411  ;;  %v18368_v56 = vunpack.i.h.bf16 %v23438_v8 }
 0x411   : > { %18970 = vrcp.f32 %v2376_v21  ;;  %v23435_v21 = vld [vmem:[#allocation60_spill] sm:$0xff] }
 0x412   : > { %4972 = vrot.lane.b32.xlu0 %v23431_v12, %s19552_s28  ;;  %18972 = vrcp.f32 %v20713_v37  ;;  %v18373_v17 = vunpack.i.h.bf16 %v23435_v21  ;;  %v18372_v58 = vunpack.i.l.bf16 %v23435_v21 }
 0x413   : > { %4517 = vrot.lane.b32.xlu1 %v23432_v14, %s19552_s28  ;;  %v2400_v0 = vpop.xlane.xlu0 %2399  ;;  %18974 = vrcp.f32 %v2388_v30  ;;  %v18963_v2 = vpop.eup %18962  ;;  %v23436_v30 = vld [vmem:[#allocation48_spill] sm:$0xff] }
 0x414   : > { %v2385_v29 = vpop.xlane.xlu1 %2384  ;;  %18976 = vrcp.f32 %v2391_v40  ;;  %v2469_v25 = vmul.f32 %v18963_v2, %v20609_v53  ;;  %v23439_v53 = vld [vmem:[#allocation57_spill] sm:$0xff] }
 0x415   : > { %18978 = vrcp.f32 %v2385_v29  ;;  %v18367_v29 = vunpack.i.l.bf16 %v23438_v8 }
 0x416   : > { %5061 = vrot.lane.b32.xlu0 %v23433_v45, %s19552_s28 }
 0x417   : > { %4606 = vrot.lane.b32.xlu1 %v23434_v18, %s19552_s28  ;;  %v18965_v60 = vpop.eup %18964  ;;  %v2415_v50 = vpop.xlane.xlu0 %2414 }
 0x418   : > { %v2382_v7 = vpop.xlane.xlu1 %2381  ;;  %v2468_v37 = vmul.f32 %v18965_v60, %v20619_v48  ;;  %v18967_v23 = vpop.eup %18966  ;;  %v17554_v60 = vpack.c.bf16 %v18373_v17, %v18372_v58  ;;  %v23441_v58 = vld [vmem:[#allocation61_spill] sm:$0xff] }
 0x419   : > { %18980 = vrcp.f32 %v2382_v7  ;;  %v23440_v7 = vld [vmem:[#allocation52_spill] sm:$0xff] }
 0x41a   : > { %5152 = vrot.lane.b32.xlu0 %v23436_v30, %s19552_s28  ;;  %v18969_v4 = vpop.eup %18968  ;;  %18982 = vrcp.f32 %v2400_v0  ;;  %16475 = vmatprep.mubr.msk.f32.mxu1 %vm2133_vm3, %v2468_v37  ;;  %v2467_v0 = vmul.f32 %v18967_v23, %v20607_v55 }
 0x41b   : > { %18450 = vrot.lane.b32.xlu1 %v23437_v27, %s19551_s10  ;;  %v18971_v40 = vpop.eup %18970  ;;  %16476 = vmatmul.mubr.msk.f32.vlgmr.msra.gmra.mrb[30].mxu1 %vm2133_vm3, %v2469_v25  ;;  %v2466_v21 = vmul.f32 %v18969_v4, %v20626_v46  ;;  %18984 = vrcp.f32 %v2403_v19  ;;  %v18378_v46 = vunpack.i.h.bf16 %v23441_v58  ;;  %v18377_v19 = vunpack.i.l.bf16 %v23441_v58  ;;  %v23443_v4 = vld [vmem:[#allocation40_spill] sm:$0xff] }
 0x41c   : > { %v2397_v48 = vpop.xlane.xlu0 %2396  ;;  %17549 = vmatpush3.bf16.msra.mxu1 %v17546_v15  ;;  %18986 = vrcp.f32 %v2412_v5  ;;  %v18973_v2 = vpop.eup %18972  ;;  %v2470_v37 = vmul.f32 %v18971_v40, %v20585_v24  ;;  %v17550_v5 = vpack.c.bf16 %v18368_v56, %v18367_v29  ;;  %v23442_v24 = vld [vmem:[#allocation14_spill] sm:$0xff] }
 0x41d   : > { %17555 = vmatprep.subr.bf16.mxu1 %v17554_v60  ;;  %16468 = vmatprep.mubr.msk.f32.mxu0 %vm2133_vm3, %v2466_v21  ;;  %v18975_v17 = vpop.eup %18974  ;;  %18988 = vrcp.f32 %v2397_v48  ;;  %v2471_v23 = vmul.f32 %v18973_v2, %v20570_v59  ;;  %v23445_v21 = vld [vmem:[#allocation63_spill] sm:$0xff] }
 0x41e   : > { %5243 = vrot.lane.b32.xlu0 %v23439_v53, %s19552_s28  ;;  %16469 = vmatmul.mubr.msk.f32.vlgmr.msra.gmra.mrb[46].mxu0 %vm2133_vm3, %v2467_v0  ;;  %v18977_v55 = vpop.eup %18976  ;;  %v2474_v40 = vmul.f32 %v18975_v17, %v20601_v41  ;;  %v18388_v0 = vunpack.i.h.bf16 %v23445_v21  ;;  %v23446_v41 = vld [vmem:[#allocation16_spill] sm:$0xff] }
 0x41f   : > { %4699 = vrot.lane.b32.xlu1 %v23440_v7, %s19552_s28  ;;  %17545 = vmatpush3.bf16.msra.mxu0 %v20741_v39  ;;  %v18979_v25 = vpop.eup %18978  ;;  %v23444_v39 = vld [vmem:[#allocation62_spill] sm:$0xff]  ;;  %v2475_v17 = vmul.f32 %v18977_v55, %v20595_v62 }
 0x420   : > { %v2394_v15 = vpop.xlane.xlu0 %2393  ;;  %16482 = vmatprep.mubr.msk.f32.mxu0 %vm2133_vm3, %v2470_v37  ;;  %17551 = vmatprep.subr.bf16.mxu0 %v17550_v5  ;;  %v18383_v56 = vunpack.i.h.bf16 %v23444_v39  ;;  %v18382_v29 = vunpack.i.l.bf16 %v23444_v39  ;;  %v18387_v37 = vunpack.i.l.bf16 %v23445_v21  ;;  %v2473_v2 = vmul.f32 %v18979_v25, %v20638_v49 }
 0x421   : > { %18990 = vrcp.f32 %v2394_v15  ;;  %v23448_v15 = vld [vmem:[#allocation66_spill] sm:$0xff] }
 0x422   : > { %18992 = vrcp.f32 %v2415_v50  ;;  %18480 = vrot.lane.b32.xlu0 %v23442_v24, %s19553_s13  ;;  %16483 = vmatmul.mubr.msk.f32.vlgmr.msra.gmra.mrb[48].mxu0 %vm2133_vm3, %v2471_v23  ;;  %v17558_v50 = vpack.c.bf16 %v18378_v46, %v18377_v19  ;;  %v23447_v46 = vld [vmem:[#allocation26_spill] sm:$0xff]  ;;  %v18392_v23 = vunpack.i.l.bf16 %v23448_v15  ;;  %v17562_v49 = vpack.c.bf16 %v18383_v56, %v18382_v29 }
 0x423   : > { %4788 = vrot.lane.b32.xlu1 %v23443_v4, %s19552_s28  ;;  %v18981_v8 = vpop.eup %18980  ;;  %17553 = vmatpush3.bf16.msra.mxu0 %v17550_v5  ;;  %v18393_v5 = vunpack.i.h.bf16 %v23448_v15  ;;  %v17566_v62 = vpack.c.bf16 %v18388_v0, %v18387_v37  ;;  %v23451_v29 = vld [vmem:[#allocation54_spill] sm:$0xff]  ;;  %v23454_v37 = vld [vmem:[#allocation68_spill] sm:$0xff] }
 0x424   : > { %v18983_v48 = vpop.eup %18982  ;;  %16496 = vmatprep.mubr.msk.f32.mxu0 %vm2133_vm3, %v2474_v40  ;;  %v2472_v59 = vmul.f32 %v18981_v8, %v20646_v57  ;;  %17559 = vmatprep.subr.bf16.mxu0 %v17558_v50  ;;  %v23449_v8 = vld [vmem:[#allocation78_spill] sm:$0xff]  ;;  %v23457_v15 = vld [vmem:[#allocation56_spill] sm:$0xff] }
 0x425   : > { %v18985_v58 = vpop.eup %18984  ;;  %v2478_v57 = vmul.f32 %v18983_v48, %v20636_v35  ;;  %v18423_v39 = vunpack.i.h.bf16 %v23449_v8  ;;  %v18422_v21 = vunpack.i.l.bf16 %v23449_v8  ;;  %v17574_v56 = vpack.c.bf16 %v18393_v5, %v18392_v23  ;;  %v23458_v5 = vld [vmem:[#allocation74_spill] sm:$0xff] }
 0x426   : > { %18490 = vrot.lane.b32.xlu0 %v23446_v41, %s19553_s13  ;;  %16489 = vmatprep.mubr.msk.f32.mxu1 %vm2133_vm3, %v2472_v59  ;;  %v18987_v19 = vpop.eup %18986  ;;  %v2479_v25 = vmul.f32 %v18985_v58, %v20617_v38  ;;  %v23450_v59 = vld [vmem:[#allocation18_spill] sm:$0xff]  ;;  %v23456_v58 = vld [vmem:[#allocation28_spill] sm:$0xff]  ;;  %v18413_v23 = vunpack.i.h.bf16 %v23458_v5 }
 0x427   : > { %18460 = vrot.lane.b32.xlu1 %v23447_v46, %s19551_s10  ;;  %16490 = vmatmul.mubr.msk.f32.vlgmr.msra.gmra.mrb[32].mxu1 %vm2133_vm3, %v2473_v2  ;;  %v18989_v55 = vpop.eup %18988  ;;  %v2482_v35 = vmul.f32 %v18987_v19, %v20628_v33  ;;  %v17570_v0 = vpack.c.bf16 %v18423_v39, %v18422_v21  ;;  %v18403_v2 = vunpack.i.h.bf16 %v23454_v37  ;;  %v23462_v8 = vld [vmem:[#allocation58_spill] sm:$0xff] }
 0x428   : > { %16497 = vmatmul.mubr.msk.f32.vlgmr.msra.gmra.mrb[50].mxu0 %vm2133_vm3, %v2475_v17  ;;  %17557 = vmatpush3.bf16.msra.mxu1 %v17554_v60  ;;  %v23455_v17 = vld [vmem:[#allocation67_spill] sm:$0xff] }
 0x429   : > { %17561 = vmatpush3.bf16.msra.mxu0 %v17558_v50  ;;  %16510 = vmatprep.mubr.msk.f32.mxu0 %vm2133_vm3, %v2478_v57  ;;  %v2477_v50 = vmul.f32 %v18989_v55, %v20652_v20  ;;  %v18402_v20 = vunpack.i.l.bf16 %v23454_v37  ;;  %v18412_v57 = vunpack.i.l.bf16 %v23458_v5  ;;  %v23460_v55 = vld [vmem:[#allocation70_spill] sm:$0xff] }
 0x42a   : > { %17563 = vmatprep.subr.bf16.mxu1 %v17562_v49  ;;  %17567 = vmatprep.subr.bf16.mxu0 %v17566_v62 }
 0x42b   : > { %v18991_v40 = vpop.eup %18990  ;;  %18500 = vrot.lane.b32.xlu0 %v23450_v59, %s19553_s13  ;;  %4881 = vrot.lane.b32.xlu1 %v23451_v29, %s19552_s28  ;;  %v17586_v19 = vpack.c.bf16 %v18403_v2, %v18402_v20 }
 0x42c   : > { %v18993_v60 = vpop.eup %18992  ;;  %16511 = vmatmul.mubr.msk.f32.vlgmr.msra.gmra.mrb[52].mxu0 %vm2133_vm3, %v2479_v25  ;;  %v2476_v38 = vmul.f32 %v18991_v40, %v20656_v6  ;;  %v23453_v6 = vld [vmem:[#allocation44_spill] sm:$0xff]  ;;  %v23461_v40 = vld [vmem:[#allocation73_spill] sm:$0xff] }
 0x42d   : > { %17569 = vmatpush3.bf16.msra.mxu0 %v17566_v62  ;;  %16524 = vmatprep.mubr.msk.f32.mxu0 %vm2133_vm3, %v2482_v35  ;;  %v2483_v33 = vmul.f32 %v18993_v60, %v20644_v34  ;;  %v2409_v34 = vpop.xlane.xlu0 %2408  ;;  %v17598_v62 = vpack.c.bf16 %v18413_v23, %v18412_v57  ;;  %v23463_v35 = vld [vmem:[#allocation12_spill] sm:$0xff]  ;;  %v4243_v60 = vpop.permute.xlu1 %4242 }
 0x42e   : > { %17576 = vmatprep.subr.msk.bf16.mxu0 %vm20122_vm2, %v17574_v56  ;;  %16503 = vmatprep.mubr.msk.f32.mxu1 %vm2133_vm3, %v2476_v38  ;;  %v23464_v38 = vld [vmem:[#allocation76_spill] sm:$0xff]  ;;  %18994 = vrcp.f32 %v2409_v34 }
 0x42f   : > { %18510 = vrot.lane.b32.xlu0 %v19952_v16, %s19553_s13  ;;  %16504 = vmatmul.mubr.msk.f32.vlgmr.msra.gmra.mrb[34].mxu1 %vm2133_vm3, %v2477_v50  ;;  %v23465_v50 = vld [vmem:[#allocation15_spill] sm:$0xff] }
 0x430   : > { %4970 = vrot.lane.b32.xlu1 %v23453_v6, %s19552_s28  ;;  %17565 = vmatpush3.bf16.msra.mxu1 %v17562_v49  ;;  %v23459_v49 = vld [vmem:[#allocation50_spill] sm:$0xff] }
 0x431   : > { %16525 = vmatmul.mubr.msk.f32.vlgmr.msra.gmra.mrb[54].mxu0 %vm2133_vm3, %v2483_v33  ;;  %17571 = vmatprep.subr.bf16.mxu1 %v17570_v0  ;;  %v18426_v25 = vpop.permute.xlu0 %18425  ;;  %v23466_v33 = vld [vmem:[#allocation17_spill] sm:$0xff] }
 0x432   : > { %16538 = vmatprep.mubr.msk.f32.mxu0 %vm682_vm1, %v23455_v17  ;;  %v18428_v39 = vunpack.i.h.bf16 %v18426_v25  ;;  %v18427_v21 = vunpack.i.l.bf16 %v18426_v25  ;;  %v23467_v17 = vld [vmem:[#allocation65_spill] sm:$0xff] }
 0x433   : > { %v18397_v5 = vunpack.i.l.bf16 %v23467_v17 }
 0x434   : > { %18470 = vrot.lane.b32.xlu1 %v23456_v58, %s19551_s10 }
 0x436   : > { %17579 = vmatpush3.bf16.xpose.msk.msra.mxu0 %vm20122_vm2, %v17574_v56  ;;  %v17610_v56 = vpack.c.bf16 %v18428_v39, %v18427_v21 }
 0x437   : > { %17588 = vmatprep.subr.msk.bf16.mxu0 %vm20122_vm2, %v17586_v19 }
 0x438   : > { %5063 = vrot.lane.b32.xlu1 %v23457_v15, %s19552_s28  ;;  %v18995_v2 = vpop.eup %18994 }
 0x43c   : > { %5154 = vrot.lane.b32.xlu1 %v23459_v49, %s19552_s28 }
 0x43d   : > { %16539 = vmatmul.mubr.msk.f32.vlgmr.msra.gmra.mrb[56].mxu0 %vm682_vm1, %v23460_v55 }
 0x43e   : > { %17591 = vmatpush3.bf16.xpose.msk.msra.mxu0 %vm20122_vm2, %v17586_v19  ;;  %16552 = vmatprep.mubr.msk.f32.mxu0 %vm682_vm1, %v23461_v40  ;;  %v18398_v19 = vunpack.i.h.bf16 %v23467_v17 }
 0x43f   : > { %17600 = vmatprep.subr.msk.bf16.mxu0 %vm20122_vm2, %v17598_v62 }
 0x440   : > { %5245 = vrot.lane.b32.xlu1 %v23462_v8, %s19552_s28  ;;  %v17580_v34 = vpack.c.bf16 %v18398_v19, %v18397_v5  ;;  %s23160_s28 = scalar_lea.hbm %s23216_s5, %s15573_s6 }
 0x444   : > { %18475 = vrot.lane.b32.xlu1 %v23463_v35, %s19553_s13 }
 0x445   : > { %16553 = vmatmul.mubr.msk.f32.vlgmr.msra.gmra.mrb[58].mxu0 %vm682_vm1, %v23464_v38 }
 0x446   : > { %17603 = vmatpush3.bf16.xpose.msk.msra.mxu0 %vm20122_vm2, %v17598_v62  ;;  %16566 = vmatprep.mubr.msk.f32.mxu0 %vm682_vm1, %v4243_v60  ;;  %v2481_v62 = vmul.f32 %v18995_v2, %v20660_v9 }
 0x447   : > { %17612 = vmatprep.subr.msk.bf16.mxu0 %vm20122_vm2, %v17610_v56 }
 0x448   : > { %18485 = vrot.lane.b32.xlu1 %v23465_v50, %s19553_s13 }
 0x44c   : > { %18495 = vrot.lane.b32.xlu1 %v23466_v33, %s19553_s13 }
 0x44d   : > { %v2406_v37 = vpop.xlane.xlu1 %2405 }
 0x44e   : > { %18996 = vrcp.f32 %v2406_v37 }
 0x450   : > { %18505 = vrot.lane.b32.xlu1 %v19940_v11, %s19553_s13 }
 0x451   : > { %v18431_v38 = vpop.permute.xlu1 %18430 }
 0x454   : > { %18515 = vrot.lane.b32.xlu1 %v19963_v22, %s19553_s13 }
 0x458   : > { %v18997_v20 = vpop.eup %18996 }
 0x459   : > { %v2421_v23 = vpop.xlane.xlu0 %2420  ;;  %v2480_v57 = vmul.f32 %v18997_v20, %v20670_v28 }
 0x45a   : > { %18998 = vrcp.f32 %v2421_v23 }
 0x45b   : > { %16517 = vmatprep.mubr.msk.f32.mxu1 %vm2133_vm3, %v2480_v57 }
 0x45c   : > { %16518 = vmatmul.mubr.msk.f32.vlgmr.msra.gmra.mrb[36].mxu1 %vm2133_vm3, %v2481_v62 }
 0x45d   : > { %v4245_v55 = vpop.permute.xlu0 %4244  ;;  %17573 = vmatpush3.bf16.msra.mxu1 %v17570_v0 }
 0x45e   : > { %16567 = vmatmul.mubr.msk.f32.vlgmr.msra.gmra.mrb[60].mxu0 %vm682_vm1, %v4245_v55  ;;  %17582 = vmatprep.subr.msk.bf16.mxu1 %vm20122_vm2, %v17580_v34 }
 0x45f   : > { %17615 = vmatpush3.bf16.xpose.msk.msra.mxu0 %vm20122_vm2, %v17610_v56 }
 0x461   : > { %v20894_v25 = vpop.permute.xlu0 %4333 }
 0x464   : > { %v18999_v62 = vpop.eup %18998 }
 0x465   : > { %v18436_v28 = vpop.permute.xlu0 %18435 }
 0x466   : > { %v18438_v40 = vunpack.i.h.bf16 %v18436_v28  ;;  %v18437_v9 = vunpack.i.l.bf16 %v18436_v28 }
 0x468   : > { %v17622_v39 = vpack.c.bf16 %v18438_v40, %v18437_v9  ;;  %v23468_v40 = vld [vmem:[#allocation69_spill] sm:$0xff] }
 0x469   : > { %v4427_v21 = vpop.permute.xlu0 %4426  ;;  %v18408_v9 = vunpack.i.h.bf16 %v23468_v40  ;;  %v18407_v23 = vunpack.i.l.bf16 %v23468_v40  ;;  %v23470_v40 = vld [vmem:[#allocation75_spill] sm:$0xff] }
 0x46a   : > { %17624 = vmatprep.subr.msk.bf16.mxu0 %vm20122_vm2, %v17622_v39 }
 0x46d   : > { %v20898_v60 = vpop.permute.xlu0 %4515 }
 0x471   : > { %v18446_v0 = vpop.permute.xlu0 %18445 }
 0x472   : > { %v18448_v17 = vunpack.i.h.bf16 %v18446_v0  ;;  %v18447_v19 = vunpack.i.l.bf16 %v18446_v0 }
 0x474   : > { %v17634_v55 = vpack.c.bf16 %v18448_v17, %v18447_v19  ;;  %v17592_v17 = vpack.c.bf16 %v18408_v9, %v18407_v23  ;;  %v23469_v19 = vld [vmem:[#allocation72_spill] sm:$0xff] }
 0x475   : > { %v4609_v37 = vpop.permute.xlu0 %4608 }
 0x479   : > { %v20900_v20 = vpop.permute.xlu0 %4697 }
 0x47d   : > { %v18456_v57 = vpop.permute.xlu0 %18455 }
 0x482   : > { %v2418_v2 = vpop.xlane.xlu1 %2417 }
 0x483   : > { %19000 = vrcp.f32 %v2418_v2 }
 0x486   : > { %v20902_v56 = vpop.permute.xlu1 %4335 }
 0x48a   : > { %v4425_v5 = vpop.permute.xlu1 %4424 }
 0x48b   : > { %16580 = vmatprep.mubr.msk.f32.mxu0 %vm682_vm1, %v4425_v5  ;;  %v2485_v5 = vmul.f32 %v18999_v62, %v20674_v1  ;;  %v18417_v1 = vunpack.i.l.bf16 %v23470_v40  ;;  %v18458_v62 = vunpack.i.h.bf16 %v18456_v57 }
 0x48c   : > { %16581 = vmatmul.mubr.msk.f32.vlgmr.msra.gmra.mrb[62].mxu0 %vm682_vm1, %v4427_v21  ;;  %v4791_v21 = vpop.permute.xlu0 %4790 }
 0x48d   : > { %v19001_v28 = vpop.eup %19000  ;;  %17627 = vmatpush3.bf16.xpose.msk.msra.mxu0 %vm20122_vm2, %v17622_v39 }
 0x48e   : > { %17636 = vmatprep.subr.msk.bf16.mxu0 %vm20122_vm2, %v17634_v55  ;;  %v18441_v0 = vpop.permute.xlu1 %18440  ;;  %v2484_v2 = vmul.f32 %v19001_v28, %v20707_v61  ;;  %v18418_v61 = vunpack.i.h.bf16 %v23470_v40  ;;  %v18457_v28 = vunpack.i.l.bf16 %v18456_v57  ;;  %v18432_v40 = vunpack.i.l.bf16 %v18431_v38 }
 0x490   : > { %16531 = vmatprep.mubr.msk.f32.mxu1 %vm2133_vm3, %v2484_v2  ;;  %v4880_v23 = vpop.permute.xlu0 %4879  ;;  %v17646_v2 = vpack.c.bf16 %v18458_v62, %v18457_v28 }
 0x491   : > { %16532 = vmatmul.mubr.msk.f32.vlgmr.msra.gmra.mrb[38].mxu1 %vm2133_vm3, %v2485_v5  ;;  %v23471_v5 = vld [vmem:[#allocation71_spill] sm:$0xff] }
 0x492   : > { %17585 = vmatpush3.bf16.xpose.msk.msra.mxu1 %vm20122_vm2, %v17580_v34  ;;  %16545 = vmatprep.mubr.msk.f32.mxu1 %vm682_vm1, %v23469_v19  ;;  %v4518_v39 = vpop.permute.xlu1 %4517  ;;  %v17604_v34 = vpack.c.bf16 %v18418_v61, %v18417_v1  ;;  %v23472_v19 = vld [vmem:[#allocation79_spill] sm:$0xff] }
 0x493   : > { %17594 = vmatprep.subr.msk.bf16.mxu1 %vm20122_vm2, %v17592_v17 }
 0x494   : > { %v18466_v61 = vpop.permute.xlu0 %18465 }
 0x495   : > { %v18468_v62 = vunpack.i.h.bf16 %v18466_v61  ;;  %v18467_v28 = vunpack.i.l.bf16 %v18466_v61 }
 0x496   : > { %v4607_v9 = vpop.permute.xlu1 %4606 }
 0x497   : > { %16594 = vmatprep.mubr.msk.f32.mxu0 %vm682_vm1, %v4607_v9  ;;  %v23473_v9 = vld [vmem:[#allocation77_spill] sm:$0xff] }
 0x498   : > { %16595 = vmatmul.mubr.msk.f32.vlgmr.msra.gmra.mrb[64].mxu0 %vm682_vm1, %v4609_v37  ;;  %v18433_v37 = vunpack.i.h.bf16 %v18431_v38  ;;  %v17658_v38 = vpack.c.bf16 %v18468_v62, %v18467_v28 }
 0x499   : > { %16546 = vmatmul.mubr.msk.f32.vlgmr.msra.gmra.mrb[40].mxu1 %vm682_vm1, %v23471_v5  ;;  %17639 = vmatpush3.bf16.xpose.msk.msra.mxu0 %vm20122_vm2, %v17634_v55  ;;  %v4973_v5 = vpop.permute.xlu0 %4972 }
 0x49a   : > { %17597 = vmatpush3.bf16.xpose.msk.msra.mxu1 %vm20122_vm2, %v17592_v17  ;;  %16559 = vmatprep.mubr.msk.f32.mxu1 %vm682_vm1, %v23472_v19  ;;  %v18451_v57 = vpop.permute.xlu1 %18450  ;;  %v17616_v55 = vpack.c.bf16 %v18433_v37, %v18432_v40  ;;  %v18443_v19 = vunpack.i.h.bf16 %v18441_v0  ;;  %v18442_v37 = vunpack.i.l.bf16 %v18441_v0 }
 0x49b   : > { %17648 = vmatprep.subr.msk.bf16.mxu0 %vm20122_vm2, %v17646_v2  ;;  %17606 = vmatprep.subr.msk.bf16.mxu1 %vm20122_vm2, %v17604_v34  ;;  %v18453_v0 = vunpack.i.h.bf16 %v18451_v57 }
 0x49d   : > { %v5062_v40 = vpop.permute.xlu0 %5061 }
 0x49e   : > { %v4700_v1 = vpop.permute.xlu1 %4699 }
 0x4a1   : > { %16560 = vmatmul.mubr.msk.f32.vlgmr.msra.gmra.mrb[42].mxu1 %vm682_vm1, %v23473_v9  ;;  %v5153_v62 = vpop.permute.xlu0 %5152 }
 0x4a2   : > { %17609 = vmatpush3.bf16.xpose.msk.msra.mxu1 %vm20122_vm2, %v17604_v34  ;;  %16573 = vmatprep.mubr.msk.f32.mxu1 %vm682_vm1, %v20894_v25  ;;  %v4789_v17 = vpop.permute.xlu1 %4788  ;;  %v17628_v25 = vpack.c.bf16 %v18443_v19, %v18442_v37 }
 0x4a3   : > { %17618 = vmatprep.subr.msk.bf16.mxu1 %vm20122_vm2, %v17616_v55  ;;  %16608 = vmatprep.mubr.msk.f32.mxu0 %vm682_vm1, %v4789_v17 }
 0x4a4   : > { %16609 = vmatmul.mubr.msk.f32.vlgmr.msra.gmra.mrb[66].mxu0 %vm682_vm1, %v4791_v21 }
 0x4a5   : > { %17651 = vmatpush3.bf16.xpose.msk.msra.mxu0 %vm20122_vm2, %v17646_v2  ;;  %v18452_v2 = vunpack.i.l.bf16 %v18451_v57 }
 0x4a6   : > { %17660 = vmatprep.subr.msk.bf16.mxu0 %vm20122_vm2, %v17658_v38  ;;  %v18461_v34 = vpop.permute.xlu1 %18460 }
 0x4a9   : > { %16574 = vmatmul.mubr.msk.f32.vlgmr.msra.gmra.mrb[44].mxu1 %vm682_vm1, %v20902_v56  ;;  %v17640_v56 = vpack.c.bf16 %v18453_v0, %v18452_v2 }
 0x4aa   : > { %17621 = vmatpush3.bf16.xpose.msk.msra.mxu1 %vm20122_vm2, %v17616_v55  ;;  %16587 = vmatprep.mubr.msk.f32.mxu1 %vm682_vm1, %v20898_v60  ;;  %v4882_v21 = vpop.permute.xlu1 %4881  ;;  %v18462_v55 = vunpack.i.l.bf16 %v18461_v34 }
 0x4ab   : > { %17630 = vmatprep.subr.msk.bf16.mxu1 %vm20122_vm2, %v17628_v25 }
 0x4ae   : > { %v4971_v61 = vpop.permute.xlu1 %4970 }
 0x4af   : > { %16622 = vmatprep.mubr.msk.f32.mxu0 %vm682_vm1, %v4971_v61 }
 0x4b0   : > { %16623 = vmatmul.mubr.msk.f32.vlgmr.msra.gmra.mrb[68].mxu0 %vm682_vm1, %v4973_v5 }
 0x4b1   : > { %16588 = vmatmul.mubr.msk.f32.vlgmr.msra.gmra.mrb[46].mxu1 %vm682_vm1, %v4518_v39  ;;  %17663 = vmatpush3.bf16.xpose.msk.msra.mxu0 %vm20122_vm2, %v17658_v38  ;;  %v18463_v39 = vunpack.i.h.bf16 %v18461_v34  ;;  %v5244_v38 = vpop.permute.xlu0 %5243 }
 0x4b2   : > { %17633 = vmatpush3.bf16.xpose.msk.msra.mxu1 %vm20122_vm2, %v17628_v25  ;;  %16601 = vmatprep.mubr.msk.f32.mxu1 %vm682_vm1, %v20900_v20  ;;  %v18471_v60 = vpop.permute.xlu1 %18470  ;;  %v20969_v57 = vpop.f32.mrb[40].mxu0 }
 0x4b3   : > { %23474 = vst [vmem:[#allocation59_spill] sm:$0xff] %v20969_v57  ;;  %16636 = vmatprep.mubr.msk.f32.mxu0 %vm682_vm1, %v5153_v62  ;;  %17642 = vmatprep.subr.msk.bf16.mxu1 %vm20122_vm2, %v17640_v56  ;;  %v20974_v28 = vpop.f32.mrb[41].mxu0  ;;  %v17652_v17 = vpack.c.bf16 %v18463_v39, %v18462_v55  ;;  %v18473_v5 = vunpack.i.h.bf16 %v18471_v60  ;;  %v18472_v19 = vunpack.i.l.bf16 %v18471_v60 }
 0x4b4   : > { %23475 = vst [vmem:[#allocation27_spill] sm:$0xff] %v20974_v28 }
 0x4b5   : > { %v18481_v0 = vpop.permute.xlu0 %18480 }
 0x4b6   : > { %v5064_v9 = vpop.permute.xlu1 %5063  ;;  %v18483_v62 = vunpack.i.h.bf16 %v18481_v0 }
 0x4b9   : > { %16602 = vmatmul.mubr.msk.f32.vlgmr.msra.gmra.mrb[48].mxu1 %vm682_vm1, %v4700_v1  ;;  %v17664_v1 = vpack.c.bf16 %v18473_v5, %v18472_v19  ;;  %v18491_v19 = vpop.permute.xlu0 %18490 }
 0x4ba   : > { %17645 = vmatpush3.bf16.xpose.msk.msra.mxu1 %vm20122_vm2, %v17640_v56  ;;  %16615 = vmatprep.mubr.msk.f32.mxu1 %vm682_vm1, %v4880_v23  ;;  %v5155_v20 = vpop.permute.xlu1 %5154  ;;  %v18482_v56 = vunpack.i.l.bf16 %v18481_v0  ;;  %v18493_v0 = vunpack.i.h.bf16 %v18491_v19 }
 0x4bb   : > { %17654 = vmatprep.subr.msk.bf16.mxu1 %vm20122_vm2, %v17652_v17  ;;  %16637 = vmatmul.mubr.msk.f32.vlgmr.msra.gmra.mrb[70].mxu0 %vm682_vm1, %v5155_v20 }
 0x4bd   : > { %v20983_v37 = vpop.f32.mrb[24].mxu1 }
 0x4be   : > { %23476 = vst [vmem:[#allocation60_spill] sm:$0xff] %v20983_v37  ;;  %v5246_v34 = vpop.permute.xlu1 %5245  ;;  %v20985_v25 = vpop.f32.mrb[25].mxu1 }
 0x4bf   : > { %23477 = vst [vmem:[#allocation64_spill] sm:$0xff] %v20985_v25 }
 0x4c1   : > { %16616 = vmatmul.mubr.msk.f32.vlgmr.msra.gmra.mrb[50].mxu1 %vm682_vm1, %v4882_v21 }
 0x4c2   : > { %17657 = vmatpush3.bf16.xpose.msk.msra.mxu1 %vm20122_vm2, %v17652_v17  ;;  %16629 = vmatprep.mubr.msk.f32.mxu1 %vm682_vm1, %v5062_v40  ;;  %v18476_v23 = vpop.permute.xlu1 %18475  ;;  %v17674_v40 = vpack.c.bf16 %v18483_v62, %v18482_v56 }
 0x4c3   : > { %v18478_v2 = vunpack.i.h.bf16 %v18476_v23  ;;  %v18477_v61 = vunpack.i.l.bf16 %v18476_v23  ;;  %17666 = vmatprep.subr.msk.bf16.mxu1 %vm20122_vm2, %v17664_v1  ;;  %v18492_v23 = vunpack.i.l.bf16 %v18491_v19 }
 0x4c5   : > { %v20993_v60 = vpop.f32.mrb[42].mxu0  ;;  %v17670_v39 = vpack.c.bf16 %v18478_v2, %v18477_v61 }
 0x4c6   : > { %23478 = vst [vmem:[#allocation61_spill] sm:$0xff] %v20993_v60  ;;  %v18486_v55 = vpop.permute.xlu1 %18485  ;;  %v20995_v20 = vpop.f32.mrb[43].mxu0 }
 0x4c7   : > { %23479 = vst [vmem:[#allocation62_spill] sm:$0xff] %v20995_v20  ;;  %v18488_v21 = vunpack.i.h.bf16 %v18486_v55  ;;  %v18487_v5 = vunpack.i.l.bf16 %v18486_v55  ;;  %17671 = vmatprep.subr.bf16.mxu0 %v17670_v39 }
 0x4c8   : > { %17673 = vmatpush3.bf16.msra.mxu0 %v17670_v39 }
 0x4c9   : > { %16630 = vmatmul.mubr.msk.f32.vlgmr.msra.gmra.mrb[52].mxu1 %vm682_vm1, %v5064_v9  ;;  %v20998_v17 = vpack.c.bf16 %v18488_v21, %v18487_v5  ;;  %v21009_v9 = vpack.c.bf16 %v18493_v0, %v18492_v23 }
 0x4ca   : > { %17669 = vmatpush3.bf16.xpose.msk.msra.mxu1 %vm20122_vm2, %v17664_v1  ;;  %16643 = vmatprep.mubr.msk.f32.mxu1 %vm682_vm1, %v5244_v38  ;;  %v21182_v16 = vpop.permute.xlu1 %18495 }
 0x4cb   : > { %17675 = vmatprep.subr.bf16.mxu1 %v17674_v40  ;;  %17679 = vmatprep.subr.bf16.mxu0 %v20998_v17 }
 0x4cd   : > { %v21004_v2 = vpop.f32.mrb[26].mxu1 }
 0x4ce   : > { %23480 = vst [vmem:[#allocation63_spill] sm:$0xff] %v21004_v2  ;;  %v21006_v61 = vpop.f32.mrb[27].mxu1  ;;  %v21186_v52 = vpop.permute.xlu1 %18505 }
 0x4cf   : > { %23481 = vst [vmem:[#allocation66_spill] sm:$0xff] %v21006_v61 }
 0x4d1   : > { %16644 = vmatmul.mubr.msk.f32.vlgmr.msra.gmra.mrb[54].mxu1 %vm682_vm1, %v5246_v34 }
 0x4d2   : > { %17677 = vmatpush3.bf16.msra.mxu1 %v17674_v40 }
 0x4d3   : > { %17683 = vmatprep.subr.bf16.mxu1 %v21009_v9 }
 0x4da   : > { %v21012_v62 = vpop.f32.mrb[44].mxu0 }
 0x4db   : > { %23482 = vst [vmem:[#allocation78_spill] sm:$0xff] %v21012_v62  ;;  %v21014_v1 = vpop.f32.mrb[45].mxu0 }
 0x4dc   : > { %23483 = vst [vmem:[#allocation68_spill] sm:$0xff] %v21014_v1 }
 0x4df   : > { %v21016_v38 = vpop.f32.mrb[28].mxu1 }
 0x4e0   : > { %23484 = vst [vmem:[#allocation67_spill] sm:$0xff] %v21016_v38  ;;  %v21018_v56 = vpop.f32.mrb[29].mxu1 }
 0x4e1   : > { %23485 = vst [vmem:[#allocation28_spill] sm:$0xff] %v21018_v56 }
 0x4ee   : > { %v21020_v39 = vpop.f32.mrb[30].mxu1 }
 0x4ef   : > { %23486 = vst [vmem:[#allocation74_spill] sm:$0xff] %v21020_v39  ;;  %v21022_v55 = vpop.f32.mrb[31].mxu1 }
 0x4f0   : > { %23487 = vst [vmem:[#allocation70_spill] sm:$0xff] %v21022_v55 }
 0x4f1   : > { %v21024_v21 = vpop.f32.mrb[46].mxu0 }
 0x4f2   : > { %23488 = vst [vmem:[#allocation73_spill] sm:$0xff] %v21024_v21  ;;  %v21026_v34 = vpop.f32.mrb[47].mxu0 }
 0x4f3   : > { %23489 = vst [vmem:[#allocation12_spill] sm:$0xff] %v21026_v34 }
 0x4f5   : > { %v21028_v5 = vpop.f32.mrb[48].mxu0 }
 0x4f6   : > { %23490 = vst [vmem:[#allocation76_spill] sm:$0xff] %v21028_v5  ;;  %v21030_v40 = vpop.f32.mrb[49].mxu0 }
 0x4f7   : > { %23491 = vst [vmem:[#allocation15_spill] sm:$0xff] %v21030_v40 }
 0x4fa   : > { %v21032_v19 = vpop.f32.mrb[32].mxu1 }
 0x4fb   : > { %23492 = vst [vmem:[#allocation17_spill] sm:$0xff] %v21032_v19  ;;  %v21034_v0 = vpop.f32.mrb[50].mxu0  ;;  %v21036_v23 = vpop.f32.mrb[33].mxu1 }
 0x4fc   : > { %23493 = vst [vmem:[#allocation65_spill] sm:$0xff] %v21034_v0  ;;  %23494 = vst [vmem:[#allocation69_spill] sm:$0xff] %v21036_v23  ;;  %v21038_v38 = vpop.f32.mrb[51].mxu0 }
 0x4fd   : > { %23495 = vst [vmem:[#allocation72_spill] sm:$0xff] %v21038_v38 }
 0x4ff   : > { %v21040_v56 = vpop.f32.mrb[52].mxu0 }
 0x500   : > { %23496 = vst [vmem:[#allocation75_spill] sm:$0xff] %v21040_v56  ;;  %v21042_v39 = vpop.f32.mrb[53].mxu0 }
 0x501   : > { %23497 = vst [vmem:[#allocation71_spill] sm:$0xff] %v21042_v39 }
 0x502   : > { %v21044_v55 = vpop.f32.mrb[34].mxu1 }
 0x503   : > { %23498 = vst [vmem:[#allocation79_spill] sm:$0xff] %v21044_v55  ;;  %v21046_v21 = vpop.f32.mrb[35].mxu1 }
 0x504   : > { %23499 = vst [vmem:[#allocation77_spill] sm:$0xff] %v21046_v21  ;;  %v21048_v34 = vpop.f32.mrb[54].mxu0 }
 0x505   : > { %23500 = vst [vmem:[#allocation80_spill] sm:$0xff] %v21048_v34  ;;  %v21050_v5 = vpop.f32.mrb[55].mxu0 }
 0x506   : > { %23501 = vst [vmem:[#allocation81_spill] sm:$0xff] %v21050_v5 }
 0x510   : > { %v21052_v40 = vpop.f32.mrb[56].mxu0 }
 0x511   : > { %v21054_v19 = vpop.f32.mrb[57].mxu0  ;;  %v5337_v0 = vsel %vm2133_vm3, %v21052_v40, -inf }
 0x512   : > { %5338 = vmax.xlane.f32.xlu0 %v5337_v0  ;;  %v5334_v56 = vsel %vm2133_vm3, %v21054_v19, -inf }
 0x516   : > { %5335 = vmax.xlane.f32.xlu0 %v5334_v56 }
 0x518   : > { %v21060_v39 = vpop.f32.mrb[58].mxu0 }
 0x519   : > { %v21062_v55 = vpop.f32.mrb[59].mxu0  ;;  %v5349_v34 = vsel %vm2133_vm3, %v21060_v39, -inf }
 0x51a   : > { %5350 = vmax.xlane.f32.xlu1 %v5349_v34  ;;  %v5346_v5 = vsel %vm2133_vm3, %v21062_v55, -inf }
 0x51e   : > { %5347 = vmax.xlane.f32.xlu1 %v5346_v5 }
 0x52f   : > { %v21068_v21 = vpop.f32.mrb[36].mxu1 }
 0x530   : > { %23502 = vst [vmem:[#allocation82_spill] sm:$0xff] %v21068_v21  ;;  %v21070_v38 = vpop.f32.mrb[37].mxu1 }
 0x531   : > { %23503 = vst [vmem:[#allocation83_spill] sm:$0xff] %v21070_v38  ;;  %v21072_v0 = vpop.f32.mrb[60].mxu0 }
 0x532   : > { %v21074_v23 = vpop.f32.mrb[61].mxu0  ;;  %v5361_v56 = vsel %vm2133_vm3, %v21072_v0, -inf }
 0x533   : > { %5362 = vmax.xlane.f32.xlu1 %v5361_v56  ;;  %v5358_v62 = vsel %vm2133_vm3, %v21074_v23, -inf }
 0x537   : > { %5359 = vmax.xlane.f32.xlu1 %v5358_v62 }
 0x55f   : > { %v21080_v34 = vpop.f32.mrb[62].mxu0 }
 0x560   : > { %v21082_v1 = vpop.f32.mrb[63].mxu0 }
 0x561   : > { %v5370_v25 = vsel %vm2133_vm3, %v21082_v1, -inf }
 0x564   : > { %v21084_v5 = vpop.f32.mrb[38].mxu1 }
 0x565   : > { %23504 = vst [vmem:[#allocation84_spill] sm:$0xff] %v21084_v5  ;;  %v21086_v21 = vpop.f32.mrb[39].mxu1  ;;  %v5373_v5 = vsel %vm2133_vm3, %v21080_v34, -inf }
 0x566   : > { %23505 = vst [vmem:[#allocation85_spill] sm:$0xff] %v21086_v21 }
 0x56b   : > { %v21088_v38 = vpop.f32.mrb[64].mxu0 }
 0x56c   : > { %v21090_v2 = vpop.f32.mrb[40].mxu1  ;;  %v21092_v61 = vpop.f32.mrb[65].mxu0 }
 0x56d   : > { %v21094_v60 = vpop.f32.mrb[41].mxu1  ;;  %v5343_v56 = vsel %vm2133_vm3, %v21090_v2, -inf }
 0x56e   : > { %5344 = vmax.xlane.f32.xlu0 %v5343_v56  ;;  %v5340_v62 = vsel %vm2133_vm3, %v21094_v60, -inf }
 0x56f   : > { %5341 = vmax.xlane.f32.xlu1 %v5340_v62 }
 0x573   : > { %5374 = vmax.xlane.f32.xlu1 %v5373_v5  ;;  %v5382_v5 = vsel %vm2133_vm3, %v21092_v61, -inf }
 0x574   : > { %v21102_v21 = vpop.f32.mrb[42].mxu1 }
 0x575   : > { %v21104_v20 = vpop.f32.mrb[43].mxu1  ;;  %v5355_v37 = vsel %vm2133_vm3, %v21102_v21, -inf }
 0x576   : > { %5356 = vmax.xlane.f32.xlu0 %v5355_v37  ;;  %v5352_v62 = vsel %vm2133_vm3, %v21104_v20, -inf  ;;  %v5385_v37 = vsel %vm2133_vm3, %v21088_v38, -inf }
 0x577   : > { %5371 = vmax.xlane.f32.xlu1 %v5370_v25  ;;  %v21110_v56 = vpop.f32.mrb[66].mxu0 }
 0x578   : > { %v21112_v57 = vpop.f32.mrb[67].mxu0 }
 0x579   : > { %v5394_v25 = vsel %vm2133_vm3, %v21112_v57, -inf }
 0x57a   : > { %5353 = vmax.xlane.f32.xlu0 %v5352_v62 }
 0x57b   : > { %5383 = vmax.xlane.f32.xlu1 %v5382_v5 }
 0x57c   : > { %v21118_v28 = vpop.f32.mrb[44].mxu1 }
 0x57d   : > { %v21120_v48 = vpop.f32.mrb[45].mxu1  ;;  %v5367_v8 = vsel %vm2133_vm3, %v21118_v28, -inf }
 0x57e   : > { %5386 = vmax.xlane.f32.xlu0 %v5385_v37  ;;  %v5364_v12 = vsel %vm2133_vm3, %v21120_v48, -inf }
 0x57f   : > { %5395 = vmax.xlane.f32.xlu1 %v5394_v25  ;;  %v5397_v25 = vsel %vm2133_vm3, %v21110_v56, -inf }
 0x582   : > { %5368 = vmax.xlane.f32.xlu0 %v5367_v8 }
 0x583   : > { %v21128_v62 = vpop.f32.mrb[68].mxu0 }
 0x584   : > { %v21130_v49 = vpop.f32.mrb[46].mxu1  ;;  %v21132_v5 = vpop.f32.mrb[69].mxu0 }
 0x585   : > { %v21134_v45 = vpop.f32.mrb[47].mxu1  ;;  %v5406_v37 = vsel %vm2133_vm3, %v21132_v5, -inf  ;;  %v5379_v63 = vsel %vm2133_vm3, %v21130_v49, -inf }
 0x586   : > { %5365 = vmax.xlane.f32.xlu0 %v5364_v12  ;;  %5407 = vmax.xlane.f32.xlu1 %v5406_v37 }
 0x58a   : > { %5398 = vmax.xlane.f32.xlu0 %v5397_v25  ;;  %v5376_v25 = vsel %vm2133_vm3, %v21134_v45, -inf }
 0x58c   : > { %v21142_v8 = vpop.f32.mrb[48].mxu1 }
 0x58d   : > { %v21144_v44 = vpop.f32.mrb[49].mxu1 }
 0x58e   : > { %5380 = vmax.xlane.f32.xlu0 %v5379_v63  ;;  %v21148_v42 = vpop.f32.mrb[70].mxu0  ;;  %v5388_v36 = vsel %vm2133_vm3, %v21144_v44, -inf  ;;  %v5409_v63 = vsel %vm2133_vm3, %v21128_v62, -inf }
 0x58f   : > { %5389 = vmax.xlane.f32.xlu1 %v5388_v36  ;;  %v21152_v12 = vpop.f32.mrb[71].mxu0  ;;  %v5391_v36 = vsel %vm2133_vm3, %v21142_v8, -inf }
 0x590   : > { %v5418_v37 = vsel %vm2133_vm3, %v21152_v12, -inf }
 0x592   : > { %5377 = vmax.xlane.f32.xlu0 %v5376_v25  ;;  %v5421_v25 = vsel %vm2133_vm3, %v21148_v42, -inf }
 0x593   : > { %5419 = vmax.xlane.f32.xlu1 %v5418_v37 }
 0x594   : > { %v21158_v53 = vpop.f32.mrb[50].mxu1 }
 0x595   : > { %v21160_v30 = vpop.f32.mrb[51].mxu1  ;;  %v5403_v37 = vsel %vm2133_vm3, %v21158_v53, -inf }
 0x596   : > { %5410 = vmax.xlane.f32.xlu0 %v5409_v63  ;;  %v5400_v14 = vsel %vm2133_vm3, %v21160_v30, -inf }
 0x59a   : > { %5392 = vmax.xlane.f32.xlu0 %v5391_v36  ;;  %v21180_v36 = vpop.permute.xlu0 %18500 }
 0x59c   : > { %v21166_v51 = vpop.f32.mrb[52].mxu1 }
 0x59d   : > { %v21168_v15 = vpop.f32.mrb[53].mxu1 }
 0x59e   : > { %5422 = vmax.xlane.f32.xlu0 %v5421_v25  ;;  %v21184_v6 = vpop.permute.xlu0 %18510 }
 0x5a2   : > { %5404 = vmax.xlane.f32.xlu0 %v5403_v37  ;;  %v5339_v25 = vpop.xlane.xlu0 %5338  ;;  %v21190_v37 = vpop.permute.xlu1 %18515 }
 0x5a3   : > { %v5431_v29 = vsub.f32 %v21052_v40, %v5339_v25  ;;  %v5412_v40 = vsel %vm2133_vm3, %v21168_v15, -inf }
 0x5a4   : > { %18525 = vrot.lane.b32.xlu1 %v19989_v32, %s19553_s13  ;;  %v21176_v63 = vpop.f32.mrb[54].mxu1 }
 0x5a5   : > { %v21178_v31 = vpop.f32.mrb[55].mxu1  ;;  %v5464_v4 = vmul.f32 1.442695, %v5431_v29 }
 0x5a6   : > { %v5336_v43 = vpop.xlane.xlu0 %5335 }
 0x5a7   : > { %v5351_v59 = vpop.xlane.xlu1 %5350  ;;  %v5430_v7 = vsub.f32 %v21054_v19, %v5336_v43  ;;  %19002 = vpow2.f32 %v5464_v4 }
 0x5a8   : > { %v5435_v18 = vsub.f32 %v21060_v39, %v5351_v59  ;;  %v5424_v59 = vsel %vm2133_vm3, %v21178_v31, -inf }
 0x5a9   : > { %v5462_v41 = vmul.f32 1.442695, %v5430_v7 }
 0x5aa   : > { %v5472_v22 = vmul.f32 1.442695, %v5435_v18 }
 0x5ab   : > { %v5348_v32 = vpop.xlane.xlu1 %5347  ;;  %19004 = vpow2.f32 %v5462_v41 }
 0x5ac   : > { %v5434_v24 = vsub.f32 %v21062_v55, %v5348_v32  ;;  %19006 = vpow2.f32 %v5472_v22  ;;  %v5427_v55 = vsel %vm2133_vm3, %v21176_v63, -inf }
 0x5ae   : > { %v5470_v43 = vmul.f32 1.442695, %v5434_v24 }
 0x5b0   : > { %19008 = vpow2.f32 %v5470_v43 }
 0x5b1   : > { %v21203_v29 = vpop.eup %19002 }
 0x5b2   : > { %v5529_v32 = vsel %vm2133_vm3, %v21203_v29, 0.0 }
 0x5b5   : > { %v21208_v41 = vpop.eup %19004 }
 0x5b6   : > { %v5526_v24 = vsel %vm2133_vm3, %v21208_v41, 0.0  ;;  %v21214_v39 = vpop.eup %19006 }
 0x5b7   : > { %v5541_v19 = vsel %vm2133_vm3, %v21214_v39, 0.0 }
 0x5b8   : > { %18520 = vrot.lane.b32.xlu0 %v23430_v54, %s19553_s13 }
 0x5c0   : > { %v5363_v54 = vpop.xlane.xlu1 %5362 }
 0x5c1   : > { %v5439_v4 = vsub.f32 %v21072_v0, %v5363_v54  ;;  %v5415_v54 = vsel %vm2133_vm3, %v21166_v51, -inf }
 0x5c4   : > { %v5360_v7 = vpop.xlane.xlu1 %5359 }
 0x5c5   : > { %v5438_v18 = vsub.f32 %v21074_v23, %v5360_v7  ;;  %v21220_v23 = vpop.eup %19008 }
 0x5c6   : > { %v5538_v0 = vsel %vm2133_vm3, %v21220_v23, 0.0 }
 0x5c7   : > { %v5478_v22 = vmul.f32 1.442695, %v5438_v18 }
 0x5c8   : > { %5401 = vmax.xlane.f32.xlu1 %v5400_v14  ;;  %v5480_v14 = vmul.f32 1.442695, %v5439_v4 }
 0x5ca   : > { %19010 = vpow2.f32 %v5480_v14 }
 0x5cb   : > { %19012 = vpow2.f32 %v5478_v22 }
 0x5cc   : > { %5413 = vmax.xlane.f32.xlu1 %v5412_v40 }
 0x5d0   : > { %5425 = vmax.xlane.f32.xlu1 %v5424_v59 }
 0x5d4   : > { %5530 = vadd.xlane.f32.xlu1 %v5529_v32  ;;  %v21224_v25 = vpop.eup %19010 }
 0x5d5   : > { %v5553_v40 = vsel %vm2133_vm3, %v21224_v25, 0.0  ;;  %v21228_v43 = vpop.eup %19012 }
 0x5d6   : > { %v5550_v4 = vsel %vm2133_vm3, %v21228_v43, 0.0 }
 0x5d7   : > { %5416 = vmax.xlane.f32.xlu0 %v5415_v54 }
 0x5d8   : > { %5527 = vadd.xlane.f32.xlu1 %v5526_v24 }
 0x5db   : > { %5428 = vmax.xlane.f32.xlu0 %v5427_v55 }
 0x5dc   : > { %5542 = vadd.xlane.f32.xlu1 %v5541_v19 }
 0x5e0   : > { %5539 = vadd.xlane.f32.xlu1 %v5538_v0 }
 0x5e4   : > { %5554 = vadd.xlane.f32.xlu1 %v5553_v40 }
 0x5e8   : > { %5551 = vadd.xlane.f32.xlu1 %v5550_v4 }
 0x5fb   : > { %v5345_v7 = vpop.xlane.xlu0 %5344 }
 0x5fc   : > { %v5433_v59 = vsub.f32 %v21090_v2, %v5345_v7  ;;  %v5342_v14 = vpop.xlane.xlu1 %5341 }
 0x5fd   : > { %v5432_v18 = vsub.f32 %v21094_v60, %v5342_v14 }
 0x5fe   : > { %v5468_v32 = vmul.f32 1.442695, %v5433_v59 }
 0x5ff   : > { %v5466_v22 = vmul.f32 1.442695, %v5432_v18 }
 0x600   : > { %19014 = vpow2.f32 %v5468_v32  ;;  %v5375_v54 = vpop.xlane.xlu1 %5374 }
 0x601   : > { %v5443_v24 = vsub.f32 %v21080_v34, %v5375_v54  ;;  %19016 = vpow2.f32 %v5466_v22 }
 0x603   : > { %v5488_v55 = vmul.f32 1.442695, %v5443_v24  ;;  %v5357_v19 = vpop.xlane.xlu0 %5356 }
 0x604   : > { %v5437_v0 = vsub.f32 %v21102_v21, %v5357_v19  ;;  %v5372_v40 = vpop.xlane.xlu1 %5371 }
 0x605   : > { %19018 = vpow2.f32 %v5488_v55  ;;  %v5442_v4 = vsub.f32 %v21082_v1, %v5372_v40 }
 0x606   : > { %v5476_v26 = vmul.f32 1.442695, %v5437_v0 }
 0x607   : > { %v5486_v2 = vmul.f32 1.442695, %v5442_v4  ;;  %v5354_v7 = vpop.xlane.xlu0 %5353 }
 0x608   : > { %19020 = vpow2.f32 %v5476_v26  ;;  %v5436_v60 = vsub.f32 %v21104_v20, %v5354_v7  ;;  %v5384_v59 = vpop.xlane.xlu1 %5383 }
 0x609   : > { %19022 = vpow2.f32 %v5486_v2  ;;  %v5446_v14 = vsub.f32 %v21092_v61, %v5384_v59 }
 0x60a   : > { %v21239_v34 = vpop.eup %19014  ;;  %v5474_v18 = vmul.f32 1.442695, %v5436_v60 }
 0x60b   : > { %v5494_v32 = vmul.f32 1.442695, %v5446_v14  ;;  %v5387_v22 = vpop.xlane.xlu0 %5386  ;;  %v5535_v21 = vsel %vm2133_vm3, %v21239_v34, 0.0  ;;  %v21243_v54 = vpop.eup %19016 }
 0x60c   : > { %19024 = vpow2.f32 %v5474_v18  ;;  %v5447_v1 = vsub.f32 %v21088_v38, %v5387_v22  ;;  %v5396_v26 = vpop.xlane.xlu1 %5395  ;;  %5536 = vadd.xlane.f32.xlu0 %v5535_v21  ;;  %v5532_v0 = vsel %vm2133_vm3, %v21243_v54, 0.0 }
 0x60d   : > { %19026 = vpow2.f32 %v5494_v32  ;;  %v5450_v20 = vsub.f32 %v21112_v57, %v5396_v26 }
 0x60e   : > { %v5496_v24 = vmul.f32 1.442695, %v5447_v1 }
 0x60f   : > { %v21247_v61 = vpop.eup %19018  ;;  %v5502_v55 = vmul.f32 1.442695, %v5450_v20  ;;  %v5369_v19 = vpop.xlane.xlu0 %5368 }
 0x610   : > { %19028 = vpow2.f32 %v5496_v24  ;;  %v5441_v40 = vsub.f32 %v21118_v28, %v5369_v19  ;;  %5533 = vadd.xlane.f32.xlu0 %v5532_v0  ;;  %v5565_v38 = vsel %vm2133_vm3, %v21247_v61, 0.0 }
 0x611   : > { %19030 = vpow2.f32 %v5502_v55  ;;  %5566 = vadd.xlane.f32.xlu1 %v5565_v38 }
 0x612   : > { %v21254_v4 = vpop.eup %19020  ;;  %v5484_v57 = vmul.f32 1.442695, %v5441_v40 }
 0x613   : > { %v21256_v2 = vpop.eup %19022  ;;  %v5366_v7 = vpop.xlane.xlu0 %5365  ;;  %v5547_v59 = vsel %vm2133_vm3, %v21254_v4, 0.0 }
 0x614   : > { %v5408_v60 = vpop.xlane.xlu1 %5407  ;;  %19032 = vpow2.f32 %v5484_v57  ;;  %v5440_v14 = vsub.f32 %v21120_v48, %v5366_v7  ;;  %5548 = vadd.xlane.f32.xlu0 %v5547_v59  ;;  %v5562_v18 = vsel %vm2133_vm3, %v21256_v2, 0.0 }
 0x615   : > { %v5454_v28 = vsub.f32 %v21132_v5, %v5408_v60  ;;  %5563 = vadd.xlane.f32.xlu1 %v5562_v18 }
 0x616   : > { %v21264_v32 = vpop.eup %19024  ;;  %v5482_v22 = vmul.f32 1.442695, %v5440_v14 }
 0x617   : > { %v5510_v21 = vmul.f32 1.442695, %v5454_v28  ;;  %v21266_v1 = vpop.eup %19026  ;;  %v5399_v26 = vpop.xlane.xlu0 %5398  ;;  %v5544_v20 = vsel %vm2133_vm3, %v21264_v32, 0.0 }
 0x618   : > { %19034 = vpow2.f32 %v5482_v22  ;;  %v5451_v48 = vsub.f32 %v21110_v56, %v5399_v26  ;;  %5545 = vadd.xlane.f32.xlu0 %v5544_v20  ;;  %v5574_v5 = vsel %vm2133_vm3, %v21266_v1, 0.0 }
 0x619   : > { %19036 = vpow2.f32 %v5510_v21  ;;  %5575 = vadd.xlane.f32.xlu1 %v5574_v5 }
 0x61a   : > { %v21273_v24 = vpop.eup %19028  ;;  %v5504_v55 = vmul.f32 1.442695, %v5451_v48 }
 0x61b   : > { %v21275_v19 = vpop.eup %19030  ;;  %v5381_v0 = vpop.xlane.xlu0 %5380  ;;  %v5577_v40 = vsel %vm2133_vm3, %v21273_v24, 0.0 }
 0x61c   : > { %19038 = vpow2.f32 %v5504_v55  ;;  %v5445_v38 = vsub.f32 %v21130_v49, %v5381_v0  ;;  %v5390_v57 = vpop.xlane.xlu1 %5389  ;;  %5578 = vadd.xlane.f32.xlu0 %v5577_v40  ;;  %v5586_v56 = vsel %vm2133_vm3, %v21275_v19, 0.0 }
 0x61d   : > { %v5448_v7 = vsub.f32 %v21144_v44, %v5390_v57  ;;  %5587 = vadd.xlane.f32.xlu1 %v5586_v56 }
 0x61e   : > { %v21283_v60 = vpop.eup %19032  ;;  %v5492_v59 = vmul.f32 1.442695, %v5445_v38 }
 0x61f   : > { %v5498_v14 = vmul.f32 1.442695, %v5448_v7  ;;  %v5378_v28 = vpop.xlane.xlu0 %5377  ;;  %v5559_v18 = vsel %vm2133_vm3, %v21283_v60, 0.0 }
 0x620   : > { %19040 = vpow2.f32 %v5492_v59  ;;  %v5444_v22 = vsub.f32 %v21134_v45, %v5378_v28  ;;  %5560 = vadd.xlane.f32.xlu0 %v5559_v18  ;;  %v5420_v0 = vpop.xlane.xlu1 %5419 }
 0x621   : > { %19042 = vpow2.f32 %v5498_v14 }
 0x622   : > { %v21288_v49 = vpop.eup %19034  ;;  %v5490_v21 = vmul.f32 1.442695, %v5444_v22 }
 0x623   : > { %v21290_v26 = vpop.eup %19036  ;;  %v5411_v44 = vpop.xlane.xlu0 %5410  ;;  %v5556_v20 = vsel %vm2133_vm3, %v21288_v49, 0.0 }
 0x624   : > { %19044 = vpow2.f32 %v5490_v21  ;;  %v5455_v48 = vsub.f32 %v21128_v62, %v5411_v44  ;;  %5557 = vadd.xlane.f32.xlu0 %v5556_v20  ;;  %v5598_v5 = vsel %vm2133_vm3, %v21290_v26, 0.0  ;;  %v5458_v62 = vsub.f32 %v21152_v12, %v5420_v0 }
 0x625   : > { %5599 = vadd.xlane.f32.xlu1 %v5598_v5 }
 0x626   : > { %v21297_v45 = vpop.eup %19038  ;;  %v5512_v55 = vmul.f32 1.442695, %v5455_v48  ;;  %v5518_v21 = vmul.f32 1.442695, %v5458_v62 }
 0x627   : > { %v5393_v40 = vpop.xlane.xlu0 %5392  ;;  %v5589_v38 = vsel %vm2133_vm3, %v21297_v45, 0.0 }
 0x628   : > { %19046 = vpow2.f32 %v5512_v55  ;;  %v5449_v57 = vsub.f32 %v21142_v8, %v5393_v40  ;;  %5590 = vadd.xlane.f32.xlu0 %v5589_v38 }
 0x62a   : > { %v21302_v56 = vpop.eup %19040  ;;  %v5500_v7 = vmul.f32 1.442695, %v5449_v57 }
 0x62b   : > { %v21305_v59 = vpop.eup %19042  ;;  %v5423_v14 = vpop.xlane.xlu0 %5422  ;;  %v5571_v28 = vsel %vm2133_vm3, %v21302_v56, 0.0 }
 0x62c   : > { %19048 = vpow2.f32 %v5500_v7  ;;  %v5459_v18 = vsub.f32 %v21148_v42, %v5423_v14  ;;  %5572 = vadd.xlane.f32.xlu0 %v5571_v28  ;;  %v5580_v22 = vsel %vm2133_vm3, %v21305_v59, 0.0  ;;  %v21337_v28 = vpop.permute.xlu1 %18525 }
 0x62d   : > { %5581 = vadd.xlane.f32.xlu1 %v5580_v22 }
 0x62e   : > { %v21312_v8 = vpop.eup %19044  ;;  %v5520_v44 = vmul.f32 1.442695, %v5459_v18 }
 0x62f   : > { %v5405_v12 = vpop.xlane.xlu0 %5404  ;;  %v5568_v20 = vsel %vm2133_vm3, %v21312_v8, 0.0 }
 0x630   : > { %19050 = vpow2.f32 %v5520_v44  ;;  %v5453_v48 = vsub.f32 %v21158_v53, %v5405_v12  ;;  %5569 = vadd.xlane.f32.xlu0 %v5568_v20 }
 0x631   : > { %19052 = vpow2.f32 %v5518_v21 }
 0x632   : > { %v21317_v5 = vpop.eup %19046  ;;  %v5508_v42 = vmul.f32 1.442695, %v5453_v48 }
 0x633   : > { %v5601_v55 = vsel %vm2133_vm3, %v21317_v5, 0.0 }
 0x634   : > { %5602 = vadd.xlane.f32.xlu0 %v5601_v55  ;;  %19054 = vpow2.f32 %v5508_v42  ;;  %v21343_v42 = vpop.permute.xlu0 %18520 }
 0x636   : > { %v21321_v0 = vpop.eup %19048 }
 0x637   : > { %v5583_v40 = vsel %vm2133_vm3, %v21321_v0, 0.0 }
 0x638   : > { %5584 = vadd.xlane.f32.xlu0 %v5583_v40 }
 0x63a   : > { %v21325_v38 = vpop.eup %19050 }
 0x63b   : > { %v5613_v53 = vsel %vm2133_vm3, %v21325_v38, 0.0  ;;  %v21329_v57 = vpop.eup %19052 }
 0x63c   : > { %5614 = vadd.xlane.f32.xlu0 %v5613_v53  ;;  %v5610_v62 = vsel %vm2133_vm3, %v21329_v57, 0.0 }
 0x63e   : > { %v21333_v7 = vpop.eup %19054 }
 0x63f   : > { %v5595_v14 = vsel %vm2133_vm3, %v21333_v7, 0.0 }
 0x640   : > { %5611 = vadd.xlane.f32.xlu0 %v5610_v62 }
 0x644   : > { %5596 = vadd.xlane.f32.xlu0 %v5595_v14 }
 0x655   : > { %v5402_v18 = vpop.xlane.xlu1 %5401 }
 0x656   : > { %v5452_v22 = vsub.f32 %v21160_v30, %v5402_v18 }
 0x658   : > { %v5506_v21 = vmul.f32 1.442695, %v5452_v22 }
 0x659   : > { %v5414_v44 = vpop.xlane.xlu1 %5413 }
 0x65a   : > { %19056 = vpow2.f32 %v5506_v21  ;;  %v5456_v12 = vsub.f32 %v21168_v15, %v5414_v44 }
 0x65c   : > { %v5514_v20 = vmul.f32 1.442695, %v5456_v12 }
 0x65d   : > { %v21341_v48 = vpop.xlane.xlu1 %5425 }
 0x65e   : > { %19058 = vpow2.f32 %v5514_v20 }
 0x661   : > { %v5531_v55 = vpop.xlane.xlu1 %5530 }
 0x662   : > { %19060 = vrcp.f32 %v5531_v55 }
 0x664   : > { %v21345_v40 = vpop.eup %19056  ;;  %v5417_v53 = vpop.xlane.xlu0 %5416 }
 0x665   : > { %v5457_v62 = vsub.f32 %v21166_v51, %v5417_v53  ;;  %v5528_v14 = vpop.xlane.xlu1 %5527  ;;  %v5592_v30 = vsel %vm2133_vm3, %v21345_v40, 0.0 }
 0x666   : > { %19062 = vrcp.f32 %v5528_v14  ;;  %5593 = vadd.xlane.f32.xlu1 %v5592_v30  ;;  %v18497_v14 = vunpack.i.l.bf16 %v21182_v16 }
 0x667   : > { %v5516_v15 = vmul.f32 1.442695, %v5457_v62  ;;  %v18498_v62 = vunpack.i.h.bf16 %v21182_v16 }
 0x668   : > { %v21350_v18 = vpop.eup %19058  ;;  %v5429_v22 = vpop.xlane.xlu0 %5428 }
 0x669   : > { %19064 = vpow2.f32 %v5516_v15  ;;  %v5461_v21 = vsub.f32 %v21176_v63, %v5429_v22  ;;  %v5543_v44 = vpop.xlane.xlu1 %5542  ;;  %v5604_v12 = vsel %vm2133_vm3, %v21350_v18, 0.0 }
 0x66a   : > { %5605 = vadd.xlane.f32.xlu1 %v5604_v12  ;;  %19066 = vrcp.f32 %v5543_v44  ;;  %v17686_v44 = vpack.c.bf16 %v18498_v62, %v18497_v14 }
 0x66b   : > { %v5524_v20 = vmul.f32 1.442695, %v5461_v21 }
 0x66c   : > { %v19061_v55 = vpop.eup %19060 }
 0x66d   : > { %19068 = vpow2.f32 %v5524_v20  ;;  %v5540_v51 = vpop.xlane.xlu1 %5539  ;;  %v5655_v63 = vmul.f32 %v19061_v55, %v21203_v29  ;;  %v18508_v20 = vunpack.i.h.bf16 %v21186_v52 }
 0x66e   : > { %19070 = vrcp.f32 %v5540_v51  ;;  %v18507_v51 = vunpack.i.l.bf16 %v21186_v52 }
 0x670   : > { %v19063_v53 = vpop.eup %19062  ;;  %v17694_v62 = vpack.c.bf16 %v18508_v20, %v18507_v51  ;;  %v23508_v20 = vld [vmem:[#allocation35_spill] sm:$0xff] }
 0x671   : > { %v5555_v30 = vpop.xlane.xlu1 %5554  ;;  %v5654_v15 = vmul.f32 %v19063_v53, %v21208_v41 }
 0x672   : > { %19072 = vrcp.f32 %v5555_v30  ;;  %v18518_v30 = vunpack.i.h.bf16 %v21190_v37 }
 0x673   : > { %v21359_v22 = vpop.eup %19064  ;;  %16650 = vmatprep.mubr.msk.f32.mxu0 %vm2133_vm3, %v5654_v15 }
 0x674   : > { %16651 = vmatmul.mubr.msk.f32.vlgmr.msra.gmra.mrb[72].mxu0 %vm2133_vm3, %v5655_v63  ;;  %v5607_v21 = vsel %vm2133_vm3, %v21359_v22, 0.0  ;;  %v19067_v12 = vpop.eup %19066 }
 0x675   : > { %17681 = vmatpush3.bf16.msra.mxu0 %v20998_v17  ;;  %5608 = vadd.xlane.f32.xlu0 %v5607_v21  ;;  %v5552_v16 = vpop.xlane.xlu1 %5551  ;;  %v5659_v17 = vmul.f32 %v19067_v12, %v21214_v39 }
 0x676   : > { %17687 = vmatprep.subr.bf16.mxu0 %v17686_v44  ;;  %19074 = vrcp.f32 %v5552_v16 }
 0x677   : > { %v21366_v41 = vpop.eup %19068 }
 0x678   : > { %v19071_v29 = vpop.eup %19070  ;;  %v5619_v55 = vsel %vm2133_vm3, %v21366_v41, 0.0 }
 0x679   : > { %5620 = vadd.xlane.f32.xlu0 %v5619_v55  ;;  %v5658_v53 = vmul.f32 %v19071_v29, %v21220_v23  ;;  %v18517_v23 = vunpack.i.l.bf16 %v21190_v37  ;;  %v5460_v37 = vsub.f32 %v21178_v31, %v21341_v48  ;;  %v23507_v31 = vld [vmem:[#allocation33_spill] sm:$0xff] }
 0x67b   : > { %18535 = vrot.lane.b32.xlu1 %v20013_v47, %s19553_s13  ;;  %16664 = vmatprep.mubr.msk.f32.mxu0 %vm2133_vm3, %v5658_v53  ;;  %v21388_v63 = vpack.c.bf16 %v18518_v30, %v18517_v23 }
 0x67c   : > { %16665 = vmatmul.mubr.msk.f32.vlgmr.msra.gmra.mrb[74].mxu0 %vm2133_vm3, %v5659_v17  ;;  %v19073_v14 = vpop.eup %19072 }
 0x67d   : > { %17689 = vmatpush3.bf16.msra.mxu0 %v17686_v44  ;;  %v5663_v15 = vmul.f32 %v19073_v14, %v21224_v25  ;;  %v5522_v25 = vmul.f32 1.442695, %v5460_v37  ;;  %v18503_v14 = vunpack.i.h.bf16 %v21180_v36  ;;  %v23509_v37 = vld [vmem:[#allocation36_spill] sm:$0xff] }
 0x67e   : > { %17695 = vmatprep.subr.bf16.mxu0 %v17694_v62 }
 0x67f   : > { %18540 = vrot.lane.b32.xlu1 %v23447_v46, %s19553_s13  ;;  %19076 = vpow2.f32 %v5522_v25 }
 0x680   : > { %v19075_v52 = vpop.eup %19074 }
 0x681   : > { %v5662_v39 = vmul.f32 %v19075_v52, %v21228_v43  ;;  %v23506_v43 = vld [vmem:[#allocation13_spill] sm:$0xff]  ;;  %v18502_v52 = vunpack.i.l.bf16 %v21180_v36  ;;  %v18528_v36 = vunpack.i.h.bf16 %v21337_v28 }
 0x683   : > { %18545 = vrot.lane.b32.xlu1 %v23429_v3, %s19553_s13  ;;  %16678 = vmatprep.mubr.msk.f32.mxu0 %vm2133_vm3, %v5662_v39 }
 0x684   : > { %16679 = vmatmul.mubr.msk.f32.vlgmr.msra.gmra.mrb[76].mxu0 %vm2133_vm3, %v5663_v15 }
 0x685   : > { %17697 = vmatpush3.bf16.msra.mxu0 %v17694_v62 }
 0x686   : > { %17703 = vmatprep.subr.bf16.mxu0 %v21388_v63 }
 0x689   : > { %v21403_v29 = vpop.eup %19076 }
 0x68a   : > { %v5616_v53 = vsel %vm2133_vm3, %v21403_v29, 0.0 }
 0x68f   : > { %18530 = vrot.lane.b32.xlu0 %v23437_v27, %s19553_s13 }
 0x693   : > { %18555 = vrot.lane.b32.xlu0 %v23463_v35, %s19554_s9 }
 0x697   : > { %7720 = vrot.lane.b32.xlu0 %v23506_v43, %s19555_s30 }
 0x699   : > { %v5537_v21 = vpop.xlane.xlu0 %5536 }
 0x69a   : > { %19078 = vrcp.f32 %v5537_v21  ;;  %v17690_v21 = vpack.c.bf16 %v18503_v14, %v18502_v52 }
 0x69b   : > { %18565 = vrot.lane.b32.xlu0 %v23465_v50, %s19554_s9 }
 0x69d   : > { %v5534_v44 = vpop.xlane.xlu0 %5533 }
 0x69e   : > { %19080 = vrcp.f32 %v5534_v44  ;;  %v5567_v16 = vpop.xlane.xlu1 %5566 }
 0x69f   : > { %7813 = vrot.lane.b32.xlu0 %v23507_v31, %s19555_s30  ;;  %19082 = vrcp.f32 %v5567_v16  ;;  %v18527_v16 = vunpack.i.l.bf16 %v21337_v28  ;;  %v18512_v28 = vunpack.i.l.bf16 %v21184_v6 }
 0x6a1   : > { %v5549_v48 = vpop.xlane.xlu0 %5548 }
 0x6a2   : > { %v5564_v12 = vpop.xlane.xlu1 %5563 }
 0x6a3   : > { %19084 = vrcp.f32 %v5564_v12  ;;  %7902 = vrot.lane.b32.xlu0 %v23508_v20, %s19555_s30 }
 0x6a4   : > { %19086 = vrcp.f32 %v5549_v48  ;;  %v19079_v17 = vpop.eup %19078 }
 0x6a5   : > { %v5546_v51 = vpop.xlane.xlu0 %5545  ;;  %v5657_v15 = vmul.f32 %v19079_v17, %v21239_v34  ;;  %v17710_v17 = vpack.c.bf16 %v18528_v36, %v18527_v16 }
 0x6a6   : > { %19088 = vrcp.f32 %v5546_v51  ;;  %v5576_v55 = vpop.xlane.xlu1 %5575 }
 0x6a7   : > { %19090 = vrcp.f32 %v5576_v55  ;;  %18575 = vrot.lane.b32.xlu0 %v23466_v33, %s19554_s9  ;;  %5617 = vadd.xlane.f32.xlu1 %v5616_v53  ;;  %v18513_v55 = vunpack.i.h.bf16 %v21184_v6 }
 0x6a8   : > { %v19081_v62 = vpop.eup %19080 }
 0x6a9   : > { %v5579_v30 = vpop.xlane.xlu0 %5578  ;;  %v5656_v23 = vmul.f32 %v19081_v62, %v21243_v54  ;;  %v19083_v25 = vpop.eup %19082 }
 0x6aa   : > { %19092 = vrcp.f32 %v5579_v30  ;;  %v5588_v39 = vpop.xlane.xlu1 %5587  ;;  %v5667_v12 = vmul.f32 %v19083_v25, %v21247_v61  ;;  %v18522_v25 = vunpack.i.l.bf16 %v21343_v42 }
 0x6ab   : > { %19094 = vrcp.f32 %v5588_v39  ;;  %7995 = vrot.lane.b32.xlu0 %v23509_v37, %s19555_s30  ;;  %16657 = vmatprep.mubr.msk.f32.mxu1 %vm2133_vm3, %v5656_v23 }
 0x6ac   : > { %16658 = vmatmul.mubr.msk.f32.vlgmr.msra.gmra.mrb[56].mxu1 %vm2133_vm3, %v5657_v15 }
 0x6ad   : > { %v19085_v44 = vpop.eup %19084  ;;  %17685 = vmatpush3.bf16.msra.mxu1 %v21009_v9  ;;  %v5561_v54 = vpop.xlane.xlu0 %5560 }
 0x6ae   : > { %17691 = vmatprep.subr.bf16.mxu1 %v17690_v21  ;;  %v5666_v34 = vmul.f32 %v19085_v44, %v21256_v2  ;;  %v19087_v48 = vpop.eup %19086  ;;  %19096 = vrcp.f32 %v5561_v54 }
 0x6af   : > { %8084 = vrot.lane.b32.xlu0 %v20171_v13, %s19555_s30  ;;  %v5661_v14 = vmul.f32 %v19087_v48, %v21254_v4 }
 0x6b0   : > { %v19089_v51 = vpop.eup %19088  ;;  %16692 = vmatprep.mubr.msk.f32.mxu0 %vm2133_vm3, %v5666_v34  ;;  %v23512_v34 = vld [vmem:[#allocation21_spill] sm:$0xff] }
 0x6b1   : > { %v19091_v53 = vpop.eup %19090  ;;  %v5558_v9 = vpop.xlane.xlu0 %5557  ;;  %16693 = vmatmul.mubr.msk.f32.vlgmr.msra.gmra.mrb[78].mxu0 %vm2133_vm3, %v5667_v12  ;;  %v5660_v2 = vmul.f32 %v19089_v51, %v21264_v32  ;;  %v17698_v32 = vpack.c.bf16 %v18513_v55, %v18512_v28  ;;  %v23514_v55 = vld [vmem:[#allocation49_spill] sm:$0xff] }
 0x6b2   : > { %19098 = vrcp.f32 %v5558_v9  ;;  %17705 = vmatpush3.bf16.msra.mxu0 %v21388_v63  ;;  %v5600_v62 = vpop.xlane.xlu1 %5599  ;;  %v5670_v61 = vmul.f32 %v19091_v53, %v21266_v1  ;;  %v23515_v53 = vld [vmem:[#allocation30_spill] sm:$0xff] }
 0x6b3   : > { %17711 = vmatprep.subr.bf16.mxu0 %v17710_v17  ;;  %18585 = vrot.lane.b32.xlu0 %v19940_v11, %s19554_s9  ;;  %19100 = vrcp.f32 %v5600_v62 }
 0x6b4   : > { %v19093_v6 = vpop.eup %19092  ;;  %16671 = vmatprep.mubr.msk.f32.mxu1 %vm2133_vm3, %v5660_v2  ;;  %16706 = vmatprep.mubr.msk.f32.mxu0 %vm2133_vm3, %v5670_v61  ;;  %v23516_v2 = vld [vmem:[#allocation20_spill] sm:$0xff] }
 0x6b5   : > { %v19095_v52 = vpop.eup %19094  ;;  %16672 = vmatmul.mubr.msk.f32.vlgmr.msra.gmra.mrb[58].mxu1 %vm2133_vm3, %v5661_v14  ;;  %v5591_v63 = vpop.xlane.xlu0 %5590  ;;  %v5671_v30 = vmul.f32 %v19093_v6, %v21273_v24  ;;  %v23510_v24 = vld [vmem:[#allocation43_spill] sm:$0xff] }
 0x6b6   : > { %17693 = vmatpush3.bf16.msra.mxu1 %v17690_v21  ;;  %19102 = vrcp.f32 %v5591_v63  ;;  %v5674_v1 = vmul.f32 %v19095_v52, %v21275_v19  ;;  %v18523_v19 = vunpack.i.h.bf16 %v21343_v42  ;;  %v23511_v21 = vld [vmem:[#allocation14_spill] sm:$0xff]  ;;  %v23513_v42 = vld [vmem:[#allocation29_spill] sm:$0xff]  ;;  %v23518_v14 = vld [vmem:[#allocation23_spill] sm:$0xff] }
 0x6b7   : > { %17699 = vmatprep.subr.bf16.mxu1 %v17698_v32  ;;  %8177 = vrot.lane.b32.xlu0 %v23425_v10, %s19555_s30  ;;  %v23519_v52 = vld [vmem:[#allocation31_spill] sm:$0xff] }
 0x6b8   : > { %16707 = vmatmul.mubr.msk.f32.vlgmr.msra.gmra.mrb[80].mxu0 %vm2133_vm3, %v5671_v30  ;;  %18550 = vrot.lane.b32.xlu1 %v23456_v58, %s19553_s13  ;;  %v19097_v39 = vpop.eup %19096  ;;  %v17706_v12 = vpack.c.bf16 %v18523_v19, %v18522_v25  ;;  %v23522_v30 = vld [vmem:[#allocation40_spill] sm:$0xff]  ;;  %v23531_v25 = vld [vmem:[#allocation47_spill] sm:$0xff]  ;;  %s19472_s13 = scalar_lea.vmem %s23162_s15, 4096 }
 0x6b9   : > { %17713 = vmatpush3.bf16.msra.mxu0 %v17710_v17  ;;  %16720 = vmatprep.mubr.msk.f32.mxu0 %vm2133_vm3, %v5674_v1  ;;  %v5573_v4 = vpop.xlane.xlu0 %5572  ;;  %v5665_v16 = vmul.f32 %v19097_v39, %v21283_v60  ;;  %v23524_v1 = vld [vmem:[#allocation37_spill] sm:$0xff]  ;;  %v23528_v39 = vld [vmem:[#allocation19_spill] sm:$0xff]  ;;  %v23530_v19 = vld [vmem:[#allocation56_spill] sm:$0xff]  ;;  %p19473_p11 = scmp.ne.s32.totalorder %s23162_s15, %s19472_s13 }
 0x6ba   : > { %v5582_v23 = vpop.xlane.xlu1 %5581  ;;  %19104 = vrcp.f32 %v5573_v4  ;;  %v23525_v4 = vld [vmem:[#allocation54_spill] sm:$0xff] }
 0x6bb   : > { %8266 = vrot.lane.b32.xlu0 %v23510_v24, %s19555_s30  ;;  %19106 = vrcp.f32 %v5582_v23  ;;  %v23526_v23 = vld [vmem:[#allocation39_spill] sm:$0xff]  ;;  %p19474_p2 = pnand %p19473_p11, %p23658_p0 }
 0x6bc   : > { %v19099_v15 = vpop.eup %19098  ;;  %18560 = vrot.lane.b32.xlu1 %v23511_v21, %s19554_s9 }
 0x6bd   : > { %v5570_v44 = vpop.xlane.xlu0 %5569  ;;  %v5664_v36 = vmul.f32 %v19099_v15, %v21288_v49  ;;  %v19101_v54 = vpop.eup %19100  ;;  %v23529_v15 = vld [vmem:[#allocation45_spill] sm:$0xff]  ;;  %p19475_p3 = pneg %p19474_p2 }
 0x6be   : > { %19108 = vrcp.f32 %v5570_v44  ;;  %v5678_v60 = vmul.f32 %v19101_v54, %v21290_v26  ;;  %v23517_v26 = vld [vmem:[#allocation16_spill] sm:$0xff]  ;;  %v23534_v54 = vld [vmem:[#allocation57_spill] sm:$0xff] }
 0x6bf   : > { %18595 = vrot.lane.b32.xlu0 %v23512_v34, %s19554_s9  ;;  %16685 = vmatprep.mubr.msk.f32.mxu1 %vm2133_vm3, %v5664_v36  ;;  %v23532_v44 = vld [vmem:[#allocation48_spill] sm:$0xff]  ;;  %v23533_v36 = vld [vmem:[#allocation22_spill] sm:$0xff] }
 0x6c0   : > { %v19103_v48 = vpop.eup %19102  ;;  %16686 = vmatmul.mubr.msk.f32.vlgmr.msra.gmra.mrb[60].mxu1 %vm2133_vm3, %v5665_v16  ;;  %7722 = vrot.lane.b32.xlu1 %v23513_v42, %s19555_s30 }
 0x6c1   : > { %17701 = vmatpush3.bf16.msra.mxu1 %v17698_v32  ;;  %v5603_v51 = vpop.xlane.xlu0 %5602  ;;  %v5675_v49 = vmul.f32 %v19103_v48, %v21297_v45  ;;  %v23520_v32 = vld [vmem:[#allocation52_spill] sm:$0xff]  ;;  %v23535_v48 = vld [vmem:[#allocation38_spill] sm:$0xff] }
 0x6c2   : > { %17707 = vmatprep.subr.bf16.mxu1 %v17706_v12 }
 0x6c3   : > { %8359 = vrot.lane.b32.xlu0 %v23514_v55, %s19555_s30  ;;  %16721 = vmatmul.mubr.msk.f32.vlgmr.msra.gmra.mrb[82].mxu0 %vm2133_vm3, %v5675_v49 }
 0x6c4   : > { %7811 = vrot.lane.b32.xlu1 %v23515_v53, %s19555_s30  ;;  %16734 = vmatprep.mubr.msk.f32.mxu0 %vm2133_vm3, %v5678_v60  ;;  %v19105_v9 = vpop.eup %19104  ;;  %v23536_v60 = vld [vmem:[#allocation51_spill] sm:$0xff] }
 0x6c5   : > { %v5585_v28 = vpop.xlane.xlu0 %5584  ;;  %v19107_v17 = vpop.eup %19106  ;;  %v5669_v61 = vmul.f32 %v19105_v9, %v21302_v56  ;;  %v23521_v56 = vld [vmem:[#allocation32_spill] sm:$0xff] }
 0x6c6   : > { %19110 = vrcp.f32 %v5585_v28  ;;  %v5672_v6 = vmul.f32 %v19107_v17, %v21305_v59  ;;  %v23523_v59 = vld [vmem:[#allocation18_spill] sm:$0xff] }
 0x6c7   : > { %8448 = vrot.lane.b32.xlu0 %v23516_v2, %s19555_s30 }
 0x6c8   : > { %v19109_v45 = vpop.eup %19108  ;;  %18570 = vrot.lane.b32.xlu1 %v23517_v26, %s19554_s9 }
 0x6c9   : > { %v5668_v62 = vmul.f32 %v19109_v45, %v21312_v8  ;;  %v5615_v16 = vpop.xlane.xlu0 %5614 }
 0x6cb   : > { %18605 = vrot.lane.b32.xlu0 %v23518_v14, %s19554_s9  ;;  %16699 = vmatprep.mubr.msk.f32.mxu1 %vm2133_vm3, %v5668_v62  ;;  %v23537_v62 = vld [vmem:[#allocation42_spill] sm:$0xff] }
 0x6cc   : > { %16700 = vmatmul.mubr.msk.f32.vlgmr.msra.gmra.mrb[62].mxu1 %vm2133_vm3, %v5669_v61  ;;  %7904 = vrot.lane.b32.xlu1 %v23519_v52, %s19555_s30 }
 0x6cd   : > { %17709 = vmatpush3.bf16.msra.mxu1 %v17706_v12  ;;  %16713 = vmatprep.mubr.msk.f32.mxu1 %vm2133_vm3, %v5672_v6  ;;  %v5612_v12 = vpop.xlane.xlu0 %5611 }
 0x6cf   : > { %8541 = vrot.lane.b32.xlu0 %v23520_v32, %s19555_s30 }
 0x6d0   : > { %v19111_v8 = vpop.eup %19110  ;;  %7993 = vrot.lane.b32.xlu1 %v23521_v56, %s19555_s30  ;;  %v23546_v56 = vld [vmem:[#allocation64_spill] sm:$0xff] }
 0x6d1   : > { %v5673_v63 = vmul.f32 %v19111_v8, %v21321_v0  ;;  %v23527_v0 = vld [vmem:[#allocation44_spill] sm:$0xff] }
 0x6d3   : > { %8630 = vrot.lane.b32.xlu0 %v23522_v30, %s19555_s30  ;;  %16714 = vmatmul.mubr.msk.f32.vlgmr.msra.gmra.mrb[64].mxu1 %vm2133_vm3, %v5673_v63 }
 0x6d4   : > { %18580 = vrot.lane.b32.xlu1 %v23523_v59, %s19554_s9 }
 0x6d7   : > { %18615 = vrot.lane.b32.xlu0 %v20013_v47, %s19554_s9 }
 0x6d8   : > { %8086 = vrot.lane.b32.xlu1 %v23524_v1, %s19555_s30 }
 0x6db   : > { %8723 = vrot.lane.b32.xlu0 %v23525_v4, %s19555_s30 }
 0x6dc   : > { %8175 = vrot.lane.b32.xlu1 %v23526_v23, %s19555_s30 }
 0x6df   : > { %8812 = vrot.lane.b32.xlu0 %v23527_v0, %s19555_s30 }
 0x6e0   : > { %18590 = vrot.lane.b32.xlu1 %v23528_v39, %s19554_s9 }
 0x6e3   : > { %18625 = vrot.lane.b32.xlu0 %v23429_v3, %s19554_s9 }
 0x6e4   : > { %8268 = vrot.lane.b32.xlu1 %v23529_v15, %s19555_s30 }
 0x6e7   : > { %8905 = vrot.lane.b32.xlu0 %v23530_v19, %s19555_s30  ;;  %v23538_v19 = vld [vmem:[#allocation53_spill] sm:$0xff] }
 0x6e8   : > { %8357 = vrot.lane.b32.xlu1 %v23531_v25, %s19555_s30 }
 0x6eb   : > { %8994 = vrot.lane.b32.xlu0 %v23532_v44, %s19555_s30 }
 0x6ec   : > { %18600 = vrot.lane.b32.xlu1 %v23533_v36, %s19554_s9 }
 0x6ef   : > { %9085 = vrot.lane.b32.xlu0 %v23534_v54, %s19555_s30 }
 0x6f0   : > { %8450 = vrot.lane.b32.xlu1 %v23535_v48, %s19555_s30 }
 0x6f3   : > { %18640 = vrot.lane.b32.xlu0 %v23511_v21, %s19556_s11  ;;  %v5594_v49 = vpop.xlane.xlu1 %5593 }
 0x6f4   : > { %19112 = vrcp.f32 %v5594_v49  ;;  %8539 = vrot.lane.b32.xlu1 %v23536_v60, %s19555_s30 }
 0x6f5   : > { %19114 = vrcp.f32 %v5603_v51  ;;  %v5597_v51 = vpop.xlane.xlu0 %5596 }
 0x6f6   : > { %19116 = vrcp.f32 %v5612_v12 }
 0x6f7   : > { %18655 = vrot.lane.b32.xlu0 %v23466_v33, %s19556_s11  ;;  %v5606_v28 = vpop.xlane.xlu1 %5605  ;;  %19118 = vrcp.f32 %v5615_v16 }
 0x6f8   : > { %18610 = vrot.lane.b32.xlu1 %v23437_v27, %s19554_s9  ;;  %19120 = vrcp.f32 %v5597_v51 }
 0x6f9   : > { %19122 = vrcp.f32 %v5606_v28  ;;  %v23540_v28 = vld [vmem:[#allocation55_spill] sm:$0xff] }
 0x6fb   : > { %18665 = vrot.lane.b32.xlu0 %v19940_v11, %s19556_s11  ;;  %v18536_v9 = vpop.permute.xlu1 %18535 }
 0x6fc   : > { %v18538_v17 = vunpack.i.h.bf16 %v18536_v9  ;;  %v18537_v45 = vunpack.i.l.bf16 %v18536_v9  ;;  %8632 = vrot.lane.b32.xlu1 %v23537_v62, %s19555_s30 }
 0x6fe   : > { %v19113_v61 = vpop.eup %19112  ;;  %v17718_v6 = vpack.c.bf16 %v18538_v17, %v18537_v45 }
 0x6ff   : > { %v19115_v8 = vpop.eup %19114  ;;  %18675 = vrot.lane.b32.xlu0 %v23512_v34, %s19556_s11  ;;  %v18541_v63 = vpop.permute.xlu1 %18540  ;;  %v5676_v12 = vmul.f32 %v19113_v61, %v21345_v40 }
 0x700   : > { %v19117_v49 = vpop.eup %19116  ;;  %8721 = vrot.lane.b32.xlu1 %v23538_v19, %s19555_s30  ;;  %17719 = vmatprep.subr.bf16.mxu0 %v17718_v6  ;;  %v5679_v16 = vmul.f32 %v19115_v8, %v21317_v5  ;;  %v23539_v5 = vld [vmem:[#allocation46_spill] sm:$0xff]  ;;  %v18543_v8 = vunpack.i.h.bf16 %v18541_v63 }
 0x701   : > { %16727 = vmatprep.mubr.msk.f32.mxu1 %vm2133_vm3, %v5676_v12  ;;  %17721 = vmatpush3.bf16.msra.mxu0 %v17718_v6  ;;  %v5682_v17 = vmul.f32 %v19117_v49, %v21329_v57  ;;  %v19119_v6 = vpop.eup %19118  ;;  %v673_v57 = vld [vmem:[#allocation7 + $0x8] sm:$0xff]  ;;  %v18542_v12 = vunpack.i.l.bf16 %v18541_v63 }
 0x702   : > { %v5609_v9 = vpop.xlane.xlu0 %5608 }
 0x703   : > { %v18546_v0 = vpop.permute.xlu1 %18545  ;;  %19124 = vrcp.f32 %v5609_v9  ;;  %v19121_v9 = vpop.eup %19120 }
 0x704   : > { %v18548_v45 = vunpack.i.h.bf16 %v18546_v0  ;;  %v18547_v4 = vunpack.i.l.bf16 %v18546_v0  ;;  %18620 = vrot.lane.b32.xlu1 %v23447_v46, %s19554_s9  ;;  %16735 = vmatmul.mubr.msk.f32.vlgmr.msra.gmra.mrb[84].mxu0 %vm2133_vm3, %v5679_v16  ;;  %v5683_v0 = vmul.f32 %v19119_v6, %v21325_v38  ;;  %v5677_v38 = vmul.f32 %v19121_v9, %v21333_v7  ;;  %v23541_v6 = vld [vmem:[#allocation50_spill] sm:$0xff]  ;;  %v672_v7 = vld [vmem:[#allocation7] sm:$0xff] }
 0x705   : > { %16748 = vmatprep.mubr.msk.f32.mxu0 %vm2133_vm3, %v5682_v17  ;;  %v17722_v17 = vpack.c.bf16 %v18543_v8, %v18542_v12 }
 0x706   : > { %v5621_v40 = vpop.xlane.xlu0 %5620  ;;  %v17726_v61 = vpack.c.bf16 %v18548_v45, %v18547_v4  ;;  %v19123_v45 = vpop.eup %19122 }
 0x707   : > { %19126 = vrcp.f32 %v5621_v40 }
 0x708   : > { %8814 = vrot.lane.b32.xlu1 %v23539_v5, %s19555_s30  ;;  %17727 = vmatprep.subr.bf16.mxu0 %v17726_v61 }
 0x709   : > { %17729 = vmatpush3.bf16.msra.mxu0 %v17726_v61  ;;  %v5680_v61 = vmul.f32 %v19123_v45, %v21350_v18 }
 0x70a   : > { %v18531_v51 = vpop.permute.xlu0 %18530  ;;  %16758 = vmatprep.subr.mxu0 %v673_v57 }
 0x70b   : > { %v18533_v49 = vunpack.i.h.bf16 %v18531_v51  ;;  %v18532_v16 = vunpack.i.l.bf16 %v18531_v51 }
 0x70c   : > { %8903 = vrot.lane.b32.xlu1 %v23540_v28, %s19555_s30  ;;  %16749 = vmatmul.mubr.msk.f32.vlgmr.msra.gmra.mrb[86].mxu0 %vm2133_vm3, %v5683_v0  ;;  %v23542_v0 = vld [vmem:[#allocation58_spill] sm:$0xff] }
 0x70d   : > { %v17714_v4 = vpack.c.bf16 %v18533_v49, %v18532_v16  ;;  %16759 = vmatpush3.msra.mxu0 %v673_v57  ;;  %v19125_v63 = vpop.eup %19124 }
 0x70e   : > { %v5681_v51 = vmul.f32 %v19125_v63, %v21359_v22  ;;  %16808 = vmatprep.subr.mxu0 %v672_v7  ;;  %v18556_v16 = vpop.permute.xlu0 %18555 }
 0x70f   : > { %17715 = vmatprep.subr.bf16.mxu1 %v17714_v4  ;;  %v18558_v45 = vunpack.i.h.bf16 %v18556_v16 }
 0x710   : > { %18630 = vrot.lane.b32.xlu1 %v23456_v58, %s19554_s9  ;;  %17717 = vmatpush3.bf16.msra.mxu1 %v17714_v4  ;;  %s19560_s9 = smov [#allocation8]  }
 0x711   : > { %17723 = vmatprep.subr.bf16.mxu1 %v17722_v17  ;;  %v19127_v9 = vpop.eup %19126 }
 0x713   : > { %16728 = vmatmul.mubr.msk.f32.vlgmr.msra.gmra.mrb[66].mxu1 %vm2133_vm3, %v5677_v38  ;;  %v18557_v38 = vunpack.i.l.bf16 %v18556_v16 }
 0x714   : > { %8996 = vrot.lane.b32.xlu1 %v23541_v6, %s19555_s30  ;;  %17725 = vmatpush3.bf16.msra.mxu1 %v17722_v17 }
 0x715   : > { %16741 = vmatprep.mubr.msk.f32.mxu1 %vm2133_vm3, %v5680_v61  ;;  %v5685_v61 = vmul.f32 %v19127_v9, %v21366_v41 }
 0x717   : > { %16742 = vmatmul.mubr.msk.f32.vlgmr.msra.gmra.mrb[68].mxu1 %vm2133_vm3, %v5681_v51  ;;  %v21580_v51 = vpack.c.bf16 %v18558_v45, %v18557_v38 }
 0x718   : > { %9087 = vrot.lane.b32.xlu1 %v23542_v0, %s19555_s30  ;;  %s19476_s30 = sshll.u32 %s19560_s9, 4  ;;  %s19477_s30 = int_to_ptr.vmem [resolvable:$false] %s19476_s30 }
 0x719   : > { %p19479_p7 = scmp.lt.s32.totalorder %s23162_s15, %s19477_s30 }
 0x71c   : > { %18635 = vrot.lane.b32.xlu1 %v23463_v35, %s19556_s11 }
 0x720   : > { %18645 = vrot.lane.b32.xlu1 %v23465_v50, %s19556_s11 }
 0x724   : > { %18650 = vrot.lane.b32.xlu1 %v23517_v26, %s19556_s11 }
 0x728   : > { %18660 = vrot.lane.b32.xlu1 %v23523_v59, %s19556_s11  ;;  %v23545_v59 = vld [vmem:[#allocation59_spill] sm:$0xff] }
 0x72c   : > { %18670 = vrot.lane.b32.xlu1 %v23528_v39, %s19556_s11 }
 0x734   : > { %v5618_v18 = vpop.xlane.xlu1 %5617 }
 0x735   : > { %19128 = vrcp.f32 %v5618_v18 }
 0x738   : > { %v18551_v22 = vpop.permute.xlu1 %18550 }
 0x739   : > { %v18553_v8 = vunpack.i.h.bf16 %v18551_v22  ;;  %v18552_v12 = vunpack.i.l.bf16 %v18551_v22 }
 0x73b   : > { %v17730_v49 = vpack.c.bf16 %v18553_v8, %v18552_v12 }
 0x73c   : > { %v21573_v4 = vpop.permute.xlu1 %18560 }
 0x73d   : > { %17731 = vmatprep.subr.bf16.mxu1 %v17730_v49 }
 0x73e   : > { %17733 = vmatpush3.bf16.msra.mxu1 %v17730_v49 }
 0x73f   : > { %v19129_v17 = vpop.eup %19128  ;;  %18054 = vmatprep.subr.mxu1 %v673_v57 }
 0x740   : > { %v21575_v63 = vpop.permute.xlu1 %7722  ;;  %v5684_v40 = vmul.f32 %v19129_v17, %v21403_v29 }
 0x742   : > { %16755 = vmatprep.mubr.msk.f32.mxu1 %vm2133_vm3, %v5684_v40 }
 0x743   : > { %16756 = vmatmul.mubr.msk.f32.vlgmr.msra.gmra.mrb[70].mxu1 %vm2133_vm3, %v5685_v61 }
 0x744   : > { %18055 = vmatpush3.msra.mxu1 %v673_v57  ;;  %v21583_v18 = vpop.permute.xlu1 %7811 }
 0x745   : > { %17736 = vmatprep.subr.msk.bf16.mxu1 %vm20122_vm2, %v21580_v51 }
 0x747   : > { %v16652_v8 = vpop.f32.mrb[72].mxu0 }
 0x748   : > { %v5764_v12 = vpop.f32.mrb[73].mxu0  ;;  %v21588_v49 = vpop.permute.xlu1 %18570 }
 0x749   : > { %16760 = vmatprep.mubr.msk.f32.mxu0 %vm682_vm1, %v5764_v12 }
 0x74a   : > { %16761 = vmatmul.mubr.msk.f32.vlgmr.msra.gmra.mrb[88].mxu0 %vm682_vm1, %v16652_v8 }
 0x74b   : > { %16809 = vmatpush3.msra.mxu0 %v672_v7 }
 0x74c   : > { %v21592_v41 = vpop.permute.xlu1 %7904 }
 0x74f   : > { %v16666_v29 = vpop.f32.mrb[74].mxu0 }
 0x750   : > { %v5938_v16 = vpop.f32.mrb[75].mxu0  ;;  %v21594_v57 = vpop.permute.xlu1 %7993 }
 0x754   : > { %v21596_v9 = vpop.permute.xlu1 %18580 }
 0x757   : > { %v16680_v17 = vpop.f32.mrb[76].mxu0 }
 0x758   : > { %v6112_v45 = vpop.f32.mrb[77].mxu0  ;;  %v21598_v38 = vpop.permute.xlu1 %8086 }
 0x75c   : > { %v21600_v40 = vpop.permute.xlu1 %8175 }
 0x760   : > { %v21602_v61 = vpop.permute.xlu1 %18590 }
 0x764   : > { %v21604_v12 = vpop.permute.xlu1 %8268 }
 0x768   : > { %v21606_v8 = vpop.permute.xlu1 %8357 }
 0x76c   : > { %v21608_v7 = vpop.permute.xlu1 %18600 }
 0x770   : > { %v21610_v0 = vpop.permute.xlu1 %8450 }
 0x774   : > { %v21612_v6 = vpop.permute.xlu1 %8539 }
 0x778   : > { %v21614_v54 = vpop.permute.xlu1 %18610 }
 0x77c   : > { %v21616_v44 = vpop.permute.xlu1 %8632 }
 0x77f   : > { %v16659_v30 = vpop.f32.mrb[56].mxu1 }
 0x780   : > { %v5851_v28 = vpop.f32.mrb[57].mxu1  ;;  %v21618_v32 = vpop.permute.xlu1 %8721 }
 0x781   : > { %16763 = vmatprep.mubr.msk.f32.mxu0 %vm682_vm1, %v5851_v28 }
 0x782   : > { %16764 = vmatmul.mubr.msk.f32.gmra.mrb[90].mxu0 %vm682_vm1, %v16659_v30 }
 0x783   : > { %16766 = vmatprep.mubr.msk.f32.mxu0 %vm682_vm1, %v5938_v16 }
 0x784   : > { %v16694_v5 = vpop.f32.mrb[78].mxu0  ;;  %v21623_v2 = vpop.permute.xlu1 %18620 }
 0x785   : > { %v6286_v19 = vpop.f32.mrb[79].mxu0 }
 0x786   : > { %16767 = vmatmul.mubr.msk.f32.gmra.mrb[92].mxu0 %vm682_vm1, %v16666_v29 }
 0x788   : > { %v16673_v55 = vpop.f32.mrb[58].mxu1  ;;  %v21626_v62 = vpop.permute.xlu1 %8814 }
 0x789   : > { %v6025_v15 = vpop.f32.mrb[59].mxu1 }
 0x78a   : > { %16769 = vmatprep.mubr.msk.f32.mxu0 %vm682_vm1, %v6025_v15 }
 0x78b   : > { %v16708_v60 = vpop.f32.mrb[80].mxu0  ;;  %16770 = vmatmul.mubr.msk.f32.gmra.mrb[94].mxu0 %vm682_vm1, %v16673_v55 }
 0x78c   : > { %v6460_v28 = vpop.f32.mrb[81].mxu0  ;;  %16772 = vmatprep.mubr.msk.f32.mxu0 %vm682_vm1, %v6112_v45  ;;  %v21631_v30 = vpop.permute.xlu1 %8903  ;;  %v23544_v45 = vld [vmem:[#allocation27_spill] sm:$0xff] }
 0x78f   : > { %16773 = vmatmul.mubr.msk.f32.gmra.mrb[96].mxu0 %vm682_vm1, %v16680_v17 }
 0x790   : > { %v21634_v16 = vpop.permute.xlu1 %18630 }
 0x793   : > { %v16687_v39 = vpop.f32.mrb[60].mxu1 }
 0x794   : > { %v6199_v29 = vpop.f32.mrb[61].mxu1  ;;  %v21636_v48 = vpop.permute.xlu1 %8996 }
 0x795   : > { %16775 = vmatprep.mubr.msk.f32.mxu0 %vm682_vm1, %v6199_v29  ;;  %v18563_v29 = vunpack.i.h.bf16 %v21573_v4 }
 0x796   : > { %v16722_v23 = vpop.f32.mrb[82].mxu0  ;;  %16776 = vmatmul.mubr.msk.f32.gmra.mrb[98].mxu0 %vm682_vm1, %v16687_v39  ;;  %v18562_v39 = vunpack.i.l.bf16 %v21573_v4  ;;  %v23553_v4 = vld [vmem:[#allocation68_spill] sm:$0xff] }
 0x797   : > { %v6634_v15 = vpop.f32.mrb[83].mxu0  ;;  %16778 = vmatprep.mubr.msk.f32.mxu0 %vm682_vm1, %v6286_v19 }
 0x798   : > { %v21641_v55 = vpop.permute.xlu1 %9087 }
 0x79a   : > { %16779 = vmatmul.mubr.msk.f32.gmra.mrb[100].mxu0 %vm682_vm1, %v16694_v5 }
 0x79b   : > { %16810 = vmatprep.mubr.msk.f32.mxu0 %vm682_vm1, %v23544_v45  ;;  %v23547_v45 = vld [vmem:[#allocation60_spill] sm:$0xff] }
 0x79c   : > { %v18636_v17 = vpop.permute.xlu1 %18635 }
 0x79d   : > { %v18638_v1 = vunpack.i.h.bf16 %v18636_v17  ;;  %v18637_v25 = vunpack.i.l.bf16 %v18636_v17  ;;  %v23557_v17 = vld [vmem:[#allocation12_spill] sm:$0xff] }
 0x79e   : > { %16811 = vmatmul.mubr.msk.f32.vlgmr.msra.gmra.mrb[88].mxu0 %vm682_vm1, %v23545_v59  ;;  %v21656_v59 = vpack.c.bf16 %v18563_v29, %v18562_v39  ;;  %v23558_v29 = vld [vmem:[#allocation73_spill] sm:$0xff]  ;;  %v23560_v39 = vld [vmem:[#allocation74_spill] sm:$0xff] }
 0x79f   : > { %v16701_v34 = vpop.f32.mrb[62].mxu1  ;;  %16813 = vmatprep.mubr.msk.f32.mxu0 %vm682_vm1, %v23546_v56  ;;  %v17830_v19 = vpack.c.bf16 %v18638_v1, %v18637_v25  ;;  %v23549_v1 = vld [vmem:[#allocation62_spill] sm:$0xff] }
 0x7a0   : > { %v6373_v24 = vpop.f32.mrb[63].mxu1  ;;  %v18646_v5 = vpop.permute.xlu1 %18645 }
 0x7a1   : > { %v18648_v52 = vunpack.i.h.bf16 %v18646_v5  ;;  %v18647_v10 = vunpack.i.l.bf16 %v18646_v5  ;;  %16781 = vmatprep.mubr.msk.f32.mxu1 %vm682_vm1, %v6373_v24  ;;  %17831 = vmatprep.subr.bf16.mxu0 %v17830_v19  ;;  %v23563_v5 = vld [vmem:[#allocation69_spill] sm:$0xff] }
 0x7a2   : > { %16782 = vmatmul.mubr.msk.f32.vlgmr.msra.gmra.mrb[72].mxu1 %vm682_vm1, %v16701_v34  ;;  %16814 = vmatmul.mubr.msk.f32.gmra.mrb[90].mxu0 %vm682_vm1, %v23547_v45  ;;  %v23550_v34 = vld [vmem:[#allocation61_spill] sm:$0xff] }
 0x7a3   : > { %17739 = vmatpush3.bf16.xpose.msk.msra.mxu1 %vm20122_vm2, %v21580_v51  ;;  %17833 = vmatpush3.bf16.msra.mxu0 %v17830_v19  ;;  %v21661_v56 = vpack.c.bf16 %v18648_v52, %v18647_v10  ;;  %v23551_v10 = vld [vmem:[#allocation66_spill] sm:$0xff]  ;;  %v23552_v52 = vld [vmem:[#allocation63_spill] sm:$0xff]  ;;  %v23555_v51 = vld [vmem:[#allocation28_spill] sm:$0xff] }
 0x7a4   : > { %16784 = vmatprep.mubr.msk.f32.mxu1 %vm682_vm1, %v6460_v28  ;;  %16816 = vmatprep.mubr.msk.f32.mxu0 %vm682_vm1, %v23549_v1  ;;  %v23556_v28 = vld [vmem:[#allocation67_spill] sm:$0xff]  ;;  %v23562_v19 = vld [vmem:[#allocation76_spill] sm:$0xff]  ;;  %v23564_v45 = vld [vmem:[#allocation17_spill] sm:$0xff] }
 0x7a5   : > { %23548 = vst [vmem:[#allocation13_spill] sm:$0xff] %v21661_v56  ;;  %17742 = vmatprep.subr.msk.bf16.mxu1 %vm20122_vm2, %v21656_v59  ;;  %17839 = vmatprep.subr.bf16.mxu0 %v21661_v56  ;;  %v23565_v1 = vld [vmem:[#allocation72_spill] sm:$0xff] }
 0x7a6   : > { %v16715_v24 = vpop.f32.mrb[64].mxu1  ;;  %16785 = vmatmul.mubr.msk.f32.gmra.mrb[74].mxu1 %vm682_vm1, %v16708_v60  ;;  %16817 = vmatmul.mubr.msk.f32.gmra.mrb[92].mxu0 %vm682_vm1, %v23550_v34  ;;  %v23554_v60 = vld [vmem:[#allocation78_spill] sm:$0xff]  ;;  %v23567_v34 = vld [vmem:[#allocation77_spill] sm:$0xff] }
 0x7a7   : > { %v6547_v25 = vpop.f32.mrb[65].mxu1  ;;  %16819 = vmatprep.mubr.msk.f32.mxu0 %vm682_vm1, %v23551_v10  ;;  %v23569_v10 = vld [vmem:[#allocation71_spill] sm:$0xff] }
 0x7a8   : > { %16787 = vmatprep.mubr.msk.f32.mxu1 %vm682_vm1, %v6547_v25  ;;  %v23568_v25 = vld [vmem:[#allocation79_spill] sm:$0xff] }
 0x7aa   : > { %16788 = vmatmul.mubr.msk.f32.gmra.mrb[76].mxu1 %vm682_vm1, %v16715_v24  ;;  %16820 = vmatmul.mubr.msk.f32.gmra.mrb[94].mxu0 %vm682_vm1, %v23552_v52  ;;  %v23566_v24 = vld [vmem:[#allocation65_spill] sm:$0xff]  ;;  %v23570_v52 = vld [vmem:[#allocation75_spill] sm:$0xff] }
 0x7ab   : > { %16790 = vmatprep.mubr.msk.f32.mxu1 %vm682_vm1, %v6634_v15  ;;  %16822 = vmatprep.mubr.msk.f32.mxu0 %vm682_vm1, %v23553_v4  ;;  %v23559_v15 = vld [vmem:[#allocation70_spill] sm:$0xff]  ;;  %v23571_v4 = vld [vmem:[#allocation83_spill] sm:$0xff] }
 0x7ae   : > { %16791 = vmatmul.mubr.msk.f32.gmra.mrb[78].mxu1 %vm682_vm1, %v16722_v23  ;;  %16823 = vmatmul.mubr.msk.f32.gmra.mrb[96].mxu0 %vm682_vm1, %v23554_v60  ;;  %v23561_v23 = vld [vmem:[#allocation15_spill] sm:$0xff]  ;;  %v23572_v60 = vld [vmem:[#allocation82_spill] sm:$0xff] }
 0x7af   : > { %16825 = vmatprep.mubr.msk.f32.mxu0 %vm682_vm1, %v23555_v51  ;;  %v23573_v51 = vld [vmem:[#allocation81_spill] sm:$0xff] }
 0x7b2   : > { %16826 = vmatmul.mubr.msk.f32.gmra.mrb[98].mxu0 %vm682_vm1, %v23556_v28  ;;  %v23574_v28 = vld [vmem:[#allocation80_spill] sm:$0xff] }
 0x7b3   : > { %16828 = vmatprep.mubr.msk.f32.mxu0 %vm682_vm1, %v23557_v17 }
 0x7b6   : > { %16829 = vmatmul.mubr.msk.f32.gmra.mrb[100].mxu0 %vm682_vm1, %v23558_v29  ;;  %v23575_v29 = vld [vmem:[#allocation85_spill] sm:$0xff] }
 0x7b7   : > { %16831 = vmatprep.mubr.msk.f32.mxu0 %vm682_vm1, %v23559_v15 }
 0x7ba   : > { %16832 = vmatmul.mubr.msk.f32.gmra.mrb[102].mxu0 %vm682_vm1, %v23560_v39  ;;  %v23576_v39 = vld [vmem:[#allocation84_spill] sm:$0xff] }
 0x7bb   : > { %16834 = vmatprep.mubr.msk.f32.mxu0 %vm682_vm1, %v23561_v23 }
 0x7be   : > { %16835 = vmatmul.mubr.msk.f32.gmra.mrb[104].mxu0 %vm682_vm1, %v23562_v19 }
 0x7bf   : > { %16837 = vmatprep.mubr.msk.f32.mxu0 %vm682_vm1, %v23563_v5 }
 0x7c2   : > { %16838 = vmatmul.mubr.msk.f32.gmra.mrb[106].mxu0 %vm682_vm1, %v23564_v45 }
 0x7c3   : > { %16840 = vmatprep.mubr.msk.f32.mxu0 %vm682_vm1, %v23565_v1 }
 0x7c6   : > { %16841 = vmatmul.mubr.msk.f32.gmra.mrb[108].mxu0 %vm682_vm1, %v23566_v24 }
 0x7c7   : > { %16843 = vmatprep.mubr.msk.f32.mxu0 %vm682_vm1, %v23567_v34  ;;  %v7721_v34 = vpop.permute.xlu0 %7720 }
 0x7ca   : > { %16844 = vmatmul.mubr.msk.f32.gmra.mrb[110].mxu0 %vm682_vm1, %v23568_v25 }
 0x7cb   : > { %16846 = vmatprep.mubr.msk.f32.mxu0 %vm682_vm1, %v23569_v10  ;;  %v18566_v25 = vpop.permute.xlu0 %18565 }
 0x7ce   : > { %16847 = vmatmul.mubr.msk.f32.gmra.mrb[112].mxu0 %vm682_vm1, %v23570_v52 }
 0x7cf   : > { %16849 = vmatprep.mubr.msk.f32.mxu0 %vm682_vm1, %v23571_v4  ;;  %v7814_v10 = vpop.permute.xlu0 %7813 }
 0x7d2   : > { %16850 = vmatmul.mubr.msk.f32.gmra.mrb[114].mxu0 %vm682_vm1, %v23572_v60 }
 0x7d3   : > { %16852 = vmatprep.mubr.msk.f32.mxu0 %vm682_vm1, %v23573_v51  ;;  %v7903_v52 = vpop.permute.xlu0 %7902 }
 0x7d6   : > { %16853 = vmatmul.mubr.msk.f32.gmra.mrb[116].mxu0 %vm682_vm1, %v23574_v28  ;;  %v18568_v28 = vunpack.i.h.bf16 %v18566_v25 }
 0x7d7   : > { %v16736_v17 = vpop.f32.mrb[84].mxu0  ;;  %16855 = vmatprep.mubr.msk.f32.mxu0 %vm682_vm1, %v23575_v29  ;;  %v18576_v4 = vpop.permute.xlu0 %18575  ;;  %v18567_v29 = vunpack.i.l.bf16 %v18566_v25 }
 0x7d8   : > { %v6808_v15 = vpop.f32.mrb[85].mxu0 }
 0x7da   : > { %16856 = vmatmul.mubr.msk.f32.gmra.mrb[118].mxu0 %vm682_vm1, %v23576_v39 }
 0x7df   : > { %v16750_v23 = vpop.f32.mrb[86].mxu0 }
 0x7e0   : > { %v6982_v19 = vpop.f32.mrb[87].mxu0 }
 0x7e6   : > { %v16729_v5 = vpop.f32.mrb[66].mxu1 }
 0x7e7   : > { %v6721_v45 = vpop.f32.mrb[67].mxu1 }
 0x7e8   : > { %16793 = vmatprep.mubr.msk.f32.mxu1 %vm682_vm1, %v6721_v45 }
 0x7e9   : > { %16794 = vmatmul.mubr.msk.f32.gmra.mrb[80].mxu1 %vm682_vm1, %v16729_v5 }
 0x7ea   : > { %v16743_v1 = vpop.f32.mrb[68].mxu1  ;;  %16796 = vmatprep.mubr.msk.f32.mxu1 %vm682_vm1, %v6808_v15  ;;  %v17746_v15 = vpack.c.bf16 %v18568_v28, %v18567_v29 }
 0x7eb   : > { %v6895_v24 = vpop.f32.mrb[69].mxu1 }
 0x7ed   : > { %16797 = vmatmul.mubr.msk.f32.gmra.mrb[82].mxu1 %vm682_vm1, %v16736_v17  ;;  %v7996_v17 = vpop.permute.xlu0 %7995 }
 0x7ee   : > { %16799 = vmatprep.mubr.msk.f32.mxu1 %vm682_vm1, %v6895_v24  ;;  %v18582_v24 = vunpack.i.l.bf16 %v21596_v9 }
 0x7f1   : > { %16800 = vmatmul.mubr.msk.f32.gmra.mrb[84].mxu1 %vm682_vm1, %v16743_v1  ;;  %v8085_v39 = vpop.permute.xlu0 %8084 }
 0x7f2   : > { %16802 = vmatprep.mubr.msk.f32.mxu1 %vm682_vm1, %v6982_v19  ;;  %v18572_v19 = vunpack.i.l.bf16 %v21588_v49 }
 0x7f5   : > { %16803 = vmatmul.mubr.msk.f32.gmra.mrb[86].mxu1 %vm682_vm1, %v16750_v23  ;;  %v18573_v23 = vunpack.i.h.bf16 %v21588_v49  ;;  %v18586_v45 = vpop.permute.xlu0 %18585  ;;  %v18583_v49 = vunpack.i.h.bf16 %v21596_v9 }
 0x7f7   : > { %v17752_v5 = vpack.c.bf16 %v18573_v23, %v18572_v19  ;;  %v17764_v25 = vpack.c.bf16 %v18583_v49, %v18582_v24  ;;  %v18623_v24 = vunpack.i.h.bf16 %v21623_v2 }
 0x816   : > { %v16757_v60 = vpop.f32.mrb[70].mxu1 }
 0x817   : > { %v7069_v51 = vpop.f32.mrb[71].mxu1 }
 0x818   : > { %16805 = vmatprep.mubr.msk.f32.mxu1 %vm682_vm1, %v7069_v51 }
 0x819   : > { %16806 = vmatmul.mubr.msk.f32.gmra.mrb[88].mxu1 %vm682_vm1, %v16757_v60  ;;  %v18592_v60 = vunpack.i.l.bf16 %v21602_v61 }
 0x81a   : > { %16862 = vmatprep.mubr.msk.f32.mxu1 %vm682_vm1, %v7721_v34 }
 0x81d   : > { %16863 = vmatmul.mubr.msk.f32.vlgmr.msra.gmra.mrb[90].mxu1 %vm682_vm1, %v21575_v63  ;;  %v18578_v63 = vunpack.i.h.bf16 %v18576_v4 }
 0x81e   : > { %17745 = vmatpush3.bf16.xpose.msk.msra.mxu1 %vm20122_vm2, %v21656_v59  ;;  %16869 = vmatprep.mubr.msk.f32.mxu1 %vm682_vm1, %v21583_v18  ;;  %v18577_v18 = vunpack.i.l.bf16 %v18576_v4  ;;  %v8178_v59 = vpop.permute.xlu0 %8177  ;;  %v18593_v4 = vunpack.i.h.bf16 %v21602_v61 }
 0x81f   : > { %17748 = vmatprep.subr.msk.bf16.mxu1 %vm20122_vm2, %v17746_v15 }
 0x820   : > { %v17758_v1 = vpack.c.bf16 %v18578_v63, %v18577_v18  ;;  %v17776_v28 = vpack.c.bf16 %v18593_v4, %v18592_v60  ;;  %v18612_v63 = vunpack.i.l.bf16 %v21614_v54 }
 0x822   : > { %v8267_v34 = vpop.permute.xlu0 %8266 }
 0x825   : > { %16870 = vmatmul.mubr.msk.f32.vlgmr.msra.gmra.mrb[92].mxu1 %vm682_vm1, %v7814_v10  ;;  %v18587_v10 = vunpack.i.l.bf16 %v18586_v45 }
 0x826   : > { %17751 = vmatpush3.bf16.xpose.msk.msra.mxu1 %vm20122_vm2, %v17746_v15  ;;  %16876 = vmatprep.mubr.msk.f32.mxu1 %vm682_vm1, %v7903_v52  ;;  %v18603_v15 = vunpack.i.h.bf16 %v21608_v7 }
 0x827   : > { %17754 = vmatprep.subr.msk.bf16.mxu1 %vm20122_vm2, %v17752_v5 }
 0x82d   : > { %16877 = vmatmul.mubr.msk.f32.vlgmr.msra.gmra.mrb[94].mxu1 %vm682_vm1, %v21592_v41  ;;  %v18596_v41 = vpop.permute.xlu0 %18595 }
 0x82e   : > { %17757 = vmatpush3.bf16.xpose.msk.msra.mxu1 %vm20122_vm2, %v17752_v5  ;;  %16883 = vmatprep.mubr.msk.f32.mxu1 %vm682_vm1, %v21594_v57  ;;  %v18588_v57 = vunpack.i.h.bf16 %v18586_v45 }
 0x82f   : > { %17760 = vmatprep.subr.msk.bf16.mxu1 %vm20122_vm2, %v17758_v1 }
 0x830   : > { %v17770_v52 = vpack.c.bf16 %v18588_v57, %v18587_v10 }
 0x831   : > { %v8360_v9 = vpop.permute.xlu0 %8359 }
 0x835   : > { %16884 = vmatmul.mubr.msk.f32.vlgmr.msra.gmra.mrb[96].mxu1 %vm682_vm1, %v7996_v17  ;;  %v8449_v51 = vpop.permute.xlu0 %8448 }
 0x836   : > { %17763 = vmatpush3.bf16.xpose.msk.msra.mxu1 %vm20122_vm2, %v17758_v1  ;;  %16890 = vmatprep.mubr.msk.f32.mxu1 %vm682_vm1, %v8085_v39  ;;  %v18602_v39 = vunpack.i.l.bf16 %v21608_v7  ;;  %v18613_v7 = vunpack.i.h.bf16 %v21614_v54 }
 0x837   : > { %17766 = vmatprep.subr.msk.bf16.mxu1 %vm20122_vm2, %v17764_v25 }
 0x838   : > { %v17788_v23 = vpack.c.bf16 %v18603_v15, %v18602_v39  ;;  %v18651_v39 = vpop.permute.xlu1 %18650 }
 0x839   : > { %v18606_v29 = vpop.permute.xlu0 %18605 }
 0x83d   : > { %16891 = vmatmul.mubr.msk.f32.vlgmr.msra.gmra.mrb[98].mxu1 %vm682_vm1, %v21598_v38  ;;  %v18598_v38 = vunpack.i.h.bf16 %v18596_v41  ;;  %v8542_v61 = vpop.permute.xlu0 %8541 }
 0x83e   : > { %17769 = vmatpush3.bf16.xpose.msk.msra.mxu1 %vm20122_vm2, %v17764_v25  ;;  %16897 = vmatprep.mubr.msk.f32.mxu1 %vm682_vm1, %v21600_v40  ;;  %v18597_v40 = vunpack.i.l.bf16 %v18596_v41 }
 0x83f   : > { %17772 = vmatprep.subr.msk.bf16.mxu1 %vm20122_vm2, %v17770_v52 }
 0x840   : > { %v17782_v17 = vpack.c.bf16 %v18598_v38, %v18597_v40  ;;  %v18633_v38 = vunpack.i.h.bf16 %v21634_v16  ;;  %v18632_v40 = vunpack.i.l.bf16 %v21634_v16 }
 0x841   : > { %v8631_v19 = vpop.permute.xlu0 %8630 }
 0x845   : > { %16898 = vmatmul.mubr.msk.f32.vlgmr.msra.gmra.mrb[100].mxu1 %vm682_vm1, %v8178_v59  ;;  %v18616_v5 = vpop.permute.xlu0 %18615  ;;  %v17800_v59 = vpack.c.bf16 %v18613_v7, %v18612_v63 }
 0x846   : > { %17775 = vmatpush3.bf16.xpose.msk.msra.mxu1 %vm20122_vm2, %v17770_v52  ;;  %16904 = vmatprep.mubr.msk.f32.mxu1 %vm682_vm1, %v8267_v34  ;;  %v18617_v1 = vunpack.i.l.bf16 %v18616_v5  ;;  %v18622_v34 = vunpack.i.l.bf16 %v21623_v2 }
 0x847   : > { %17778 = vmatprep.subr.msk.bf16.mxu1 %vm20122_vm2, %v17776_v28 }
 0x848   : > { %v17812_v41 = vpack.c.bf16 %v18623_v24, %v18622_v34 }
 0x849   : > { %v8724_v18 = vpop.permute.xlu0 %8723 }
 0x84d   : > { %16905 = vmatmul.mubr.msk.f32.vlgmr.msra.gmra.mrb[102].mxu1 %vm682_vm1, %v21604_v12  ;;  %v18608_v12 = vunpack.i.h.bf16 %v18606_v29 }
 0x84e   : > { %17781 = vmatpush3.bf16.xpose.msk.msra.mxu1 %vm20122_vm2, %v17776_v28  ;;  %16911 = vmatprep.mubr.msk.f32.mxu1 %vm682_vm1, %v21606_v8  ;;  %v18607_v8 = vunpack.i.l.bf16 %v18606_v29 }
 0x84f   : > { %17784 = vmatprep.subr.msk.bf16.mxu1 %vm20122_vm2, %v17782_v17 }
 0x850   : > { %v17794_v45 = vpack.c.bf16 %v18608_v12, %v18607_v8 }
 0x855   : > { %16912 = vmatmul.mubr.msk.f32.vlgmr.msra.gmra.mrb[104].mxu1 %vm682_vm1, %v8360_v9 }
 0x856   : > { %17787 = vmatpush3.bf16.xpose.msk.msra.mxu1 %vm20122_vm2, %v17782_v17  ;;  %16918 = vmatprep.mubr.msk.f32.mxu1 %vm682_vm1, %v8449_v51  ;;  %v17824_v17 = vpack.c.bf16 %v18633_v38, %v18632_v40 }
 0x857   : > { %17790 = vmatprep.subr.msk.bf16.mxu1 %vm20122_vm2, %v17788_v23 }
 0x85d   : > { %16919 = vmatmul.mubr.msk.f32.vlgmr.msra.gmra.mrb[106].mxu1 %vm682_vm1, %v21610_v0  ;;  %v18618_v0 = vunpack.i.h.bf16 %v18616_v5 }
 0x85e   : > { %17793 = vmatpush3.bf16.xpose.msk.msra.mxu1 %vm20122_vm2, %v17788_v23  ;;  %16925 = vmatprep.mubr.msk.f32.mxu1 %vm682_vm1, %v21612_v6  ;;  %v8813_v6 = vpop.permute.xlu0 %8812  ;;  %v18653_v23 = vunpack.i.h.bf16 %v18651_v39 }
 0x85f   : > { %17796 = vmatprep.subr.msk.bf16.mxu1 %vm20122_vm2, %v17794_v45  ;;  %v17806_v49 = vpack.c.bf16 %v18618_v0, %v18617_v1 }
 0x862   : > { %v18626_v54 = vpop.permute.xlu0 %18625 }
 0x863   : > { %v18627_v10 = vunpack.i.l.bf16 %v18626_v54 }
 0x865   : > { %16926 = vmatmul.mubr.msk.f32.vlgmr.msra.gmra.mrb[108].mxu1 %vm682_vm1, %v8542_v61 }
 0x866   : > { %17799 = vmatpush3.bf16.xpose.msk.msra.mxu1 %vm20122_vm2, %v17794_v45  ;;  %16932 = vmatprep.mubr.msk.f32.mxu1 %vm682_vm1, %v8631_v19  ;;  %v8906_v25 = vpop.permute.xlu0 %8905  ;;  %v18652_v19 = vunpack.i.l.bf16 %v18651_v39 }
 0x867   : > { %17802 = vmatprep.subr.msk.bf16.mxu1 %vm20122_vm2, %v17800_v59 }
 0x868   : > { %v21876_v12 = vpack.c.bf16 %v18653_v23, %v18652_v19 }
 0x86a   : > { %v8995_v2 = vpop.permute.xlu0 %8994  ;;  %23585 = vst [vmem:[#allocation59_spill] sm:$0xff] %v21876_v12 }
 0x86d   : > { %16933 = vmatmul.mubr.msk.f32.vlgmr.msra.gmra.mrb[110].mxu1 %vm682_vm1, %v21616_v44 }
 0x86e   : > { %17805 = vmatpush3.bf16.xpose.msk.msra.mxu1 %vm20122_vm2, %v17800_v59  ;;  %16939 = vmatprep.mubr.msk.f32.mxu1 %vm682_vm1, %v21618_v32  ;;  %v18628_v32 = vunpack.i.h.bf16 %v18626_v54  ;;  %v9086_v28 = vpop.permute.xlu0 %9085 }
 0x86f   : > { %17808 = vmatprep.subr.msk.bf16.mxu1 %vm20122_vm2, %v17806_v49 }
 0x870   : > { %v17818_v4 = vpack.c.bf16 %v18628_v32, %v18627_v10 }
 0x872   : > { %v18641_v61 = vpop.permute.xlu0 %18640 }
 0x873   : > { %v18642_v15 = vunpack.i.l.bf16 %v18641_v61 }
 0x875   : > { %16940 = vmatmul.mubr.msk.f32.vlgmr.msra.gmra.mrb[112].mxu1 %vm682_vm1, %v8724_v18  ;;  %v21832_v57 = vpop.f32.mrb[72].mxu1 }
 0x876   : > { %23577 = vst [vmem:[#allocation33_spill] sm:$0xff] %v21832_v57  ;;  %17811 = vmatpush3.bf16.xpose.msk.msra.mxu1 %vm20122_vm2, %v17806_v49  ;;  %16946 = vmatprep.mubr.msk.f32.mxu1 %vm682_vm1, %v8813_v6  ;;  %v21837_v44 = vpop.f32.mrb[73].mxu1 }
 0x877   : > { %23578 = vst [vmem:[#allocation35_spill] sm:$0xff] %v21837_v44  ;;  %17814 = vmatprep.subr.msk.bf16.mxu1 %vm20122_vm2, %v17812_v41 }
 0x879   : > { %v21841_v52 = vpop.f32.mrb[74].mxu1 }
 0x87a   : > { %23579 = vst [vmem:[#allocation36_spill] sm:$0xff] %v21841_v52  ;;  %v21843_v9 = vpop.f32.mrb[75].mxu1 }
 0x87b   : > { %23580 = vst [vmem:[#allocation14_spill] sm:$0xff] %v21843_v9 }
 0x87d   : > { %16947 = vmatmul.mubr.msk.f32.vlgmr.msra.gmra.mrb[114].mxu1 %vm682_vm1, %v21626_v62  ;;  %v21847_v60 = vpop.f32.mrb[76].mxu1 }
 0x87e   : > { %23581 = vst [vmem:[#allocation29_spill] sm:$0xff] %v21847_v60  ;;  %17817 = vmatpush3.bf16.xpose.msk.msra.mxu1 %vm20122_vm2, %v17812_v41  ;;  %16953 = vmatprep.mubr.msk.f32.mxu1 %vm682_vm1, %v21631_v30  ;;  %v21853_v51 = vpop.f32.mrb[77].mxu1  ;;  %v18643_v30 = vunpack.i.h.bf16 %v18641_v61  ;;  %v22027_v60 = vpop.permute.xlu0 %18655 }
 0x87f   : > { %23582 = vst [vmem:[#allocation30_spill] sm:$0xff] %v21853_v51  ;;  %17820 = vmatprep.subr.msk.bf16.mxu1 %vm20122_vm2, %v17818_v4 }
 0x880   : > { %v17834_v16 = vpack.c.bf16 %v18643_v30, %v18642_v15 }
 0x881   : > { %v21859_v29 = vpop.f32.mrb[78].mxu1 }
 0x882   : > { %23583 = vst [vmem:[#allocation16_spill] sm:$0xff] %v21859_v29  ;;  %v21861_v62 = vpop.f32.mrb[79].mxu1  ;;  %v22029_v9 = vpop.permute.xlu0 %18665 }
 0x883   : > { %23584 = vst [vmem:[#allocation27_spill] sm:$0xff] %v21861_v62  ;;  %23596 = vst [vmem:[#allocation12_spill] sm:$0xff] %v22029_v9 }
 0x885   : > { %16954 = vmatmul.mubr.msk.f32.vlgmr.msra.gmra.mrb[116].mxu1 %vm682_vm1, %v8906_v25 }
 0x886   : > { %17823 = vmatpush3.bf16.xpose.msk.msra.mxu1 %vm20122_vm2, %v17818_v4  ;;  %16960 = vmatprep.mubr.msk.f32.mxu1 %vm682_vm1, %v8995_v2 }
 0x887   : > { %17826 = vmatprep.subr.msk.bf16.mxu1 %vm20122_vm2, %v17824_v17 }
 0x88d   : > { %16961 = vmatmul.mubr.msk.f32.vlgmr.msra.gmra.mrb[118].mxu1 %vm682_vm1, %v21636_v48 }
 0x88e   : > { %17829 = vmatpush3.bf16.xpose.msk.msra.mxu1 %vm20122_vm2, %v17824_v17  ;;  %16967 = vmatprep.mubr.msk.f32.mxu1 %vm682_vm1, %v9086_v28 }
 0x88f   : > { %17835 = vmatprep.subr.bf16.mxu1 %v17834_v16 }
 0x895   : > { %16968 = vmatmul.mubr.msk.f32.vlgmr.msra.gmra.mrb[120].mxu1 %vm682_vm1, %v21641_v55 }
 0x896   : > { %17837 = vmatpush3.bf16.msra.mxu1 %v17834_v16 }
 0x897   : > { %17843 = vmatprep.subr.bf16.mxu1 %v21876_v12 }
 0x8bc   : > { %v21879_v8 = vpop.f32.mrb[80].mxu1 }
 0x8bd   : > { %23586 = vst [vmem:[#allocation64_spill] sm:$0xff] %v21879_v8  ;;  %v21881_v48 = vpop.f32.mrb[81].mxu1 }
 0x8be   : > { %23587 = vst [vmem:[#allocation60_spill] sm:$0xff] %v21881_v48 }
 0x8c0   : > { %v21883_v5 = vpop.f32.mrb[82].mxu1 }
 0x8c1   : > { %23588 = vst [vmem:[#allocation62_spill] sm:$0xff] %v21883_v5  ;;  %v21885_v45 = vpop.f32.mrb[83].mxu1 }
 0x8c2   : > { %23589 = vst [vmem:[#allocation61_spill] sm:$0xff] %v21885_v45 }
 0x8c4   : > { %v21887_v7 = vpop.f32.mrb[84].mxu1 }
 0x8c5   : > { %23590 = vst [vmem:[#allocation66_spill] sm:$0xff] %v21887_v7  ;;  %v21889_v63 = vpop.f32.mrb[85].mxu1 }
 0x8c6   : > { %23591 = vst [vmem:[#allocation63_spill] sm:$0xff] %v21889_v63 }
 0x8c8   : > { %v21891_v18 = vpop.f32.mrb[86].mxu1 }
 0x8c9   : > { %23592 = vst [vmem:[#allocation68_spill] sm:$0xff] %v21891_v18  ;;  %v21893_v55 = vpop.f32.mrb[87].mxu1 }
 0x8ca   : > { %23593 = vst [vmem:[#allocation78_spill] sm:$0xff] %v21893_v55 }
 0x8ec   : > { %v21895_v59 = vpop.f32.mrb[88].mxu1 }
 0x8ed   : > { %23594 = vst [vmem:[#allocation28_spill] sm:$0xff] %v21895_v59  ;;  %v21897_v6 = vpop.f32.mrb[89].mxu1 }
 0x8ee   : > { %23595 = vst [vmem:[#allocation67_spill] sm:$0xff] %v21897_v6 }
 0x8f0   : > { %v21899_v0 = vpop.f32.mrb[90].mxu1 }
 0x8f1   : > { %v21901_v1 = vpop.f32.mrb[91].mxu1  ;;  %v9179_v49 = vsel %vm2133_vm3, %v21899_v0, -inf }
 0x8f2   : > { %9180 = vmax.xlane.f32.xlu1 %v9179_v49  ;;  %v9176_v54 = vsel %vm2133_vm3, %v21901_v1, -inf }
 0x8f3   : > { %9177 = vmax.xlane.f32.xlu0 %v9176_v54 }
 0x8f8   : > { %v21907_v24 = vpop.f32.mrb[92].mxu1 }
 0x8f9   : > { %v21909_v34 = vpop.f32.mrb[93].mxu1  ;;  %v9185_v25 = vsel %vm2133_vm3, %v21907_v24, -inf }
 0x8fa   : > { %9186 = vmax.xlane.f32.xlu0 %v9185_v25  ;;  %v9182_v41 = vsel %vm2133_vm3, %v21909_v34, -inf }
 0x8fe   : > { %9183 = vmax.xlane.f32.xlu0 %v9182_v41 }
 0x900   : > { %v21915_v32 = vpop.f32.mrb[94].mxu1 }
 0x901   : > { %v21917_v10 = vpop.f32.mrb[95].mxu1  ;;  %v9191_v2 = vsel %vm2133_vm3, %v21915_v32, -inf }
 0x902   : > { %9192 = vmax.xlane.f32.xlu0 %v9191_v2  ;;  %v9188_v4 = vsel %vm2133_vm3, %v21917_v10, -inf }
 0x903   : > { %9189 = vmax.xlane.f32.xlu1 %v9188_v4 }
 0x908   : > { %v21923_v28 = vpop.f32.mrb[96].mxu1 }
 0x909   : > { %v21925_v38 = vpop.f32.mrb[97].mxu1  ;;  %v9197_v40 = vsel %vm2133_vm3, %v21923_v28, -inf }
 0x90a   : > { %9198 = vmax.xlane.f32.xlu0 %v9197_v40  ;;  %v9194_v17 = vsel %vm2133_vm3, %v21925_v38, -inf }
 0x90b   : > { %9195 = vmax.xlane.f32.xlu1 %v9194_v17 }
 0x910   : > { %v21931_v61 = vpop.f32.mrb[98].mxu1 }
 0x911   : > { %v21933_v30 = vpop.f32.mrb[99].mxu1  ;;  %v9203_v15 = vsel %vm2133_vm3, %v21931_v61, -inf }
 0x912   : > { %9204 = vmax.xlane.f32.xlu0 %v9203_v15  ;;  %v9200_v16 = vsel %vm2133_vm3, %v21933_v30, -inf }
 0x913   : > { %9201 = vmax.xlane.f32.xlu1 %v9200_v16 }
 0x918   : > { %v21939_v39 = vpop.f32.mrb[100].mxu1 }
 0x919   : > { %v21941_v23 = vpop.f32.mrb[101].mxu1  ;;  %v9209_v19 = vsel %vm2133_vm3, %v21939_v39, -inf }
 0x91a   : > { %9210 = vmax.xlane.f32.xlu0 %v9209_v19  ;;  %v9206_v49 = vsel %vm2133_vm3, %v21941_v23, -inf }
 0x91b   : > { %9207 = vmax.xlane.f32.xlu1 %v9206_v49 }
 0x920   : > { %v21947_v54 = vpop.f32.mrb[102].mxu1 }
 0x921   : > { %v21949_v25 = vpop.f32.mrb[103].mxu1  ;;  %v9215_v41 = vsel %vm2133_vm3, %v21947_v54, -inf }
 0x922   : > { %9216 = vmax.xlane.f32.xlu0 %v9215_v41  ;;  %v9212_v2 = vsel %vm2133_vm3, %v21949_v25, -inf }
 0x923   : > { %9213 = vmax.xlane.f32.xlu1 %v9212_v2 }
 0x928   : > { %v21955_v4 = vpop.f32.mrb[104].mxu1 }
 0x929   : > { %v21957_v40 = vpop.f32.mrb[105].mxu1  ;;  %v9221_v17 = vsel %vm2133_vm3, %v21955_v4, -inf }
 0x92a   : > { %9222 = vmax.xlane.f32.xlu0 %v9221_v17  ;;  %v9218_v15 = vsel %vm2133_vm3, %v21957_v40, -inf }
 0x92b   : > { %9219 = vmax.xlane.f32.xlu1 %v9218_v15 }
 0x930   : > { %v21963_v16 = vpop.f32.mrb[106].mxu1 }
 0x931   : > { %v21965_v19 = vpop.f32.mrb[107].mxu1  ;;  %v9227_v49 = vsel %vm2133_vm3, %v21963_v16, -inf }
 0x932   : > { %9228 = vmax.xlane.f32.xlu0 %v9227_v49  ;;  %v9224_v41 = vsel %vm2133_vm3, %v21965_v19, -inf }
 0x933   : > { %9225 = vmax.xlane.f32.xlu1 %v9224_v41 }
 0x938   : > { %v21971_v2 = vpop.f32.mrb[108].mxu1 }
 0x939   : > { %v21973_v6 = vpop.f32.mrb[109].mxu1  ;;  %v9233_v17 = vsel %vm2133_vm3, %v21971_v2, -inf }
 0x93a   : > { %9234 = vmax.xlane.f32.xlu0 %v9233_v17  ;;  %v9230_v15 = vsel %vm2133_vm3, %v21973_v6, -inf }
 0x93b   : > { %9231 = vmax.xlane.f32.xlu1 %v9230_v15 }
 0x940   : > { %v21979_v59 = vpop.f32.mrb[110].mxu1 }
 0x941   : > { %v21981_v55 = vpop.f32.mrb[111].mxu1  ;;  %v9239_v49 = vsel %vm2133_vm3, %v21979_v59, -inf }
 0x942   : > { %9240 = vmax.xlane.f32.xlu0 %v9239_v49  ;;  %v9236_v41 = vsel %vm2133_vm3, %v21981_v55, -inf }
 0x943   : > { %9237 = vmax.xlane.f32.xlu1 %v9236_v41 }
 0x948   : > { %v21987_v18 = vpop.f32.mrb[112].mxu1 }
 0x949   : > { %v21989_v63 = vpop.f32.mrb[113].mxu1  ;;  %v9245_v17 = vsel %vm2133_vm3, %v21987_v18, -inf }
 0x94a   : > { %9246 = vmax.xlane.f32.xlu0 %v9245_v17  ;;  %v9242_v15 = vsel %vm2133_vm3, %v21989_v63, -inf }
 0x94b   : > { %9243 = vmax.xlane.f32.xlu1 %v9242_v15 }
 0x950   : > { %v21995_v7 = vpop.f32.mrb[114].mxu1 }
 0x951   : > { %v21997_v45 = vpop.f32.mrb[115].mxu1  ;;  %v9251_v49 = vsel %vm2133_vm3, %v21995_v7, -inf }
 0x952   : > { %9252 = vmax.xlane.f32.xlu0 %v9251_v49  ;;  %v9248_v41 = vsel %vm2133_vm3, %v21997_v45, -inf }
 0x953   : > { %9249 = vmax.xlane.f32.xlu1 %v9248_v41 }
 0x958   : > { %v22003_v5 = vpop.f32.mrb[116].mxu1 }
 0x959   : > { %v22005_v48 = vpop.f32.mrb[117].mxu1  ;;  %v9257_v17 = vsel %vm2133_vm3, %v22003_v5, -inf }
 0x95a   : > { %9258 = vmax.xlane.f32.xlu0 %v9257_v17  ;;  %v9254_v15 = vsel %vm2133_vm3, %v22005_v48, -inf }
 0x95b   : > { %9255 = vmax.xlane.f32.xlu1 %v9254_v15 }
 0x960   : > { %v22011_v8 = vpop.f32.mrb[118].mxu1 }
 0x961   : > { %v22013_v62 = vpop.f32.mrb[119].mxu1  ;;  %v9263_v49 = vsel %vm2133_vm3, %v22011_v8, -inf }
 0x962   : > { %9264 = vmax.xlane.f32.xlu0 %v9263_v49  ;;  %v9260_v41 = vsel %vm2133_vm3, %v22013_v62, -inf  ;;  %v22033_v49 = vpop.permute.xlu0 %18675 }
 0x963   : > { %9261 = vmax.xlane.f32.xlu1 %v9260_v41  ;;  %23597 = vst [vmem:[#allocation73_spill] sm:$0xff] %v22033_v49  ;;  %v22037_v41 = vpop.permute.xlu1 %18660 }
 0x964   : > { %23598 = vst [vmem:[#allocation70_spill] sm:$0xff] %v22037_v41 }
 0x968   : > { %v22019_v29 = vpop.f32.mrb[120].mxu1 }
 0x969   : > { %v22021_v51 = vpop.f32.mrb[121].mxu1  ;;  %v9269_v17 = vsel %vm2133_vm3, %v22019_v29, -inf }
 0x96a   : > { %9270 = vmax.xlane.f32.xlu0 %v9269_v17  ;;  %v9266_v15 = vsel %vm2133_vm3, %v22021_v51, -inf }
 0x96b   : > { %9267 = vmax.xlane.f32.xlu1 %v9266_v15  ;;  %v22041_v15 = vpop.permute.xlu1 %18670 }
 0x96c   : > { %23599 = vst [vmem:[#allocation74_spill] sm:$0xff] %v22041_v15 }
 0x97c   : > { %18680 = vrot.lane.b32.xlu1 %v23533_v36, %s19556_s11 }
 0x97f   : > { %v9181_v22 = vpop.xlane.xlu1 %9180 }
 0x980   : > { %18685 = vrot.lane.b32.xlu0 %v23518_v14, %s19556_s11  ;;  %v9178_v52 = vpop.xlane.xlu0 %9177  ;;  %v9273_v15 = vsub.f32 %v21899_v0, %v9181_v22 }
 0x981   : > { %v9272_v44 = vsub.f32 %v21901_v1, %v9178_v52 }
 0x982   : > { %v9306_v56 = vmul.f32 1.442695, %v9273_v15 }
 0x983   : > { %v9304_v36 = vmul.f32 1.442695, %v9272_v44 }
 0x984   : > { %18690 = vrot.lane.b32.xlu0 %v23437_v27, %s19556_s11 }
 0x985   : > { %19130 = vpow2.f32 %v9304_v36 }
 0x987   : > { %v9187_v17 = vpop.xlane.xlu0 %9186 }
 0x988   : > { %18695 = vrot.lane.b32.xlu0 %v20013_v47, %s19556_s11  ;;  %v9275_v52 = vsub.f32 %v21907_v24, %v9187_v17 }
 0x98b   : > { %v9184_v57 = vpop.xlane.xlu0 %9183 }
 0x98c   : > { %18700 = vrot.lane.b32.xlu0 %v23447_v46, %s19556_s11  ;;  %v9274_v49 = vsub.f32 %v21909_v34, %v9184_v57  ;;  %v9310_v57 = vmul.f32 1.442695, %v9275_v52 }
 0x98e   : > { %v9308_v9 = vmul.f32 1.442695, %v9274_v49 }
 0x98f   : > { %v9193_v1 = vpop.xlane.xlu0 %9192  ;;  %v22053_v46 = vpop.eup %19130 }
 0x990   : > { %v9190_v12 = vpop.xlane.xlu1 %9189  ;;  %19132 = vpow2.f32 %v9308_v9  ;;  %v9277_v36 = vsub.f32 %v21915_v32, %v9193_v1 }
 0x991   : > { %v9276_v27 = vsub.f32 %v21917_v10, %v9190_v12 }
 0x992   : > { %v9314_v9 = vmul.f32 1.442695, %v9277_v36 }
 0x993   : > { %v9312_v14 = vmul.f32 1.442695, %v9276_v27  ;;  %v9368_v27 = vsel %vm2133_vm3, %v22053_v46, 0.0 }
 0x995   : > { %19134 = vpow2.f32 %v9312_v14 }
 0x996   : > { %19136 = vpow2.f32 %v9306_v56 }
 0x997   : > { %v9199_v12 = vpop.xlane.xlu0 %9198 }
 0x998   : > { %v9196_v47 = vpop.xlane.xlu1 %9195 }
 0x999   : > { %v9278_v41 = vsub.f32 %v21925_v38, %v9196_v47  ;;  %v9279_v47 = vsub.f32 %v21923_v28, %v9199_v12 }
 0x99a   : > { %v22058_v22 = vpop.eup %19132 }
 0x99b   : > { %v9316_v44 = vmul.f32 1.442695, %v9278_v41  ;;  %v9374_v56 = vsel %vm2133_vm3, %v22058_v22, 0.0  ;;  %v9318_v38 = vmul.f32 1.442695, %v9279_v47 }
 0x99d   : > { %19138 = vpow2.f32 %v9316_v44 }
 0x99e   : > { %19140 = vpow2.f32 %v9310_v57 }
 0x99f   : > { %v9205_v14 = vpop.xlane.xlu0 %9204  ;;  %v22064_v32 = vpop.eup %19134  ;;  %19142 = vpow2.f32 %v9314_v9 }
 0x9a0   : > { %v9202_v0 = vpop.xlane.xlu1 %9201  ;;  %9369 = vadd.xlane.f32.xlu1 %v9368_v27  ;;  %v9281_v10 = vsub.f32 %v21931_v61, %v9205_v14  ;;  %v22067_v49 = vpop.eup %19136  ;;  %v9380_v28 = vsel %vm2133_vm3, %v22064_v32, 0.0 }
 0x9a1   : > { %v9280_v24 = vsub.f32 %v21933_v30, %v9202_v0  ;;  %v9371_v61 = vsel %vm2133_vm3, %v22067_v49, 0.0 }
 0x9a2   : > { %v9322_v30 = vmul.f32 1.442695, %v9281_v10 }
 0x9a3   : > { %v9320_v34 = vmul.f32 1.442695, %v9280_v24 }
 0x9a4   : > { %9375 = vadd.xlane.f32.xlu1 %v9374_v56 }
 0x9a5   : > { %19144 = vpow2.f32 %v9320_v34 }
 0x9a6   : > { %19146 = vpow2.f32 %v9318_v38 }
 0x9a7   : > { %v9211_v41 = vpop.xlane.xlu0 %9210  ;;  %v22071_v17 = vpop.eup %19138  ;;  %19148 = vpow2.f32 %v9322_v30 }
 0x9a8   : > { %v9208_v15 = vpop.xlane.xlu1 %9207  ;;  %9381 = vadd.xlane.f32.xlu1 %v9380_v28  ;;  %v9283_v52 = vsub.f32 %v21939_v39, %v9211_v41  ;;  %v22077_v44 = vpop.eup %19140  ;;  %v9386_v57 = vsel %vm2133_vm3, %v22071_v17, 0.0 }
 0x9a9   : > { %v9282_v1 = vsub.f32 %v21941_v23, %v9208_v15  ;;  %v22081_v27 = vpop.eup %19142  ;;  %v9377_v39 = vsel %vm2133_vm3, %v22077_v44, 0.0 }
 0x9aa   : > { %v9326_v12 = vmul.f32 1.442695, %v9283_v52  ;;  %v9383_v56 = vsel %vm2133_vm3, %v22081_v27, 0.0 }
 0x9ab   : > { %v9324_v36 = vmul.f32 1.442695, %v9282_v1  ;;  %9372 = vadd.xlane.f32.xlu0 %v9371_v61 }
 0x9ac   : > { %9387 = vadd.xlane.f32.xlu1 %v9386_v57 }
 0x9ad   : > { %19150 = vpow2.f32 %v9324_v36 }
 0x9ae   : > { %19152 = vpow2.f32 %v9326_v12 }
 0x9af   : > { %v22085_v23 = vpop.eup %19144  ;;  %v9217_v9 = vpop.xlane.xlu0 %9216  ;;  %9378 = vadd.xlane.f32.xlu0 %v9377_v39 }
 0x9b0   : > { %v9285_v0 = vsub.f32 %v21947_v54, %v9217_v9  ;;  %v9214_v47 = vpop.xlane.xlu1 %9213  ;;  %v9392_v14 = vsel %vm2133_vm3, %v22085_v23, 0.0  ;;  %v22093_v10 = vpop.eup %19146 }
 0x9b1   : > { %v9284_v24 = vsub.f32 %v21949_v25, %v9214_v47  ;;  %9393 = vadd.xlane.f32.xlu1 %v9392_v14  ;;  %v22095_v41 = vpop.eup %19148  ;;  %v9389_v54 = vsel %vm2133_vm3, %v22093_v10, 0.0 }
 0x9b2   : > { %v9330_v34 = vmul.f32 1.442695, %v9285_v0  ;;  %v9395_v36 = vsel %vm2133_vm3, %v22095_v41, 0.0 }
 0x9b3   : > { %9384 = vadd.xlane.f32.xlu0 %v9383_v56  ;;  %v9328_v38 = vmul.f32 1.442695, %v9284_v24 }
 0x9b4   : > { %19154 = vpow2.f32 %v9330_v34 }
 0x9b5   : > { %19156 = vpow2.f32 %v9328_v38 }
 0x9b7   : > { %v22099_v28 = vpop.eup %19150  ;;  %v9223_v30 = vpop.xlane.xlu0 %9222  ;;  %9390 = vadd.xlane.f32.xlu0 %v9389_v54 }
 0x9b8   : > { %v9287_v25 = vsub.f32 %v21955_v4, %v9223_v30  ;;  %v9220_v15 = vpop.xlane.xlu1 %9219  ;;  %v9398_v52 = vsel %vm2133_vm3, %v22099_v28, 0.0  ;;  %v22107_v57 = vpop.eup %19152 }
 0x9b9   : > { %v9286_v1 = vsub.f32 %v21957_v40, %v9220_v15  ;;  %9399 = vadd.xlane.f32.xlu1 %v9398_v52  ;;  %v9401_v4 = vsel %vm2133_vm3, %v22107_v57, 0.0 }
 0x9ba   : > { %v9334_v61 = vmul.f32 1.442695, %v9287_v25 }
 0x9bb   : > { %v9332_v12 = vmul.f32 1.442695, %v9286_v1  ;;  %9396 = vadd.xlane.f32.xlu0 %v9395_v36 }
 0x9bc   : > { %19158 = vpow2.f32 %v9334_v61 }
 0x9bd   : > { %19160 = vpow2.f32 %v9332_v12 }
 0x9be   : > { %v22111_v39 = vpop.eup %19154 }
 0x9bf   : > { %v9229_v9 = vpop.xlane.xlu0 %9228  ;;  %9402 = vadd.xlane.f32.xlu0 %v9401_v4  ;;  %v9407_v24 = vsel %vm2133_vm3, %v22111_v39, 0.0  ;;  %v22117_v34 = vpop.eup %19156 }
 0x9c0   : > { %v9289_v40 = vsub.f32 %v21963_v16, %v9229_v9  ;;  %v9226_v0 = vpop.xlane.xlu1 %9225  ;;  %v9404_v54 = vsel %vm2133_vm3, %v22117_v34, 0.0 }
 0x9c1   : > { %v9288_v47 = vsub.f32 %v21965_v19, %v9226_v0 }
 0x9c2   : > { %v9338_v14 = vmul.f32 1.442695, %v9289_v40 }
 0x9c3   : > { %v9336_v56 = vmul.f32 1.442695, %v9288_v47  ;;  %9408 = vadd.xlane.f32.xlu0 %v9407_v24 }
 0x9c4   : > { %19162 = vpow2.f32 %v9338_v14 }
 0x9c5   : > { %19164 = vpow2.f32 %v9336_v56 }
 0x9c6   : > { %v22119_v38 = vpop.eup %19158 }
 0x9c7   : > { %v22123_v30 = vpop.eup %19160  ;;  %v9235_v16 = vpop.xlane.xlu0 %9234  ;;  %9405 = vadd.xlane.f32.xlu0 %v9404_v54  ;;  %v9413_v61 = vsel %vm2133_vm3, %v22119_v38, 0.0 }
 0x9c8   : > { %v9291_v19 = vsub.f32 %v21971_v2, %v9235_v16  ;;  %v9232_v25 = vpop.xlane.xlu1 %9231  ;;  %v9410_v15 = vsel %vm2133_vm3, %v22123_v30, 0.0 }
 0x9c9   : > { %v9290_v52 = vsub.f32 %v21973_v6, %v9232_v25  ;;  %9411 = vadd.xlane.f32.xlu1 %v9410_v15 }
 0x9ca   : > { %v9342_v1 = vmul.f32 1.442695, %v9291_v19 }
 0x9cb   : > { %v9340_v36 = vmul.f32 1.442695, %v9290_v52  ;;  %9414 = vadd.xlane.f32.xlu0 %v9413_v61 }
 0x9cc   : > { %19166 = vpow2.f32 %v9342_v1 }
 0x9cd   : > { %19168 = vpow2.f32 %v9340_v36 }
 0x9ce   : > { %v22131_v12 = vpop.eup %19162 }
 0x9cf   : > { %v9241_v4 = vpop.xlane.xlu0 %9240  ;;  %v9419_v2 = vsel %vm2133_vm3, %v22131_v12, 0.0  ;;  %v22135_v9 = vpop.eup %19164 }
 0x9d0   : > { %v9293_v40 = vsub.f32 %v21979_v59, %v9241_v4  ;;  %v9238_v6 = vpop.xlane.xlu1 %9237  ;;  %9420 = vadd.xlane.f32.xlu0 %v9419_v2  ;;  %v9416_v24 = vsel %vm2133_vm3, %v22135_v9, 0.0 }
 0x9d1   : > { %v9292_v0 = vsub.f32 %v21981_v55, %v9238_v6 }
 0x9d2   : > { %v9346_v47 = vmul.f32 1.442695, %v9293_v40 }
 0x9d3   : > { %v9344_v14 = vmul.f32 1.442695, %v9292_v0 }
 0x9d4   : > { %19170 = vpow2.f32 %v9346_v47  ;;  %9417 = vadd.xlane.f32.xlu0 %v9416_v24 }
 0x9d5   : > { %19172 = vpow2.f32 %v9344_v14 }
 0x9d6   : > { %v22141_v56 = vpop.eup %19166 }
 0x9d7   : > { %v22143_v54 = vpop.eup %19168  ;;  %v9247_v16 = vpop.xlane.xlu0 %9246  ;;  %v9425_v59 = vsel %vm2133_vm3, %v22141_v56, 0.0 }
 0x9d8   : > { %v9295_v19 = vsub.f32 %v21987_v18, %v9247_v16  ;;  %v9244_v25 = vpop.xlane.xlu1 %9243  ;;  %9426 = vadd.xlane.f32.xlu1 %v9425_v59  ;;  %v9422_v55 = vsel %vm2133_vm3, %v22143_v54, 0.0 }
 0x9d9   : > { %v9294_v15 = vsub.f32 %v21989_v63, %v9244_v25  ;;  %9423 = vadd.xlane.f32.xlu0 %v9422_v55 }
 0x9da   : > { %v9350_v52 = vmul.f32 1.442695, %v9295_v19 }
 0x9db   : > { %v9348_v1 = vmul.f32 1.442695, %v9294_v15 }
 0x9dc   : > { %19174 = vpow2.f32 %v9350_v52 }
 0x9dd   : > { %19176 = vpow2.f32 %v9348_v1 }
 0x9de   : > { %v22151_v61 = vpop.eup %19170 }
 0x9df   : > { %v22153_v36 = vpop.eup %19172  ;;  %v9253_v4 = vpop.xlane.xlu0 %9252  ;;  %v9431_v18 = vsel %vm2133_vm3, %v22151_v61, 0.0 }
 0x9e0   : > { %v9297_v2 = vsub.f32 %v21995_v7, %v9253_v4  ;;  %v9250_v40 = vpop.xlane.xlu1 %9249  ;;  %9432 = vadd.xlane.f32.xlu1 %v9431_v18  ;;  %v9428_v63 = vsel %vm2133_vm3, %v22153_v36, 0.0 }
 0x9e1   : > { %v9296_v6 = vsub.f32 %v21997_v45, %v9250_v40  ;;  %9429 = vadd.xlane.f32.xlu0 %v9428_v63 }
 0x9e2   : > { %v9354_v0 = vmul.f32 1.442695, %v9297_v2 }
 0x9e3   : > { %v9352_v47 = vmul.f32 1.442695, %v9296_v6 }
 0x9e4   : > { %19178 = vpow2.f32 %v9354_v0 }
 0x9e5   : > { %19180 = vpow2.f32 %v9352_v47 }
 0x9e6   : > { %v22161_v14 = vpop.eup %19174 }
 0x9e7   : > { %v22163_v24 = vpop.eup %19176  ;;  %v9259_v16 = vpop.xlane.xlu0 %9258  ;;  %v9437_v7 = vsel %vm2133_vm3, %v22161_v14, 0.0 }
 0x9e8   : > { %v9299_v59 = vsub.f32 %v22003_v5, %v9259_v16  ;;  %v9256_v19 = vpop.xlane.xlu1 %9255  ;;  %9438 = vadd.xlane.f32.xlu1 %v9437_v7  ;;  %v9434_v45 = vsel %vm2133_vm3, %v22163_v24, 0.0 }
 0x9e9   : > { %v9298_v25 = vsub.f32 %v22005_v48, %v9256_v19  ;;  %9435 = vadd.xlane.f32.xlu0 %v9434_v45 }
 0x9ea   : > { %v9358_v55 = vmul.f32 1.442695, %v9299_v59 }
 0x9eb   : > { %v9356_v15 = vmul.f32 1.442695, %v9298_v25 }
 0x9ec   : > { %19182 = vpow2.f32 %v9358_v55 }
 0x9ed   : > { %19184 = vpow2.f32 %v9356_v15 }
 0x9ee   : > { %v22171_v52 = vpop.eup %19178 }
 0x9ef   : > { %v22173_v1 = vpop.eup %19180  ;;  %v9265_v4 = vpop.xlane.xlu0 %9264  ;;  %v9443_v5 = vsel %vm2133_vm3, %v22171_v52, 0.0 }
 0x9f0   : > { %v9301_v18 = vsub.f32 %v22011_v8, %v9265_v4  ;;  %v9262_v2 = vpop.xlane.xlu1 %9261  ;;  %9444 = vadd.xlane.f32.xlu1 %v9443_v5  ;;  %v9440_v48 = vsel %vm2133_vm3, %v22173_v1, 0.0 }
 0x9f1   : > { %v9300_v40 = vsub.f32 %v22013_v62, %v9262_v2  ;;  %9441 = vadd.xlane.f32.xlu0 %v9440_v48 }
 0x9f2   : > { %v9362_v63 = vmul.f32 1.442695, %v9301_v18 }
 0x9f3   : > { %v9360_v6 = vmul.f32 1.442695, %v9300_v40 }
 0x9f4   : > { %19186 = vpow2.f32 %v9362_v63 }
 0x9f5   : > { %19188 = vpow2.f32 %v9360_v6 }
 0x9f6   : > { %v22181_v0 = vpop.eup %19182 }
 0x9f7   : > { %v22183_v47 = vpop.eup %19184  ;;  %v9271_v16 = vpop.xlane.xlu0 %9270  ;;  %v9449_v8 = vsel %vm2133_vm3, %v22181_v0, 0.0 }
 0x9f8   : > { %v9303_v7 = vsub.f32 %v22019_v29, %v9271_v16  ;;  %9450 = vadd.xlane.f32.xlu1 %v9449_v8  ;;  %v9268_v59 = vpop.xlane.xlu1 %9267  ;;  %v9446_v62 = vsel %vm2133_vm3, %v22183_v47, 0.0 }
 0x9f9   : > { %v9302_v19 = vsub.f32 %v22021_v51, %v9268_v59  ;;  %9447 = vadd.xlane.f32.xlu0 %v9446_v62 }
 0x9fa   : > { %v9366_v45 = vmul.f32 1.442695, %v9303_v7 }
 0x9fb   : > { %v9364_v25 = vmul.f32 1.442695, %v9302_v19  ;;  %v22215_v48 = vpop.permute.xlu0 %18685  ;;  %v23602_v19 = vld [vmem:[#allocation43_spill] sm:$0xff] }
 0x9fc   : > { %19190 = vpow2.f32 %v9366_v45  ;;  %v22225_v63 = vpop.permute.xlu1 %18680 }
 0x9fd   : > { %19192 = vpow2.f32 %v9364_v25 }
 0x9fe   : > { %v22191_v55 = vpop.eup %19186 }
 0x9ff   : > { %v22193_v15 = vpop.eup %19188  ;;  %v9455_v4 = vsel %vm2133_vm3, %v22191_v55, 0.0  ;;  %v22223_v40 = vpop.permute.xlu0 %18690 }
 0xa00   : > { %9456 = vadd.xlane.f32.xlu1 %v9455_v4  ;;  %v9452_v29 = vsel %vm2133_vm3, %v22193_v15, 0.0  ;;  %v23603_v4 = vld [vmem:[#allocation32_spill] sm:$0xff] }
 0xa01   : > { %9453 = vadd.xlane.f32.xlu0 %v9452_v29  ;;  %v23604_v29 = vld [vmem:[#allocation21_spill] sm:$0xff] }
 0xa03   : > { %v22233_v6 = vpop.permute.xlu0 %18695 }
 0xa06   : > { %v22199_v5 = vpop.eup %19190 }
 0xa07   : > { %v22201_v51 = vpop.eup %19192  ;;  %v9461_v18 = vsel %vm2133_vm3, %v22199_v5, 0.0  ;;  %v22241_v16 = vpop.permute.xlu0 %18700 }
 0xa08   : > { %9462 = vadd.xlane.f32.xlu1 %v9461_v18  ;;  %v9458_v2 = vsel %vm2133_vm3, %v22201_v51, 0.0 }
 0xa09   : > { %9459 = vadd.xlane.f32.xlu0 %v9458_v2  ;;  %v18658_v2 = vunpack.i.h.bf16 %v22027_v60 }
 0xa19   : > { %18710 = vrot.lane.b32.xlu1 %v23456_v58, %s19556_s11 }
 0xa1d   : > { %18725 = vrot.lane.b32.xlu1 %v23465_v50, %s19557_s17 }
 0xa1f   : > { %18705 = vrot.lane.b32.xlu0 %v23429_v3, %s19556_s11  ;;  %s19478_s11 = scalar_lea.vmem %s19477_s30, 8192 }
 0xa20   : > { %p19480_p9 = scmp.lt.s32.totalorder %s19478_s11, %s19472_s13 }
 0xa21   : > { %11366 = vrot.lane.b32.xlu1 %v23507_v31, %s19558_s7 }
 0xa22   : > { %p19481_p12 = por %p19480_p9, %p19479_p7 }
 0xa23   : > { %18715 = vrot.lane.b32.xlu0 %v23463_v35, %s19557_s17 }
 0xa24   : > { %p19482_p1 = pnand %p19481_p12, %p19475_p3 }
 0xa25   : > { %11455 = vrot.lane.b32.xlu1 %v23508_v20, %s19558_s7 }
 0xa27   : > { %18720 = vrot.lane.b32.xlu0 %v23511_v21, %s19557_s17 }
 0xa29   : > { %18735 = vrot.lane.b32.xlu1 %v23466_v33, %s19557_s17 }
 0xa2b   : > { %11273 = vrot.lane.b32.xlu0 %v23506_v43, %s19558_s7 }
 0xa2d   : > { %11548 = vrot.lane.b32.xlu1 %v23509_v37, %s19558_s7  ;;  %v9370_v31 = vpop.xlane.xlu1 %9369 }
 0xa2e   : > { %19194 = vrcp.f32 %v9370_v31  ;;  %v18657_v31 = vunpack.i.l.bf16 %v22027_v60 }
 0xa2f   : > { %11275 = vrot.lane.b32.xlu0 %v23513_v42, %s19558_s7 }
 0xa31   : > { %11637 = vrot.lane.b32.xlu1 %v20171_v13, %s19558_s7  ;;  %v9376_v20 = vpop.xlane.xlu1 %9375  ;;  %v23600_v13 = vld [vmem:[#allocation41_spill] sm:$0xff] }
 0xa32   : > { %19196 = vrcp.f32 %v9376_v20 }
 0xa33   : > { %11364 = vrot.lane.b32.xlu0 %v23515_v53, %s19558_s7  ;;  %v23601_v53 = vld [vmem:[#allocation31_spill] sm:$0xff] }
 0xa35   : > { %18745 = vrot.lane.b32.xlu1 %v19940_v11, %s19557_s17  ;;  %v9382_v43 = vpop.xlane.xlu1 %9381 }
 0xa36   : > { %19198 = vrcp.f32 %v9382_v43 }
 0xa37   : > { %18730 = vrot.lane.b32.xlu0 %v23517_v26, %s19557_s17 }
 0xa38   : > { %v19195_v37 = vpop.eup %19194  ;;  %v9373_v42 = vpop.xlane.xlu0 %9372 }
 0xa39   : > { %19200 = vrcp.f32 %v9373_v42  ;;  %11730 = vrot.lane.b32.xlu1 %v23600_v13, %s19558_s7  ;;  %v9388_v8 = vpop.xlane.xlu1 %9387  ;;  %v9496_v7 = vmul.f32 %v19195_v37, %v22053_v46  ;;  %v23606_v42 = vld [vmem:[#allocation47_spill] sm:$0xff] }
 0xa3a   : > { %19202 = vrcp.f32 %v9388_v8  ;;  %v23607_v8 = vld [vmem:[#allocation70_spill] sm:$0xff] }
 0xa3b   : > { %11457 = vrot.lane.b32.xlu0 %v23601_v53, %s19558_s7  ;;  %16974 = vmatprep.mubr.msk.f32.mxu0 %vm2133_vm3, %v9496_v7  ;;  %v18663_v7 = vunpack.i.h.bf16 %v23607_v8  ;;  %v18662_v53 = vunpack.i.l.bf16 %v23607_v8  ;;  %v23613_v8 = vld [vmem:[#allocation39_spill] sm:$0xff] }
 0xa3c   : > { %v19197_v59 = vpop.eup %19196  ;;  %v9379_v62 = vpop.xlane.xlu0 %9378 }
 0xa3d   : > { %19204 = vrcp.f32 %v9379_v62  ;;  %11819 = vrot.lane.b32.xlu1 %v23602_v19, %s19558_s7  ;;  %v9498_v45 = vmul.f32 %v19197_v59, %v22058_v22  ;;  %v23605_v22 = vld [vmem:[#allocation18_spill] sm:$0xff]  ;;  %v17846_v62 = vpack.c.bf16 %v18658_v2, %v18657_v31 }
 0xa3e   : > { %v9394_v25 = vpop.xlane.xlu1 %9393 }
 0xa3f   : > { %11546 = vrot.lane.b32.xlu0 %v23603_v4, %s19558_s7  ;;  %16981 = vmatprep.mubr.msk.f32.mxu1 %vm2133_vm3, %v9498_v45  ;;  %19206 = vrcp.f32 %v9394_v25  ;;  %v23608_v45 = vld [vmem:[#allocation13_spill] sm:$0xff] }
 0xa40   : > { %v9385_v46 = vpop.xlane.xlu0 %9384  ;;  %v19199_v18 = vpop.eup %19198 }
 0xa41   : > { %19208 = vrcp.f32 %v9385_v46  ;;  %18755 = vrot.lane.b32.xlu1 %v23604_v29, %s19557_s17  ;;  %v9500_v60 = vmul.f32 %v19199_v18, %v22064_v32  ;;  %v23610_v46 = vld [vmem:[#allocation23_spill] sm:$0xff]  ;;  %v23611_v32 = vld [vmem:[#allocation12_spill] sm:$0xff] }
 0xa42   : > { %v18668_v18 = vunpack.i.h.bf16 %v23611_v32  ;;  %v18667_v2 = vunpack.i.l.bf16 %v23611_v32  ;;  %v23617_v32 = vld [vmem:[#allocation51_spill] sm:$0xff] }
 0xa43   : > { %v19201_v20 = vpop.eup %19200  ;;  %18740 = vrot.lane.b32.xlu0 %v23605_v22, %s19557_s17 }
 0xa44   : > { %v9497_v43 = vmul.f32 %v19201_v20, %v22067_v49  ;;  %v9391_v37 = vpop.xlane.xlu0 %9390  ;;  %v19203_v13 = vpop.eup %19202  ;;  %v23609_v49 = vld [vmem:[#allocation37_spill] sm:$0xff] }
 0xa45   : > { %19210 = vrcp.f32 %v9391_v37  ;;  %11910 = vrot.lane.b32.xlu1 %v23606_v42, %s19558_s7  ;;  %v9502_v31 = vmul.f32 %v19203_v13, %v22071_v17  ;;  %v23612_v42 = vld [vmem:[#allocation59_spill] sm:$0xff] }
 0xa46   : > { %16975 = vmatmul.mubr.msk.f32.vlgmr.msra.gmra.mrb[120].mxu0 %vm2133_vm3, %v9497_v43  ;;  %v9400_v59 = vpop.xlane.xlu1 %9399  ;;  %v17850_v43 = vpack.c.bf16 %v18663_v7, %v18662_v53  ;;  %v17854_v7 = vpack.c.bf16 %v18668_v18, %v18667_v2  ;;  %v23619_v2 = vld [vmem:[#allocation45_spill] sm:$0xff] }
 0xa47   : > { %v19205_v19 = vpop.eup %19204  ;;  %17841 = vmatpush3.bf16.msra.mxu0 %v23608_v45  ;;  %19212 = vrcp.f32 %v9400_v59  ;;  %11639 = vrot.lane.b32.xlu0 %v23609_v49, %s19558_s7  ;;  %v23616_v49 = vld [vmem:[#allocation19_spill] sm:$0xff] }
 0xa48   : > { %16988 = vmatprep.mubr.msk.f32.mxu0 %vm2133_vm3, %v9500_v60  ;;  %17847 = vmatprep.subr.bf16.mxu0 %v17846_v62  ;;  %v9397_v25 = vpop.xlane.xlu0 %9396  ;;  %v9499_v4 = vmul.f32 %v19205_v19, %v22077_v44  ;;  %v23614_v60 = vld [vmem:[#allocation38_spill] sm:$0xff] }
 0xa49   : > { %19214 = vrcp.f32 %v9397_v25  ;;  %18765 = vrot.lane.b32.xlu1 %v23610_v46, %s19557_s17  ;;  %v19207_v20 = vpop.eup %19206  ;;  %v23615_v19 = vld [vmem:[#allocation74_spill] sm:$0xff] }
 0xa4a   : > { %16982 = vmatmul.mubr.msk.f32.vlgmr.msra.gmra.mrb[122].mxu1 %vm2133_vm3, %v9499_v4  ;;  %v18673_v45 = vunpack.i.h.bf16 %v23615_v19  ;;  %v18672_v17 = vunpack.i.l.bf16 %v23615_v19  ;;  %v9504_v13 = vmul.f32 %v19207_v20, %v22085_v23  ;;  %v23621_v19 = vld [vmem:[#allocation22_spill] sm:$0xff] }
 0xa4b   : > { %v19209_v37 = vpop.eup %19208  ;;  %17845 = vmatpush3.bf16.msra.mxu1 %v23612_v42  ;;  %11728 = vrot.lane.b32.xlu0 %v23613_v8, %s19558_s7  ;;  %v23620_v8 = vld [vmem:[#allocation25_spill] sm:$0xff] }
 0xa4c   : > { %16995 = vmatprep.mubr.msk.f32.mxu1 %vm2133_vm3, %v9502_v31  ;;  %17851 = vmatprep.subr.bf16.mxu1 %v17850_v43  ;;  %v9403_v44 = vpop.xlane.xlu0 %9402  ;;  %v9501_v59 = vmul.f32 %v19209_v37, %v22081_v27  ;;  %v23618_v31 = vld [vmem:[#allocation73_spill] sm:$0xff] }
 0xa4d   : > { %19216 = vrcp.f32 %v9403_v44  ;;  %12003 = vrot.lane.b32.xlu1 %v23614_v60, %s19558_s7  ;;  %v18678_v37 = vunpack.i.h.bf16 %v23618_v31  ;;  %v18677_v23 = vunpack.i.l.bf16 %v23618_v31  ;;  %v18683_v44 = vunpack.i.h.bf16 %v22225_v63 }
 0xa4e   : > { %16989 = vmatmul.mubr.msk.f32.vlgmr.msra.gmra.mrb[122].mxu0 %vm2133_vm3, %v9501_v59 }
 0xa4f   : > { %v19211_v53 = vpop.eup %19210  ;;  %17849 = vmatpush3.bf16.msra.mxu0 %v17846_v62  ;;  %18750 = vrot.lane.b32.xlu0 %v23616_v49, %s19557_s17  ;;  %v17858_v62 = vpack.c.bf16 %v18673_v45, %v18672_v17  ;;  %v17862_v59 = vpack.c.bf16 %v18678_v37, %v18677_v23  ;;  %v23622_v17 = vld [vmem:[#allocation42_spill] sm:$0xff] }
 0xa50   : > { %17002 = vmatprep.mubr.msk.f32.mxu0 %vm2133_vm3, %v9504_v13  ;;  %17855 = vmatprep.subr.bf16.mxu0 %v17854_v7  ;;  %v9409_v27 = vpop.xlane.xlu0 %9408  ;;  %v9503_v25 = vmul.f32 %v19211_v53, %v22093_v10  ;;  %v23623_v13 = vld [vmem:[#allocation49_spill] sm:$0xff] }
 0xa51   : > { %v19213_v4 = vpop.eup %19212  ;;  %12092 = vrot.lane.b32.xlu1 %v23617_v32, %s19558_s7  ;;  %19218 = vrcp.f32 %v9409_v27  ;;  %v23624_v53 = vld [vmem:[#allocation53_spill] sm:$0xff]  ;;  %v23625_v32 = vld [vmem:[#allocation20_spill] sm:$0xff] }
 0xa52   : > { %16996 = vmatmul.mubr.msk.f32.vlgmr.msra.gmra.mrb[124].mxu1 %vm2133_vm3, %v9503_v25  ;;  %v9506_v20 = vmul.f32 %v19213_v4, %v22099_v28  ;;  %v18682_v28 = vunpack.i.l.bf16 %v22225_v63  ;;  %v18687_v4 = vunpack.i.l.bf16 %v22215_v48 }
 0xa53   : > { %v19215_v18 = vpop.eup %19214  ;;  %17853 = vmatpush3.bf16.msra.mxu1 %v17850_v43  ;;  %11821 = vrot.lane.b32.xlu0 %v23619_v2, %s19558_s7 }
 0xa54   : > { %17859 = vmatprep.subr.bf16.mxu1 %v17858_v62  ;;  %v9406_v10 = vpop.xlane.xlu0 %9405  ;;  %17009 = vmatprep.mubr.msk.f32.mxu1 %vm2133_vm3, %v9506_v20  ;;  %v9505_v42 = vmul.f32 %v19215_v18, %v22095_v41  ;;  %v17866_v63 = vpack.c.bf16 %v18683_v44, %v18682_v28  ;;  %v18693_v20 = vunpack.i.h.bf16 %v22223_v40  ;;  %v18692_v18 = vunpack.i.l.bf16 %v22223_v40  ;;  %v23627_v40 = vld [vmem:[#allocation46_spill] sm:$0xff]  ;;  %v23628_v28 = vld [vmem:[#allocation52_spill] sm:$0xff] }
 0xa55   : > { %19220 = vrcp.f32 %v9406_v10  ;;  %18775 = vrot.lane.b32.xlu1 %v23620_v8, %s19557_s17 }
 0xa56   : > { %17003 = vmatmul.mubr.msk.f32.vlgmr.msra.gmra.mrb[124].mxu0 %vm2133_vm3, %v9505_v42  ;;  %v9412_v43 = vpop.xlane.xlu1 %9411 }
 0xa57   : > { %v19217_v60 = vpop.eup %19216  ;;  %17857 = vmatpush3.bf16.msra.mxu0 %v17854_v7  ;;  %19222 = vrcp.f32 %v9412_v43  ;;  %18760 = vrot.lane.b32.xlu0 %v23621_v19, %s19557_s17  ;;  %v23629_v43 = vld [vmem:[#allocation55_spill] sm:$0xff] }
 0xa58   : > { %17863 = vmatprep.subr.bf16.mxu0 %v17862_v59  ;;  %v9415_v41 = vpop.xlane.xlu0 %9414  ;;  %v9507_v45 = vmul.f32 %v19217_v60, %v22107_v57  ;;  %v18688_v57 = vunpack.i.h.bf16 %v22215_v48 }
 0xa59   : > { %19224 = vrcp.f32 %v9415_v41  ;;  %12185 = vrot.lane.b32.xlu1 %v23622_v17, %s19558_s7  ;;  %v18698_v41 = vunpack.i.h.bf16 %v22233_v6  ;;  %v23631_v17 = vld [vmem:[#allocation48_spill] sm:$0xff] }
 0xa5a   : > { %17010 = vmatmul.mubr.msk.f32.vlgmr.msra.gmra.mrb[126].mxu1 %vm2133_vm3, %v9507_v45  ;;  %v17870_v10 = vpack.c.bf16 %v18688_v57, %v18687_v4  ;;  %v18697_v45 = vunpack.i.l.bf16 %v22233_v6  ;;  %v18703_v4 = vunpack.i.h.bf16 %v22241_v16 }
 0xa5b   : > { %17861 = vmatpush3.bf16.msra.mxu1 %v17858_v62  ;;  %11912 = vrot.lane.b32.xlu0 %v23623_v13, %s19558_s7  ;;  %v19219_v27 = vpop.eup %19218 }
 0xa5c   : > { %17867 = vmatprep.subr.bf16.mxu1 %v17866_v63  ;;  %v9509_v62 = vmul.f32 %v19219_v27, %v22111_v39  ;;  %v23632_v27 = vld [vmem:[#allocation26_spill] sm:$0xff]  ;;  %v17878_v6 = vpack.c.bf16 %v18698_v41, %v18697_v45 }
 0xa5d   : > { %v9421_v7 = vpop.xlane.xlu0 %9420  ;;  %12274 = vrot.lane.b32.xlu1 %v23624_v53, %s19558_s7 }
 0xa5e   : > { %19226 = vrcp.f32 %v9421_v7 }
 0xa5f   : > { %v19221_v25 = vpop.eup %19220  ;;  %12001 = vrot.lane.b32.xlu0 %v23625_v32, %s19558_s7  ;;  %v18702_v32 = vunpack.i.l.bf16 %v22241_v16 }
 0xa60   : > { %v9508_v31 = vmul.f32 %v19221_v25, %v22117_v34  ;;  %v23626_v34 = vld [vmem:[#allocation24_spill] sm:$0xff] }
 0xa61   : > { %v19223_v37 = vpop.eup %19222  ;;  %v9418_v23 = vpop.xlane.xlu0 %9417  ;;  %18785 = vrot.lane.b32.xlu1 %v23429_v3, %s19557_s17  ;;  %v17882_v16 = vpack.c.bf16 %v18703_v4, %v18702_v32 }
 0xa62   : > { %19228 = vrcp.f32 %v9418_v23  ;;  %17016 = vmatprep.mubr.msk.f32.mxu0 %vm2133_vm3, %v9508_v31  ;;  %v9510_v48 = vmul.f32 %v19223_v37, %v22123_v30  ;;  %v17874_v30 = vpack.c.bf16 %v18693_v20, %v18692_v18  ;;  %v23634_v31 = vld [vmem:[#allocation54_spill] sm:$0xff] }
 0xa63   : > { %v19225_v2 = vpop.eup %19224  ;;  %18770 = vrot.lane.b32.xlu0 %v23626_v34, %s19557_s17  ;;  %17017 = vmatmul.mubr.msk.f32.vlgmr.msra.gmra.mrb[126].mxu0 %vm2133_vm3, %v9509_v62 }
 0xa64   : > { %17865 = vmatpush3.bf16.msra.mxu0 %v17862_v59  ;;  %17023 = vmatprep.mubr.msk.f32.mxu1 %vm2133_vm3, %v9510_v48  ;;  %v9511_v39 = vmul.f32 %v19225_v2, %v22119_v38  ;;  %v23630_v59 = vld [vmem:[#allocation40_spill] sm:$0xff] }
 0xa65   : > { %17871 = vmatprep.subr.bf16.mxu0 %v17870_v10  ;;  %12367 = vrot.lane.b32.xlu1 %v23627_v40, %s19558_s7  ;;  %v9427_v42 = vpop.xlane.xlu1 %9426 }
 0xa66   : > { %19230 = vrcp.f32 %v9427_v42  ;;  %v9424_v44 = vpop.xlane.xlu0 %9423  ;;  %17024 = vmatmul.mubr.msk.f32.vlgmr.msra.gmra.mrb[128].mxu1 %vm2133_vm3, %v9511_v39  ;;  %v23637_v39 = vld [vmem:[#allocation50_spill] sm:$0xff] }
 0xa67   : > { %19232 = vrcp.f32 %v9424_v44  ;;  %17869 = vmatpush3.bf16.msra.mxu1 %v17866_v63  ;;  %12094 = vrot.lane.b32.xlu0 %v23628_v28, %s19558_s7  ;;  %v23638_v44 = vld [vmem:[#allocation58_spill] sm:$0xff] }
 0xa68   : > { %17875 = vmatprep.subr.bf16.mxu1 %v17874_v30  ;;  %v19227_v38 = vpop.eup %19226 }
 0xa69   : > { %12456 = vrot.lane.b32.xlu1 %v23629_v43, %s19558_s7  ;;  %v9513_v53 = vmul.f32 %v19227_v38, %v22131_v12 }
 0xa6b   : > { %12183 = vrot.lane.b32.xlu0 %v23630_v59, %s19558_s7 }
 0xa6c   : > { %v19229_v60 = vpop.eup %19228 }
 0xa6d   : > { %12547 = vrot.lane.b32.xlu1 %v23631_v17, %s19558_s7  ;;  %v9433_v63 = vpop.xlane.xlu1 %9432  ;;  %v9512_v13 = vmul.f32 %v19229_v60, %v22135_v9  ;;  %v23633_v9 = vld [vmem:[#allocation57_spill] sm:$0xff] }
 0xa6e   : > { %19234 = vrcp.f32 %v9433_v63  ;;  %v9430_v7 = vpop.xlane.xlu0 %9429 }
 0xa6f   : > { %19236 = vrcp.f32 %v9430_v7  ;;  %18780 = vrot.lane.b32.xlu0 %v23632_v27, %s19557_s17  ;;  %17030 = vmatprep.mubr.msk.f32.mxu0 %vm2133_vm3, %v9512_v13 }
 0xa70   : > { %v19231_v25 = vpop.eup %19230  ;;  %17031 = vmatmul.mubr.msk.f32.vlgmr.msra.gmra.mrb[128].mxu0 %vm2133_vm3, %v9513_v53 }
 0xa71   : > { %v19233_v57 = vpop.eup %19232  ;;  %17873 = vmatpush3.bf16.msra.mxu0 %v17870_v10  ;;  %12638 = vrot.lane.b32.xlu1 %v23633_v9, %s19558_s7  ;;  %v9515_v37 = vmul.f32 %v19231_v25, %v22141_v56 }
 0xa72   : > { %17879 = vmatprep.subr.bf16.mxu0 %v17878_v6  ;;  %v9514_v12 = vmul.f32 %v19233_v57, %v22143_v54  ;;  %v23635_v54 = vld [vmem:[#allocation44_spill] sm:$0xff]  ;;  %v674_v57 = vld [vmem:[#allocation7 + $0x10] sm:$0xff] }
 0xa73   : > { %12276 = vrot.lane.b32.xlu0 %v23634_v31, %s19558_s7 }
 0xa74   : > { %17037 = vmatprep.mubr.msk.f32.mxu1 %vm2133_vm3, %v9514_v12 }
 0xa75   : > { %18800 = vrot.lane.b32.xlu1 %v23511_v21, %s19559_s8  ;;  %v9439_v23 = vpop.xlane.xlu1 %9438  ;;  %17038 = vmatmul.mubr.msk.f32.vlgmr.msra.gmra.mrb[130].mxu1 %vm2133_vm3, %v9515_v37 }
 0xa76   : > { %19238 = vrcp.f32 %v9439_v23  ;;  %17877 = vmatpush3.bf16.msra.mxu1 %v17874_v30  ;;  %v9436_v62 = vpop.xlane.xlu0 %9435 }
 0xa77   : > { %19240 = vrcp.f32 %v9436_v62  ;;  %17883 = vmatprep.subr.bf16.mxu1 %v17882_v16  ;;  %12365 = vrot.lane.b32.xlu0 %v23635_v54, %s19558_s7 }
 0xa78   : > { %v19235_v20 = vpop.eup %19234 }
 0xa79   : > { %v19237_v56 = vpop.eup %19236  ;;  %18810 = vrot.lane.b32.xlu1 %v23517_v26, %s19559_s8  ;;  %v9517_v21 = vmul.f32 %v19235_v20, %v22151_v61  ;;  %v23636_v26 = vld [vmem:[#allocation56_spill] sm:$0xff] }
 0xa7a   : > { %v9516_v18 = vmul.f32 %v19237_v56, %v22153_v36 }
 0xa7b   : > { %18790 = vrot.lane.b32.xlu0 %v23456_v58, %s19557_s17 }
 0xa7c   : > { %17044 = vmatprep.mubr.msk.f32.mxu0 %vm2133_vm3, %v9516_v18 }
 0xa7d   : > { %18820 = vrot.lane.b32.xlu1 %v23605_v22, %s19559_s8  ;;  %17045 = vmatmul.mubr.msk.f32.vlgmr.msra.gmra.mrb[130].mxu0 %vm2133_vm3, %v9517_v21  ;;  %v9445_v48 = vpop.xlane.xlu1 %9444 }
 0xa7e   : > { %17881 = vmatpush3.bf16.msra.mxu0 %v17878_v6  ;;  %19242 = vrcp.f32 %v9445_v48  ;;  %v9442_v2 = vpop.xlane.xlu0 %9441 }
 0xa7f   : > { %19244 = vrcp.f32 %v9442_v2  ;;  %12458 = vrot.lane.b32.xlu0 %v23636_v26, %s19558_s7 }
 0xa80   : > { %v19239_v36 = vpop.eup %19238 }
 0xa81   : > { %v19241_v10 = vpop.eup %19240  ;;  %18830 = vrot.lane.b32.xlu1 %v23616_v49, %s19559_s8  ;;  %v9519_v22 = vmul.f32 %v19239_v36, %v22161_v14 }
 0xa82   : > { %v9518_v61 = vmul.f32 %v19241_v10, %v22163_v24 }
 0xa83   : > { %12549 = vrot.lane.b32.xlu0 %v23637_v39, %s19558_s7 }
 0xa84   : > { %17051 = vmatprep.mubr.msk.f32.mxu1 %vm2133_vm3, %v9518_v61 }
 0xa85   : > { %v9451_v40 = vpop.xlane.xlu1 %9450  ;;  %17052 = vmatmul.mubr.msk.f32.vlgmr.msra.gmra.mrb[132].mxu1 %vm2133_vm3, %v9519_v22 }
 0xa86   : > { %19246 = vrcp.f32 %v9451_v40  ;;  %17885 = vmatpush3.bf16.msra.mxu1 %v17882_v16  ;;  %v9448_v42 = vpop.xlane.xlu0 %9447 }
 0xa87   : > { %19248 = vrcp.f32 %v9448_v42  ;;  %12640 = vrot.lane.b32.xlu0 %v23638_v44, %s19558_s7 }
 0xa88   : > { %v19243_v49 = vpop.eup %19242 }
 0xa89   : > { %v19245_v30 = vpop.eup %19244  ;;  %v9521_v14 = vmul.f32 %v19243_v49, %v22171_v52 }
 0xa8a   : > { %v9520_v24 = vmul.f32 %v19245_v30, %v22173_v1 }
 0xa8b   : > { %18795 = vrot.lane.b32.xlu0 %v23463_v35, %s19559_s8 }
 0xa8c   : > { %17058 = vmatprep.mubr.msk.f32.mxu0 %vm2133_vm3, %v9520_v24 }
 0xa8d   : > { %17059 = vmatmul.mubr.msk.f32.vlgmr.msra.gmra.mrb[132].mxu0 %vm2133_vm3, %v9521_v14  ;;  %v9457_v59 = vpop.xlane.xlu1 %9456 }
 0xa8e   : > { %v9454_v28 = vpop.xlane.xlu0 %9453 }
 0xa8f   : > { %19250 = vrcp.f32 %v9454_v28  ;;  %18805 = vrot.lane.b32.xlu0 %v23465_v50, %s19559_s8 }
 0xa90   : > { %v19247_v43 = vpop.eup %19246  ;;  %19252 = vrcp.f32 %v9457_v59 }
 0xa91   : > { %v19249_v38 = vpop.eup %19248  ;;  %v9523_v35 = vmul.f32 %v19247_v43, %v22181_v0 }
 0xa92   : > { %v9522_v60 = vmul.f32 %v19249_v38, %v22183_v47 }
 0xa93   : > { %18815 = vrot.lane.b32.xlu0 %v23466_v33, %s19559_s8 }
 0xa94   : > { %17065 = vmatprep.mubr.msk.f32.mxu1 %vm2133_vm3, %v9522_v60 }
 0xa95   : > { %v9463_v52 = vpop.xlane.xlu1 %9462  ;;  %17066 = vmatmul.mubr.msk.f32.vlgmr.msra.gmra.mrb[134].mxu1 %vm2133_vm3, %v9523_v35 }
 0xa96   : > { %19254 = vrcp.f32 %v9463_v52  ;;  %v9460_v1 = vpop.xlane.xlu0 %9459 }
 0xa97   : > { %19256 = vrcp.f32 %v9460_v1  ;;  %18825 = vrot.lane.b32.xlu0 %v19940_v11, %s19559_s8 }
 0xa99   : > { %v19251_v50 = vpop.eup %19250  ;;  %v18711_v41 = vpop.permute.xlu1 %18710 }
 0xa9a   : > { %v18713_v47 = vunpack.i.h.bf16 %v18711_v41  ;;  %v18712_v45 = vunpack.i.l.bf16 %v18711_v41  ;;  %v18706_v17 = vpop.permute.xlu0 %18705  ;;  %v9524_v33 = vmul.f32 %v19251_v50, %v22193_v15  ;;  %v19253_v25 = vpop.eup %19252 }
 0xa9b   : > { %v18708_v0 = vunpack.i.h.bf16 %v18706_v17  ;;  %v18707_v63 = vunpack.i.l.bf16 %v18706_v17  ;;  %v9525_v31 = vmul.f32 %v19253_v25, %v22191_v55 }
 0xa9c   : > { %17072 = vmatprep.mubr.msk.f32.mxu0 %vm2133_vm3, %v9524_v33  ;;  %v17890_v13 = vpack.c.bf16 %v18713_v47, %v18712_v45 }
 0xa9d   : > { %v18726_v7 = vpop.permute.xlu1 %18725  ;;  %v17886_v53 = vpack.c.bf16 %v18708_v0, %v18707_v63 }
 0xa9e   : > { %v18716_v6 = vpop.permute.xlu0 %18715  ;;  %17891 = vmatprep.subr.bf16.mxu1 %v17890_v13  ;;  %v18728_v48 = vunpack.i.h.bf16 %v18726_v7 }
 0xa9f   : > { %v18718_v4 = vunpack.i.h.bf16 %v18716_v6  ;;  %v18717_v11 = vunpack.i.l.bf16 %v18716_v6  ;;  %17887 = vmatprep.subr.bf16.mxu0 %v17886_v53  ;;  %17893 = vmatpush3.bf16.msra.mxu1 %v17890_v13 }
 0xaa0   : > { %v19255_v32 = vpop.eup %19254  ;;  %17889 = vmatpush3.bf16.msra.mxu0 %v17886_v53 }
 0xaa1   : > { %v19257_v9 = vpop.eup %19256  ;;  %v17894_v12 = vpack.c.bf16 %v18718_v4, %v18717_v11  ;;  %v11367_v15 = vpop.permute.xlu1 %11366  ;;  %17082 = vmatprep.subr.mxu0 %v674_v57  ;;  %v9527_v20 = vmul.f32 %v19255_v32, %v22199_v5  ;;  %v18727_v5 = vunpack.i.l.bf16 %v18726_v7 }
 0xaa2   : > { %v18721_v37 = vpop.permute.xlu0 %18720  ;;  %v9526_v23 = vmul.f32 %v19257_v9, %v22201_v51 }
 0xaa3   : > { %v18723_v16 = vunpack.i.h.bf16 %v18721_v37  ;;  %v18722_v62 = vunpack.i.l.bf16 %v18721_v37  ;;  %17073 = vmatmul.mubr.msk.f32.vlgmr.msra.gmra.mrb[134].mxu0 %vm2133_vm3, %v9525_v31  ;;  %17896 = vmatprep.subr.msk.bf16.mxu1 %vm20122_vm2, %v17894_v12  ;;  %v17906_v36 = vpack.c.bf16 %v18728_v48, %v18727_v5 }
 0xaa4   : > { %17079 = vmatprep.mubr.msk.f32.mxu1 %vm2133_vm3, %v9526_v23  ;;  %17083 = vmatpush3.msra.mxu0 %v674_v57 }
 0xaa5   : > { %v11456_v56 = vpop.permute.xlu1 %11455  ;;  %17080 = vmatmul.mubr.msk.f32.vlgmr.msra.gmra.mrb[136].mxu1 %vm2133_vm3, %v9527_v20  ;;  %v17900_v18 = vpack.c.bf16 %v18723_v16, %v18722_v62 }
 0xaa6   : > { %v11274_v55 = vpop.permute.xlu0 %11273 }
 0xaa7   : > { %17136 = vmatprep.mubr.msk.f32.mxu1 %vm682_vm1, %v11274_v55 }
 0xaa8   : > { %17899 = vmatpush3.bf16.xpose.msk.msra.mxu1 %vm20122_vm2, %v17894_v12 }
 0xaa9   : > { %v18736_v51 = vpop.permute.xlu1 %18735  ;;  %17902 = vmatprep.subr.msk.bf16.mxu1 %vm20122_vm2, %v17900_v18 }
 0xaaa   : > { %v11276_v21 = vpop.permute.xlu0 %11275  ;;  %v18738_v24 = vunpack.i.h.bf16 %v18736_v51  ;;  %v18737_v14 = vunpack.i.l.bf16 %v18736_v51 }
 0xaac   : > { %v17918_v38 = vpack.c.bf16 %v18738_v24, %v18737_v14 }
 0xaad   : > { %v11549_v2 = vpop.permute.xlu1 %11548 }
 0xaae   : > { %v11365_v26 = vpop.permute.xlu0 %11364 }
 0xaaf   : > { %17137 = vmatmul.mubr.msk.f32.vlgmr.msra.gmra.mrb[138].mxu1 %vm682_vm1, %v11276_v21 }
 0xab0   : > { %17905 = vmatpush3.bf16.xpose.msk.msra.mxu1 %vm20122_vm2, %v17900_v18  ;;  %17143 = vmatprep.mubr.msk.f32.mxu1 %vm682_vm1, %v11365_v26 }
 0xab1   : > { %v11638_v10 = vpop.permute.xlu1 %11637  ;;  %17908 = vmatprep.subr.msk.bf16.mxu1 %vm20122_vm2, %v17906_v36 }
 0xab2   : > { %v18731_v61 = vpop.permute.xlu0 %18730 }
 0xab3   : > { %v18733_v39 = vunpack.i.h.bf16 %v18731_v61  ;;  %v18732_v22 = vunpack.i.l.bf16 %v18731_v61 }
 0xab5   : > { %v18746_v40 = vpop.permute.xlu1 %18745  ;;  %v17912_v44 = vpack.c.bf16 %v18733_v39, %v18732_v22 }
 0xab6   : > { %v11458_v42 = vpop.permute.xlu0 %11457  ;;  %v18748_v63 = vunpack.i.h.bf16 %v18746_v40  ;;  %v18747_v13 = vunpack.i.l.bf16 %v18746_v40 }
 0xab7   : > { %17144 = vmatmul.mubr.msk.f32.vlgmr.msra.gmra.mrb[140].mxu1 %vm682_vm1, %v11367_v15 }
 0xab8   : > { %17911 = vmatpush3.bf16.xpose.msk.msra.mxu1 %vm20122_vm2, %v17906_v36  ;;  %17150 = vmatprep.mubr.msk.f32.mxu1 %vm682_vm1, %v11456_v56  ;;  %v17930_v25 = vpack.c.bf16 %v18748_v63, %v18747_v13 }
 0xab9   : > { %v11731_v49 = vpop.permute.xlu1 %11730  ;;  %17914 = vmatprep.subr.msk.bf16.mxu1 %vm20122_vm2, %v17912_v44 }
 0xaba   : > { %v11547_v30 = vpop.permute.xlu0 %11546 }
 0xabd   : > { %v11820_v28 = vpop.permute.xlu1 %11819 }
 0xabe   : > { %v18741_v43 = vpop.permute.xlu0 %18740 }
 0xabf   : > { %17151 = vmatmul.mubr.msk.f32.vlgmr.msra.gmra.mrb[142].mxu1 %vm682_vm1, %v11458_v42  ;;  %v18743_v1 = vunpack.i.h.bf16 %v18741_v43  ;;  %v18742_v50 = vunpack.i.l.bf16 %v18741_v43 }
 0xac0   : > { %17917 = vmatpush3.bf16.xpose.msk.msra.mxu1 %vm20122_vm2, %v17912_v44  ;;  %17157 = vmatprep.mubr.msk.f32.mxu1 %vm682_vm1, %v11547_v30 }
 0xac1   : > { %v18756_v59 = vpop.permute.xlu1 %18755  ;;  %17920 = vmatprep.subr.msk.bf16.mxu1 %vm20122_vm2, %v17918_v38  ;;  %v17924_v17 = vpack.c.bf16 %v18743_v1, %v18742_v50 }
 0xac2   : > { %v18758_v60 = vunpack.i.h.bf16 %v18756_v59  ;;  %v18757_v35 = vunpack.i.l.bf16 %v18756_v59  ;;  %v11640_v52 = vpop.permute.xlu0 %11639 }
 0xac4   : > { %v22444_v41 = vpack.c.bf16 %v18758_v60, %v18757_v35 }
 0xac5   : > { %v11911_v47 = vpop.permute.xlu1 %11910 }
 0xac6   : > { %v11729_v45 = vpop.permute.xlu0 %11728  ;;  %17944 = vmatprep.subr.msk.bf16.mxu0 %vm20122_vm2, %v22444_v41 }
 0xac7   : > { %17158 = vmatmul.mubr.msk.f32.vlgmr.msra.gmra.mrb[144].mxu1 %vm682_vm1, %v11549_v2 }
 0xac8   : > { %17923 = vmatpush3.bf16.xpose.msk.msra.mxu1 %vm20122_vm2, %v17918_v38  ;;  %17164 = vmatprep.mubr.msk.f32.mxu1 %vm682_vm1, %v11638_v10 }
 0xac9   : > { %v22453_v33 = vpop.permute.xlu1 %18765  ;;  %17926 = vmatprep.subr.msk.bf16.mxu1 %vm20122_vm2, %v17924_v17 }
 0xaca   : > { %v18751_v0 = vpop.permute.xlu0 %18750 }
 0xacb   : > { %v18753_v4 = vunpack.i.h.bf16 %v18751_v0  ;;  %v18752_v11 = vunpack.i.l.bf16 %v18751_v0  ;;  %v18767_v0 = vunpack.i.l.bf16 %v22453_v33 }
 0xacd   : > { %v22457_v7 = vpop.permute.xlu1 %12003  ;;  %v17936_v12 = vpack.c.bf16 %v18753_v4, %v18752_v11 }
 0xace   : > { %v11822_v53 = vpop.permute.xlu0 %11821 }
 0xacf   : > { %17165 = vmatmul.mubr.msk.f32.vlgmr.msra.gmra.mrb[146].mxu1 %vm682_vm1, %v11640_v52 }
 0xad0   : > { %17929 = vmatpush3.bf16.xpose.msk.msra.mxu1 %vm20122_vm2, %v17924_v17  ;;  %17171 = vmatprep.mubr.msk.f32.mxu1 %vm682_vm1, %v11729_v45  ;;  %v18768_v17 = vunpack.i.h.bf16 %v22453_v33 }
 0xad1   : > { %v12093_v6 = vpop.permute.xlu1 %12092  ;;  %17932 = vmatprep.subr.msk.bf16.mxu1 %vm20122_vm2, %v17930_v25 }
 0xad2   : > { %v18761_v57 = vpop.permute.xlu0 %18760 }
 0xad3   : > { %v18763_v31 = vunpack.i.h.bf16 %v18761_v57  ;;  %v18762_v37 = vunpack.i.l.bf16 %v18761_v57 }
 0xad5   : > { %v22465_v32 = vpop.permute.xlu1 %18775  ;;  %v17948_v62 = vpack.c.bf16 %v18763_v31, %v18762_v37 }
 0xad6   : > { %v11913_v9 = vpop.permute.xlu0 %11912 }
 0xad7   : > { %17172 = vmatmul.mubr.msk.f32.vlgmr.msra.gmra.mrb[148].mxu1 %vm682_vm1, %v11731_v49 }
 0xad8   : > { %17935 = vmatpush3.bf16.xpose.msk.msra.mxu1 %vm20122_vm2, %v17930_v25  ;;  %17178 = vmatprep.mubr.msk.f32.mxu1 %vm682_vm1, %v11820_v28 }
 0xad9   : > { %17938 = vmatprep.subr.msk.bf16.mxu1 %vm20122_vm2, %v17936_v12  ;;  %v22475_v23 = vpop.permute.xlu1 %12185 }
 0xada   : > { %v22473_v15 = vpop.permute.xlu0 %12001 }
 0xadd   : > { %v12275_v20 = vpop.permute.xlu1 %12274 }
 0xade   : > { %v18771_v16 = vpop.permute.xlu0 %18770 }
 0xadf   : > { %17179 = vmatmul.mubr.msk.f32.vlgmr.msra.gmra.mrb[150].mxu1 %vm682_vm1, %v11822_v53  ;;  %v18773_v55 = vunpack.i.h.bf16 %v18771_v16  ;;  %v18772_v18 = vunpack.i.l.bf16 %v18771_v16  ;;  %v22526_v53 = vpack.c.bf16 %v18768_v17, %v18767_v0 }
 0xae0   : > { %17941 = vmatpush3.bf16.xpose.msk.msra.mxu1 %vm20122_vm2, %v17936_v12  ;;  %17185 = vmatprep.mubr.msk.f32.mxu1 %vm682_vm1, %v11911_v47 }
 0xae1   : > { %17950 = vmatprep.subr.msk.bf16.mxu1 %vm20122_vm2, %v17948_v62  ;;  %v17960_v21 = vpack.c.bf16 %v18773_v55, %v18772_v18  ;;  %v22485_v48 = vpop.permute.xlu1 %18785 }
 0xae2   : > { %v12095_v56 = vpop.permute.xlu0 %12094 }
 0xae5   : > { %v22493_v36 = vpop.permute.xlu1 %12367 }
 0xae6   : > { %v22483_v51 = vpop.permute.xlu0 %12183 }
 0xae7   : > { %17186 = vmatmul.mubr.msk.f32.vlgmr.msra.gmra.mrb[152].mxu1 %vm682_vm1, %v11913_v9 }
 0xae8   : > { %17953 = vmatpush3.bf16.xpose.msk.msra.mxu1 %vm20122_vm2, %v17948_v62  ;;  %17199 = vmatprep.mubr.msk.f32.mxu1 %vm682_vm1, %v12093_v6 }
 0xae9   : > { %17962 = vmatprep.subr.msk.bf16.mxu1 %vm20122_vm2, %v17960_v21  ;;  %v12457_v22 = vpop.permute.xlu1 %12456 }
 0xaea   : > { %v18781_v5 = vpop.permute.xlu0 %18780 }
 0xaeb   : > { %v18783_v2 = vunpack.i.h.bf16 %v18781_v5  ;;  %v18782_v26 = vunpack.i.l.bf16 %v18781_v5 }
 0xaed   : > { %v17972_v61 = vpack.c.bf16 %v18783_v2, %v18782_v26  ;;  %v22507_v49 = vpop.permute.xlu1 %12547 }
 0xaee   : > { %v12277_v10 = vpop.permute.xlu0 %12276 }
 0xaef   : > { %17200 = vmatmul.mubr.msk.f32.vlgmr.msra.gmra.mrb[154].mxu1 %vm682_vm1, %v12095_v56 }
 0xaf0   : > { %17965 = vmatpush3.bf16.xpose.msk.msra.mxu1 %vm20122_vm2, %v17960_v21  ;;  %17213 = vmatprep.mubr.msk.f32.mxu1 %vm682_vm1, %v12275_v20 }
 0xaf1   : > { %17974 = vmatprep.subr.msk.bf16.mxu1 %vm20122_vm2, %v17972_v61  ;;  %v12639_v28 = vpop.permute.xlu1 %12638 }
 0xaf2   : > { %v22501_v39 = vpop.permute.xlu0 %12365 }
 0xaf6   : > { %v18791_v40 = vpop.permute.xlu0 %18790 }
 0xaf7   : > { %v18793_v42 = vunpack.i.h.bf16 %v18791_v40  ;;  %v18792_v44 = vunpack.i.l.bf16 %v18791_v40  ;;  %17214 = vmatmul.mubr.msk.f32.vlgmr.msra.gmra.mrb[156].mxu1 %vm682_vm1, %v12277_v10 }
 0xaf8   : > { %17977 = vmatpush3.bf16.xpose.msk.msra.mxu1 %vm20122_vm2, %v17972_v61  ;;  %17227 = vmatprep.mubr.msk.f32.mxu1 %vm682_vm1, %v12457_v22 }
 0xaf9   : > { %v17984_v30 = vpack.c.bf16 %v18793_v42, %v18792_v44 }
 0xafa   : > { %v12459_v24 = vpop.permute.xlu0 %12458 }
 0xafb   : > { %17986 = vmatprep.subr.msk.bf16.mxu1 %vm20122_vm2, %v17984_v30 }
 0xafe   : > { %v22511_v14 = vpop.permute.xlu0 %12549 }
 0xaff   : > { %17228 = vmatmul.mubr.msk.f32.vlgmr.msra.gmra.mrb[158].mxu1 %vm682_vm1, %v12459_v24 }
 0xb00   : > { %17989 = vmatpush3.bf16.xpose.msk.msra.mxu1 %vm20122_vm2, %v17984_v30  ;;  %17241 = vmatprep.mubr.msk.f32.mxu1 %vm682_vm1, %v12639_v28 }
 0xb02   : > { %v12641_v43 = vpop.permute.xlu0 %12640 }
 0xb06   : > { %v22517_v38 = vpop.permute.xlu0 %18795 }
 0xb07   : > { %17242 = vmatmul.mubr.msk.f32.vlgmr.msra.gmra.mrb[160].mxu1 %vm682_vm1, %v12641_v43  ;;  %v18778_v43 = vunpack.i.h.bf16 %v22465_v32  ;;  %v18798_v17 = vunpack.i.h.bf16 %v22517_v38  ;;  %v18797_v0 = vunpack.i.l.bf16 %v22517_v38 }
 0xb0a   : > { %v18806_v59 = vpop.permute.xlu0 %18805 }
 0xb0b   : > { %v18808_v60 = vunpack.i.h.bf16 %v18806_v59  ;;  %v18807_v35 = vunpack.i.l.bf16 %v18806_v59  ;;  %v18777_v59 = vunpack.i.l.bf16 %v22465_v32 }
 0xb0d   : > { %v17998_v52 = vpack.c.bf16 %v18808_v60, %v18807_v35  ;;  %v17966_v60 = vpack.c.bf16 %v18778_v43, %v18777_v59 }
 0xb0e   : > { %v18816_v1 = vpop.permute.xlu0 %18815 }
 0xb0f   : > { %v18818_v50 = vunpack.i.h.bf16 %v18816_v1  ;;  %v18817_v47 = vunpack.i.l.bf16 %v18816_v1  ;;  %17999 = vmatprep.subr.bf16.mxu1 %v17998_v52  ;;  %v18787_v1 = vunpack.i.l.bf16 %v22485_v48 }
 0xb10   : > { %18001 = vmatpush3.bf16.msra.mxu1 %v17998_v52  ;;  %v18788_v52 = vunpack.i.h.bf16 %v22485_v48 }
 0xb11   : > { %v22520_v45 = vpack.c.bf16 %v18818_v50, %v18817_v47 }
 0xb12   : > { %v17978_v50 = vpack.c.bf16 %v18788_v52, %v18787_v1 }
 0xb13   : > { %18007 = vmatprep.subr.bf16.mxu1 %v22520_v45 }
 0xb19   : > { %v16976_v63 = vpop.f32.mrb[120].mxu0 }
 0xb1a   : > { %v9606_v13 = vpop.f32.mrb[121].mxu0 }
 0xb1b   : > { %17084 = vmatprep.mubr.msk.f32.mxu0 %vm682_vm1, %v9606_v13 }
 0xb1c   : > { %17085 = vmatmul.mubr.msk.f32.vlgmr.msra.gmra.mrb[88].mxu0 %vm682_vm1, %v16976_v63  ;;  %v18801_v63 = vpop.permute.xlu1 %18800 }
 0xb1d   : > { %17947 = vmatpush3.bf16.xpose.msk.msra.mxu0 %vm20122_vm2, %v22444_v41  ;;  %v16983_v25 = vpop.f32.mrb[122].mxu1 }
 0xb1e   : > { %17956 = vmatprep.subr.msk.bf16.mxu0 %vm20122_vm2, %v22526_v53  ;;  %v9693_v6 = vpop.f32.mrb[123].mxu1 }
 0xb1f   : > { %17087 = vmatprep.mubr.msk.f32.mxu0 %vm682_vm1, %v9693_v6  ;;  %v18802_v6 = vunpack.i.l.bf16 %v18801_v63 }
 0xb20   : > { %17088 = vmatmul.mubr.msk.f32.gmra.mrb[90].mxu0 %vm682_vm1, %v16983_v25  ;;  %v22697_v1 = vpop.permute.xlu1 %18810 }
 0xb21   : > { %v16990_v33 = vpop.f32.mrb[122].mxu0 }
 0xb22   : > { %v9780_v57 = vpop.f32.mrb[123].mxu0 }
 0xb23   : > { %17090 = vmatprep.mubr.msk.f32.mxu0 %vm682_vm1, %v9780_v57 }
 0xb24   : > { %17091 = vmatmul.mubr.msk.f32.gmra.mrb[92].mxu0 %vm682_vm1, %v16990_v33 }
 0xb25   : > { %v16997_v4 = vpop.f32.mrb[124].mxu1 }
 0xb26   : > { %v9867_v11 = vpop.f32.mrb[125].mxu1 }
 0xb27   : > { %17093 = vmatprep.mubr.msk.f32.mxu0 %vm682_vm1, %v9867_v11 }
 0xb28   : > { %17094 = vmatmul.mubr.msk.f32.gmra.mrb[94].mxu0 %vm682_vm1, %v16997_v4 }
 0xb29   : > { %v17004_v41 = vpop.f32.mrb[124].mxu0 }
 0xb2a   : > { %v9954_v9 = vpop.f32.mrb[125].mxu0 }
 0xb2b   : > { %17096 = vmatprep.mubr.msk.f32.mxu0 %vm682_vm1, %v9954_v9 }
 0xb2c   : > { %17097 = vmatmul.mubr.msk.f32.gmra.mrb[96].mxu0 %vm682_vm1, %v17004_v41 }
 0xb2d   : > { %v17011_v12 = vpop.f32.mrb[126].mxu1 }
 0xb2e   : > { %v10041_v31 = vpop.f32.mrb[127].mxu1 }
 0xb2f   : > { %17099 = vmatprep.mubr.msk.f32.mxu0 %vm682_vm1, %v10041_v31 }
 0xb30   : > { %17100 = vmatmul.mubr.msk.f32.gmra.mrb[98].mxu0 %vm682_vm1, %v17011_v12 }
 0xb36   : > { %v17018_v37 = vpop.f32.mrb[126].mxu0 }
 0xb37   : > { %v10128_v16 = vpop.f32.mrb[127].mxu0 }
 0xb38   : > { %17102 = vmatprep.mubr.msk.f32.mxu0 %vm682_vm1, %v10128_v16 }
 0xb39   : > { %v17025_v62 = vpop.f32.mrb[128].mxu1  ;;  %17103 = vmatmul.mubr.msk.f32.gmra.mrb[100].mxu0 %vm682_vm1, %v17018_v37 }
 0xb3a   : > { %v10215_v20 = vpop.f32.mrb[129].mxu1 }
 0xb3b   : > { %17105 = vmatprep.mubr.msk.f32.mxu0 %vm682_vm1, %v10215_v20 }
 0xb3d   : > { %17106 = vmatmul.mubr.msk.f32.gmra.mrb[102].mxu0 %vm682_vm1, %v17025_v62 }
 0xb43   : > { %v17032_v56 = vpop.f32.mrb[128].mxu0 }
 0xb44   : > { %v10302_v55 = vpop.f32.mrb[129].mxu0 }
 0xb45   : > { %17108 = vmatprep.mubr.msk.f32.mxu0 %vm682_vm1, %v10302_v55 }
 0xb46   : > { %17109 = vmatmul.mubr.msk.f32.gmra.mrb[104].mxu0 %vm682_vm1, %v17032_v56 }
 0xb48   : > { %v17039_v18 = vpop.f32.mrb[130].mxu1 }
 0xb49   : > { %v10389_v21 = vpop.f32.mrb[131].mxu1 }
 0xb4a   : > { %17111 = vmatprep.mubr.msk.f32.mxu0 %vm682_vm1, %v10389_v21 }
 0xb4b   : > { %17112 = vmatmul.mubr.msk.f32.gmra.mrb[106].mxu0 %vm682_vm1, %v17039_v18 }
 0xb50   : > { %v17046_v5 = vpop.f32.mrb[130].mxu0 }
 0xb51   : > { %v10476_v2 = vpop.f32.mrb[131].mxu0 }
 0xb52   : > { %17114 = vmatprep.mubr.msk.f32.mxu0 %vm682_vm1, %v10476_v2 }
 0xb53   : > { %17115 = vmatmul.mubr.msk.f32.gmra.mrb[108].mxu0 %vm682_vm1, %v17046_v5 }
 0xb58   : > { %v17053_v26 = vpop.f32.mrb[132].mxu1 }
 0xb59   : > { %v10563_v10 = vpop.f32.mrb[133].mxu1 }
 0xb5a   : > { %17117 = vmatprep.mubr.msk.f32.mxu0 %vm682_vm1, %v10563_v10 }
 0xb5b   : > { %17118 = vmatmul.mubr.msk.f32.gmra.mrb[110].mxu0 %vm682_vm1, %v17053_v26 }
 0xb60   : > { %v17060_v61 = vpop.f32.mrb[132].mxu0 }
 0xb61   : > { %v10650_v22 = vpop.f32.mrb[133].mxu0 }
 0xb62   : > { %17120 = vmatprep.mubr.msk.f32.mxu0 %vm682_vm1, %v10650_v22 }
 0xb63   : > { %17121 = vmatmul.mubr.msk.f32.gmra.mrb[112].mxu0 %vm682_vm1, %v17060_v61 }
 0xb68   : > { %v17067_v40 = vpop.f32.mrb[134].mxu1 }
 0xb69   : > { %v10737_v42 = vpop.f32.mrb[135].mxu1 }
 0xb6a   : > { %17123 = vmatprep.mubr.msk.f32.mxu0 %vm682_vm1, %v10737_v42 }
 0xb6b   : > { %17124 = vmatmul.mubr.msk.f32.gmra.mrb[114].mxu0 %vm682_vm1, %v17067_v40 }
 0xb76   : > { %v17074_v44 = vpop.f32.mrb[134].mxu0 }
 0xb77   : > { %v10824_v30 = vpop.f32.mrb[135].mxu0 }
 0xb78   : > { %v17081_v24 = vpop.f32.mrb[136].mxu1  ;;  %17126 = vmatprep.mubr.msk.f32.mxu0 %vm682_vm1, %v10824_v30 }
 0xb79   : > { %v10911_v28 = vpop.f32.mrb[137].mxu1  ;;  %17127 = vmatmul.mubr.msk.f32.gmra.mrb[116].mxu0 %vm682_vm1, %v17074_v44 }
 0xb7a   : > { %17129 = vmatprep.mubr.msk.f32.mxu0 %vm682_vm1, %v10911_v28 }
 0xb7d   : > { %17130 = vmatmul.mubr.msk.f32.gmra.mrb[118].mxu0 %vm682_vm1, %v17081_v24 }
 0xb7e   : > { %17192 = vmatprep.mubr.msk.f32.mxu0 %vm682_vm1, %v22473_v15 }
 0xb81   : > { %17193 = vmatmul.mubr.msk.f32.vlgmr.msra.gmra.mrb[136].mxu0 %vm682_vm1, %v22457_v7 }
 0xb82   : > { %17959 = vmatpush3.bf16.xpose.msk.msra.mxu0 %vm20122_vm2, %v22526_v53  ;;  %v22574_v35 = vpop.f32.mrb[138].mxu1  ;;  %17206 = vmatprep.mubr.msk.f32.mxu0 %vm682_vm1, %v22483_v51 }
 0xb83   : > { %17968 = vmatprep.subr.msk.bf16.mxu0 %vm20122_vm2, %v17966_v60  ;;  %v22580_v32 = vpop.f32.mrb[139].mxu1  ;;  %v12732_v15 = vsel %vm2133_vm3, %v22574_v35, -inf }
 0xb84   : > { %12733 = vmax.xlane.f32.xlu0 %v12732_v15  ;;  %v12729_v7 = vsel %vm2133_vm3, %v22580_v32, -inf }
 0xb85   : > { %12730 = vmax.xlane.f32.xlu1 %v12729_v7 }
 0xb89   : > { %17207 = vmatmul.mubr.msk.f32.vlgmr.msra.gmra.mrb[138].mxu0 %vm682_vm1, %v22475_v23 }
 0xb8a   : > { %17971 = vmatpush3.bf16.xpose.msk.msra.mxu0 %vm20122_vm2, %v17966_v60  ;;  %17220 = vmatprep.mubr.msk.f32.mxu0 %vm682_vm1, %v22501_v39  ;;  %v22594_v51 = vpop.f32.mrb[140].mxu1  ;;  %v17990_v39 = vpack.c.bf16 %v18798_v17, %v18797_v0 }
 0xb8b   : > { %17980 = vmatprep.subr.msk.bf16.mxu0 %vm20122_vm2, %v17978_v50  ;;  %v22598_v47 = vpop.f32.mrb[141].mxu1  ;;  %v12738_v48 = vsel %vm2133_vm3, %v22594_v51, -inf }
 0xb8c   : > { %12739 = vmax.xlane.f32.xlu1 %v12738_v48  ;;  %v12735_v23 = vsel %vm2133_vm3, %v22598_v47, -inf  ;;  %v22701_v48 = vpop.permute.xlu0 %18825 }
 0xb8d   : > { %12736 = vmax.xlane.f32.xlu0 %v12735_v23 }
 0xb91   : > { %17221 = vmatmul.mubr.msk.f32.vlgmr.msra.gmra.mrb[140].mxu0 %vm682_vm1, %v22493_v36  ;;  %v18803_v36 = vunpack.i.h.bf16 %v18801_v63 }
 0xb92   : > { %17983 = vmatpush3.bf16.xpose.msk.msra.mxu0 %vm20122_vm2, %v17978_v50  ;;  %17234 = vmatprep.mubr.msk.f32.mxu0 %vm682_vm1, %v22507_v49  ;;  %v22612_v13 = vpop.f32.mrb[142].mxu1  ;;  %v22699_v50 = vpop.permute.xlu1 %18820 }
 0xb93   : > { %17991 = vmatprep.subr.bf16.mxu0 %v17990_v39  ;;  %v22614_v53 = vpop.f32.mrb[143].mxu1  ;;  %v12744_v38 = vsel %vm2133_vm3, %v22612_v13, -inf  ;;  %v22620_v54 = vpack.c.bf16 %v18803_v36, %v18802_v6 }
 0xb94   : > { %12745 = vmax.xlane.f32.xlu1 %v12744_v38  ;;  %v12741_v25 = vsel %vm2133_vm3, %v22614_v53, -inf }
 0xb95   : > { %12742 = vmax.xlane.f32.xlu0 %v12741_v25 }
 0xb96   : > { %v22703_v23 = vpop.permute.xlu1 %18830 }
 0xb99   : > { %17235 = vmatmul.mubr.msk.f32.vlgmr.msra.gmra.mrb[142].mxu0 %vm682_vm1, %v22511_v14 }
 0xb9a   : > { %17993 = vmatpush3.bf16.msra.mxu0 %v17990_v39  ;;  %v22624_v49 = vpop.f32.mrb[144].mxu1 }
 0xb9b   : > { %17995 = vmatprep.subr.bf16.mxu0 %v22620_v54  ;;  %v22627_v33 = vpop.f32.mrb[145].mxu1  ;;  %v12750_v57 = vsel %vm2133_vm3, %v22624_v49, -inf }
 0xb9c   : > { %12751 = vmax.xlane.f32.xlu1 %v12750_v57  ;;  %v12747_v4 = vsel %vm2133_vm3, %v22627_v33, -inf }
 0xb9d   : > { %12748 = vmax.xlane.f32.xlu0 %v12747_v4 }
 0xba2   : > { %v22633_v11 = vpop.f32.mrb[146].mxu1 }
 0xba3   : > { %v22635_v41 = vpop.f32.mrb[147].mxu1  ;;  %v12756_v14 = vsel %vm2133_vm3, %v22633_v11, -inf }
 0xba4   : > { %12757 = vmax.xlane.f32.xlu1 %v12756_v14  ;;  %v12753_v9 = vsel %vm2133_vm3, %v22635_v41, -inf }
 0xba5   : > { %12754 = vmax.xlane.f32.xlu0 %v12753_v9 }
 0xbaa   : > { %v22641_v12 = vpop.f32.mrb[148].mxu1 }
 0xbab   : > { %v22643_v31 = vpop.f32.mrb[149].mxu1  ;;  %v12762_v37 = vsel %vm2133_vm3, %v22641_v12, -inf }
 0xbac   : > { %12763 = vmax.xlane.f32.xlu1 %v12762_v37  ;;  %v12759_v16 = vsel %vm2133_vm3, %v22643_v31, -inf }
 0xbad   : > { %12760 = vmax.xlane.f32.xlu0 %v12759_v16 }
 0xbb2   : > { %v22649_v62 = vpop.f32.mrb[150].mxu1 }
 0xbb3   : > { %v22651_v20 = vpop.f32.mrb[151].mxu1  ;;  %v12768_v56 = vsel %vm2133_vm3, %v22649_v62, -inf }
 0xbb4   : > { %12769 = vmax.xlane.f32.xlu1 %v12768_v56  ;;  %v12765_v55 = vsel %vm2133_vm3, %v22651_v20, -inf }
 0xbb5   : > { %12766 = vmax.xlane.f32.xlu0 %v12765_v55 }
 0xbba   : > { %v22657_v18 = vpop.f32.mrb[152].mxu1 }
 0xbbb   : > { %v22659_v21 = vpop.f32.mrb[153].mxu1  ;;  %v12774_v5 = vsel %vm2133_vm3, %v22657_v18, -inf }
 0xbbc   : > { %12775 = vmax.xlane.f32.xlu1 %v12774_v5  ;;  %v12771_v2 = vsel %vm2133_vm3, %v22659_v21, -inf }
 0xbbd   : > { %12772 = vmax.xlane.f32.xlu0 %v12771_v2 }
 0xbc2   : > { %v22665_v26 = vpop.f32.mrb[154].mxu1 }
 0xbc3   : > { %v22667_v10 = vpop.f32.mrb[155].mxu1  ;;  %v12786_v61 = vsel %vm2133_vm3, %v22665_v26, -inf }
 0xbc4   : > { %12787 = vmax.xlane.f32.xlu1 %v12786_v61  ;;  %v12783_v22 = vsel %vm2133_vm3, %v22667_v10, -inf }
 0xbc5   : > { %12784 = vmax.xlane.f32.xlu0 %v12783_v22 }
 0xbca   : > { %v22673_v40 = vpop.f32.mrb[156].mxu1 }
 0xbcb   : > { %v22675_v42 = vpop.f32.mrb[157].mxu1  ;;  %v12798_v44 = vsel %vm2133_vm3, %v22673_v40, -inf }
 0xbcc   : > { %12799 = vmax.xlane.f32.xlu1 %v12798_v44  ;;  %v12795_v30 = vsel %vm2133_vm3, %v22675_v42, -inf }
 0xbcd   : > { %12796 = vmax.xlane.f32.xlu0 %v12795_v30 }
 0xbd2   : > { %v22681_v24 = vpop.f32.mrb[158].mxu1 }
 0xbd3   : > { %v22683_v28 = vpop.f32.mrb[159].mxu1  ;;  %v12810_v43 = vsel %vm2133_vm3, %v22681_v24, -inf }
 0xbd4   : > { %12811 = vmax.xlane.f32.xlu1 %v12810_v43  ;;  %v12807_v59 = vsel %vm2133_vm3, %v22683_v28, -inf }
 0xbd5   : > { %12808 = vmax.xlane.f32.xlu0 %v12807_v59 }
 0xbda   : > { %v22689_v60 = vpop.f32.mrb[160].mxu1 }
 0xbdb   : > { %v22691_v15 = vpop.f32.mrb[161].mxu1  ;;  %v12822_v7 = vsel %vm2133_vm3, %v22689_v60, -inf }
 0xbdc   : > { %12823 = vmax.xlane.f32.xlu1 %v12822_v7  ;;  %v12819_v52 = vsel %vm2133_vm3, %v22691_v15, -inf }
 0xbdd   : > { %12820 = vmax.xlane.f32.xlu0 %v12819_v52 }
 0xc11   : > { %v12734_v17 = vpop.xlane.xlu0 %12733 }
 0xc12   : > { %v12826_v0 = vsub.f32 %v22574_v35, %v12734_v17  ;;  %v12731_v39 = vpop.xlane.xlu1 %12730 }
 0xc13   : > { %v12825_v63 = vsub.f32 %v22580_v32, %v12731_v39 }
 0xc14   : > { %v12859_v38 = vmul.f32 1.442695, %v12826_v0 }
 0xc15   : > { %v12857_v25 = vmul.f32 1.442695, %v12825_v63 }
 0xc16   : > { %19258 = vpow2.f32 %v12859_v38 }
 0xc17   : > { %19260 = vpow2.f32 %v12857_v25 }
 0xc19   : > { %v12740_v36 = vpop.xlane.xlu1 %12739 }
 0xc1a   : > { %v12828_v6 = vsub.f32 %v22594_v51, %v12740_v36  ;;  %v12737_v57 = vpop.xlane.xlu0 %12736 }
 0xc1b   : > { %v12827_v4 = vsub.f32 %v22598_v47, %v12737_v57 }
 0xc1c   : > { %v12863_v14 = vmul.f32 1.442695, %v12828_v6 }
 0xc1d   : > { %v12861_v9 = vmul.f32 1.442695, %v12827_v4 }
 0xc1e   : > { %19262 = vpow2.f32 %v12863_v14 }
 0xc1f   : > { %19264 = vpow2.f32 %v12861_v9 }
 0xc20   : > { %v22709_v37 = vpop.eup %19258 }
 0xc21   : > { %v22711_v35 = vpop.eup %19260  ;;  %v12746_v16 = vpop.xlane.xlu1 %12745  ;;  %v12924_v32 = vsel %vm2133_vm3, %v22709_v37, 0.0 }
 0xc22   : > { %v12830_v56 = vsub.f32 %v22612_v13, %v12746_v16  ;;  %v12743_v55 = vpop.xlane.xlu0 %12742  ;;  %12925 = vadd.xlane.f32.xlu1 %v12924_v32  ;;  %v12921_v51 = vsel %vm2133_vm3, %v22711_v35, 0.0 }
 0xc23   : > { %v12829_v47 = vsub.f32 %v22614_v53, %v12743_v55  ;;  %12922 = vadd.xlane.f32.xlu0 %v12921_v51 }
 0xc24   : > { %v12867_v5 = vmul.f32 1.442695, %v12830_v56 }
 0xc25   : > { %v12865_v2 = vmul.f32 1.442695, %v12829_v47 }
 0xc26   : > { %19266 = vpow2.f32 %v12867_v5 }
 0xc27   : > { %19268 = vpow2.f32 %v12865_v2 }
 0xc28   : > { %v22719_v61 = vpop.eup %19262 }
 0xc29   : > { %v22721_v22 = vpop.eup %19264  ;;  %v12752_v44 = vpop.xlane.xlu1 %12751  ;;  %v12930_v13 = vsel %vm2133_vm3, %v22719_v61, 0.0 }
 0xc2a   : > { %v12832_v30 = vsub.f32 %v22624_v49, %v12752_v44  ;;  %v12749_v43 = vpop.xlane.xlu0 %12748  ;;  %12931 = vadd.xlane.f32.xlu1 %v12930_v13  ;;  %v12927_v53 = vsel %vm2133_vm3, %v22721_v22, 0.0 }
 0xc2b   : > { %v12831_v59 = vsub.f32 %v22627_v33, %v12749_v43  ;;  %12928 = vadd.xlane.f32.xlu0 %v12927_v53 }
 0xc2c   : > { %v12871_v7 = vmul.f32 1.442695, %v12832_v30 }
 0xc2d   : > { %v12869_v52 = vmul.f32 1.442695, %v12831_v59 }
 0xc2e   : > { %19270 = vpow2.f32 %v12871_v7 }
 0xc2f   : > { %19272 = vpow2.f32 %v12869_v52 }
 0xc30   : > { %v22729_v17 = vpop.eup %19266 }
 0xc31   : > { %v22731_v0 = vpop.eup %19268  ;;  %v12758_v39 = vpop.xlane.xlu1 %12757  ;;  %v12936_v49 = vsel %vm2133_vm3, %v22729_v17, 0.0 }
 0xc32   : > { %v12834_v63 = vsub.f32 %v22633_v11, %v12758_v39  ;;  %v12755_v38 = vpop.xlane.xlu0 %12754  ;;  %12937 = vadd.xlane.f32.xlu1 %v12936_v49  ;;  %v12933_v33 = vsel %vm2133_vm3, %v22731_v0, 0.0 }
 0xc33   : > { %v12833_v25 = vsub.f32 %v22635_v41, %v12755_v38  ;;  %12934 = vadd.xlane.f32.xlu0 %v12933_v33 }
 0xc34   : > { %v12875_v36 = vmul.f32 1.442695, %v12834_v63 }
 0xc35   : > { %v12873_v6 = vmul.f32 1.442695, %v12833_v25 }
 0xc36   : > { %19274 = vpow2.f32 %v12875_v36 }
 0xc37   : > { %19276 = vpow2.f32 %v12873_v6 }
 0xc38   : > { %v22739_v57 = vpop.eup %19270 }
 0xc39   : > { %v22741_v4 = vpop.eup %19272  ;;  %v12764_v14 = vpop.xlane.xlu1 %12763  ;;  %v12942_v11 = vsel %vm2133_vm3, %v22739_v57, 0.0 }
 0xc3a   : > { %v12836_v9 = vsub.f32 %v22641_v12, %v12764_v14  ;;  %v12761_v16 = vpop.xlane.xlu0 %12760  ;;  %12943 = vadd.xlane.f32.xlu1 %v12942_v11  ;;  %v12939_v41 = vsel %vm2133_vm3, %v22741_v4, 0.0 }
 0xc3b   : > { %v12835_v32 = vsub.f32 %v22643_v31, %v12761_v16  ;;  %12940 = vadd.xlane.f32.xlu0 %v12939_v41 }
 0xc3c   : > { %v12879_v56 = vmul.f32 1.442695, %v12836_v9 }
 0xc3d   : > { %v12877_v55 = vmul.f32 1.442695, %v12835_v32 }
 0xc3e   : > { %19278 = vpow2.f32 %v12879_v56 }
 0xc3f   : > { %19280 = vpow2.f32 %v12877_v55 }
 0xc40   : > { %v22749_v51 = vpop.eup %19274 }
 0xc41   : > { %v22751_v47 = vpop.eup %19276  ;;  %v12770_v5 = vpop.xlane.xlu1 %12769  ;;  %v12948_v12 = vsel %vm2133_vm3, %v22749_v51, 0.0 }
 0xc42   : > { %v12838_v2 = vsub.f32 %v22649_v62, %v12770_v5  ;;  %v12767_v44 = vpop.xlane.xlu0 %12766  ;;  %12949 = vadd.xlane.f32.xlu1 %v12948_v12  ;;  %v12945_v31 = vsel %vm2133_vm3, %v22751_v47, 0.0 }
 0xc43   : > { %v12837_v13 = vsub.f32 %v22651_v20, %v12767_v44  ;;  %12946 = vadd.xlane.f32.xlu0 %v12945_v31 }
 0xc44   : > { %v12883_v30 = vmul.f32 1.442695, %v12838_v2 }
 0xc45   : > { %v12881_v43 = vmul.f32 1.442695, %v12837_v13 }
 0xc46   : > { %19282 = vpow2.f32 %v12883_v30 }
 0xc47   : > { %19284 = vpow2.f32 %v12881_v43 }
 0xc48   : > { %v22759_v53 = vpop.eup %19278 }
 0xc49   : > { %v22761_v59 = vpop.eup %19280  ;;  %v12776_v7 = vpop.xlane.xlu1 %12775  ;;  %v12954_v62 = vsel %vm2133_vm3, %v22759_v53, 0.0 }
 0xc4a   : > { %v12840_v52 = vsub.f32 %v22657_v18, %v12776_v7  ;;  %v12773_v39 = vpop.xlane.xlu0 %12772  ;;  %12955 = vadd.xlane.f32.xlu1 %v12954_v62  ;;  %v12951_v20 = vsel %vm2133_vm3, %v22761_v59, 0.0 }
 0xc4b   : > { %v12839_v49 = vsub.f32 %v22659_v21, %v12773_v39  ;;  %12952 = vadd.xlane.f32.xlu0 %v12951_v20 }
 0xc4c   : > { %v12887_v63 = vmul.f32 1.442695, %v12840_v52 }
 0xc4d   : > { %v12885_v38 = vmul.f32 1.442695, %v12839_v49 }
 0xc4f   : > { %19286 = vpow2.f32 %v12885_v38 }
 0xc50   : > { %v22769_v33 = vpop.eup %19282  ;;  %19288 = vpow2.f32 %v12887_v63 }
 0xc51   : > { %v12788_v25 = vpop.xlane.xlu1 %12787  ;;  %v12960_v36 = vsel %vm2133_vm3, %v22769_v33, 0.0  ;;  %v22773_v6 = vpop.eup %19284 }
 0xc52   : > { %v12844_v18 = vsub.f32 %v22665_v26, %v12788_v25  ;;  %v12785_v14 = vpop.xlane.xlu0 %12784  ;;  %12961 = vadd.xlane.f32.xlu1 %v12960_v36  ;;  %v12957_v32 = vsel %vm2133_vm3, %v22773_v6, 0.0 }
 0xc53   : > { %v12843_v11 = vsub.f32 %v22667_v10, %v12785_v14 }
 0xc54   : > { %v12895_v21 = vmul.f32 1.442695, %v12844_v18  ;;  %v22777_v9 = vpop.f32.mrb[136].mxu0 }
 0xc55   : > { %v12893_v16 = vmul.f32 1.442695, %v12843_v11  ;;  %v22779_v41 = vpop.f32.mrb[137].mxu0  ;;  %v12780_v10 = vsel %vm2133_vm3, %v22777_v9, -inf }
 0xc56   : > { %12958 = vadd.xlane.f32.xlu1 %v12957_v32  ;;  %v12777_v56 = vsel %vm2133_vm3, %v22779_v41, -inf }
 0xc57   : > { %19290 = vpow2.f32 %v12893_v16  ;;  %12778 = vmax.xlane.f32.xlu0 %v12777_v56 }
 0xc58   : > { %19292 = vpow2.f32 %v12895_v21 }
 0xc59   : > { %v22785_v26 = vpop.eup %19286  ;;  %v12800_v55 = vpop.xlane.xlu1 %12799 }
 0xc5a   : > { %v22789_v5 = vpop.eup %19288  ;;  %v12848_v12 = vsub.f32 %v22673_v40, %v12800_v55  ;;  %v12797_v2 = vpop.xlane.xlu0 %12796  ;;  %12781 = vmax.xlane.f32.xlu1 %v12780_v10  ;;  %v12963_v44 = vsel %vm2133_vm3, %v22785_v26, 0.0 }
 0xc5b   : > { %v12847_v31 = vsub.f32 %v22675_v42, %v12797_v2  ;;  %12964 = vadd.xlane.f32.xlu0 %v12963_v44  ;;  %v12966_v62 = vsel %vm2133_vm3, %v22789_v5, 0.0 }
 0xc5c   : > { %v12903_v13 = vmul.f32 1.442695, %v12848_v12  ;;  %v22795_v30 = vpop.f32.mrb[138].mxu0 }
 0xc5d   : > { %v12901_v43 = vmul.f32 1.442695, %v12847_v31  ;;  %v22797_v7 = vpop.f32.mrb[139].mxu0  ;;  %v12792_v42 = vsel %vm2133_vm3, %v22795_v30, -inf }
 0xc5e   : > { %19294 = vpow2.f32 %v12903_v13  ;;  %12967 = vadd.xlane.f32.xlu1 %v12966_v62  ;;  %v12789_v40 = vsel %vm2133_vm3, %v22797_v7, -inf }
 0xc5f   : > { %12790 = vmax.xlane.f32.xlu0 %v12789_v40  ;;  %19296 = vpow2.f32 %v12901_v43 }
 0xc61   : > { %v22803_v52 = vpop.eup %19290  ;;  %v12812_v12 = vpop.xlane.xlu1 %12811 }
 0xc62   : > { %v22807_v39 = vpop.eup %19292  ;;  %12793 = vmax.xlane.f32.xlu1 %v12792_v42  ;;  %v12975_v20 = vsel %vm2133_vm3, %v22803_v52, 0.0  ;;  %v12809_v10 = vpop.xlane.xlu0 %12808  ;;  %v12852_v44 = vsub.f32 %v22681_v24, %v12812_v12  ;;  %v18813_v12 = vunpack.i.h.bf16 %v22697_v1 }
 0xc63   : > { %12976 = vadd.xlane.f32.xlu0 %v12975_v20  ;;  %v12978_v38 = vsel %vm2133_vm3, %v22807_v39, 0.0  ;;  %v12851_v2 = vsub.f32 %v22683_v28, %v12809_v10 }
 0xc64   : > { %v22811_v49 = vpop.f32.mrb[140].mxu0  ;;  %v12911_v40 = vmul.f32 1.442695, %v12852_v44 }
 0xc65   : > { %v22813_v63 = vpop.f32.mrb[141].mxu0  ;;  %v12804_v18 = vsel %vm2133_vm3, %v22811_v49, -inf  ;;  %v12909_v43 = vmul.f32 1.442695, %v12851_v2  ;;  %v18812_v2 = vunpack.i.l.bf16 %v22697_v1  ;;  %v18823_v1 = vunpack.i.h.bf16 %v22699_v50 }
 0xc66   : > { %12979 = vadd.xlane.f32.xlu1 %v12978_v38  ;;  %v12801_v25 = vsel %vm2133_vm3, %v22813_v63, -inf }
 0xc67   : > { %12802 = vmax.xlane.f32.xlu0 %v12801_v25  ;;  %19298 = vpow2.f32 %v12909_v43 }
 0xc68   : > { %v22819_v36 = vpop.eup %19294  ;;  %19300 = vpow2.f32 %v12911_v40 }
 0xc69   : > { %v12990_v14 = vsel %vm2133_vm3, %v22819_v36, 0.0  ;;  %v22825_v11 = vpop.eup %19296  ;;  %v12824_v13 = vpop.xlane.xlu1 %12823 }
 0xc6a   : > { %12805 = vmax.xlane.f32.xlu1 %v12804_v18  ;;  %v12987_v32 = vsel %vm2133_vm3, %v22825_v11, 0.0  ;;  %v12821_v31 = vpop.xlane.xlu0 %12820 }
 0xc6b   : > { %12991 = vadd.xlane.f32.xlu0 %v12990_v14  ;;  %v12855_v62 = vsub.f32 %v22691_v15, %v12821_v31 }
 0xc6c   : > { %v22827_v21 = vpop.f32.mrb[142].mxu0 }
 0xc6d   : > { %v22829_v16 = vpop.f32.mrb[143].mxu0  ;;  %v12816_v55 = vsel %vm2133_vm3, %v22827_v21, -inf  ;;  %v12917_v42 = vmul.f32 1.442695, %v12855_v62 }
 0xc6e   : > { %12988 = vadd.xlane.f32.xlu1 %v12987_v32  ;;  %v12813_v56 = vsel %vm2133_vm3, %v22829_v16, -inf }
 0xc6f   : > { %12814 = vmax.xlane.f32.xlu0 %v12813_v56  ;;  %19302 = vpow2.f32 %v12917_v42 }
 0xc72   : > { %12817 = vmax.xlane.f32.xlu1 %v12816_v55 }
 0xc83   : > { %18840 = vrot.lane.b32.xlu1 %v23621_v19, %s19559_s8  ;;  %v12856_v19 = vsub.f32 %v22689_v60, %v12824_v13  ;;  %v18002_v13 = vpack.c.bf16 %v18813_v12, %v18812_v2 }
 0xc85   : > { %18835 = vrot.lane.b32.xlu0 %v23604_v29, %s19559_s8  ;;  %v12919_v29 = vmul.f32 1.442695, %v12856_v19 }
 0xc87   : > { %19304 = vpow2.f32 %v12919_v29 }
 0xc89   : > { %18845 = vrot.lane.b32.xlu0 %v23610_v46, %s19559_s8  ;;  %v22847_v46 = vpop.eup %19298 }
 0xc8a   : > { %v22849_v20 = vpop.eup %19300  ;;  %v12999_v24 = vsel %vm2133_vm3, %v22847_v46, 0.0 }
 0xc8b   : > { %v22853_v28 = vpop.eup %19302  ;;  %v13002_v15 = vsel %vm2133_vm3, %v22849_v20, 0.0 }
 0xc8c   : > { %v13011_v38 = vsel %vm2133_vm3, %v22853_v28, 0.0 }
 0xc91   : > { %v22857_v60 = vpop.eup %19304 }
 0xc92   : > { %v13014_v25 = vsel %vm2133_vm3, %v22857_v60, 0.0 }
 0xca7   : > { %13000 = vadd.xlane.f32.xlu1 %v12999_v24 }
 0xca8   : > { %13003 = vadd.xlane.f32.xlu0 %v13002_v15 }
 0xcab   : > { %13012 = vadd.xlane.f32.xlu1 %v13011_v38 }
 0xcac   : > { %13015 = vadd.xlane.f32.xlu0 %v13014_v25  ;;  %v18828_v25 = vunpack.i.h.bf16 %v22701_v48 }
 0xcaf   : > { %v12926_v18 = vpop.xlane.xlu1 %12925 }
 0xcb0   : > { %19306 = vrcp.f32 %v12926_v18  ;;  %v12923_v14 = vpop.xlane.xlu0 %12922 }
 0xcb1   : > { %19308 = vrcp.f32 %v12923_v14 }
 0xcb7   : > { %v12932_v32 = vpop.xlane.xlu1 %12931 }
 0xcb8   : > { %19310 = vrcp.f32 %v12932_v32  ;;  %v12929_v56 = vpop.xlane.xlu0 %12928 }
 0xcb9   : > { %19312 = vrcp.f32 %v12929_v56 }
 0xcba   : > { %v19307_v55 = vpop.eup %19306 }
 0xcbb   : > { %v19309_v10 = vpop.eup %19308  ;;  %v13050_v31 = vmul.f32 %v19307_v55, %v22709_v37 }
 0xcbc   : > { %v13049_v44 = vmul.f32 %v19309_v10, %v22711_v35  ;;  %v18822_v35 = vunpack.i.l.bf16 %v22699_v50  ;;  %v18827_v50 = vunpack.i.l.bf16 %v22701_v48  ;;  %v18833_v48 = vunpack.i.h.bf16 %v22703_v23 }
 0xcbe   : > { %17248 = vmatprep.mubr.msk.f32.mxu0 %vm2133_vm3, %v13049_v44  ;;  %v18010_v29 = vpack.c.bf16 %v18823_v1, %v18822_v35  ;;  %v18014_v18 = vpack.c.bf16 %v18828_v25, %v18827_v50 }
 0xcbf   : > { %v12938_v43 = vpop.xlane.xlu1 %12937  ;;  %17249 = vmatmul.mubr.msk.f32.vlgmr.msra.gmra.mrb[144].mxu0 %vm2133_vm3, %v13050_v31 }
 0xcc0   : > { %19314 = vrcp.f32 %v12938_v43  ;;  %17997 = vmatpush3.bf16.msra.mxu0 %v22620_v54  ;;  %v12935_v62 = vpop.xlane.xlu0 %12934 }
 0xcc1   : > { %19316 = vrcp.f32 %v12935_v62  ;;  %18003 = vmatprep.subr.bf16.mxu0 %v18002_v13 }
 0xcc2   : > { %v19311_v40 = vpop.eup %19310 }
 0xcc3   : > { %v19313_v19 = vpop.eup %19312  ;;  %v13052_v42 = vmul.f32 %v19311_v40, %v22719_v61 }
 0xcc4   : > { %v13051_v37 = vmul.f32 %v19313_v19, %v22721_v22 }
 0xcc6   : > { %17255 = vmatprep.mubr.msk.f32.mxu0 %vm2133_vm3, %v13051_v37 }
 0xcc7   : > { %v12944_v24 = vpop.xlane.xlu1 %12943  ;;  %17256 = vmatmul.mubr.msk.f32.vlgmr.msra.gmra.mrb[146].mxu0 %vm2133_vm3, %v13052_v42 }
 0xcc8   : > { %19318 = vrcp.f32 %v12944_v24  ;;  %18005 = vmatpush3.bf16.msra.mxu0 %v18002_v13  ;;  %v12941_v54 = vpop.xlane.xlu0 %12940 }
 0xcc9   : > { %19320 = vrcp.f32 %v12941_v54  ;;  %18011 = vmatprep.subr.bf16.mxu0 %v18010_v29 }
 0xcca   : > { %v19315_v15 = vpop.eup %19314 }
 0xccb   : > { %v19317_v38 = vpop.eup %19316  ;;  %v13054_v61 = vmul.f32 %v19315_v15, %v22729_v17 }
 0xccc   : > { %v13053_v22 = vmul.f32 %v19317_v38, %v22731_v0  ;;  %v18832_v0 = vunpack.i.l.bf16 %v22703_v23 }
 0xcce   : > { %17262 = vmatprep.mubr.msk.f32.mxu1 %vm2133_vm3, %v13053_v22  ;;  %v18018_v12 = vpack.c.bf16 %v18833_v48, %v18832_v0 }
 0xccf   : > { %v12950_v14 = vpop.xlane.xlu1 %12949  ;;  %17263 = vmatmul.mubr.msk.f32.vlgmr.msra.gmra.mrb[162].mxu1 %vm2133_vm3, %v13054_v61 }
 0xcd0   : > { %19322 = vrcp.f32 %v12950_v14  ;;  %18009 = vmatpush3.bf16.msra.mxu1 %v22520_v45  ;;  %v12947_v32 = vpop.xlane.xlu0 %12946 }
 0xcd1   : > { %18015 = vmatprep.subr.bf16.mxu1 %v18014_v18  ;;  %19324 = vrcp.f32 %v12947_v32 }
 0xcd2   : > { %v19319_v56 = vpop.eup %19318 }
 0xcd3   : > { %v19321_v55 = vpop.eup %19320  ;;  %v13056_v10 = vmul.f32 %v19319_v56, %v22739_v57 }
 0xcd4   : > { %v13055_v17 = vmul.f32 %v19321_v55, %v22741_v4 }
 0xcd6   : > { %17269 = vmatprep.mubr.msk.f32.mxu0 %vm2133_vm3, %v13055_v17 }
 0xcd7   : > { %v12956_v2 = vpop.xlane.xlu1 %12955  ;;  %17270 = vmatmul.mubr.msk.f32.vlgmr.msra.gmra.mrb[148].mxu0 %vm2133_vm3, %v13056_v10 }
 0xcd8   : > { %19326 = vrcp.f32 %v12956_v2  ;;  %18013 = vmatpush3.bf16.msra.mxu0 %v18010_v29  ;;  %v12953_v45 = vpop.xlane.xlu0 %12952 }
 0xcd9   : > { %19328 = vrcp.f32 %v12953_v45  ;;  %18019 = vmatprep.subr.bf16.mxu0 %v18018_v12 }
 0xcda   : > { %v19323_v44 = vpop.eup %19322 }
 0xcdb   : > { %v19325_v31 = vpop.eup %19324  ;;  %v13058_v23 = vmul.f32 %v19323_v44, %v22749_v51 }
 0xcdc   : > { %v13057_v13 = vmul.f32 %v19325_v31, %v22751_v47 }
 0xcde   : > { %17276 = vmatprep.mubr.msk.f32.mxu1 %vm2133_vm3, %v13057_v13 }
 0xcdf   : > { %v12962_v57 = vpop.xlane.xlu1 %12961  ;;  %17277 = vmatmul.mubr.msk.f32.vlgmr.msra.gmra.mrb[164].mxu1 %vm2133_vm3, %v13058_v23 }
 0xce0   : > { %18017 = vmatpush3.bf16.msra.mxu1 %v18014_v18  ;;  %19330 = vrcp.f32 %v12962_v57 }
 0xce2   : > { %v19327_v4 = vpop.eup %19326 }
 0xce3   : > { %v19329_v43 = vpop.eup %19328  ;;  %v12959_v62 = vpop.xlane.xlu1 %12958  ;;  %v13060_v1 = vmul.f32 %v19327_v4, %v22759_v53 }
 0xce4   : > { %19332 = vrcp.f32 %v12959_v62  ;;  %v12779_v40 = vpop.xlane.xlu0 %12778  ;;  %v13059_v19 = vmul.f32 %v19329_v43, %v22761_v59 }
 0xce5   : > { %v12841_v47 = vsub.f32 %v22779_v41, %v12779_v40 }
 0xce6   : > { %17283 = vmatprep.mubr.msk.f32.mxu0 %vm2133_vm3, %v13059_v19 }
 0xce7   : > { %17284 = vmatmul.mubr.msk.f32.vlgmr.msra.gmra.mrb[150].mxu0 %vm2133_vm3, %v13060_v1  ;;  %v12782_v51 = vpop.xlane.xlu1 %12781  ;;  %v12889_v42 = vmul.f32 1.442695, %v12841_v47 }
 0xce8   : > { %18021 = vmatpush3.bf16.msra.mxu0 %v18018_v12  ;;  %v12842_v35 = vsub.f32 %v22777_v9, %v12782_v51  ;;  %v12965_v37 = vpop.xlane.xlu0 %12964 }
 0xce9   : > { %19334 = vrcp.f32 %v12965_v37 }
 0xcea   : > { %v12891_v29 = vmul.f32 1.442695, %v12842_v35  ;;  %v19331_v59 = vpop.eup %19330 }
 0xceb   : > { %v12968_v24 = vpop.xlane.xlu1 %12967  ;;  %v13062_v50 = vmul.f32 %v19331_v59, %v22769_v33 }
 0xcec   : > { %19336 = vpow2.f32 %v12891_v29  ;;  %v12791_v54 = vpop.xlane.xlu0 %12790 }
 0xced   : > { %19338 = vrcp.f32 %v12968_v24  ;;  %v12845_v53 = vsub.f32 %v22797_v7, %v12791_v54 }
 0xcee   : > { %v19333_v41 = vpop.eup %19332  ;;  %19340 = vpow2.f32 %v12889_v42 }
 0xcef   : > { %v12897_v15 = vmul.f32 1.442695, %v12845_v53  ;;  %v12794_v38 = vpop.xlane.xlu1 %12793  ;;  %v13061_v25 = vmul.f32 %v19333_v41, %v22773_v6 }
 0xcf0   : > { %v12846_v9 = vsub.f32 %v22795_v30, %v12794_v38  ;;  %v12977_v22 = vpop.xlane.xlu0 %12976 }
 0xcf1   : > { %19342 = vpow2.f32 %v12897_v15  ;;  %17290 = vmatprep.mubr.msk.f32.mxu1 %vm2133_vm3, %v13061_v25 }
 0xcf2   : > { %v12899_v61 = vmul.f32 1.442695, %v12846_v9  ;;  %19344 = vrcp.f32 %v12977_v22  ;;  %17291 = vmatmul.mubr.msk.f32.vlgmr.msra.gmra.mrb[166].mxu1 %vm2133_vm3, %v13062_v50 }
 0xcf3   : > { %v12980_v18 = vpop.xlane.xlu1 %12979  ;;  %v19335_v7 = vpop.eup %19334 }
 0xcf4   : > { %19346 = vpow2.f32 %v12899_v61  ;;  %v12803_v14 = vpop.xlane.xlu0 %12802  ;;  %v13063_v6 = vmul.f32 %v19335_v7, %v22785_v26 }
 0xcf5   : > { %v12849_v32 = vsub.f32 %v22813_v63, %v12803_v14 }
 0xcf6   : > { %v22907_v56 = vpop.eup %19336  ;;  %17297 = vmatprep.mubr.msk.f32.mxu0 %vm2133_vm3, %v13063_v6 }
 0xcf7   : > { %v19339_v33 = vpop.eup %19338  ;;  %v12905_v30 = vmul.f32 1.442695, %v12849_v32  ;;  %v12806_v55 = vpop.xlane.xlu1 %12805  ;;  %v12972_v48 = vsel %vm2133_vm3, %v22907_v56, 0.0 }
 0xcf8   : > { %v22912_v0 = vpop.eup %19340  ;;  %v13064_v17 = vmul.f32 %v19339_v33, %v22789_v5  ;;  %v12850_v10 = vsub.f32 %v22811_v49, %v12806_v55  ;;  %v22916_v12 = vpop.xlane.xlu0 %12991  ;;  %12973 = vadd.xlane.f32.xlu1 %v12972_v48 }
 0xcf9   : > { %19348 = vpow2.f32 %v12905_v30  ;;  %v12969_v45 = vsel %vm2133_vm3, %v22912_v0, 0.0 }
 0xcfa   : > { %v12907_v26 = vmul.f32 1.442695, %v12850_v10  ;;  %17298 = vmatmul.mubr.msk.f32.vlgmr.msra.gmra.mrb[152].mxu0 %vm2133_vm3, %v13064_v17 }
 0xcfb   : > { %v22919_v63 = vpop.eup %19342  ;;  %v12989_v2 = vpop.xlane.xlu1 %12988 }
 0xcfc   : > { %v19345_v44 = vpop.eup %19344  ;;  %19350 = vpow2.f32 %v12907_v26  ;;  %12970 = vadd.xlane.f32.xlu1 %v12969_v45  ;;  %v12815_v31 = vpop.xlane.xlu0 %12814  ;;  %v12981_v4 = vsel %vm2133_vm3, %v22919_v63, 0.0 }
 0xcfd   : > { %19352 = vrcp.f32 %v12980_v18  ;;  %v12853_v5 = vsub.f32 %v22829_v16, %v12815_v31  ;;  %v13067_v49 = vmul.f32 %v19345_v44, %v22803_v52 }
 0xcfe   : > { %v22925_v13 = vpop.eup %19346  ;;  %19354 = vrcp.f32 %v12989_v2 }
 0xcff   : > { %v12913_v23 = vmul.f32 1.442695, %v12853_v5  ;;  %17311 = vmatprep.mubr.msk.f32.mxu0 %vm2133_vm3, %v13067_v49  ;;  %v12818_v57 = vpop.xlane.xlu1 %12817  ;;  %v12984_v43 = vsel %vm2133_vm3, %v22925_v13, 0.0 }
 0xd00   : > { %v12854_v62 = vsub.f32 %v22827_v21, %v12818_v57  ;;  %12982 = vadd.xlane.f32.xlu1 %v12981_v4  ;;  %12985 = vadd.xlane.f32.xlu0 %v12984_v43  ;;  %v18836_v16 = vpop.permute.xlu0 %18835 }
 0xd01   : > { %19356 = vpow2.f32 %v12913_v23  ;;  %v18838_v52 = vunpack.i.h.bf16 %v18836_v16  ;;  %v18837_v40 = vunpack.i.l.bf16 %v18836_v16 }
 0xd02   : > { %v12915_v19 = vmul.f32 1.442695, %v12854_v62 }
 0xd03   : > { %v22933_v1 = vpop.eup %19348  ;;  %v18022_v47 = vpack.c.bf16 %v18838_v52, %v18837_v40  ;;  %v18841_v51 = vpop.permute.xlu1 %18840 }
 0xd04   : > { %19358 = vpow2.f32 %v12915_v19  ;;  %v18843_v35 = vunpack.i.h.bf16 %v18841_v51  ;;  %v18842_v37 = vunpack.i.l.bf16 %v18841_v51  ;;  %v18846_v42 = vpop.permute.xlu0 %18845  ;;  %v12993_v29 = vsel %vm2133_vm3, %v22933_v1, 0.0 }
 0xd05   : > { %v18848_v24 = vunpack.i.h.bf16 %v18846_v42  ;;  %v18847_v21 = vunpack.i.l.bf16 %v18846_v42  ;;  %12994 = vadd.xlane.f32.xlu1 %v12993_v29  ;;  %18023 = vmatprep.subr.bf16.mxu1 %v18022_v47 }
 0xd06   : > { %v22937_v54 = vpop.eup %19350  ;;  %v18026_v59 = vpack.c.bf16 %v18843_v35, %v18842_v37  ;;  %18025 = vmatpush3.bf16.msra.mxu1 %v18022_v47 }
 0xd07   : > { %v19353_v53 = vpop.eup %19352  ;;  %v18030_v41 = vpack.c.bf16 %v18848_v24, %v18847_v21  ;;  %v12996_v15 = vsel %vm2133_vm3, %v22937_v54, 0.0 }
 0xd08   : > { %v19355_v38 = vpop.eup %19354  ;;  %18027 = vmatprep.subr.bf16.mxu0 %v18026_v59  ;;  %12997 = vadd.xlane.f32.xlu0 %v12996_v15  ;;  %v13068_v25 = vmul.f32 %v19353_v53, %v22807_v39 }
 0xd09   : > { %18029 = vmatpush3.bf16.msra.mxu0 %v18026_v59  ;;  %18031 = vmatprep.subr.bf16.mxu1 %v18030_v41  ;;  %v13071_v9 = vmul.f32 %v19355_v38, %v22825_v11 }
 0xd0b   : > { %v22942_v50 = vpop.eup %19356 }
 0xd0c   : > { %17312 = vmatmul.mubr.msk.f32.vlgmr.msra.gmra.mrb[154].mxu0 %vm2133_vm3, %v13068_v25  ;;  %v13005_v22 = vsel %vm2133_vm3, %v22942_v50, 0.0 }
 0xd0d   : > { %17325 = vmatprep.mubr.msk.f32.mxu0 %vm2133_vm3, %v13071_v9  ;;  %13006 = vadd.xlane.f32.xlu1 %v13005_v22 }
 0xd0e   : > { %v22949_v61 = vpop.eup %19358 }
 0xd0f   : > { %v13008_v18 = vsel %vm2133_vm3, %v22949_v61, 0.0 }
 0xd10   : > { %13009 = vadd.xlane.f32.xlu0 %v13008_v18 }
 0xd1e   : > { %18850 = vrot.lane.b32.xlu1 %v23626_v34, %s19559_s8 }
 0xd26   : > { %18855 = vrot.lane.b32.xlu0 %v23620_v8, %s19559_s8 }
 0xd2a   : > { %18860 = vrot.lane.b32.xlu0 %v23632_v27, %s19559_s8 }
 0xd2e   : > { %18865 = vrot.lane.b32.xlu0 %v23429_v3, %s19559_s8 }
 0xd32   : > { %18870 = vrot.lane.b32.xlu0 %v23456_v58, %s19559_s8 }
 0xd34   : > { %v13001_v39 = vpop.xlane.xlu1 %13000 }
 0xd35   : > { %v13004_v7 = vpop.xlane.xlu0 %13003 }
 0xd38   : > { %v13013_v11 = vpop.xlane.xlu1 %13012 }
 0xd39   : > { %v13016_v32 = vpop.xlane.xlu0 %13015 }
 0xd85   : > { %v12974_v14 = vpop.xlane.xlu1 %12973 }
 0xd86   : > { %19360 = vrcp.f32 %v12974_v14 }
 0xd89   : > { %v12971_v6 = vpop.xlane.xlu1 %12970 }
 0xd8a   : > { %19362 = vrcp.f32 %v12971_v6  ;;  %v675_v6 = vld [vmem:[#allocation7 + $0x18] sm:$0xff] }
 0xd8d   : > { %v12983_v34 = vpop.xlane.xlu1 %12982  ;;  %v12986_v33 = vpop.xlane.xlu0 %12985 }
 0xd8e   : > { %19364 = vrcp.f32 %v12983_v34 }
 0xd8f   : > { %19366 = vrcp.f32 %v12986_v33 }
 0xd90   : > { %v19361_v30 = vpop.eup %19360 }
 0xd91   : > { %v13066_v48 = vmul.f32 %v19361_v30, %v22907_v56 }
 0xd92   : > { %v12995_v8 = vpop.xlane.xlu1 %12994  ;;  %v22963_v27 = vpop.f32.mrb[144].mxu0 }
 0xd93   : > { %19368 = vrcp.f32 %v12995_v8  ;;  %v22965_v3 = vpop.f32.mrb[145].mxu0 }
 0xd94   : > { %v19363_v58 = vpop.eup %19362  ;;  %19370 = vrcp.f32 %v22916_v12 }
 0xd95   : > { %v13065_v55 = vmul.f32 %v19363_v58, %v22912_v0  ;;  %v12998_v10 = vpop.xlane.xlu0 %12997  ;;  %19372 = vrcp.f32 %v13001_v39 }
 0xd96   : > { %19374 = vrcp.f32 %v12998_v10 }
 0xd97   : > { %17304 = vmatprep.mubr.msk.f32.mxu1 %vm2133_vm3, %v13065_v55 }
 0xd98   : > { %v19365_v17 = vpop.eup %19364  ;;  %17305 = vmatmul.mubr.msk.f32.vlgmr.msra.gmra.mrb[168].mxu1 %vm2133_vm3, %v13066_v48 }
 0xd99   : > { %v19367_v26 = vpop.eup %19366  ;;  %18033 = vmatpush3.bf16.msra.mxu1 %v18030_v41  ;;  %v13069_v2 = vmul.f32 %v19365_v17, %v22919_v63 }
 0xd9a   : > { %v13070_v45 = vmul.f32 %v19367_v26, %v22925_v13  ;;  %v22974_v44 = vpop.f32.mrb[146].mxu0  ;;  %v13007_v0 = vpop.xlane.xlu1 %13006 }
 0xd9b   : > { %v22976_v56 = vpop.f32.mrb[147].mxu0  ;;  %17318 = vmatprep.mubr.msk.f32.mxu1 %vm2133_vm3, %v13069_v2  ;;  %19376 = vrcp.f32 %v13007_v0 }
 0xd9c   : > { %17319 = vmatmul.mubr.msk.f32.vlgmr.msra.gmra.mrb[170].mxu1 %vm2133_vm3, %v13070_v45  ;;  %19378 = vrcp.f32 %v13004_v7 }
 0xd9d   : > { %v19369_v12 = vpop.eup %19368  ;;  %v13010_v31 = vpop.xlane.xlu0 %13009  ;;  %19380 = vrcp.f32 %v13013_v11 }
 0xd9e   : > { %v18851_v5 = vpop.permute.xlu1 %18850  ;;  %v13073_v49 = vmul.f32 %v19369_v12, %v22933_v1  ;;  %v19371_v4 = vpop.eup %19370  ;;  %19382 = vrcp.f32 %v13010_v31 }
 0xd9f   : > { %v18853_v63 = vunpack.i.h.bf16 %v18851_v5  ;;  %v18852_v23 = vunpack.i.l.bf16 %v18851_v5  ;;  %v19373_v52 = vpop.eup %19372  ;;  %v13072_v47 = vmul.f32 %v19371_v4, %v22819_v36  ;;  %19384 = vrcp.f32 %v13016_v32 }
 0xda0   : > { %17332 = vmatprep.mubr.msk.f32.mxu1 %vm2133_vm3, %v13073_v49  ;;  %v19375_v1 = vpop.eup %19374  ;;  %v13075_v29 = vmul.f32 %v19373_v52, %v22847_v46 }
 0xda1   : > { %v18034_v13 = vpack.c.bf16 %v18853_v63, %v18852_v23  ;;  %v18856_v57 = vpop.permute.xlu0 %18855  ;;  %v13074_v24 = vmul.f32 %v19375_v1, %v22937_v54  ;;  %v23039_v63 = vld [vmem:[%s23215_s4] ss:$0 sm:$0xff] }
 0xda2   : > { %v18858_v43 = vunpack.i.h.bf16 %v18856_v57  ;;  %v18857_v62 = vunpack.i.l.bf16 %v18856_v57  ;;  %v22982_v16 = vpop.f32.mrb[162].mxu1 }
 0xda3   : > { %v13333_v40 = vpop.f32.mrb[163].mxu1  ;;  %18035 = vmatprep.subr.bf16.mxu0 %v18034_v13 }
 0xda4   : > { %v18038_v19 = vpack.c.bf16 %v18858_v43, %v18857_v62  ;;  %18037 = vmatpush3.bf16.msra.mxu0 %v18034_v13 }
 0xda5   : > { %v18861_v51 = vpop.permute.xlu0 %18860  ;;  %v19377_v35 = vpop.eup %19376 }
 0xda6   : > { %v18863_v37 = vunpack.i.h.bf16 %v18861_v51  ;;  %v18862_v42 = vunpack.i.l.bf16 %v18861_v51  ;;  %18039 = vmatprep.subr.bf16.mxu1 %v18038_v19  ;;  %v19379_v59 = vpop.eup %19378  ;;  %v13077_v36 = vmul.f32 %v19377_v35, %v22942_v50 }
 0xda7   : > { %17326 = vmatmul.mubr.msk.f32.vlgmr.msra.gmra.mrb[156].mxu0 %vm2133_vm3, %v13072_v47  ;;  %18041 = vmatpush3.bf16.msra.mxu1 %v18038_v19  ;;  %v19381_v41 = vpop.eup %19380  ;;  %v13076_v54 = vmul.f32 %v19379_v59, %v22849_v20 }
 0xda8   : > { %v18042_v21 = vpack.c.bf16 %v18863_v37, %v18862_v42  ;;  %17339 = vmatprep.mubr.msk.f32.mxu0 %vm2133_vm3, %v13075_v29  ;;  %v19383_v22 = vpop.eup %19382  ;;  %v13079_v39 = vmul.f32 %v19381_v41, %v22853_v28 }
 0xda9   : > { %v18866_v53 = vpop.permute.xlu0 %18865  ;;  %v13078_v7 = vmul.f32 %v19383_v22, %v22949_v61  ;;  %v19385_v32 = vpop.eup %19384  ;;  %v23640_v22 = vld [vmem:[#allocation33_spill] sm:$0xff] }
 0xdaa   : > { %v18868_v15 = vunpack.i.h.bf16 %v18866_v53  ;;  %v18867_v38 = vunpack.i.l.bf16 %v18866_v53  ;;  %v17271_v25 = vpop.f32.mrb[148].mxu0  ;;  %17333 = vmatmul.mubr.msk.f32.vlgmr.msra.gmra.mrb[172].mxu1 %vm2133_vm3, %v13074_v24  ;;  %18043 = vmatprep.subr.bf16.mxu0 %v18042_v21  ;;  %v13080_v28 = vmul.f32 %v19385_v32, %v22857_v60 }
 0xdab   : > { %v13420_v46 = vpop.f32.mrb[149].mxu0  ;;  %18045 = vmatpush3.bf16.msra.mxu0 %v18042_v21  ;;  %17346 = vmatprep.mubr.msk.f32.mxu1 %vm2133_vm3, %v13077_v36 }
 0xdac   : > { %v18046_v9 = vpack.c.bf16 %v18868_v15, %v18867_v38 }
 0xdad   : > { %v18871_v18 = vpop.permute.xlu0 %18870 }
 0xdae   : > { %v18873_v11 = vunpack.i.h.bf16 %v18871_v18  ;;  %v18872_v50 = vunpack.i.l.bf16 %v18871_v18  ;;  %17340 = vmatmul.mubr.msk.f32.vlgmr.msra.gmra.mrb[158].mxu0 %vm2133_vm3, %v13076_v54  ;;  %18047 = vmatprep.subr.bf16.mxu1 %v18046_v9 }
 0xdaf   : > { %18049 = vmatpush3.bf16.msra.mxu1 %v18046_v9  ;;  %17353 = vmatprep.mubr.msk.f32.mxu0 %vm2133_vm3, %v13079_v39 }
 0xdb0   : > { %v18050_v14 = vpack.c.bf16 %v18873_v11, %v18872_v50  ;;  %v23641_v11 = vld [vmem:[#allocation35_spill] sm:$0xff] }
 0xdb2   : > { %v17278_v34 = vpop.f32.mrb[164].mxu1  ;;  %17347 = vmatmul.mubr.msk.f32.vlgmr.msra.gmra.mrb[174].mxu1 %vm2133_vm3, %v13078_v7  ;;  %18051 = vmatprep.subr.bf16.mxu0 %v18050_v14 }
 0xdb3   : > { %v13507_v20 = vpop.f32.mrb[165].mxu1  ;;  %18053 = vmatpush3.bf16.msra.mxu0 %v18050_v14 }
 0xdb4   : > { %17356 = vmatprep.subr.mxu0 %v675_v6 }
 0xdb6   : > { %17354 = vmatmul.mubr.msk.f32.vlgmr.msra.gmra.mrb[160].mxu0 %vm2133_vm3, %v13080_v28  ;;  %v23643_v28 = vld [vmem:[#allocation14_spill] sm:$0xff] }
 0xdb7   : > { %17358 = vmatprep.mubr.msk.f32.mxu0 %vm682_vm1, %v22965_v3  ;;  %17357 = vmatpush3.msra.mxu0 %v675_v6  ;;  %v23642_v6 = vld [vmem:[#allocation36_spill] sm:$0xff] }
 0xdba   : > { %v17285_v33 = vpop.f32.mrb[150].mxu0  ;;  %17359 = vmatmul.mubr.msk.f32.vlgmr.msra.gmra.mrb[88].mxu0 %vm682_vm1, %v22963_v27 }
 0xdbb   : > { %v13594_v61 = vpop.f32.mrb[151].mxu0  ;;  %17361 = vmatprep.mubr.msk.f32.mxu0 %vm682_vm1, %v22976_v56 }
 0xdbe   : > { %17362 = vmatmul.mubr.msk.f32.gmra.mrb[90].mxu0 %vm682_vm1, %v22974_v44 }
 0xdbf   : > { %17364 = vmatprep.mubr.msk.f32.mxu0 %vm682_vm1, %v13333_v40 }
 0xdc2   : > { %17365 = vmatmul.mubr.msk.f32.gmra.mrb[92].mxu0 %vm682_vm1, %v22982_v16 }
 0xdc3   : > { %17367 = vmatprep.mubr.msk.f32.mxu0 %vm682_vm1, %v13420_v46 }
 0xdc5   : > { %v17292_v60 = vpop.f32.mrb[166].mxu1 }
 0xdc6   : > { %v13681_v8 = vpop.f32.mrb[167].mxu1  ;;  %17368 = vmatmul.mubr.msk.f32.gmra.mrb[94].mxu0 %vm682_vm1, %v17271_v25 }
 0xdc7   : > { %17370 = vmatprep.mubr.msk.f32.mxu0 %vm682_vm1, %v13507_v20 }
 0xdca   : > { %17371 = vmatmul.mubr.msk.f32.gmra.mrb[96].mxu0 %vm682_vm1, %v17278_v34 }
 0xdcb   : > { %17373 = vmatprep.mubr.msk.f32.mxu0 %vm682_vm1, %v13594_v61 }
 0xdcd   : > { %v17299_v27 = vpop.f32.mrb[152].mxu0 }
 0xdce   : > { %v13768_v30 = vpop.f32.mrb[153].mxu0  ;;  %17374 = vmatmul.mubr.msk.f32.gmra.mrb[98].mxu0 %vm682_vm1, %v17285_v33 }
 0xdcf   : > { %17376 = vmatprep.mubr.msk.f32.mxu0 %vm682_vm1, %v13681_v8 }
 0xdd2   : > { %17377 = vmatmul.mubr.msk.f32.gmra.mrb[100].mxu0 %vm682_vm1, %v17292_v60 }
 0xdd3   : > { %17379 = vmatprep.mubr.msk.f32.mxu0 %vm682_vm1, %v13768_v30 }
 0xdd6   : > { %17380 = vmatmul.mubr.msk.f32.gmra.mrb[102].mxu0 %vm682_vm1, %v17299_v27  ;;  %v23644_v27 = vld [vmem:[#allocation29_spill] sm:$0xff] }
 0xddf   : > { %v17313_v3 = vpop.f32.mrb[154].mxu0 }
 0xde0   : > { %v13942_v58 = vpop.f32.mrb[155].mxu0 }
 0xe6b   : > { %v17306_v55 = vpop.f32.mrb[168].mxu1 }
 0xe6c   : > { %v13855_v48 = vpop.f32.mrb[169].mxu1 }
 0xe6d   : > { %17382 = vmatprep.mubr.msk.f32.mxu0 %vm682_vm1, %v13855_v48 }
 0xe6e   : > { %17383 = vmatmul.mubr.msk.f32.gmra.mrb[104].mxu0 %vm682_vm1, %v17306_v55 }
 0xe6f   : > { %v17320_v17 = vpop.f32.mrb[170].mxu1  ;;  %17385 = vmatprep.mubr.msk.f32.mxu0 %vm682_vm1, %v13942_v58  ;;  %v23645_v58 = vld [vmem:[#allocation30_spill] sm:$0xff] }
 0xe70   : > { %v14029_v10 = vpop.f32.mrb[171].mxu1 }
 0xe72   : > { %17386 = vmatmul.mubr.msk.f32.gmra.mrb[106].mxu0 %vm682_vm1, %v17313_v3 }
 0xe73   : > { %17388 = vmatprep.mubr.msk.f32.mxu0 %vm682_vm1, %v14029_v10 }
 0xe76   : > { %17389 = vmatmul.mubr.msk.f32.gmra.mrb[108].mxu0 %vm682_vm1, %v17320_v17 }
 0xe7a   : > { %v17327_v26 = vpop.f32.mrb[156].mxu0 }
 0xe7b   : > { %v14116_v2 = vpop.f32.mrb[157].mxu0 }
 0xe7c   : > { %17391 = vmatprep.mubr.msk.f32.mxu0 %vm682_vm1, %v14116_v2 }
 0xe7d   : > { %v17334_v45 = vpop.f32.mrb[172].mxu1  ;;  %17392 = vmatmul.mubr.msk.f32.gmra.mrb[110].mxu0 %vm682_vm1, %v17327_v26  ;;  %v23646_v26 = vld [vmem:[#allocation16_spill] sm:$0xff] }
 0xe7e   : > { %v14203_v44 = vpop.f32.mrb[173].mxu1 }
 0xe7f   : > { %17394 = vmatprep.mubr.msk.f32.mxu0 %vm682_vm1, %v14203_v44  ;;  %v23647_v44 = vld [vmem:[#allocation27_spill] sm:$0xff] }
 0xe81   : > { %v17341_v0 = vpop.f32.mrb[158].mxu0  ;;  %17395 = vmatmul.mubr.msk.f32.gmra.mrb[112].mxu0 %vm682_vm1, %v17334_v45 }
 0xe82   : > { %v14290_v56 = vpop.f32.mrb[159].mxu0 }
 0xe83   : > { %17397 = vmatprep.mubr.msk.f32.mxu0 %vm682_vm1, %v14290_v56 }
 0xe85   : > { %v17348_v12 = vpop.f32.mrb[174].mxu1  ;;  %17398 = vmatmul.mubr.msk.f32.gmra.mrb[114].mxu0 %vm682_vm1, %v17341_v0 }
 0xe86   : > { %v14377_v31 = vpop.f32.mrb[175].mxu1 }
 0xe87   : > { %17400 = vmatprep.mubr.msk.f32.mxu0 %vm682_vm1, %v14377_v31 }
 0xe89   : > { %v17355_v5 = vpop.f32.mrb[160].mxu0  ;;  %17401 = vmatmul.mubr.msk.f32.gmra.mrb[116].mxu0 %vm682_vm1, %v17348_v12 }
 0xe8a   : > { %v14464_v49 = vpop.f32.mrb[161].mxu0 }
 0xe8b   : > { %17403 = vmatprep.mubr.msk.f32.mxu0 %vm682_vm1, %v14464_v49 }
 0xe8d   : > { %v17360_v23 = vpop.f32.mrb[88].mxu0  ;;  %17404 = vmatmul.mubr.msk.f32.gmra.mrb[118].mxu0 %vm682_vm1, %v17355_v5  ;;  %v23648_v5 = vld [vmem:[#allocation64_spill] sm:$0xff] }
 0xe8e   : > { %v14834_v13 = vadd.f32 %v17360_v23, %v23039_v63  ;;  %v14635_v57 = vpop.f32.mrb[89].mxu0 }
 0xe8f   : > { %v14833_v4 = vadd.f32 %v23039_v63, %v14635_v57 }
 0xe90   : > { %14866 = vst.msk [vmem:[%s23046_s26 + $0x8] sm:$0xff] %vm318_vm0, %v14834_v13  ;;  %v23649_v13 = vld [vmem:[#allocation60_spill] sm:$0xff] }
 0xe91   : > { %14865 = vst.msk [vmem:[%s23046_s26] sm:$0xff] %vm318_vm0, %v14833_v4  ;;  %v17363_v43 = vpop.f32.mrb[90].mxu0 }
 0xe92   : > { %v14836_v62 = vadd.f32 %v17363_v43, %v23039_v63  ;;  %v14645_v16 = vpop.f32.mrb[91].mxu0 }
 0xe93   : > { %v14835_v52 = vadd.f32 %v23039_v63, %v14645_v16  ;;  %v23650_v16 = vld [vmem:[#allocation62_spill] sm:$0xff] }
 0xe94   : > { %14868 = vst.msk [vmem:[%s23046_s26 + $0x18] sm:$0xff] %vm318_vm0, %v14836_v62 }
 0xe95   : > { %14867 = vst.msk [vmem:[%s23046_s26 + $0x10] sm:$0xff] %vm318_vm0, %v14835_v52  ;;  %v17366_v40 = vpop.f32.mrb[92].mxu0 }
 0xe96   : > { %v14838_v19 = vadd.f32 %v17366_v40, %v23039_v63  ;;  %v14655_v1 = vpop.f32.mrb[93].mxu0 }
 0xe97   : > { %v14837_v47 = vadd.f32 %v23039_v63, %v14655_v1 }
 0xe98   : > { %14870 = vst.msk [vmem:[%s23046_s26 + $0x28] sm:$0xff] %vm318_vm0, %v14838_v19  ;;  %v23651_v19 = vld [vmem:[#allocation61_spill] sm:$0xff] }
 0xe99   : > { %14869 = vst.msk [vmem:[%s23046_s26 + $0x20] sm:$0xff] %vm318_vm0, %v14837_v47  ;;  %v17369_v51 = vpop.f32.mrb[94].mxu0 }
 0xe9a   : > { %v14840_v35 = vadd.f32 %v17369_v51, %v23039_v63  ;;  %v14665_v37 = vpop.f32.mrb[95].mxu0 }
 0xe9b   : > { %v14839_v42 = vadd.f32 %v23039_v63, %v14665_v37  ;;  %v23652_v37 = vld [vmem:[#allocation66_spill] sm:$0xff] }
 0xe9c   : > { %14872 = vst.msk [vmem:[%s23046_s26 + $0x38] sm:$0xff] %vm318_vm0, %v14840_v35 }
 0xe9d   : > { %14871 = vst.msk [vmem:[%s23046_s26 + $0x30] sm:$0xff] %vm318_vm0, %v14839_v42  ;;  %v17372_v29 = vpop.f32.mrb[96].mxu0 }
 0xe9e   : > { %v14842_v24 = vadd.f32 %v17372_v29, %v23039_v63  ;;  %v14675_v21 = vpop.f32.mrb[97].mxu0 }
 0xe9f   : > { %v14841_v59 = vadd.f32 %v23039_v63, %v14675_v21 }
 0xea0   : > { %14874 = vst.msk [vmem:[%s23046_s26 + $0x48] sm:$0xff] %vm318_vm0, %v14842_v24  ;;  %v23653_v24 = vld [vmem:[#allocation63_spill] sm:$0xff] }
 0xea1   : > { %14873 = vst.msk [vmem:[%s23046_s26 + $0x40] sm:$0xff] %vm318_vm0, %v14841_v59  ;;  %v17375_v53 = vpop.f32.mrb[98].mxu0 }
 0xea2   : > { %v14844_v36 = vadd.f32 %v17375_v53, %v23039_v63  ;;  %v14685_v41 = vpop.f32.mrb[99].mxu0 }
 0xea3   : > { %v14843_v15 = vadd.f32 %v23039_v63, %v14685_v41  ;;  %v23654_v41 = vld [vmem:[#allocation68_spill] sm:$0xff] }
 0xea4   : > { %14876 = vst.msk [vmem:[%s23046_s26 + $0x58] sm:$0xff] %vm318_vm0, %v14844_v36 }
 0xea5   : > { %14875 = vst.msk [vmem:[%s23046_s26 + $0x50] sm:$0xff] %vm318_vm0, %v14843_v15  ;;  %v17378_v38 = vpop.f32.mrb[100].mxu0 }
 0xea6   : > { %v14846_v25 = vadd.f32 %v17378_v38, %v23039_v63  ;;  %v14695_v46 = vpop.f32.mrb[101].mxu0 }
 0xea7   : > { %v14845_v54 = vadd.f32 %v23039_v63, %v14695_v46 }
 0xea8   : > { %14878 = vst.msk [vmem:[%s23046_s26 + $0x68] sm:$0xff] %vm318_vm0, %v14846_v25  ;;  %v23655_v25 = vld [vmem:[#allocation78_spill] sm:$0xff] }
 0xea9   : > { %14877 = vst.msk [vmem:[%s23046_s26 + $0x60] sm:$0xff] %vm318_vm0, %v14845_v54  ;;  %v17381_v9 = vpop.f32.mrb[102].mxu0 }
 0xeaa   : > { %v18056_v18 = vadd.f32 %v17381_v9, %v23640_v22  ;;  %v14705_v39 = vpop.f32.mrb[103].mxu0 }
 0xeab   : > { %v18057_v50 = vadd.f32 %v14705_v39, %v23641_v11 }
 0xeac   : > { %v14848_v7 = vadd.f32 %v18056_v18, %v23039_v63  ;;  %v23656_v18 = vld [vmem:[#allocation28_spill] sm:$0xff] }
 0xead   : > { %v14847_v14 = vadd.f32 %v18057_v50, %v23039_v63  ;;  %v23657_v50 = vld [vmem:[#allocation67_spill] sm:$0xff] }
 0xeae   : > { %14880 = vst.msk [vmem:[%s23046_s26 + $0x78] sm:$0xff] %vm318_vm0, %v14848_v7 }
 0xeaf   : > { %14879 = vst.msk [vmem:[%s23046_s26 + $0x70] sm:$0xff] %vm318_vm0, %v14847_v14 }
 0xf41   : > { %v17384_v32 = vpop.f32.mrb[104].mxu0 }
 0xf42   : > { %v18058_v34 = vadd.f32 %v17384_v32, %v23642_v6  ;;  %v14715_v20 = vpop.f32.mrb[105].mxu0 }
 0xf43   : > { %v18059_v33 = vadd.f32 %v14715_v20, %v23643_v28 }
 0xf44   : > { %v14850_v61 = vadd.f32 %v18058_v34, %v23039_v63 }
 0xf45   : > { %v14849_v60 = vadd.f32 %v18059_v33, %v23039_v63  ;;  %v17387_v8 = vpop.f32.mrb[106].mxu0 }
 0xf46   : > { %14882 = vst.msk [vmem:[%s23046_s26 + $0x88] sm:$0xff] %vm318_vm0, %v14850_v61  ;;  %v18060_v30 = vadd.f32 %v17387_v8, %v23644_v27  ;;  %v14725_v3 = vpop.f32.mrb[107].mxu0 }
 0xf47   : > { %14881 = vst.msk [vmem:[%s23046_s26 + $0x80] sm:$0xff] %vm318_vm0, %v14849_v60  ;;  %v18061_v55 = vadd.f32 %v14725_v3, %v23645_v58 }
 0xf48   : > { %v14852_v48 = vadd.f32 %v18060_v30, %v23039_v63 }
 0xf49   : > { %v14851_v17 = vadd.f32 %v18061_v55, %v23039_v63  ;;  %v17390_v10 = vpop.f32.mrb[108].mxu0 }
 0xf4a   : > { %14884 = vst.msk [vmem:[%s23046_s26 + $0x98] sm:$0xff] %vm318_vm0, %v14852_v48  ;;  %v18062_v2 = vadd.f32 %v17390_v10, %v23646_v26  ;;  %v14735_v45 = vpop.f32.mrb[109].mxu0 }
 0xf4b   : > { %14883 = vst.msk [vmem:[%s23046_s26 + $0x90] sm:$0xff] %vm318_vm0, %v14851_v17  ;;  %v18063_v0 = vadd.f32 %v14735_v45, %v23647_v44 }
 0xf4c   : > { %v14854_v56 = vadd.f32 %v18062_v2, %v23039_v63 }
 0xf4d   : > { %v14853_v12 = vadd.f32 %v18063_v0, %v23039_v63 }
 0xf4e   : > { %14886 = vst.msk [vmem:[%s23046_s26 + $0xa8] sm:$0xff] %vm318_vm0, %v14854_v56 }
 0xf4f   : > { %14885 = vst.msk [vmem:[%s23046_s26 + $0xa0] sm:$0xff] %vm318_vm0, %v14853_v12 }
 0xf50   : > { %v17393_v31 = vpop.f32.mrb[110].mxu0 }
 0xf51   : > { %v18064_v49 = vadd.f32 %v17393_v31, %v23648_v5  ;;  %v14745_v23 = vpop.f32.mrb[111].mxu0 }
 0xf52   : > { %v18065_v57 = vadd.f32 %v14745_v23, %v23649_v13 }
 0xf53   : > { %v14856_v4 = vadd.f32 %v18064_v49, %v23039_v63 }
 0xf54   : > { %v14855_v43 = vadd.f32 %v18065_v57, %v23039_v63  ;;  %v17396_v62 = vpop.f32.mrb[112].mxu0 }
 0xf55   : > { %14888 = vst.msk [vmem:[%s23046_s26 + $0xb8] sm:$0xff] %vm318_vm0, %v14856_v4  ;;  %v18066_v52 = vadd.f32 %v17396_v62, %v23650_v16  ;;  %v14755_v40 = vpop.f32.mrb[113].mxu0 }
 0xf56   : > { %14887 = vst.msk [vmem:[%s23046_s26 + $0xb0] sm:$0xff] %vm318_vm0, %v14855_v43  ;;  %v18067_v1 = vadd.f32 %v14755_v40, %v23651_v19 }
 0xf57   : > { %v14858_v47 = vadd.f32 %v18066_v52, %v23039_v63 }
 0xf58   : > { %v14857_v51 = vadd.f32 %v18067_v1, %v23039_v63  ;;  %v17399_v35 = vpop.f32.mrb[114].mxu0 }
 0xf59   : > { %14890 = vst.msk [vmem:[%s23046_s26 + $0xc8] sm:$0xff] %vm318_vm0, %v14858_v47  ;;  %v18068_v42 = vadd.f32 %v17399_v35, %v23652_v37  ;;  %v14765_v29 = vpop.f32.mrb[115].mxu0 }
 0xf5a   : > { %14889 = vst.msk [vmem:[%s23046_s26 + $0xc0] sm:$0xff] %vm318_vm0, %v14857_v51  ;;  %v18069_v21 = vadd.f32 %v14765_v29, %v23653_v24 }
 0xf5b   : > { %v14860_v59 = vadd.f32 %v18068_v42, %v23039_v63 }
 0xf5c   : > { %v14859_v53 = vadd.f32 %v18069_v21, %v23039_v63  ;;  %v17402_v36 = vpop.f32.mrb[116].mxu0 }
 0xf5d   : > { %14892 = vst.msk [vmem:[%s23046_s26 + $0xd8] sm:$0xff] %vm318_vm0, %v14860_v59  ;;  %v18070_v15 = vadd.f32 %v17402_v36, %v23654_v41  ;;  %v14775_v38 = vpop.f32.mrb[117].mxu0 }
 0xf5e   : > { %14891 = vst.msk [vmem:[%s23046_s26 + $0xd0] sm:$0xff] %vm318_vm0, %v14859_v53  ;;  %v18071_v46 = vadd.f32 %v14775_v38, %v23655_v25 }
 0xf5f   : > { %v14862_v54 = vadd.f32 %v18070_v15, %v23039_v63 }
 0xf60   : > { %v14861_v9 = vadd.f32 %v18071_v46, %v23039_v63  ;;  %v17405_v22 = vpop.f32.mrb[118].mxu0 }
 0xf61   : > { %14894 = vst.msk [vmem:[%s23046_s26 + $0xe8] sm:$0xff] %vm318_vm0, %v14862_v54  ;;  %v18072_v39 = vadd.f32 %v17405_v22, %v23656_v18  ;;  %v14785_v11 = vpop.f32.mrb[119].mxu0 }
 0xf62   : > { %14893 = vst.msk [vmem:[%s23046_s26 + $0xe0] sm:$0xff] %vm318_vm0, %v14861_v9  ;;  %v18073_v7 = vadd.f32 %v14785_v11, %v23657_v50 }
 0xf63   : > { %v14864_v14 = vadd.f32 %v18072_v39, %v23039_v63 }
 0xf64   : > { %v14863_v32 = vadd.f32 %v18073_v7, %v23039_v63 }
 0xf65   : > { %14896 = vst.msk [vmem:[%s23046_s26 + $0xf8] sm:$0xff] %vm318_vm0, %v14864_v14 }
 0xf66   : > { %14895 = vst.msk [vmem:[%s23046_s26 + $0xf0] sm:$0xff] %vm318_vm0, %v14863_v32 }
 0xf67   : > { %19485 = shalt.err (!%p19482_p1)
}
 0xf68   : > { %s19486_s17 = scalar_lea.hbm %s23160_s28, 4096  ;;  %s19490_s12 = scalar_lea.hbm %s23216_s5, 8192 }
 0xf69   : > { %p19487_p13 = scmp.ne.s32.totalorder %s23160_s28, %s19486_s17  ;;  %p19491_p4 = scmp.lt.u32.totalorder %s23160_s28, %s23216_s5 }
 0xf6a   : > { %p19492_p5 = scmp.lt.u32.totalorder %s19490_s12, %s19486_s17  ;;  %p19494_p11 = scmp.lt.u32.totalorder %s19486_s17, %s23160_s28 }
 0xf6b   : > { %p19488_p6 = pnand %p19487_p13, %p23658_p0 }
 0xf6c   : > { %p19493_p8 = por %p19492_p5, %p19491_p4 }
 0xf6d   : > { %p19489_p10 = pneg %p19488_p6 }
 0xf6e   : > { %p19495_p2 = por %p19494_p11, %p19493_p8 }
 0xf70   : > { %p19496_p3 = pnand %p19495_p2, %p19489_p10 }
 0xf72   : > { %19499 = shalt.err (!%p19496_p3)
}
 0xf73   : > { %s19561_s6 = smov 128   ;;  %s19562_s16 = smov 8  }
 0xf74   : > { %18162 = dma.vmem_to_hbm [thread:$0]  (%p23658_p0), %s23162_s15, 4096, %s23160_s28, %s14898_s22, %s19561_s6, %s19561_s6, %s19562_s16  }
 0xf75 PF: > { %s14927_s10 = sand.u32 1, %s19530_s18   ;;  %p23659_p7 = scmp.ne.s32.totalorder %s23345_s25, 0 }
 0xf76   : > { %p23660_p9 = scmp.ge.s32.totalorder %s19542_s21, 2  ;;  %s14928_s13 = scalar_lea.sflag [#allocation4], %s14927_s10 }
 0xf78   : > { %p18176_p12 = pnand %p23660_p9, %p23659_p7 }
 0xf7a   : > { %19525 = dma.done.wait (!%p18176_p12), %s14928_s13, 4096  }
 0xf7b   : > { %19527 = vsyncadd (!%p18176_p12), %s14928_s13, 4294963200  ;;  %p19_p1 = scmp.ge.s32.totalorder %s19709_s29, 4   ;;  %s23661_s18 = smov %s19534_s19 }
 0xf7c   : > { %s23662_s19 = smov %s19538_s20  ;;  %s23663_s20 = smov %s19725_s27 }
 0xf7d   : > { %s23664_s21 = smov %s19709_s29  ;;  %21 = sbr.rel (!%p19_p1) target bundleno = 6 (0x6), region = 93 }
 0xf84   :  { %14933 = vsyncpa [#allocation3], 1 }
 0xf85   :  { %14935 = vsyncpa [#allocation3 + $0x1], 1 }
 0xf86   :  { %14936 = vsyncpa [#allocation6], 1 }
 0xf87   :  { %14937 = vsyncpa [#allocation4], 1 }
 0xf88   :  { %14939 = vsyncpa [#allocation4 + $0x1], 1 }

</bundles_post_ra>
